<compile_context>
chip_gen: v5e
topology: v5e:2x2
jax: 0.10.0
libtpu: 0.0.40
codegen_flags: <defaults>
</compile_context>

<pallas_src>
import jax
import jax.numpy as jnp
from jax import lax
from jax.experimental import pallas as pl
from jax.experimental.pallas import tpu as pltpu

KSIZE = 5
PAD = 2


# --------------------- fused Conv2d(5x5,p=2) + bias + MaxPool2d(2) ----------------

def _make_conv_pool_kernel(H, W, Cin, Cout, R, n_chunks):
    """Kernel body for one batch element.

    xf_ref : (1, (H+5)*(W+4), Cin)  zero-padded image, rows flattened (row stride W+4)
    w_ref  : (25, Cin, Cout)        taps ordered (kh, kw)
    b_ref  : (1, Cout)
    o_ref  : (1, H//2, W//2, Cout)  pooled output
    s_ref  : VMEM (R*(W+4), Cout) f32 scratch (one chunk of conv rows)
    """
    Wp = W + 2 * PAD          # padded row stride
    W2 = W // 2
    L = R * Wp                # flat conv rows per chunk (R conv output rows)

    def kernel(xf_ref, w_ref, b_ref, o_ref, s_ref):
        bias = b_ref[...]                                    # (1, Cout)

        def chunk_body(chunk, carry):
            h0 = chunk * R                                   # first conv row of chunk
            acc = jnp.zeros((L, Cout), jnp.float32)
            # 25 shifted taps accumulated on the MXU (no im2col, no HBM round trips).
            for kh in range(KSIZE):
                for kw in range(KSIZE):
                    start = (h0 + kh) * Wp + kw
                    xs = xf_ref[0, pl.ds(start, L), :]       # (L, Cin)
                    wt = w_ref[kh * KSIZE + kw]              # (Cin, Cout)
                    acc = acc + jnp.dot(xs, wt,
                                        preferred_element_type=jnp.float32)
            s_ref[...] = acc                                 # park chunk in VMEM
            # 2x2 max-pool: stride-2 reads on the sublane (flat-row) axis; channels
            # stay on lanes -> pure element-wise VPU max.  Bias added after the max.
            for pr in range(R // 2):
                r0 = 2 * pr * Wp
                r1 = r0 + Wp
                a = s_ref[pl.ds(r0, W2, 2), :]               # (even row, even col)
                b = s_ref[pl.ds(r0 + 1, W2, 2), :]           # (even row, odd  col)
                c = s_ref[pl.ds(r1, W2, 2), :]               # (odd  row, even col)
                d = s_ref[pl.ds(r1 + 1, W2, 2), :]           # (odd  row, odd  col)
                m = jnp.maximum(jnp.maximum(a, b), jnp.maximum(c, d))
                o_ref[0, chunk * (R // 2) + pr] = (m + bias).astype(o_ref.dtype)
            return carry

        lax.fori_loop(0, n_chunks, chunk_body, 0)

    return kernel


def _conv_pool(xf, wmat, bias, *, B, H, W, Cin, Cout):
    Wp = W + 2 * PAD
    Lp = (H + 2 * PAD + 1) * Wp          # one extra zero row so tap windows stay in-bounds
    H2, W2 = H // 2, W // 2
    # Largest even divisor of H keeping the per-chunk accumulator <= ~128 flat rows
    # (bounds vreg pressure while minimising the number of chunks).
    R = 2
    for cand in range(H, 1, -2):
        if H % cand == 0 and cand * Wp <= 128:
            R = cand
            break
    n_chunks = H // R
    kernel = _make_conv_pool_kernel(H, W, Cin, Cout, R, n_chunks)
    return pl.pallas_call(
        kernel,
        out_shape=jax.ShapeDtypeStruct((B, H2, W2, Cout), jnp.float32),
        grid=(B,),
        in_specs=[
            pl.BlockSpec((1, Lp, Cin), lambda b: (b, 0, 0)),
            pl.BlockSpec((KSIZE * KSIZE, Cin, Cout), lambda b: (0, 0, 0)),
            pl.BlockSpec((1, Cout), lambda b: (0, 0)),
        ],
        out_specs=pl.BlockSpec((1, H2, W2, Cout), lambda b: (b, 0, 0, 0)),
        scratch_shapes=[pltpu.VMEM((R * Wp, Cout), jnp.float32)],
        compiler_params=pltpu.CompilerParams(
            dimension_semantics=("parallel",)),      # 2 parallel steps -> both v7x TCs
    )(xf, wmat, bias)


# ------------------------------- fused Linear x2 ----------------------------------

def _fc_kernel(x_ref, w1_ref, b1_ref, w2_ref, b2_ref, o_ref):
    # Hidden (Mp, 64) stays in registers; final store is a lane-dense (Mp, 128) slab.
    h = jnp.dot(x_ref[...], w1_ref[...],
                preferred_element_type=jnp.float32) + b1_ref[...]
    o_ref[...] = (jnp.dot(h, w2_ref[...],
                          preferred_element_type=jnp.float32)
                  + b2_ref[...]).astype(o_ref.dtype)


# ------------------------------ params & preparation ------------------------------

def init_params(key):
    ks = jax.random.split(key, 10)

    def u(k, shape, fan_in):
        bound = 1.0 / jnp.sqrt(fan_in)
        return jax.random.uniform(k, shape, jnp.float32, -bound, bound)

    return {
        "w1": u(ks[0], (32, 3, 5, 5), 3 * 25),   "b1": u(ks[1], (32,), 3 * 25),
        "w2": u(ks[2], (32, 32, 5, 5), 32 * 25), "b2": u(ks[3], (32,), 32 * 25),
        "w3": u(ks[4], (64, 32, 5, 5), 32 * 25), "b3": u(ks[5], (64,), 32 * 25),
        "wl1": u(ks[6], (64, 1024), 1024),       "bl1": u(ks[7], (64,), 1024),
        "wl2": u(ks[8], (10, 64), 64),           "bl2": u(ks[9], (10,), 64),
    }


def prepare_params(p):
    """One-time weight repacking (hoisted out of the jitted forward pass)."""
    def conv_w(w, cin_pad=0):
        cout, cin, k, _ = w.shape
        wt = jnp.transpose(w, (2, 3, 1, 0)).reshape(k * k, cin, cout)   # (25,Cin,Cout)
        if cin_pad:
            wt = jnp.pad(wt, ((0, 0), (0, cin_pad), (0, 0)))
        return wt

    # Linear 1: reorder rows of wl1.T from PyTorch's NCHW flatten order (c*16+h*4+w)
    # to our NHWC flatten order (h*256+w*64+c) -> no activation transpose at runtime.
    w1t = p["wl1"].T.reshape(64, 4, 4, 64)                     # (c, h, w, out)
    w1p = jnp.transpose(w1t, (1, 2, 0, 3)).reshape(1024, 64)   # rows ordered (h, w, c)
    # Linear 2: pad N 10 -> 128 so the final store is lane-dense (sliced back outside).
    w2p = jnp.pad(p["wl2"].T, ((0, 0), (0, 118)))              # (64, 128)
    b2p = jnp.pad(p["bl2"].reshape(1, 10), ((0, 0), (0, 118)))

    return {
        "w1": conv_w(p["w1"], cin_pad=5), "b1": p["b1"].reshape(1, 32),
        "w2": conv_w(p["w2"]),            "b2": p["b2"].reshape(1, 32),
        "w3": conv_w(p["w3"]),            "b3": p["b3"].reshape(1, 64),
        "w1p": w1p, "b1p": p["bl1"].reshape(1, 64),
        "w2p": w2p, "b2p": b2p,
    }


# ----------------------------------- forward --------------------------------------

def _pad_and_flatten(x_nhwc, cin_pad=0):
    """Zero-pad (conv padding=2 plus one spare bottom row) and flatten H,W."""
    B, H, W, C = x_nhwc.shape
    xp = jnp.pad(x_nhwc, ((0, 0), (PAD, PAD + 1), (PAD, PAD), (0, cin_pad)))
    return xp.reshape(B, (H + 2 * PAD + 1) * (W + 2 * PAD), C + cin_pad)


@jax.jit
def my_module_forward(x_nchw, prep):
    B = x_nchw.shape[0]
    x = jnp.transpose(x_nchw, (0, 2, 3, 1))                       # NCHW -> NHWC
    x = _pad_and_flatten(x, cin_pad=5)                            # Cin 3 -> 8 (zeros)
    x = _conv_pool(x, prep["w1"], prep["b1"], B=B, H=32, W=32, Cin=8, Cout=32)
    x = _pad_and_flatten(x)
    x = _conv_pool(x, prep["w2"], prep["b2"], B=B, H=16, W=16, Cin=32, Cout=32)
    x = _pad_and_flatten(x)
    x = _conv_pool(x, prep["w3"], prep["b3"], B=B, H=8, W=8, Cin=32, Cout=64)
    xf = x.reshape(B, 4 * 4 * 64)                                 # NHWC flatten (h,w,c)
    Mp = max(8, -(-B // 8) * 8)                                   # pad M: 2 -> 8 rows
    xf = jnp.pad(xf, ((0, Mp - B), (0, 0)))
    out = pl.pallas_call(
        _fc_kernel,
        out_shape=jax.ShapeDtypeStruct((Mp, 128), jnp.float32),
    )(xf, prep["w1p"], prep["b1p"], prep["w2p"], prep["b2p"])
    return out[:B, :10]


# --------------------------- pure-JAX reference (check) ---------------------------

def _reference_forward(x_nchw, p):
    dn = ("NCHW", "OIHW", "NCHW")
    hi = lax.Precision.HIGHEST

    def conv(x, w, b):
        y = lax.conv_general_dilated(x, w, (1, 1), ((2, 2), (2, 2)),
                                     dimension_numbers=dn, precision=hi)
        return y + b.reshape(1, -1, 1, 1)

    def pool(x):
        B, C, H, W = x.shape
        return jnp.max(x.reshape(B, C, H // 2, 2, W // 2, 2), axis=(3, 5))

    x = pool(conv(x_nchw, p["w1"], p["b1"]))
    x = pool(conv(x, p["w2"], p["b2"]))
    x = pool(conv(x, p["w3"], p["b3"]))
    x = x.reshape(x.shape[0], -1)                                 # NCHW flatten
    x = jnp.dot(x, p["wl1"].T, precision=hi) + p["bl1"]
    x = jnp.dot(x, p["wl2"].T, precision=hi) + p["bl2"]
    return x


if __name__ == "__main__":
    key = jax.random.PRNGKey(0)
    pkey, xkey = jax.random.split(key)
    raw = init_params(pkey)
    prep = prepare_params(raw)
    x = jax.random.normal(xkey, (2, 3, 32, 32), jnp.float32)   # shape implied by Linear(1024,64)

    out = my_module_forward(x, prep)
    jax.block_until_ready(out)
    assert out.shape == (2, 10), out.shape

    ref = _reference_forward(x, raw)
    err = float(jnp.max(jnp.abs(out - ref)))
    assert err < 5e-2, f"mismatch vs reference: max abs err = {err}"

    print("KERNEL_OK")
</pallas_src>

<mosaic_0001>
module attributes {stable_mosaic.version = 11 : i64} {
  func.func @kernel(%arg0: i32, %arg1: memref<1x1332x8xf32, #tpu.memory_space<vmem>>, %arg2: memref<25x8x32xf32, #tpu.memory_space<vmem>>, %arg3: memref<1x32xf32, #tpu.memory_space<vmem>>, %arg4: memref<1x16x16x32xf32, #tpu.memory_space<vmem>>, %arg5: memref<72x32xf32, #tpu.memory_space<vmem>>) attributes {dimension_semantics = [#tpu.dimension_semantics<parallel>], iteration_bounds = array<i64: 2>, scalar_prefetch = 0 : i64, scratch_operands = 1 : i64, tpu.core_type = #tpu.core_type<tc>, window_params = [{transform_indices = @transform_0, window_bounds = array<i64: 1, 1332, 8>}, {pipeline_mode = #tpu.pipeline_mode<synchronous>, transform_indices = @transform_1, window_bounds = array<i64: 25, 8, 32>}, {pipeline_mode = #tpu.pipeline_mode<synchronous>, transform_indices = @transform_2, window_bounds = array<i64: 1, 32>}, {transform_indices = @transform_3, window_bounds = array<i64: 1, 16, 16, 32>}]} {
    %c0 = arith.constant 0 : index
    %c0_0 = arith.constant 0 : index
    %0 = vector.load %arg3[%c0, %c0_0] : memref<1x32xf32, #tpu.memory_space<vmem>>, vector<1x32xf32>
    %c0_i32 = arith.constant 0 : i32
    %c16_i32 = arith.constant 16 : i32
    %1 = arith.addi %c0_i32, %c16_i32 : i32
    %c1_i32 = arith.constant 1 : i32
    scf.for %arg6 = %c0_i32 to %1 step %c1_i32  : i32 {
      %c2_i32 = arith.constant 2 : i32
      %2 = arith.muli %arg6, %c2_i32 : i32
      %cst = arith.constant 0.000000e+00 : f32
      %3 = vector.broadcast %cst : f32 to vector<72x32xf32>
      %c0_i32_2 = arith.constant 0 : i32
      %4 = arith.addi %2, %c0_i32_2 : i32
      %c36_i32 = arith.constant 36 : i32
      %5 = arith.muli %4, %c36_i32 : i32
      %c0_i32_3 = arith.constant 0 : i32
      %6 = arith.addi %5, %c0_i32_3 : i32
      %c0_4 = arith.constant 0 : index
      %7 = arith.index_cast %6 : i32 to index
      %c0_5 = arith.constant 0 : index
      %8 = vector.load %arg1[%c0_4, %7, %c0_5] : memref<1x1332x8xf32, #tpu.memory_space<vmem>>, vector<1x72x8xf32>
      %9 = vector.shape_cast %8 : vector<1x72x8xf32> to vector<72x8xf32>
      %c0_6 = arith.constant 0 : index
      %c0_7 = arith.constant 0 : index
      %c0_8 = arith.constant 0 : index
      %10 = vector.load %arg2[%c0_6, %c0_7, %c0_8] : memref<25x8x32xf32, #tpu.memory_space<vmem>>, vector<1x8x32xf32>
      %11 = vector.shape_cast %10 : vector<1x8x32xf32> to vector<8x32xf32>
      %cst_9 = arith.constant dense<0.000000e+00> : vector<72x32xf32>
      %12 = tpu.matmul %9, %11, %cst_9 {dimension_numbers = #tpu.dot_dimension_numbers<[1], [0], [0], [1], [0, 0, 1, 1], [], []>} : vector<72x8xf32>, vector<8x32xf32>, vector<72x32xf32> -> vector<72x32xf32>
      %13 = arith.addf %3, %12 : vector<72x32xf32>
      %c0_i32_10 = arith.constant 0 : i32
      %14 = arith.addi %2, %c0_i32_10 : i32
      %c36_i32_11 = arith.constant 36 : i32
      %15 = arith.muli %14, %c36_i32_11 : i32
      %c1_i32_12 = arith.constant 1 : i32
      %16 = arith.addi %15, %c1_i32_12 : i32
      %c0_13 = arith.constant 0 : index
      %17 = arith.index_cast %16 : i32 to index
      %c0_14 = arith.constant 0 : index
      %18 = vector.load %arg1[%c0_13, %17, %c0_14] : memref<1x1332x8xf32, #tpu.memory_space<vmem>>, vector<1x72x8xf32>
      %19 = vector.shape_cast %18 : vector<1x72x8xf32> to vector<72x8xf32>
      %c1 = arith.constant 1 : index
      %c0_15 = arith.constant 0 : index
      %c0_16 = arith.constant 0 : index
      %20 = vector.load %arg2[%c1, %c0_15, %c0_16] : memref<25x8x32xf32, #tpu.memory_space<vmem>>, vector<1x8x32xf32>
      %21 = vector.shape_cast %20 : vector<1x8x32xf32> to vector<8x32xf32>
      %cst_17 = arith.constant dense<0.000000e+00> : vector<72x32xf32>
      %22 = tpu.matmul %19, %21, %cst_17 {dimension_numbers = #tpu.dot_dimension_numbers<[1], [0], [0], [1], [0, 0, 1, 1], [], []>} : vector<72x8xf32>, vector<8x32xf32>, vector<72x32xf32> -> vector<72x32xf32>
      %23 = arith.addf %13, %22 : vector<72x32xf32>
      %c0_i32_18 = arith.constant 0 : i32
      %24 = arith.addi %2, %c0_i32_18 : i32
      %c36_i32_19 = arith.constant 36 : i32
      %25 = arith.muli %24, %c36_i32_19 : i32
      %c2_i32_20 = arith.constant 2 : i32
      %26 = arith.addi %25, %c2_i32_20 : i32
      %c0_21 = arith.constant 0 : index
      %27 = arith.index_cast %26 : i32 to index
      %c0_22 = arith.constant 0 : index
      %28 = vector.load %arg1[%c0_21, %27, %c0_22] : memref<1x1332x8xf32, #tpu.memory_space<vmem>>, vector<1x72x8xf32>
      %29 = vector.shape_cast %28 : vector<1x72x8xf32> to vector<72x8xf32>
      %c2 = arith.constant 2 : index
      %c0_23 = arith.constant 0 : index
      %c0_24 = arith.constant 0 : index
      %30 = vector.load %arg2[%c2, %c0_23, %c0_24] : memref<25x8x32xf32, #tpu.memory_space<vmem>>, vector<1x8x32xf32>
      %31 = vector.shape_cast %30 : vector<1x8x32xf32> to vector<8x32xf32>
      %cst_25 = arith.constant dense<0.000000e+00> : vector<72x32xf32>
      %32 = tpu.matmul %29, %31, %cst_25 {dimension_numbers = #tpu.dot_dimension_numbers<[1], [0], [0], [1], [0, 0, 1, 1], [], []>} : vector<72x8xf32>, vector<8x32xf32>, vector<72x32xf32> -> vector<72x32xf32>
      %33 = arith.addf %23, %32 : vector<72x32xf32>
      %c0_i32_26 = arith.constant 0 : i32
      %34 = arith.addi %2, %c0_i32_26 : i32
      %c36_i32_27 = arith.constant 36 : i32
      %35 = arith.muli %34, %c36_i32_27 : i32
      %c3_i32 = arith.constant 3 : i32
      %36 = arith.addi %35, %c3_i32 : i32
      %c0_28 = arith.constant 0 : index
      %37 = arith.index_cast %36 : i32 to index
      %c0_29 = arith.constant 0 : index
      %38 = vector.load %arg1[%c0_28, %37, %c0_29] : memref<1x1332x8xf32, #tpu.memory_space<vmem>>, vector<1x72x8xf32>
      %39 = vector.shape_cast %38 : vector<1x72x8xf32> to vector<72x8xf32>
      %c3 = arith.constant 3 : index
      %c0_30 = arith.constant 0 : index
      %c0_31 = arith.constant 0 : index
      %40 = vector.load %arg2[%c3, %c0_30, %c0_31] : memref<25x8x32xf32, #tpu.memory_space<vmem>>, vector<1x8x32xf32>
      %41 = vector.shape_cast %40 : vector<1x8x32xf32> to vector<8x32xf32>
      %cst_32 = arith.constant dense<0.000000e+00> : vector<72x32xf32>
      %42 = tpu.matmul %39, %41, %cst_32 {dimension_numbers = #tpu.dot_dimension_numbers<[1], [0], [0], [1], [0, 0, 1, 1], [], []>} : vector<72x8xf32>, vector<8x32xf32>, vector<72x32xf32> -> vector<72x32xf32>
      %43 = arith.addf %33, %42 : vector<72x32xf32>
      %c0_i32_33 = arith.constant 0 : i32
      %44 = arith.addi %2, %c0_i32_33 : i32
      %c36_i32_34 = arith.constant 36 : i32
      %45 = arith.muli %44, %c36_i32_34 : i32
      %c4_i32 = arith.constant 4 : i32
      %46 = arith.addi %45, %c4_i32 : i32
      %c0_35 = arith.constant 0 : index
      %47 = arith.index_cast %46 : i32 to index
      %c0_36 = arith.constant 0 : index
      %48 = vector.load %arg1[%c0_35, %47, %c0_36] : memref<1x1332x8xf32, #tpu.memory_space<vmem>>, vector<1x72x8xf32>
      %49 = vector.shape_cast %48 : vector<1x72x8xf32> to vector<72x8xf32>
      %c4 = arith.constant 4 : index
      %c0_37 = arith.constant 0 : index
      %c0_38 = arith.constant 0 : index
      %50 = vector.load %arg2[%c4, %c0_37, %c0_38] : memref<25x8x32xf32, #tpu.memory_space<vmem>>, vector<1x8x32xf32>
      %51 = vector.shape_cast %50 : vector<1x8x32xf32> to vector<8x32xf32>
      %cst_39 = arith.constant dense<0.000000e+00> : vector<72x32xf32>
      %52 = tpu.matmul %49, %51, %cst_39 {dimension_numbers = #tpu.dot_dimension_numbers<[1], [0], [0], [1], [0, 0, 1, 1], [], []>} : vector<72x8xf32>, vector<8x32xf32>, vector<72x32xf32> -> vector<72x32xf32>
      %53 = arith.addf %43, %52 : vector<72x32xf32>
      %c1_i32_40 = arith.constant 1 : i32
      %54 = arith.addi %2, %c1_i32_40 : i32
      %c36_i32_41 = arith.constant 36 : i32
      %55 = arith.muli %54, %c36_i32_41 : i32
      %c0_i32_42 = arith.constant 0 : i32
      %56 = arith.addi %55, %c0_i32_42 : i32
      %c0_43 = arith.constant 0 : index
      %57 = arith.index_cast %56 : i32 to index
      %c0_44 = arith.constant 0 : index
      %58 = vector.load %arg1[%c0_43, %57, %c0_44] : memref<1x1332x8xf32, #tpu.memory_space<vmem>>, vector<1x72x8xf32>
      %59 = vector.shape_cast %58 : vector<1x72x8xf32> to vector<72x8xf32>
      %c5 = arith.constant 5 : index
      %c0_45 = arith.constant 0 : index
      %c0_46 = arith.constant 0 : index
      %60 = vector.load %arg2[%c5, %c0_45, %c0_46] : memref<25x8x32xf32, #tpu.memory_space<vmem>>, vector<1x8x32xf32>
      %61 = vector.shape_cast %60 : vector<1x8x32xf32> to vector<8x32xf32>
      %cst_47 = arith.constant dense<0.000000e+00> : vector<72x32xf32>
      %62 = tpu.matmul %59, %61, %cst_47 {dimension_numbers = #tpu.dot_dimension_numbers<[1], [0], [0], [1], [0, 0, 1, 1], [], []>} : vector<72x8xf32>, vector<8x32xf32>, vector<72x32xf32> -> vector<72x32xf32>
      %63 = arith.addf %53, %62 : vector<72x32xf32>
      %c1_i32_48 = arith.constant 1 : i32
      %64 = arith.addi %2, %c1_i32_48 : i32
      %c36_i32_49 = arith.constant 36 : i32
      %65 = arith.muli %64, %c36_i32_49 : i32
      %c1_i32_50 = arith.constant 1 : i32
      %66 = arith.addi %65, %c1_i32_50 : i32
      %c0_51 = arith.constant 0 : index
      %67 = arith.index_cast %66 : i32 to index
      %c0_52 = arith.constant 0 : index
      %68 = vector.load %arg1[%c0_51, %67, %c0_52] : memref<1x1332x8xf32, #tpu.memory_space<vmem>>, vector<1x72x8xf32>
      %69 = vector.shape_cast %68 : vector<1x72x8xf32> to vector<72x8xf32>
      %c6 = arith.constant 6 : index
      %c0_53 = arith.constant 0 : index
      %c0_54 = arith.constant 0 : index
      %70 = vector.load %arg2[%c6, %c0_53, %c0_54] : memref<25x8x32xf32, #tpu.memory_space<vmem>>, vector<1x8x32xf32>
      %71 = vector.shape_cast %70 : vector<1x8x32xf32> to vector<8x32xf32>
      %cst_55 = arith.constant dense<0.000000e+00> : vector<72x32xf32>
      %72 = tpu.matmul %69, %71, %cst_55 {dimension_numbers = #tpu.dot_dimension_numbers<[1], [0], [0], [1], [0, 0, 1, 1], [], []>} : vector<72x8xf32>, vector<8x32xf32>, vector<72x32xf32> -> vector<72x32xf32>
      %73 = arith.addf %63, %72 : vector<72x32xf32>
      %c1_i32_56 = arith.constant 1 : i32
      %74 = arith.addi %2, %c1_i32_56 : i32
      %c36_i32_57 = arith.constant 36 : i32
      %75 = arith.muli %74, %c36_i32_57 : i32
      %c2_i32_58 = arith.constant 2 : i32
      %76 = arith.addi %75, %c2_i32_58 : i32
      %c0_59 = arith.constant 0 : index
      %77 = arith.index_cast %76 : i32 to index
      %c0_60 = arith.constant 0 : index
      %78 = vector.load %arg1[%c0_59, %77, %c0_60] : memref<1x1332x8xf32, #tpu.memory_space<vmem>>, vector<1x72x8xf32>
      %79 = vector.shape_cast %78 : vector<1x72x8xf32> to vector<72x8xf32>
      %c7 = arith.constant 7 : index
      %c0_61 = arith.constant 0 : index
      %c0_62 = arith.constant 0 : index
      %80 = vector.load %arg2[%c7, %c0_61, %c0_62] : memref<25x8x32xf32, #tpu.memory_space<vmem>>, vector<1x8x32xf32>
      %81 = vector.shape_cast %80 : vector<1x8x32xf32> to vector<8x32xf32>
      %cst_63 = arith.constant dense<0.000000e+00> : vector<72x32xf32>
      %82 = tpu.matmul %79, %81, %cst_63 {dimension_numbers = #tpu.dot_dimension_numbers<[1], [0], [0], [1], [0, 0, 1, 1], [], []>} : vector<72x8xf32>, vector<8x32xf32>, vector<72x32xf32> -> vector<72x32xf32>
      %83 = arith.addf %73, %82 : vector<72x32xf32>
      %c1_i32_64 = arith.constant 1 : i32
      %84 = arith.addi %2, %c1_i32_64 : i32
      %c36_i32_65 = arith.constant 36 : i32
      %85 = arith.muli %84, %c36_i32_65 : i32
      %c3_i32_66 = arith.constant 3 : i32
      %86 = arith.addi %85, %c3_i32_66 : i32
      %c0_67 = arith.constant 0 : index
      %87 = arith.index_cast %86 : i32 to index
      %c0_68 = arith.constant 0 : index
      %88 = vector.load %arg1[%c0_67, %87, %c0_68] : memref<1x1332x8xf32, #tpu.memory_space<vmem>>, vector<1x72x8xf32>
      %89 = vector.shape_cast %88 : vector<1x72x8xf32> to vector<72x8xf32>
      %c8 = arith.constant 8 : index
      %c0_69 = arith.constant 0 : index
      %c0_70 = arith.constant 0 : index
      %90 = vector.load %arg2[%c8, %c0_69, %c0_70] : memref<25x8x32xf32, #tpu.memory_space<vmem>>, vector<1x8x32xf32>
      %91 = vector.shape_cast %90 : vector<1x8x32xf32> to vector<8x32xf32>
      %cst_71 = arith.constant dense<0.000000e+00> : vector<72x32xf32>
      %92 = tpu.matmul %89, %91, %cst_71 {dimension_numbers = #tpu.dot_dimension_numbers<[1], [0], [0], [1], [0, 0, 1, 1], [], []>} : vector<72x8xf32>, vector<8x32xf32>, vector<72x32xf32> -> vector<72x32xf32>
      %93 = arith.addf %83, %92 : vector<72x32xf32>
      %c1_i32_72 = arith.constant 1 : i32
      %94 = arith.addi %2, %c1_i32_72 : i32
      %c36_i32_73 = arith.constant 36 : i32
      %95 = arith.muli %94, %c36_i32_73 : i32
      %c4_i32_74 = arith.constant 4 : i32
      %96 = arith.addi %95, %c4_i32_74 : i32
      %c0_75 = arith.constant 0 : index
      %97 = arith.index_cast %96 : i32 to index
      %c0_76 = arith.constant 0 : index
      %98 = vector.load %arg1[%c0_75, %97, %c0_76] : memref<1x1332x8xf32, #tpu.memory_space<vmem>>, vector<1x72x8xf32>
      %99 = vector.shape_cast %98 : vector<1x72x8xf32> to vector<72x8xf32>
      %c9 = arith.constant 9 : index
      %c0_77 = arith.constant 0 : index
      %c0_78 = arith.constant 0 : index
      %100 = vector.load %arg2[%c9, %c0_77, %c0_78] : memref<25x8x32xf32, #tpu.memory_space<vmem>>, vector<1x8x32xf32>
      %101 = vector.shape_cast %100 : vector<1x8x32xf32> to vector<8x32xf32>
      %cst_79 = arith.constant dense<0.000000e+00> : vector<72x32xf32>
      %102 = tpu.matmul %99, %101, %cst_79 {dimension_numbers = #tpu.dot_dimension_numbers<[1], [0], [0], [1], [0, 0, 1, 1], [], []>} : vector<72x8xf32>, vector<8x32xf32>, vector<72x32xf32> -> vector<72x32xf32>
      %103 = arith.addf %93, %102 : vector<72x32xf32>
      %c2_i32_80 = arith.constant 2 : i32
      %104 = arith.addi %2, %c2_i32_80 : i32
      %c36_i32_81 = arith.constant 36 : i32
      %105 = arith.muli %104, %c36_i32_81 : i32
      %c0_i32_82 = arith.constant 0 : i32
      %106 = arith.addi %105, %c0_i32_82 : i32
      %c0_83 = arith.constant 0 : index
      %107 = arith.index_cast %106 : i32 to index
      %c0_84 = arith.constant 0 : index
      %108 = vector.load %arg1[%c0_83, %107, %c0_84] : memref<1x1332x8xf32, #tpu.memory_space<vmem>>, vector<1x72x8xf32>
      %109 = vector.shape_cast %108 : vector<1x72x8xf32> to vector<72x8xf32>
      %c10 = arith.constant 10 : index
      %c0_85 = arith.constant 0 : index
      %c0_86 = arith.constant 0 : index
      %110 = vector.load %arg2[%c10, %c0_85, %c0_86] : memref<25x8x32xf32, #tpu.memory_space<vmem>>, vector<1x8x32xf32>
      %111 = vector.shape_cast %110 : vector<1x8x32xf32> to vector<8x32xf32>
      %cst_87 = arith.constant dense<0.000000e+00> : vector<72x32xf32>
      %112 = tpu.matmul %109, %111, %cst_87 {dimension_numbers = #tpu.dot_dimension_numbers<[1], [0], [0], [1], [0, 0, 1, 1], [], []>} : vector<72x8xf32>, vector<8x32xf32>, vector<72x32xf32> -> vector<72x32xf32>
      %113 = arith.addf %103, %112 : vector<72x32xf32>
      %c2_i32_88 = arith.constant 2 : i32
      %114 = arith.addi %2, %c2_i32_88 : i32
      %c36_i32_89 = arith.constant 36 : i32
      %115 = arith.muli %114, %c36_i32_89 : i32
      %c1_i32_90 = arith.constant 1 : i32
      %116 = arith.addi %115, %c1_i32_90 : i32
      %c0_91 = arith.constant 0 : index
      %117 = arith.index_cast %116 : i32 to index
      %c0_92 = arith.constant 0 : index
      %118 = vector.load %arg1[%c0_91, %117, %c0_92] : memref<1x1332x8xf32, #tpu.memory_space<vmem>>, vector<1x72x8xf32>
      %119 = vector.shape_cast %118 : vector<1x72x8xf32> to vector<72x8xf32>
      %c11 = arith.constant 11 : index
      %c0_93 = arith.constant 0 : index
      %c0_94 = arith.constant 0 : index
      %120 = vector.load %arg2[%c11, %c0_93, %c0_94] : memref<25x8x32xf32, #tpu.memory_space<vmem>>, vector<1x8x32xf32>
      %121 = vector.shape_cast %120 : vector<1x8x32xf32> to vector<8x32xf32>
      %cst_95 = arith.constant dense<0.000000e+00> : vector<72x32xf32>
      %122 = tpu.matmul %119, %121, %cst_95 {dimension_numbers = #tpu.dot_dimension_numbers<[1], [0], [0], [1], [0, 0, 1, 1], [], []>} : vector<72x8xf32>, vector<8x32xf32>, vector<72x32xf32> -> vector<72x32xf32>
      %123 = arith.addf %113, %122 : vector<72x32xf32>
      %c2_i32_96 = arith.constant 2 : i32
      %124 = arith.addi %2, %c2_i32_96 : i32
      %c36_i32_97 = arith.constant 36 : i32
      %125 = arith.muli %124, %c36_i32_97 : i32
      %c2_i32_98 = arith.constant 2 : i32
      %126 = arith.addi %125, %c2_i32_98 : i32
      %c0_99 = arith.constant 0 : index
      %127 = arith.index_cast %126 : i32 to index
      %c0_100 = arith.constant 0 : index
      %128 = vector.load %arg1[%c0_99, %127, %c0_100] : memref<1x1332x8xf32, #tpu.memory_space<vmem>>, vector<1x72x8xf32>
      %129 = vector.shape_cast %128 : vector<1x72x8xf32> to vector<72x8xf32>
      %c12 = arith.constant 12 : index
      %c0_101 = arith.constant 0 : index
      %c0_102 = arith.constant 0 : index
      %130 = vector.load %arg2[%c12, %c0_101, %c0_102] : memref<25x8x32xf32, #tpu.memory_space<vmem>>, vector<1x8x32xf32>
      %131 = vector.shape_cast %130 : vector<1x8x32xf32> to vector<8x32xf32>
      %cst_103 = arith.constant dense<0.000000e+00> : vector<72x32xf32>
      %132 = tpu.matmul %129, %131, %cst_103 {dimension_numbers = #tpu.dot_dimension_numbers<[1], [0], [0], [1], [0, 0, 1, 1], [], []>} : vector<72x8xf32>, vector<8x32xf32>, vector<72x32xf32> -> vector<72x32xf32>
      %133 = arith.addf %123, %132 : vector<72x32xf32>
      %c2_i32_104 = arith.constant 2 : i32
      %134 = arith.addi %2, %c2_i32_104 : i32
      %c36_i32_105 = arith.constant 36 : i32
      %135 = arith.muli %134, %c36_i32_105 : i32
      %c3_i32_106 = arith.constant 3 : i32
      %136 = arith.addi %135, %c3_i32_106 : i32
      %c0_107 = arith.constant 0 : index
      %137 = arith.index_cast %136 : i32 to index
      %c0_108 = arith.constant 0 : index
      %138 = vector.load %arg1[%c0_107, %137, %c0_108] : memref<1x1332x8xf32, #tpu.memory_space<vmem>>, vector<1x72x8xf32>
      %139 = vector.shape_cast %138 : vector<1x72x8xf32> to vector<72x8xf32>
      %c13 = arith.constant 13 : index
      %c0_109 = arith.constant 0 : index
      %c0_110 = arith.constant 0 : index
      %140 = vector.load %arg2[%c13, %c0_109, %c0_110] : memref<25x8x32xf32, #tpu.memory_space<vmem>>, vector<1x8x32xf32>
      %141 = vector.shape_cast %140 : vector<1x8x32xf32> to vector<8x32xf32>
      %cst_111 = arith.constant dense<0.000000e+00> : vector<72x32xf32>
      %142 = tpu.matmul %139, %141, %cst_111 {dimension_numbers = #tpu.dot_dimension_numbers<[1], [0], [0], [1], [0, 0, 1, 1], [], []>} : vector<72x8xf32>, vector<8x32xf32>, vector<72x32xf32> -> vector<72x32xf32>
      %143 = arith.addf %133, %142 : vector<72x32xf32>
      %c2_i32_112 = arith.constant 2 : i32
      %144 = arith.addi %2, %c2_i32_112 : i32
      %c36_i32_113 = arith.constant 36 : i32
      %145 = arith.muli %144, %c36_i32_113 : i32
      %c4_i32_114 = arith.constant 4 : i32
      %146 = arith.addi %145, %c4_i32_114 : i32
      %c0_115 = arith.constant 0 : index
      %147 = arith.index_cast %146 : i32 to index
      %c0_116 = arith.constant 0 : index
      %148 = vector.load %arg1[%c0_115, %147, %c0_116] : memref<1x1332x8xf32, #tpu.memory_space<vmem>>, vector<1x72x8xf32>
      %149 = vector.shape_cast %148 : vector<1x72x8xf32> to vector<72x8xf32>
      %c14 = arith.constant 14 : index
      %c0_117 = arith.constant 0 : index
      %c0_118 = arith.constant 0 : index
      %150 = vector.load %arg2[%c14, %c0_117, %c0_118] : memref<25x8x32xf32, #tpu.memory_space<vmem>>, vector<1x8x32xf32>
      %151 = vector.shape_cast %150 : vector<1x8x32xf32> to vector<8x32xf32>
      %cst_119 = arith.constant dense<0.000000e+00> : vector<72x32xf32>
      %152 = tpu.matmul %149, %151, %cst_119 {dimension_numbers = #tpu.dot_dimension_numbers<[1], [0], [0], [1], [0, 0, 1, 1], [], []>} : vector<72x8xf32>, vector<8x32xf32>, vector<72x32xf32> -> vector<72x32xf32>
      %153 = arith.addf %143, %152 : vector<72x32xf32>
      %c3_i32_120 = arith.constant 3 : i32
      %154 = arith.addi %2, %c3_i32_120 : i32
      %c36_i32_121 = arith.constant 36 : i32
      %155 = arith.muli %154, %c36_i32_121 : i32
      %c0_i32_122 = arith.constant 0 : i32
      %156 = arith.addi %155, %c0_i32_122 : i32
      %c0_123 = arith.constant 0 : index
      %157 = arith.index_cast %156 : i32 to index
      %c0_124 = arith.constant 0 : index
      %158 = vector.load %arg1[%c0_123, %157, %c0_124] : memref<1x1332x8xf32, #tpu.memory_space<vmem>>, vector<1x72x8xf32>
      %159 = vector.shape_cast %158 : vector<1x72x8xf32> to vector<72x8xf32>
      %c15 = arith.constant 15 : index
      %c0_125 = arith.constant 0 : index
      %c0_126 = arith.constant 0 : index
      %160 = vector.load %arg2[%c15, %c0_125, %c0_126] : memref<25x8x32xf32, #tpu.memory_space<vmem>>, vector<1x8x32xf32>
      %161 = vector.shape_cast %160 : vector<1x8x32xf32> to vector<8x32xf32>
      %cst_127 = arith.constant dense<0.000000e+00> : vector<72x32xf32>
      %162 = tpu.matmul %159, %161, %cst_127 {dimension_numbers = #tpu.dot_dimension_numbers<[1], [0], [0], [1], [0, 0, 1, 1], [], []>} : vector<72x8xf32>, vector<8x32xf32>, vector<72x32xf32> -> vector<72x32xf32>
      %163 = arith.addf %153, %162 : vector<72x32xf32>
      %c3_i32_128 = arith.constant 3 : i32
      %164 = arith.addi %2, %c3_i32_128 : i32
      %c36_i32_129 = arith.constant 36 : i32
      %165 = arith.muli %164, %c36_i32_129 : i32
      %c1_i32_130 = arith.constant 1 : i32
      %166 = arith.addi %165, %c1_i32_130 : i32
      %c0_131 = arith.constant 0 : index
      %167 = arith.index_cast %166 : i32 to index
      %c0_132 = arith.constant 0 : index
      %168 = vector.load %arg1[%c0_131, %167, %c0_132] : memref<1x1332x8xf32, #tpu.memory_space<vmem>>, vector<1x72x8xf32>
      %169 = vector.shape_cast %168 : vector<1x72x8xf32> to vector<72x8xf32>
      %c16 = arith.constant 16 : index
      %c0_133 = arith.constant 0 : index
      %c0_134 = arith.constant 0 : index
      %170 = vector.load %arg2[%c16, %c0_133, %c0_134] : memref<25x8x32xf32, #tpu.memory_space<vmem>>, vector<1x8x32xf32>
      %171 = vector.shape_cast %170 : vector<1x8x32xf32> to vector<8x32xf32>
      %cst_135 = arith.constant dense<0.000000e+00> : vector<72x32xf32>
      %172 = tpu.matmul %169, %171, %cst_135 {dimension_numbers = #tpu.dot_dimension_numbers<[1], [0], [0], [1], [0, 0, 1, 1], [], []>} : vector<72x8xf32>, vector<8x32xf32>, vector<72x32xf32> -> vector<72x32xf32>
      %173 = arith.addf %163, %172 : vector<72x32xf32>
      %c3_i32_136 = arith.constant 3 : i32
      %174 = arith.addi %2, %c3_i32_136 : i32
      %c36_i32_137 = arith.constant 36 : i32
      %175 = arith.muli %174, %c36_i32_137 : i32
      %c2_i32_138 = arith.constant 2 : i32
      %176 = arith.addi %175, %c2_i32_138 : i32
      %c0_139 = arith.constant 0 : index
      %177 = arith.index_cast %176 : i32 to index
      %c0_140 = arith.constant 0 : index
      %178 = vector.load %arg1[%c0_139, %177, %c0_140] : memref<1x1332x8xf32, #tpu.memory_space<vmem>>, vector<1x72x8xf32>
      %179 = vector.shape_cast %178 : vector<1x72x8xf32> to vector<72x8xf32>
      %c17 = arith.constant 17 : index
      %c0_141 = arith.constant 0 : index
      %c0_142 = arith.constant 0 : index
      %180 = vector.load %arg2[%c17, %c0_141, %c0_142] : memref<25x8x32xf32, #tpu.memory_space<vmem>>, vector<1x8x32xf32>
      %181 = vector.shape_cast %180 : vector<1x8x32xf32> to vector<8x32xf32>
      %cst_143 = arith.constant dense<0.000000e+00> : vector<72x32xf32>
      %182 = tpu.matmul %179, %181, %cst_143 {dimension_numbers = #tpu.dot_dimension_numbers<[1], [0], [0], [1], [0, 0, 1, 1], [], []>} : vector<72x8xf32>, vector<8x32xf32>, vector<72x32xf32> -> vector<72x32xf32>
      %183 = arith.addf %173, %182 : vector<72x32xf32>
      %c3_i32_144 = arith.constant 3 : i32
      %184 = arith.addi %2, %c3_i32_144 : i32
      %c36_i32_145 = arith.constant 36 : i32
      %185 = arith.muli %184, %c36_i32_145 : i32
      %c3_i32_146 = arith.constant 3 : i32
      %186 = arith.addi %185, %c3_i32_146 : i32
      %c0_147 = arith.constant 0 : index
      %187 = arith.index_cast %186 : i32 to index
      %c0_148 = arith.constant 0 : index
      %188 = vector.load %arg1[%c0_147, %187, %c0_148] : memref<1x1332x8xf32, #tpu.memory_space<vmem>>, vector<1x72x8xf32>
      %189 = vector.shape_cast %188 : vector<1x72x8xf32> to vector<72x8xf32>
      %c18 = arith.constant 18 : index
      %c0_149 = arith.constant 0 : index
      %c0_150 = arith.constant 0 : index
      %190 = vector.load %arg2[%c18, %c0_149, %c0_150] : memref<25x8x32xf32, #tpu.memory_space<vmem>>, vector<1x8x32xf32>
      %191 = vector.shape_cast %190 : vector<1x8x32xf32> to vector<8x32xf32>
      %cst_151 = arith.constant dense<0.000000e+00> : vector<72x32xf32>
      %192 = tpu.matmul %189, %191, %cst_151 {dimension_numbers = #tpu.dot_dimension_numbers<[1], [0], [0], [1], [0, 0, 1, 1], [], []>} : vector<72x8xf32>, vector<8x32xf32>, vector<72x32xf32> -> vector<72x32xf32>
      %193 = arith.addf %183, %192 : vector<72x32xf32>
      %c3_i32_152 = arith.constant 3 : i32
      %194 = arith.addi %2, %c3_i32_152 : i32
      %c36_i32_153 = arith.constant 36 : i32
      %195 = arith.muli %194, %c36_i32_153 : i32
      %c4_i32_154 = arith.constant 4 : i32
      %196 = arith.addi %195, %c4_i32_154 : i32
      %c0_155 = arith.constant 0 : index
      %197 = arith.index_cast %196 : i32 to index
      %c0_156 = arith.constant 0 : index
      %198 = vector.load %arg1[%c0_155, %197, %c0_156] : memref<1x1332x8xf32, #tpu.memory_space<vmem>>, vector<1x72x8xf32>
      %199 = vector.shape_cast %198 : vector<1x72x8xf32> to vector<72x8xf32>
      %c19 = arith.constant 19 : index
      %c0_157 = arith.constant 0 : index
      %c0_158 = arith.constant 0 : index
      %200 = vector.load %arg2[%c19, %c0_157, %c0_158] : memref<25x8x32xf32, #tpu.memory_space<vmem>>, vector<1x8x32xf32>
      %201 = vector.shape_cast %200 : vector<1x8x32xf32> to vector<8x32xf32>
      %cst_159 = arith.constant dense<0.000000e+00> : vector<72x32xf32>
      %202 = tpu.matmul %199, %201, %cst_159 {dimension_numbers = #tpu.dot_dimension_numbers<[1], [0], [0], [1], [0, 0, 1, 1], [], []>} : vector<72x8xf32>, vector<8x32xf32>, vector<72x32xf32> -> vector<72x32xf32>
      %203 = arith.addf %193, %202 : vector<72x32xf32>
      %c4_i32_160 = arith.constant 4 : i32
      %204 = arith.addi %2, %c4_i32_160 : i32
      %c36_i32_161 = arith.constant 36 : i32
      %205 = arith.muli %204, %c36_i32_161 : i32
      %c0_i32_162 = arith.constant 0 : i32
      %206 = arith.addi %205, %c0_i32_162 : i32
      %c0_163 = arith.constant 0 : index
      %207 = arith.index_cast %206 : i32 to index
      %c0_164 = arith.constant 0 : index
      %208 = vector.load %arg1[%c0_163, %207, %c0_164] : memref<1x1332x8xf32, #tpu.memory_space<vmem>>, vector<1x72x8xf32>
      %209 = vector.shape_cast %208 : vector<1x72x8xf32> to vector<72x8xf32>
      %c20 = arith.constant 20 : index
      %c0_165 = arith.constant 0 : index
      %c0_166 = arith.constant 0 : index
      %210 = vector.load %arg2[%c20, %c0_165, %c0_166] : memref<25x8x32xf32, #tpu.memory_space<vmem>>, vector<1x8x32xf32>
      %211 = vector.shape_cast %210 : vector<1x8x32xf32> to vector<8x32xf32>
      %cst_167 = arith.constant dense<0.000000e+00> : vector<72x32xf32>
      %212 = tpu.matmul %209, %211, %cst_167 {dimension_numbers = #tpu.dot_dimension_numbers<[1], [0], [0], [1], [0, 0, 1, 1], [], []>} : vector<72x8xf32>, vector<8x32xf32>, vector<72x32xf32> -> vector<72x32xf32>
      %213 = arith.addf %203, %212 : vector<72x32xf32>
      %c4_i32_168 = arith.constant 4 : i32
      %214 = arith.addi %2, %c4_i32_168 : i32
      %c36_i32_169 = arith.constant 36 : i32
      %215 = arith.muli %214, %c36_i32_169 : i32
      %c1_i32_170 = arith.constant 1 : i32
      %216 = arith.addi %215, %c1_i32_170 : i32
      %c0_171 = arith.constant 0 : index
      %217 = arith.index_cast %216 : i32 to index
      %c0_172 = arith.constant 0 : index
      %218 = vector.load %arg1[%c0_171, %217, %c0_172] : memref<1x1332x8xf32, #tpu.memory_space<vmem>>, vector<1x72x8xf32>
      %219 = vector.shape_cast %218 : vector<1x72x8xf32> to vector<72x8xf32>
      %c21 = arith.constant 21 : index
      %c0_173 = arith.constant 0 : index
      %c0_174 = arith.constant 0 : index
      %220 = vector.load %arg2[%c21, %c0_173, %c0_174] : memref<25x8x32xf32, #tpu.memory_space<vmem>>, vector<1x8x32xf32>
      %221 = vector.shape_cast %220 : vector<1x8x32xf32> to vector<8x32xf32>
      %cst_175 = arith.constant dense<0.000000e+00> : vector<72x32xf32>
      %222 = tpu.matmul %219, %221, %cst_175 {dimension_numbers = #tpu.dot_dimension_numbers<[1], [0], [0], [1], [0, 0, 1, 1], [], []>} : vector<72x8xf32>, vector<8x32xf32>, vector<72x32xf32> -> vector<72x32xf32>
      %223 = arith.addf %213, %222 : vector<72x32xf32>
      %c4_i32_176 = arith.constant 4 : i32
      %224 = arith.addi %2, %c4_i32_176 : i32
      %c36_i32_177 = arith.constant 36 : i32
      %225 = arith.muli %224, %c36_i32_177 : i32
      %c2_i32_178 = arith.constant 2 : i32
      %226 = arith.addi %225, %c2_i32_178 : i32
      %c0_179 = arith.constant 0 : index
      %227 = arith.index_cast %226 : i32 to index
      %c0_180 = arith.constant 0 : index
      %228 = vector.load %arg1[%c0_179, %227, %c0_180] : memref<1x1332x8xf32, #tpu.memory_space<vmem>>, vector<1x72x8xf32>
      %229 = vector.shape_cast %228 : vector<1x72x8xf32> to vector<72x8xf32>
      %c22 = arith.constant 22 : index
      %c0_181 = arith.constant 0 : index
      %c0_182 = arith.constant 0 : index
      %230 = vector.load %arg2[%c22, %c0_181, %c0_182] : memref<25x8x32xf32, #tpu.memory_space<vmem>>, vector<1x8x32xf32>
      %231 = vector.shape_cast %230 : vector<1x8x32xf32> to vector<8x32xf32>
      %cst_183 = arith.constant dense<0.000000e+00> : vector<72x32xf32>
      %232 = tpu.matmul %229, %231, %cst_183 {dimension_numbers = #tpu.dot_dimension_numbers<[1], [0], [0], [1], [0, 0, 1, 1], [], []>} : vector<72x8xf32>, vector<8x32xf32>, vector<72x32xf32> -> vector<72x32xf32>
      %233 = arith.addf %223, %232 : vector<72x32xf32>
      %c4_i32_184 = arith.constant 4 : i32
      %234 = arith.addi %2, %c4_i32_184 : i32
      %c36_i32_185 = arith.constant 36 : i32
      %235 = arith.muli %234, %c36_i32_185 : i32
      %c3_i32_186 = arith.constant 3 : i32
      %236 = arith.addi %235, %c3_i32_186 : i32
      %c0_187 = arith.constant 0 : index
      %237 = arith.index_cast %236 : i32 to index
      %c0_188 = arith.constant 0 : index
      %238 = vector.load %arg1[%c0_187, %237, %c0_188] : memref<1x1332x8xf32, #tpu.memory_space<vmem>>, vector<1x72x8xf32>
      %239 = vector.shape_cast %238 : vector<1x72x8xf32> to vector<72x8xf32>
      %c23 = arith.constant 23 : index
      %c0_189 = arith.constant 0 : index
      %c0_190 = arith.constant 0 : index
      %240 = vector.load %arg2[%c23, %c0_189, %c0_190] : memref<25x8x32xf32, #tpu.memory_space<vmem>>, vector<1x8x32xf32>
      %241 = vector.shape_cast %240 : vector<1x8x32xf32> to vector<8x32xf32>
      %cst_191 = arith.constant dense<0.000000e+00> : vector<72x32xf32>
      %242 = tpu.matmul %239, %241, %cst_191 {dimension_numbers = #tpu.dot_dimension_numbers<[1], [0], [0], [1], [0, 0, 1, 1], [], []>} : vector<72x8xf32>, vector<8x32xf32>, vector<72x32xf32> -> vector<72x32xf32>
      %243 = arith.addf %233, %242 : vector<72x32xf32>
      %c4_i32_192 = arith.constant 4 : i32
      %244 = arith.addi %2, %c4_i32_192 : i32
      %c36_i32_193 = arith.constant 36 : i32
      %245 = arith.muli %244, %c36_i32_193 : i32
      %c4_i32_194 = arith.constant 4 : i32
      %246 = arith.addi %245, %c4_i32_194 : i32
      %c0_195 = arith.constant 0 : index
      %247 = arith.index_cast %246 : i32 to index
      %c0_196 = arith.constant 0 : index
      %248 = vector.load %arg1[%c0_195, %247, %c0_196] : memref<1x1332x8xf32, #tpu.memory_space<vmem>>, vector<1x72x8xf32>
      %249 = vector.shape_cast %248 : vector<1x72x8xf32> to vector<72x8xf32>
      %c24 = arith.constant 24 : index
      %c0_197 = arith.constant 0 : index
      %c0_198 = arith.constant 0 : index
      %250 = vector.load %arg2[%c24, %c0_197, %c0_198] : memref<25x8x32xf32, #tpu.memory_space<vmem>>, vector<1x8x32xf32>
      %251 = vector.shape_cast %250 : vector<1x8x32xf32> to vector<8x32xf32>
      %cst_199 = arith.constant dense<0.000000e+00> : vector<72x32xf32>
      %252 = tpu.matmul %249, %251, %cst_199 {dimension_numbers = #tpu.dot_dimension_numbers<[1], [0], [0], [1], [0, 0, 1, 1], [], []>} : vector<72x8xf32>, vector<8x32xf32>, vector<72x32xf32> -> vector<72x32xf32>
      %253 = arith.addf %243, %252 : vector<72x32xf32>
      %c0_200 = arith.constant 0 : index
      %c0_201 = arith.constant 0 : index
      %254 = vector.load %arg5[%c0_200, %c0_201] : memref<72x32xf32, #tpu.memory_space<vmem>>, vector<72x32xf32>
      tpu.vector_store %arg5[%c0_200, %c0_201], %253 {strides = array<i32>} : memref<72x32xf32, #tpu.memory_space<vmem>>, vector<72x32xf32>,
      %c0_202 = arith.constant 0 : index
      %c0_203 = arith.constant 0 : index
      %255 = tpu.strided_load %arg5[%c0_202, %c0_203] {strides = array<i32: 2, 1>} : memref<72x32xf32, #tpu.memory_space<vmem>>, vector<16x32xf32>
      %c1_204 = arith.constant 1 : index
      %c0_205 = arith.constant 0 : index
      %256 = tpu.strided_load %arg5[%c1_204, %c0_205] {strides = array<i32: 2, 1>} : memref<72x32xf32, #tpu.memory_space<vmem>>, vector<16x32xf32>
      %c36 = arith.constant 36 : index
      %c0_206 = arith.constant 0 : index
      %257 = tpu.strided_load %arg5[%c36, %c0_206] {strides = array<i32: 2, 1>} : memref<72x32xf32, #tpu.memory_space<vmem>>, vector<16x32xf32>
      %c37 = arith.constant 37 : index
      %c0_207 = arith.constant 0 : index
      %258 = tpu.strided_load %arg5[%c37, %c0_207] {strides = array<i32: 2, 1>} : memref<72x32xf32, #tpu.memory_space<vmem>>, vector<16x32xf32>
      %259 = arith.maximumf %255, %256 : vector<16x32xf32>
      %260 = arith.maximumf %257, %258 : vector<16x32xf32>
      %261 = arith.maximumf %259, %260 : vector<16x32xf32>
      %262 = vector.broadcast %0 : vector<1x32xf32> to vector<16x32xf32>
      %263 = arith.addf %261, %262 : vector<16x32xf32>
      %c1_i32_208 = arith.constant 1 : i32
      %264 = arith.muli %arg6, %c1_i32_208 : i32
      %c0_i32_209 = arith.constant 0 : i32
      %265 = arith.addi %264, %c0_i32_209 : i32
      %c0_210 = arith.constant 0 : index
      %266 = arith.index_cast %265 : i32 to index
      %c0_211 = arith.constant 0 : index
      %c0_212 = arith.constant 0 : index
      %267 = vector.load %arg4[%c0_210, %266, %c0_211, %c0_212] : memref<1x16x16x32xf32, #tpu.memory_space<vmem>>, vector<1x1x16x32xf32>
      %268 = vector.shape_cast %267 : vector<1x1x16x32xf32> to vector<16x32xf32>
      %269 = vector.shape_cast %263 : vector<16x32xf32> to vector<1x1x16x32xf32>
      tpu.vector_store %arg4[%c0_210, %266, %c0_211, %c0_212], %269 {strides = array<i32>} : memref<1x16x16x32xf32, #tpu.memory_space<vmem>>, vector<1x1x16x32xf32>,
    }
    %c16_i32_1 = arith.constant 16 : i32
    return
  }
  func.func @transform_0(%arg0: i32) -> (i32, i32, i32) {
    %c0_i32 = arith.constant 0 : i32
    %c0_i32_0 = arith.constant 0 : i32
    %c0_i32_1 = arith.constant 0 : i32
    return %arg0, %c0_i32, %c0_i32_0 : i32, i32, i32
  }
  func.func @transform_1(%arg0: i32) -> (i32, i32, i32) {
    %c0_i32 = arith.constant 0 : i32
    %c0_i32_0 = arith.constant 0 : i32
    %c0_i32_1 = arith.constant 0 : i32
    %c0_i32_2 = arith.constant 0 : i32
    return %c0_i32, %c0_i32_0, %c0_i32_1 : i32, i32, i32
  }
  func.func @transform_2(%arg0: i32) -> (i32, i32) {
    %c0_i32 = arith.constant 0 : i32
    %c0_i32_0 = arith.constant 0 : i32
    %c0_i32_1 = arith.constant 0 : i32
    return %c0_i32, %c0_i32_0 : i32, i32
  }
  func.func @transform_3(%arg0: i32) -> (i32, i32, i32, i32) {
    %c0_i32 = arith.constant 0 : i32
    %c0_i32_0 = arith.constant 0 : i32
    %c0_i32_1 = arith.constant 0 : i32
    %c0_i32_2 = arith.constant 0 : i32
    return %arg0, %c0_i32, %c0_i32_0, %c0_i32_1 : i32, i32, i32, i32
  }
}

module attributes {stable_mosaic.version = 11 : i64} {
  func.func @kernel(%arg0: i32, %arg1: memref<1x420x32xf32, #tpu.memory_space<vmem>>, %arg2: memref<25x32x32xf32, #tpu.memory_space<vmem>>, %arg3: memref<1x32xf32, #tpu.memory_space<vmem>>, %arg4: memref<1x8x8x32xf32, #tpu.memory_space<vmem>>, %arg5: memref<80x32xf32, #tpu.memory_space<vmem>>) attributes {dimension_semantics = [#tpu.dimension_semantics<parallel>], iteration_bounds = array<i64: 2>, scalar_prefetch = 0 : i64, scratch_operands = 1 : i64, tpu.core_type = #tpu.core_type<tc>, window_params = [{transform_indices = @transform_0, window_bounds = array<i64: 1, 420, 32>}, {pipeline_mode = #tpu.pipeline_mode<synchronous>, transform_indices = @transform_1, window_bounds = array<i64: 25, 32, 32>}, {pipeline_mode = #tpu.pipeline_mode<synchronous>, transform_indices = @transform_2, window_bounds = array<i64: 1, 32>}, {transform_indices = @transform_3, window_bounds = array<i64: 1, 8, 8, 32>}]} {
    %c0 = arith.constant 0 : index
    %c0_0 = arith.constant 0 : index
    %0 = vector.load %arg3[%c0, %c0_0] : memref<1x32xf32, #tpu.memory_space<vmem>>, vector<1x32xf32>
    %c0_i32 = arith.constant 0 : i32
    %c4_i32 = arith.constant 4 : i32
    %1 = arith.addi %c0_i32, %c4_i32 : i32
    %c1_i32 = arith.constant 1 : i32
    scf.for %arg6 = %c0_i32 to %1 step %c1_i32  : i32 {
      %c4_i32_2 = arith.constant 4 : i32
      %2 = arith.muli %arg6, %c4_i32_2 : i32
      %cst = arith.constant 0.000000e+00 : f32
      %3 = vector.broadcast %cst : f32 to vector<80x32xf32>
      %c0_i32_3 = arith.constant 0 : i32
      %4 = arith.addi %2, %c0_i32_3 : i32
      %c20_i32 = arith.constant 20 : i32
      %5 = arith.muli %4, %c20_i32 : i32
      %c0_i32_4 = arith.constant 0 : i32
      %6 = arith.addi %5, %c0_i32_4 : i32
      %c0_5 = arith.constant 0 : index
      %7 = arith.index_cast %6 : i32 to index
      %c0_6 = arith.constant 0 : index
      %8 = vector.load %arg1[%c0_5, %7, %c0_6] : memref<1x420x32xf32, #tpu.memory_space<vmem>>, vector<1x80x32xf32>
      %9 = vector.shape_cast %8 : vector<1x80x32xf32> to vector<80x32xf32>
      %c0_7 = arith.constant 0 : index
      %c0_8 = arith.constant 0 : index
      %c0_9 = arith.constant 0 : index
      %10 = vector.load %arg2[%c0_7, %c0_8, %c0_9] : memref<25x32x32xf32, #tpu.memory_space<vmem>>, vector<1x32x32xf32>
      %11 = vector.shape_cast %10 : vector<1x32x32xf32> to vector<32x32xf32>
      %cst_10 = arith.constant dense<0.000000e+00> : vector<80x32xf32>
      %12 = tpu.matmul %9, %11, %cst_10 {dimension_numbers = #tpu.dot_dimension_numbers<[1], [0], [0], [1], [0, 0, 1, 1], [], []>} : vector<80x32xf32>, vector<32x32xf32>, vector<80x32xf32> -> vector<80x32xf32>
      %13 = arith.addf %3, %12 : vector<80x32xf32>
      %c0_i32_11 = arith.constant 0 : i32
      %14 = arith.addi %2, %c0_i32_11 : i32
      %c20_i32_12 = arith.constant 20 : i32
      %15 = arith.muli %14, %c20_i32_12 : i32
      %c1_i32_13 = arith.constant 1 : i32
      %16 = arith.addi %15, %c1_i32_13 : i32
      %c0_14 = arith.constant 0 : index
      %17 = arith.index_cast %16 : i32 to index
      %c0_15 = arith.constant 0 : index
      %18 = vector.load %arg1[%c0_14, %17, %c0_15] : memref<1x420x32xf32, #tpu.memory_space<vmem>>, vector<1x80x32xf32>
      %19 = vector.shape_cast %18 : vector<1x80x32xf32> to vector<80x32xf32>
      %c1 = arith.constant 1 : index
      %c0_16 = arith.constant 0 : index
      %c0_17 = arith.constant 0 : index
      %20 = vector.load %arg2[%c1, %c0_16, %c0_17] : memref<25x32x32xf32, #tpu.memory_space<vmem>>, vector<1x32x32xf32>
      %21 = vector.shape_cast %20 : vector<1x32x32xf32> to vector<32x32xf32>
      %cst_18 = arith.constant dense<0.000000e+00> : vector<80x32xf32>
      %22 = tpu.matmul %19, %21, %cst_18 {dimension_numbers = #tpu.dot_dimension_numbers<[1], [0], [0], [1], [0, 0, 1, 1], [], []>} : vector<80x32xf32>, vector<32x32xf32>, vector<80x32xf32> -> vector<80x32xf32>
      %23 = arith.addf %13, %22 : vector<80x32xf32>
      %c0_i32_19 = arith.constant 0 : i32
      %24 = arith.addi %2, %c0_i32_19 : i32
      %c20_i32_20 = arith.constant 20 : i32
      %25 = arith.muli %24, %c20_i32_20 : i32
      %c2_i32 = arith.constant 2 : i32
      %26 = arith.addi %25, %c2_i32 : i32
      %c0_21 = arith.constant 0 : index
      %27 = arith.index_cast %26 : i32 to index
      %c0_22 = arith.constant 0 : index
      %28 = vector.load %arg1[%c0_21, %27, %c0_22] : memref<1x420x32xf32, #tpu.memory_space<vmem>>, vector<1x80x32xf32>
      %29 = vector.shape_cast %28 : vector<1x80x32xf32> to vector<80x32xf32>
      %c2 = arith.constant 2 : index
      %c0_23 = arith.constant 0 : index
      %c0_24 = arith.constant 0 : index
      %30 = vector.load %arg2[%c2, %c0_23, %c0_24] : memref<25x32x32xf32, #tpu.memory_space<vmem>>, vector<1x32x32xf32>
      %31 = vector.shape_cast %30 : vector<1x32x32xf32> to vector<32x32xf32>
      %cst_25 = arith.constant dense<0.000000e+00> : vector<80x32xf32>
      %32 = tpu.matmul %29, %31, %cst_25 {dimension_numbers = #tpu.dot_dimension_numbers<[1], [0], [0], [1], [0, 0, 1, 1], [], []>} : vector<80x32xf32>, vector<32x32xf32>, vector<80x32xf32> -> vector<80x32xf32>
      %33 = arith.addf %23, %32 : vector<80x32xf32>
      %c0_i32_26 = arith.constant 0 : i32
      %34 = arith.addi %2, %c0_i32_26 : i32
      %c20_i32_27 = arith.constant 20 : i32
      %35 = arith.muli %34, %c20_i32_27 : i32
      %c3_i32 = arith.constant 3 : i32
      %36 = arith.addi %35, %c3_i32 : i32
      %c0_28 = arith.constant 0 : index
      %37 = arith.index_cast %36 : i32 to index
      %c0_29 = arith.constant 0 : index
      %38 = vector.load %arg1[%c0_28, %37, %c0_29] : memref<1x420x32xf32, #tpu.memory_space<vmem>>, vector<1x80x32xf32>
      %39 = vector.shape_cast %38 : vector<1x80x32xf32> to vector<80x32xf32>
      %c3 = arith.constant 3 : index
      %c0_30 = arith.constant 0 : index
      %c0_31 = arith.constant 0 : index
      %40 = vector.load %arg2[%c3, %c0_30, %c0_31] : memref<25x32x32xf32, #tpu.memory_space<vmem>>, vector<1x32x32xf32>
      %41 = vector.shape_cast %40 : vector<1x32x32xf32> to vector<32x32xf32>
      %cst_32 = arith.constant dense<0.000000e+00> : vector<80x32xf32>
      %42 = tpu.matmul %39, %41, %cst_32 {dimension_numbers = #tpu.dot_dimension_numbers<[1], [0], [0], [1], [0, 0, 1, 1], [], []>} : vector<80x32xf32>, vector<32x32xf32>, vector<80x32xf32> -> vector<80x32xf32>
      %43 = arith.addf %33, %42 : vector<80x32xf32>
      %c0_i32_33 = arith.constant 0 : i32
      %44 = arith.addi %2, %c0_i32_33 : i32
      %c20_i32_34 = arith.constant 20 : i32
      %45 = arith.muli %44, %c20_i32_34 : i32
      %c4_i32_35 = arith.constant 4 : i32
      %46 = arith.addi %45, %c4_i32_35 : i32
      %c0_36 = arith.constant 0 : index
      %47 = arith.index_cast %46 : i32 to index
      %c0_37 = arith.constant 0 : index
      %48 = vector.load %arg1[%c0_36, %47, %c0_37] : memref<1x420x32xf32, #tpu.memory_space<vmem>>, vector<1x80x32xf32>
      %49 = vector.shape_cast %48 : vector<1x80x32xf32> to vector<80x32xf32>
      %c4 = arith.constant 4 : index
      %c0_38 = arith.constant 0 : index
      %c0_39 = arith.constant 0 : index
      %50 = vector.load %arg2[%c4, %c0_38, %c0_39] : memref<25x32x32xf32, #tpu.memory_space<vmem>>, vector<1x32x32xf32>
      %51 = vector.shape_cast %50 : vector<1x32x32xf32> to vector<32x32xf32>
      %cst_40 = arith.constant dense<0.000000e+00> : vector<80x32xf32>
      %52 = tpu.matmul %49, %51, %cst_40 {dimension_numbers = #tpu.dot_dimension_numbers<[1], [0], [0], [1], [0, 0, 1, 1], [], []>} : vector<80x32xf32>, vector<32x32xf32>, vector<80x32xf32> -> vector<80x32xf32>
      %53 = arith.addf %43, %52 : vector<80x32xf32>
      %c1_i32_41 = arith.constant 1 : i32
      %54 = arith.addi %2, %c1_i32_41 : i32
      %c20_i32_42 = arith.constant 20 : i32
      %55 = arith.muli %54, %c20_i32_42 : i32
      %c0_i32_43 = arith.constant 0 : i32
      %56 = arith.addi %55, %c0_i32_43 : i32
      %c0_44 = arith.constant 0 : index
      %57 = arith.index_cast %56 : i32 to index
      %c0_45 = arith.constant 0 : index
      %58 = vector.load %arg1[%c0_44, %57, %c0_45] : memref<1x420x32xf32, #tpu.memory_space<vmem>>, vector<1x80x32xf32>
      %59 = vector.shape_cast %58 : vector<1x80x32xf32> to vector<80x32xf32>
      %c5 = arith.constant 5 : index
      %c0_46 = arith.constant 0 : index
      %c0_47 = arith.constant 0 : index
      %60 = vector.load %arg2[%c5, %c0_46, %c0_47] : memref<25x32x32xf32, #tpu.memory_space<vmem>>, vector<1x32x32xf32>
      %61 = vector.shape_cast %60 : vector<1x32x32xf32> to vector<32x32xf32>
      %cst_48 = arith.constant dense<0.000000e+00> : vector<80x32xf32>
      %62 = tpu.matmul %59, %61, %cst_48 {dimension_numbers = #tpu.dot_dimension_numbers<[1], [0], [0], [1], [0, 0, 1, 1], [], []>} : vector<80x32xf32>, vector<32x32xf32>, vector<80x32xf32> -> vector<80x32xf32>
      %63 = arith.addf %53, %62 : vector<80x32xf32>
      %c1_i32_49 = arith.constant 1 : i32
      %64 = arith.addi %2, %c1_i32_49 : i32
      %c20_i32_50 = arith.constant 20 : i32
      %65 = arith.muli %64, %c20_i32_50 : i32
      %c1_i32_51 = arith.constant 1 : i32
      %66 = arith.addi %65, %c1_i32_51 : i32
      %c0_52 = arith.constant 0 : index
      %67 = arith.index_cast %66 : i32 to index
      %c0_53 = arith.constant 0 : index
      %68 = vector.load %arg1[%c0_52, %67, %c0_53] : memref<1x420x32xf32, #tpu.memory_space<vmem>>, vector<1x80x32xf32>
      %69 = vector.shape_cast %68 : vector<1x80x32xf32> to vector<80x32xf32>
      %c6 = arith.constant 6 : index
      %c0_54 = arith.constant 0 : index
      %c0_55 = arith.constant 0 : index
      %70 = vector.load %arg2[%c6, %c0_54, %c0_55] : memref<25x32x32xf32, #tpu.memory_space<vmem>>, vector<1x32x32xf32>
      %71 = vector.shape_cast %70 : vector<1x32x32xf32> to vector<32x32xf32>
      %cst_56 = arith.constant dense<0.000000e+00> : vector<80x32xf32>
      %72 = tpu.matmul %69, %71, %cst_56 {dimension_numbers = #tpu.dot_dimension_numbers<[1], [0], [0], [1], [0, 0, 1, 1], [], []>} : vector<80x32xf32>, vector<32x32xf32>, vector<80x32xf32> -> vector<80x32xf32>
      %73 = arith.addf %63, %72 : vector<80x32xf32>
      %c1_i32_57 = arith.constant 1 : i32
      %74 = arith.addi %2, %c1_i32_57 : i32
      %c20_i32_58 = arith.constant 20 : i32
      %75 = arith.muli %74, %c20_i32_58 : i32
      %c2_i32_59 = arith.constant 2 : i32
      %76 = arith.addi %75, %c2_i32_59 : i32
      %c0_60 = arith.constant 0 : index
      %77 = arith.index_cast %76 : i32 to index
      %c0_61 = arith.constant 0 : index
      %78 = vector.load %arg1[%c0_60, %77, %c0_61] : memref<1x420x32xf32, #tpu.memory_space<vmem>>, vector<1x80x32xf32>
      %79 = vector.shape_cast %78 : vector<1x80x32xf32> to vector<80x32xf32>
      %c7 = arith.constant 7 : index
      %c0_62 = arith.constant 0 : index
      %c0_63 = arith.constant 0 : index
      %80 = vector.load %arg2[%c7, %c0_62, %c0_63] : memref<25x32x32xf32, #tpu.memory_space<vmem>>, vector<1x32x32xf32>
      %81 = vector.shape_cast %80 : vector<1x32x32xf32> to vector<32x32xf32>
      %cst_64 = arith.constant dense<0.000000e+00> : vector<80x32xf32>
      %82 = tpu.matmul %79, %81, %cst_64 {dimension_numbers = #tpu.dot_dimension_numbers<[1], [0], [0], [1], [0, 0, 1, 1], [], []>} : vector<80x32xf32>, vector<32x32xf32>, vector<80x32xf32> -> vector<80x32xf32>
      %83 = arith.addf %73, %82 : vector<80x32xf32>
      %c1_i32_65 = arith.constant 1 : i32
      %84 = arith.addi %2, %c1_i32_65 : i32
      %c20_i32_66 = arith.constant 20 : i32
      %85 = arith.muli %84, %c20_i32_66 : i32
      %c3_i32_67 = arith.constant 3 : i32
      %86 = arith.addi %85, %c3_i32_67 : i32
      %c0_68 = arith.constant 0 : index
      %87 = arith.index_cast %86 : i32 to index
      %c0_69 = arith.constant 0 : index
      %88 = vector.load %arg1[%c0_68, %87, %c0_69] : memref<1x420x32xf32, #tpu.memory_space<vmem>>, vector<1x80x32xf32>
      %89 = vector.shape_cast %88 : vector<1x80x32xf32> to vector<80x32xf32>
      %c8 = arith.constant 8 : index
      %c0_70 = arith.constant 0 : index
      %c0_71 = arith.constant 0 : index
      %90 = vector.load %arg2[%c8, %c0_70, %c0_71] : memref<25x32x32xf32, #tpu.memory_space<vmem>>, vector<1x32x32xf32>
      %91 = vector.shape_cast %90 : vector<1x32x32xf32> to vector<32x32xf32>
      %cst_72 = arith.constant dense<0.000000e+00> : vector<80x32xf32>
      %92 = tpu.matmul %89, %91, %cst_72 {dimension_numbers = #tpu.dot_dimension_numbers<[1], [0], [0], [1], [0, 0, 1, 1], [], []>} : vector<80x32xf32>, vector<32x32xf32>, vector<80x32xf32> -> vector<80x32xf32>
      %93 = arith.addf %83, %92 : vector<80x32xf32>
      %c1_i32_73 = arith.constant 1 : i32
      %94 = arith.addi %2, %c1_i32_73 : i32
      %c20_i32_74 = arith.constant 20 : i32
      %95 = arith.muli %94, %c20_i32_74 : i32
      %c4_i32_75 = arith.constant 4 : i32
      %96 = arith.addi %95, %c4_i32_75 : i32
      %c0_76 = arith.constant 0 : index
      %97 = arith.index_cast %96 : i32 to index
      %c0_77 = arith.constant 0 : index
      %98 = vector.load %arg1[%c0_76, %97, %c0_77] : memref<1x420x32xf32, #tpu.memory_space<vmem>>, vector<1x80x32xf32>
      %99 = vector.shape_cast %98 : vector<1x80x32xf32> to vector<80x32xf32>
      %c9 = arith.constant 9 : index
      %c0_78 = arith.constant 0 : index
      %c0_79 = arith.constant 0 : index
      %100 = vector.load %arg2[%c9, %c0_78, %c0_79] : memref<25x32x32xf32, #tpu.memory_space<vmem>>, vector<1x32x32xf32>
      %101 = vector.shape_cast %100 : vector<1x32x32xf32> to vector<32x32xf32>
      %cst_80 = arith.constant dense<0.000000e+00> : vector<80x32xf32>
      %102 = tpu.matmul %99, %101, %cst_80 {dimension_numbers = #tpu.dot_dimension_numbers<[1], [0], [0], [1], [0, 0, 1, 1], [], []>} : vector<80x32xf32>, vector<32x32xf32>, vector<80x32xf32> -> vector<80x32xf32>
      %103 = arith.addf %93, %102 : vector<80x32xf32>
      %c2_i32_81 = arith.constant 2 : i32
      %104 = arith.addi %2, %c2_i32_81 : i32
      %c20_i32_82 = arith.constant 20 : i32
      %105 = arith.muli %104, %c20_i32_82 : i32
      %c0_i32_83 = arith.constant 0 : i32
      %106 = arith.addi %105, %c0_i32_83 : i32
      %c0_84 = arith.constant 0 : index
      %107 = arith.index_cast %106 : i32 to index
      %c0_85 = arith.constant 0 : index
      %108 = vector.load %arg1[%c0_84, %107, %c0_85] : memref<1x420x32xf32, #tpu.memory_space<vmem>>, vector<1x80x32xf32>
      %109 = vector.shape_cast %108 : vector<1x80x32xf32> to vector<80x32xf32>
      %c10 = arith.constant 10 : index
      %c0_86 = arith.constant 0 : index
      %c0_87 = arith.constant 0 : index
      %110 = vector.load %arg2[%c10, %c0_86, %c0_87] : memref<25x32x32xf32, #tpu.memory_space<vmem>>, vector<1x32x32xf32>
      %111 = vector.shape_cast %110 : vector<1x32x32xf32> to vector<32x32xf32>
      %cst_88 = arith.constant dense<0.000000e+00> : vector<80x32xf32>
      %112 = tpu.matmul %109, %111, %cst_88 {dimension_numbers = #tpu.dot_dimension_numbers<[1], [0], [0], [1], [0, 0, 1, 1], [], []>} : vector<80x32xf32>, vector<32x32xf32>, vector<80x32xf32> -> vector<80x32xf32>
      %113 = arith.addf %103, %112 : vector<80x32xf32>
      %c2_i32_89 = arith.constant 2 : i32
      %114 = arith.addi %2, %c2_i32_89 : i32
      %c20_i32_90 = arith.constant 20 : i32
      %115 = arith.muli %114, %c20_i32_90 : i32
      %c1_i32_91 = arith.constant 1 : i32
      %116 = arith.addi %115, %c1_i32_91 : i32
      %c0_92 = arith.constant 0 : index
      %117 = arith.index_cast %116 : i32 to index
      %c0_93 = arith.constant 0 : index
      %118 = vector.load %arg1[%c0_92, %117, %c0_93] : memref<1x420x32xf32, #tpu.memory_space<vmem>>, vector<1x80x32xf32>
      %119 = vector.shape_cast %118 : vector<1x80x32xf32> to vector<80x32xf32>
      %c11 = arith.constant 11 : index
      %c0_94 = arith.constant 0 : index
      %c0_95 = arith.constant 0 : index
      %120 = vector.load %arg2[%c11, %c0_94, %c0_95] : memref<25x32x32xf32, #tpu.memory_space<vmem>>, vector<1x32x32xf32>
      %121 = vector.shape_cast %120 : vector<1x32x32xf32> to vector<32x32xf32>
      %cst_96 = arith.constant dense<0.000000e+00> : vector<80x32xf32>
      %122 = tpu.matmul %119, %121, %cst_96 {dimension_numbers = #tpu.dot_dimension_numbers<[1], [0], [0], [1], [0, 0, 1, 1], [], []>} : vector<80x32xf32>, vector<32x32xf32>, vector<80x32xf32> -> vector<80x32xf32>
      %123 = arith.addf %113, %122 : vector<80x32xf32>
      %c2_i32_97 = arith.constant 2 : i32
      %124 = arith.addi %2, %c2_i32_97 : i32
      %c20_i32_98 = arith.constant 20 : i32
      %125 = arith.muli %124, %c20_i32_98 : i32
      %c2_i32_99 = arith.constant 2 : i32
      %126 = arith.addi %125, %c2_i32_99 : i32
      %c0_100 = arith.constant 0 : index
      %127 = arith.index_cast %126 : i32 to index
      %c0_101 = arith.constant 0 : index
      %128 = vector.load %arg1[%c0_100, %127, %c0_101] : memref<1x420x32xf32, #tpu.memory_space<vmem>>, vector<1x80x32xf32>
      %129 = vector.shape_cast %128 : vector<1x80x32xf32> to vector<80x32xf32>
      %c12 = arith.constant 12 : index
      %c0_102 = arith.constant 0 : index
      %c0_103 = arith.constant 0 : index
      %130 = vector.load %arg2[%c12, %c0_102, %c0_103] : memref<25x32x32xf32, #tpu.memory_space<vmem>>, vector<1x32x32xf32>
      %131 = vector.shape_cast %130 : vector<1x32x32xf32> to vector<32x32xf32>
      %cst_104 = arith.constant dense<0.000000e+00> : vector<80x32xf32>
      %132 = tpu.matmul %129, %131, %cst_104 {dimension_numbers = #tpu.dot_dimension_numbers<[1], [0], [0], [1], [0, 0, 1, 1], [], []>} : vector<80x32xf32>, vector<32x32xf32>, vector<80x32xf32> -> vector<80x32xf32>
      %133 = arith.addf %123, %132 : vector<80x32xf32>
      %c2_i32_105 = arith.constant 2 : i32
      %134 = arith.addi %2, %c2_i32_105 : i32
      %c20_i32_106 = arith.constant 20 : i32
      %135 = arith.muli %134, %c20_i32_106 : i32
      %c3_i32_107 = arith.constant 3 : i32
      %136 = arith.addi %135, %c3_i32_107 : i32
      %c0_108 = arith.constant 0 : index
      %137 = arith.index_cast %136 : i32 to index
      %c0_109 = arith.constant 0 : index
      %138 = vector.load %arg1[%c0_108, %137, %c0_109] : memref<1x420x32xf32, #tpu.memory_space<vmem>>, vector<1x80x32xf32>
      %139 = vector.shape_cast %138 : vector<1x80x32xf32> to vector<80x32xf32>
      %c13 = arith.constant 13 : index
      %c0_110 = arith.constant 0 : index
      %c0_111 = arith.constant 0 : index
      %140 = vector.load %arg2[%c13, %c0_110, %c0_111] : memref<25x32x32xf32, #tpu.memory_space<vmem>>, vector<1x32x32xf32>
      %141 = vector.shape_cast %140 : vector<1x32x32xf32> to vector<32x32xf32>
      %cst_112 = arith.constant dense<0.000000e+00> : vector<80x32xf32>
      %142 = tpu.matmul %139, %141, %cst_112 {dimension_numbers = #tpu.dot_dimension_numbers<[1], [0], [0], [1], [0, 0, 1, 1], [], []>} : vector<80x32xf32>, vector<32x32xf32>, vector<80x32xf32> -> vector<80x32xf32>
      %143 = arith.addf %133, %142 : vector<80x32xf32>
      %c2_i32_113 = arith.constant 2 : i32
      %144 = arith.addi %2, %c2_i32_113 : i32
      %c20_i32_114 = arith.constant 20 : i32
      %145 = arith.muli %144, %c20_i32_114 : i32
      %c4_i32_115 = arith.constant 4 : i32
      %146 = arith.addi %145, %c4_i32_115 : i32
      %c0_116 = arith.constant 0 : index
      %147 = arith.index_cast %146 : i32 to index
      %c0_117 = arith.constant 0 : index
      %148 = vector.load %arg1[%c0_116, %147, %c0_117] : memref<1x420x32xf32, #tpu.memory_space<vmem>>, vector<1x80x32xf32>
      %149 = vector.shape_cast %148 : vector<1x80x32xf32> to vector<80x32xf32>
      %c14 = arith.constant 14 : index
      %c0_118 = arith.constant 0 : index
      %c0_119 = arith.constant 0 : index
      %150 = vector.load %arg2[%c14, %c0_118, %c0_119] : memref<25x32x32xf32, #tpu.memory_space<vmem>>, vector<1x32x32xf32>
      %151 = vector.shape_cast %150 : vector<1x32x32xf32> to vector<32x32xf32>
      %cst_120 = arith.constant dense<0.000000e+00> : vector<80x32xf32>
      %152 = tpu.matmul %149, %151, %cst_120 {dimension_numbers = #tpu.dot_dimension_numbers<[1], [0], [0], [1], [0, 0, 1, 1], [], []>} : vector<80x32xf32>, vector<32x32xf32>, vector<80x32xf32> -> vector<80x32xf32>
      %153 = arith.addf %143, %152 : vector<80x32xf32>
      %c3_i32_121 = arith.constant 3 : i32
      %154 = arith.addi %2, %c3_i32_121 : i32
      %c20_i32_122 = arith.constant 20 : i32
      %155 = arith.muli %154, %c20_i32_122 : i32
      %c0_i32_123 = arith.constant 0 : i32
      %156 = arith.addi %155, %c0_i32_123 : i32
      %c0_124 = arith.constant 0 : index
      %157 = arith.index_cast %156 : i32 to index
      %c0_125 = arith.constant 0 : index
      %158 = vector.load %arg1[%c0_124, %157, %c0_125] : memref<1x420x32xf32, #tpu.memory_space<vmem>>, vector<1x80x32xf32>
      %159 = vector.shape_cast %158 : vector<1x80x32xf32> to vector<80x32xf32>
      %c15 = arith.constant 15 : index
      %c0_126 = arith.constant 0 : index
      %c0_127 = arith.constant 0 : index
      %160 = vector.load %arg2[%c15, %c0_126, %c0_127] : memref<25x32x32xf32, #tpu.memory_space<vmem>>, vector<1x32x32xf32>
      %161 = vector.shape_cast %160 : vector<1x32x32xf32> to vector<32x32xf32>
      %cst_128 = arith.constant dense<0.000000e+00> : vector<80x32xf32>
      %162 = tpu.matmul %159, %161, %cst_128 {dimension_numbers = #tpu.dot_dimension_numbers<[1], [0], [0], [1], [0, 0, 1, 1], [], []>} : vector<80x32xf32>, vector<32x32xf32>, vector<80x32xf32> -> vector<80x32xf32>
      %163 = arith.addf %153, %162 : vector<80x32xf32>
      %c3_i32_129 = arith.constant 3 : i32
      %164 = arith.addi %2, %c3_i32_129 : i32
      %c20_i32_130 = arith.constant 20 : i32
      %165 = arith.muli %164, %c20_i32_130 : i32
      %c1_i32_131 = arith.constant 1 : i32
      %166 = arith.addi %165, %c1_i32_131 : i32
      %c0_132 = arith.constant 0 : index
      %167 = arith.index_cast %166 : i32 to index
      %c0_133 = arith.constant 0 : index
      %168 = vector.load %arg1[%c0_132, %167, %c0_133] : memref<1x420x32xf32, #tpu.memory_space<vmem>>, vector<1x80x32xf32>
      %169 = vector.shape_cast %168 : vector<1x80x32xf32> to vector<80x32xf32>
      %c16 = arith.constant 16 : index
      %c0_134 = arith.constant 0 : index
      %c0_135 = arith.constant 0 : index
      %170 = vector.load %arg2[%c16, %c0_134, %c0_135] : memref<25x32x32xf32, #tpu.memory_space<vmem>>, vector<1x32x32xf32>
      %171 = vector.shape_cast %170 : vector<1x32x32xf32> to vector<32x32xf32>
      %cst_136 = arith.constant dense<0.000000e+00> : vector<80x32xf32>
      %172 = tpu.matmul %169, %171, %cst_136 {dimension_numbers = #tpu.dot_dimension_numbers<[1], [0], [0], [1], [0, 0, 1, 1], [], []>} : vector<80x32xf32>, vector<32x32xf32>, vector<80x32xf32> -> vector<80x32xf32>
      %173 = arith.addf %163, %172 : vector<80x32xf32>
      %c3_i32_137 = arith.constant 3 : i32
      %174 = arith.addi %2, %c3_i32_137 : i32
      %c20_i32_138 = arith.constant 20 : i32
      %175 = arith.muli %174, %c20_i32_138 : i32
      %c2_i32_139 = arith.constant 2 : i32
      %176 = arith.addi %175, %c2_i32_139 : i32
      %c0_140 = arith.constant 0 : index
      %177 = arith.index_cast %176 : i32 to index
      %c0_141 = arith.constant 0 : index
      %178 = vector.load %arg1[%c0_140, %177, %c0_141] : memref<1x420x32xf32, #tpu.memory_space<vmem>>, vector<1x80x32xf32>
      %179 = vector.shape_cast %178 : vector<1x80x32xf32> to vector<80x32xf32>
      %c17 = arith.constant 17 : index
      %c0_142 = arith.constant 0 : index
      %c0_143 = arith.constant 0 : index
      %180 = vector.load %arg2[%c17, %c0_142, %c0_143] : memref<25x32x32xf32, #tpu.memory_space<vmem>>, vector<1x32x32xf32>
      %181 = vector.shape_cast %180 : vector<1x32x32xf32> to vector<32x32xf32>
      %cst_144 = arith.constant dense<0.000000e+00> : vector<80x32xf32>
      %182 = tpu.matmul %179, %181, %cst_144 {dimension_numbers = #tpu.dot_dimension_numbers<[1], [0], [0], [1], [0, 0, 1, 1], [], []>} : vector<80x32xf32>, vector<32x32xf32>, vector<80x32xf32> -> vector<80x32xf32>
      %183 = arith.addf %173, %182 : vector<80x32xf32>
      %c3_i32_145 = arith.constant 3 : i32
      %184 = arith.addi %2, %c3_i32_145 : i32
      %c20_i32_146 = arith.constant 20 : i32
      %185 = arith.muli %184, %c20_i32_146 : i32
      %c3_i32_147 = arith.constant 3 : i32
      %186 = arith.addi %185, %c3_i32_147 : i32
      %c0_148 = arith.constant 0 : index
      %187 = arith.index_cast %186 : i32 to index
      %c0_149 = arith.constant 0 : index
      %188 = vector.load %arg1[%c0_148, %187, %c0_149] : memref<1x420x32xf32, #tpu.memory_space<vmem>>, vector<1x80x32xf32>
      %189 = vector.shape_cast %188 : vector<1x80x32xf32> to vector<80x32xf32>
      %c18 = arith.constant 18 : index
      %c0_150 = arith.constant 0 : index
      %c0_151 = arith.constant 0 : index
      %190 = vector.load %arg2[%c18, %c0_150, %c0_151] : memref<25x32x32xf32, #tpu.memory_space<vmem>>, vector<1x32x32xf32>
      %191 = vector.shape_cast %190 : vector<1x32x32xf32> to vector<32x32xf32>
      %cst_152 = arith.constant dense<0.000000e+00> : vector<80x32xf32>
      %192 = tpu.matmul %189, %191, %cst_152 {dimension_numbers = #tpu.dot_dimension_numbers<[1], [0], [0], [1], [0, 0, 1, 1], [], []>} : vector<80x32xf32>, vector<32x32xf32>, vector<80x32xf32> -> vector<80x32xf32>
      %193 = arith.addf %183, %192 : vector<80x32xf32>
      %c3_i32_153 = arith.constant 3 : i32
      %194 = arith.addi %2, %c3_i32_153 : i32
      %c20_i32_154 = arith.constant 20 : i32
      %195 = arith.muli %194, %c20_i32_154 : i32
      %c4_i32_155 = arith.constant 4 : i32
      %196 = arith.addi %195, %c4_i32_155 : i32
      %c0_156 = arith.constant 0 : index
      %197 = arith.index_cast %196 : i32 to index
      %c0_157 = arith.constant 0 : index
      %198 = vector.load %arg1[%c0_156, %197, %c0_157] : memref<1x420x32xf32, #tpu.memory_space<vmem>>, vector<1x80x32xf32>
      %199 = vector.shape_cast %198 : vector<1x80x32xf32> to vector<80x32xf32>
      %c19 = arith.constant 19 : index
      %c0_158 = arith.constant 0 : index
      %c0_159 = arith.constant 0 : index
      %200 = vector.load %arg2[%c19, %c0_158, %c0_159] : memref<25x32x32xf32, #tpu.memory_space<vmem>>, vector<1x32x32xf32>
      %201 = vector.shape_cast %200 : vector<1x32x32xf32> to vector<32x32xf32>
      %cst_160 = arith.constant dense<0.000000e+00> : vector<80x32xf32>
      %202 = tpu.matmul %199, %201, %cst_160 {dimension_numbers = #tpu.dot_dimension_numbers<[1], [0], [0], [1], [0, 0, 1, 1], [], []>} : vector<80x32xf32>, vector<32x32xf32>, vector<80x32xf32> -> vector<80x32xf32>
      %203 = arith.addf %193, %202 : vector<80x32xf32>
      %c4_i32_161 = arith.constant 4 : i32
      %204 = arith.addi %2, %c4_i32_161 : i32
      %c20_i32_162 = arith.constant 20 : i32
      %205 = arith.muli %204, %c20_i32_162 : i32
      %c0_i32_163 = arith.constant 0 : i32
      %206 = arith.addi %205, %c0_i32_163 : i32
      %c0_164 = arith.constant 0 : index
      %207 = arith.index_cast %206 : i32 to index
      %c0_165 = arith.constant 0 : index
      %208 = vector.load %arg1[%c0_164, %207, %c0_165] : memref<1x420x32xf32, #tpu.memory_space<vmem>>, vector<1x80x32xf32>
      %209 = vector.shape_cast %208 : vector<1x80x32xf32> to vector<80x32xf32>
      %c20 = arith.constant 20 : index
      %c0_166 = arith.constant 0 : index
      %c0_167 = arith.constant 0 : index
      %210 = vector.load %arg2[%c20, %c0_166, %c0_167] : memref<25x32x32xf32, #tpu.memory_space<vmem>>, vector<1x32x32xf32>
      %211 = vector.shape_cast %210 : vector<1x32x32xf32> to vector<32x32xf32>
      %cst_168 = arith.constant dense<0.000000e+00> : vector<80x32xf32>
      %212 = tpu.matmul %209, %211, %cst_168 {dimension_numbers = #tpu.dot_dimension_numbers<[1], [0], [0], [1], [0, 0, 1, 1], [], []>} : vector<80x32xf32>, vector<32x32xf32>, vector<80x32xf32> -> vector<80x32xf32>
      %213 = arith.addf %203, %212 : vector<80x32xf32>
      %c4_i32_169 = arith.constant 4 : i32
      %214 = arith.addi %2, %c4_i32_169 : i32
      %c20_i32_170 = arith.constant 20 : i32
      %215 = arith.muli %214, %c20_i32_170 : i32
      %c1_i32_171 = arith.constant 1 : i32
      %216 = arith.addi %215, %c1_i32_171 : i32
      %c0_172 = arith.constant 0 : index
      %217 = arith.index_cast %216 : i32 to index
      %c0_173 = arith.constant 0 : index
      %218 = vector.load %arg1[%c0_172, %217, %c0_173] : memref<1x420x32xf32, #tpu.memory_space<vmem>>, vector<1x80x32xf32>
      %219 = vector.shape_cast %218 : vector<1x80x32xf32> to vector<80x32xf32>
      %c21 = arith.constant 21 : index
      %c0_174 = arith.constant 0 : index
      %c0_175 = arith.constant 0 : index
      %220 = vector.load %arg2[%c21, %c0_174, %c0_175] : memref<25x32x32xf32, #tpu.memory_space<vmem>>, vector<1x32x32xf32>
      %221 = vector.shape_cast %220 : vector<1x32x32xf32> to vector<32x32xf32>
      %cst_176 = arith.constant dense<0.000000e+00> : vector<80x32xf32>
      %222 = tpu.matmul %219, %221, %cst_176 {dimension_numbers = #tpu.dot_dimension_numbers<[1], [0], [0], [1], [0, 0, 1, 1], [], []>} : vector<80x32xf32>, vector<32x32xf32>, vector<80x32xf32> -> vector<80x32xf32>
      %223 = arith.addf %213, %222 : vector<80x32xf32>
      %c4_i32_177 = arith.constant 4 : i32
      %224 = arith.addi %2, %c4_i32_177 : i32
      %c20_i32_178 = arith.constant 20 : i32
      %225 = arith.muli %224, %c20_i32_178 : i32
      %c2_i32_179 = arith.constant 2 : i32
      %226 = arith.addi %225, %c2_i32_179 : i32
      %c0_180 = arith.constant 0 : index
      %227 = arith.index_cast %226 : i32 to index
      %c0_181 = arith.constant 0 : index
      %228 = vector.load %arg1[%c0_180, %227, %c0_181] : memref<1x420x32xf32, #tpu.memory_space<vmem>>, vector<1x80x32xf32>
      %229 = vector.shape_cast %228 : vector<1x80x32xf32> to vector<80x32xf32>
      %c22 = arith.constant 22 : index
      %c0_182 = arith.constant 0 : index
      %c0_183 = arith.constant 0 : index
      %230 = vector.load %arg2[%c22, %c0_182, %c0_183] : memref<25x32x32xf32, #tpu.memory_space<vmem>>, vector<1x32x32xf32>
      %231 = vector.shape_cast %230 : vector<1x32x32xf32> to vector<32x32xf32>
      %cst_184 = arith.constant dense<0.000000e+00> : vector<80x32xf32>
      %232 = tpu.matmul %229, %231, %cst_184 {dimension_numbers = #tpu.dot_dimension_numbers<[1], [0], [0], [1], [0, 0, 1, 1], [], []>} : vector<80x32xf32>, vector<32x32xf32>, vector<80x32xf32> -> vector<80x32xf32>
      %233 = arith.addf %223, %232 : vector<80x32xf32>
      %c4_i32_185 = arith.constant 4 : i32
      %234 = arith.addi %2, %c4_i32_185 : i32
      %c20_i32_186 = arith.constant 20 : i32
      %235 = arith.muli %234, %c20_i32_186 : i32
      %c3_i32_187 = arith.constant 3 : i32
      %236 = arith.addi %235, %c3_i32_187 : i32
      %c0_188 = arith.constant 0 : index
      %237 = arith.index_cast %236 : i32 to index
      %c0_189 = arith.constant 0 : index
      %238 = vector.load %arg1[%c0_188, %237, %c0_189] : memref<1x420x32xf32, #tpu.memory_space<vmem>>, vector<1x80x32xf32>
      %239 = vector.shape_cast %238 : vector<1x80x32xf32> to vector<80x32xf32>
      %c23 = arith.constant 23 : index
      %c0_190 = arith.constant 0 : index
      %c0_191 = arith.constant 0 : index
      %240 = vector.load %arg2[%c23, %c0_190, %c0_191] : memref<25x32x32xf32, #tpu.memory_space<vmem>>, vector<1x32x32xf32>
      %241 = vector.shape_cast %240 : vector<1x32x32xf32> to vector<32x32xf32>
      %cst_192 = arith.constant dense<0.000000e+00> : vector<80x32xf32>
      %242 = tpu.matmul %239, %241, %cst_192 {dimension_numbers = #tpu.dot_dimension_numbers<[1], [0], [0], [1], [0, 0, 1, 1], [], []>} : vector<80x32xf32>, vector<32x32xf32>, vector<80x32xf32> -> vector<80x32xf32>
      %243 = arith.addf %233, %242 : vector<80x32xf32>
      %c4_i32_193 = arith.constant 4 : i32
      %244 = arith.addi %2, %c4_i32_193 : i32
      %c20_i32_194 = arith.constant 20 : i32
      %245 = arith.muli %244, %c20_i32_194 : i32
      %c4_i32_195 = arith.constant 4 : i32
      %246 = arith.addi %245, %c4_i32_195 : i32
      %c0_196 = arith.constant 0 : index
      %247 = arith.index_cast %246 : i32 to index
      %c0_197 = arith.constant 0 : index
      %248 = vector.load %arg1[%c0_196, %247, %c0_197] : memref<1x420x32xf32, #tpu.memory_space<vmem>>, vector<1x80x32xf32>
      %249 = vector.shape_cast %248 : vector<1x80x32xf32> to vector<80x32xf32>
      %c24 = arith.constant 24 : index
      %c0_198 = arith.constant 0 : index
      %c0_199 = arith.constant 0 : index
      %250 = vector.load %arg2[%c24, %c0_198, %c0_199] : memref<25x32x32xf32, #tpu.memory_space<vmem>>, vector<1x32x32xf32>
      %251 = vector.shape_cast %250 : vector<1x32x32xf32> to vector<32x32xf32>
      %cst_200 = arith.constant dense<0.000000e+00> : vector<80x32xf32>
      %252 = tpu.matmul %249, %251, %cst_200 {dimension_numbers = #tpu.dot_dimension_numbers<[1], [0], [0], [1], [0, 0, 1, 1], [], []>} : vector<80x32xf32>, vector<32x32xf32>, vector<80x32xf32> -> vector<80x32xf32>
      %253 = arith.addf %243, %252 : vector<80x32xf32>
      %c0_201 = arith.constant 0 : index
      %c0_202 = arith.constant 0 : index
      %254 = vector.load %arg5[%c0_201, %c0_202] : memref<80x32xf32, #tpu.memory_space<vmem>>, vector<80x32xf32>
      tpu.vector_store %arg5[%c0_201, %c0_202], %253 {strides = array<i32>} : memref<80x32xf32, #tpu.memory_space<vmem>>, vector<80x32xf32>,
      %c0_203 = arith.constant 0 : index
      %c0_204 = arith.constant 0 : index
      %255 = tpu.strided_load %arg5[%c0_203, %c0_204] {strides = array<i32: 2, 1>} : memref<80x32xf32, #tpu.memory_space<vmem>>, vector<8x32xf32>
      %c1_205 = arith.constant 1 : index
      %c0_206 = arith.constant 0 : index
      %256 = tpu.strided_load %arg5[%c1_205, %c0_206] {strides = array<i32: 2, 1>} : memref<80x32xf32, #tpu.memory_space<vmem>>, vector<8x32xf32>
      %c20_207 = arith.constant 20 : index
      %c0_208 = arith.constant 0 : index
      %257 = tpu.strided_load %arg5[%c20_207, %c0_208] {strides = array<i32: 2, 1>} : memref<80x32xf32, #tpu.memory_space<vmem>>, vector<8x32xf32>
      %c21_209 = arith.constant 21 : index
      %c0_210 = arith.constant 0 : index
      %258 = tpu.strided_load %arg5[%c21_209, %c0_210] {strides = array<i32: 2, 1>} : memref<80x32xf32, #tpu.memory_space<vmem>>, vector<8x32xf32>
      %259 = arith.maximumf %255, %256 : vector<8x32xf32>
      %260 = arith.maximumf %257, %258 : vector<8x32xf32>
      %261 = arith.maximumf %259, %260 : vector<8x32xf32>
      %262 = vector.broadcast %0 : vector<1x32xf32> to vector<8x32xf32>
      %263 = arith.addf %261, %262 : vector<8x32xf32>
      %c2_i32_211 = arith.constant 2 : i32
      %264 = arith.muli %arg6, %c2_i32_211 : i32
      %c0_i32_212 = arith.constant 0 : i32
      %265 = arith.addi %264, %c0_i32_212 : i32
      %c0_213 = arith.constant 0 : index
      %266 = arith.index_cast %265 : i32 to index
      %c0_214 = arith.constant 0 : index
      %c0_215 = arith.constant 0 : index
      %267 = vector.load %arg4[%c0_213, %266, %c0_214, %c0_215] : memref<1x8x8x32xf32, #tpu.memory_space<vmem>>, vector<1x1x8x32xf32>
      %268 = vector.shape_cast %267 : vector<1x1x8x32xf32> to vector<8x32xf32>
      %269 = vector.shape_cast %263 : vector<8x32xf32> to vector<1x1x8x32xf32>
      tpu.vector_store %arg4[%c0_213, %266, %c0_214, %c0_215], %269 {strides = array<i32>} : memref<1x8x8x32xf32, #tpu.memory_space<vmem>>, vector<1x1x8x32xf32>,
      %c40 = arith.constant 40 : index
      %c0_216 = arith.constant 0 : index
      %270 = tpu.strided_load %arg5[%c40, %c0_216] {strides = array<i32: 2, 1>} : memref<80x32xf32, #tpu.memory_space<vmem>>, vector<8x32xf32>
      %c41 = arith.constant 41 : index
      %c0_217 = arith.constant 0 : index
      %271 = tpu.strided_load %arg5[%c41, %c0_217] {strides = array<i32: 2, 1>} : memref<80x32xf32, #tpu.memory_space<vmem>>, vector<8x32xf32>
      %c60 = arith.constant 60 : index
      %c0_218 = arith.constant 0 : index
      %272 = tpu.strided_load %arg5[%c60, %c0_218] {strides = array<i32: 2, 1>} : memref<80x32xf32, #tpu.memory_space<vmem>>, vector<8x32xf32>
      %c61 = arith.constant 61 : index
      %c0_219 = arith.constant 0 : index
      %273 = tpu.strided_load %arg5[%c61, %c0_219] {strides = array<i32: 2, 1>} : memref<80x32xf32, #tpu.memory_space<vmem>>, vector<8x32xf32>
      %274 = arith.maximumf %270, %271 : vector<8x32xf32>
      %275 = arith.maximumf %272, %273 : vector<8x32xf32>
      %276 = arith.maximumf %274, %275 : vector<8x32xf32>
      %277 = vector.broadcast %0 : vector<1x32xf32> to vector<8x32xf32>
      %278 = arith.addf %276, %277 : vector<8x32xf32>
      %c2_i32_220 = arith.constant 2 : i32
      %279 = arith.muli %arg6, %c2_i32_220 : i32
      %c1_i32_221 = arith.constant 1 : i32
      %280 = arith.addi %279, %c1_i32_221 : i32
      %c0_222 = arith.constant 0 : index
      %281 = arith.index_cast %280 : i32 to index
      %c0_223 = arith.constant 0 : index
      %c0_224 = arith.constant 0 : index
      %282 = vector.load %arg4[%c0_222, %281, %c0_223, %c0_224] : memref<1x8x8x32xf32, #tpu.memory_space<vmem>>, vector<1x1x8x32xf32>
      %283 = vector.shape_cast %282 : vector<1x1x8x32xf32> to vector<8x32xf32>
      %284 = vector.shape_cast %278 : vector<8x32xf32> to vector<1x1x8x32xf32>
      tpu.vector_store %arg4[%c0_222, %281, %c0_223, %c0_224], %284 {strides = array<i32>} : memref<1x8x8x32xf32, #tpu.memory_space<vmem>>, vector<1x1x8x32xf32>,
    }
    %c4_i32_1 = arith.constant 4 : i32
    return
  }
  func.func @transform_0(%arg0: i32) -> (i32, i32, i32) {
    %c0_i32 = arith.constant 0 : i32
    %c0_i32_0 = arith.constant 0 : i32
    %c0_i32_1 = arith.constant 0 : i32
    return %arg0, %c0_i32, %c0_i32_0 : i32, i32, i32
  }
  func.func @transform_1(%arg0: i32) -> (i32, i32, i32) {
    %c0_i32 = arith.constant 0 : i32
    %c0_i32_0 = arith.constant 0 : i32
    %c0_i32_1 = arith.constant 0 : i32
    %c0_i32_2 = arith.constant 0 : i32
    return %c0_i32, %c0_i32_0, %c0_i32_1 : i32, i32, i32
  }
  func.func @transform_2(%arg0: i32) -> (i32, i32) {
    %c0_i32 = arith.constant 0 : i32
    %c0_i32_0 = arith.constant 0 : i32
    %c0_i32_1 = arith.constant 0 : i32
    return %c0_i32, %c0_i32_0 : i32, i32
  }
  func.func @transform_3(%arg0: i32) -> (i32, i32, i32, i32) {
    %c0_i32 = arith.constant 0 : i32
    %c0_i32_0 = arith.constant 0 : i32
    %c0_i32_1 = arith.constant 0 : i32
    %c0_i32_2 = arith.constant 0 : i32
    return %arg0, %c0_i32, %c0_i32_0, %c0_i32_1 : i32, i32, i32, i32
  }
}

module attributes {stable_mosaic.version = 11 : i64} {
  func.func @kernel(%arg0: i32, %arg1: memref<1x156x32xf32, #tpu.memory_space<vmem>>, %arg2: memref<25x32x64xf32, #tpu.memory_space<vmem>>, %arg3: memref<1x64xf32, #tpu.memory_space<vmem>>, %arg4: memref<1x4x4x64xf32, #tpu.memory_space<vmem>>, %arg5: memref<96x64xf32, #tpu.memory_space<vmem>>) attributes {dimension_semantics = [#tpu.dimension_semantics<parallel>], iteration_bounds = array<i64: 2>, scalar_prefetch = 0 : i64, scratch_operands = 1 : i64, tpu.core_type = #tpu.core_type<tc>, window_params = [{transform_indices = @transform_0, window_bounds = array<i64: 1, 156, 32>}, {pipeline_mode = #tpu.pipeline_mode<synchronous>, transform_indices = @transform_1, window_bounds = array<i64: 25, 32, 64>}, {pipeline_mode = #tpu.pipeline_mode<synchronous>, transform_indices = @transform_2, window_bounds = array<i64: 1, 64>}, {transform_indices = @transform_3, window_bounds = array<i64: 1, 4, 4, 64>}]} {
    %c0 = arith.constant 0 : index
    %c0_0 = arith.constant 0 : index
    %0 = vector.load %arg3[%c0, %c0_0] : memref<1x64xf32, #tpu.memory_space<vmem>>, vector<1x64xf32>
    %c0_i32 = arith.constant 0 : i32
    %c8_i32 = arith.constant 8 : i32
    %1 = arith.muli %c0_i32, %c8_i32 : i32
    %cst = arith.constant 0.000000e+00 : f32
    %2 = vector.broadcast %cst : f32 to vector<96x64xf32>
    %c0_i32_1 = arith.constant 0 : i32
    %3 = arith.addi %1, %c0_i32_1 : i32
    %c12_i32 = arith.constant 12 : i32
    %4 = arith.muli %3, %c12_i32 : i32
    %c0_i32_2 = arith.constant 0 : i32
    %5 = arith.addi %4, %c0_i32_2 : i32
    %c0_3 = arith.constant 0 : index
    %6 = arith.index_cast %5 : i32 to index
    %c0_4 = arith.constant 0 : index
    %7 = vector.load %arg1[%c0_3, %6, %c0_4] : memref<1x156x32xf32, #tpu.memory_space<vmem>>, vector<1x96x32xf32>
    %8 = vector.shape_cast %7 : vector<1x96x32xf32> to vector<96x32xf32>
    %c0_5 = arith.constant 0 : index
    %c0_6 = arith.constant 0 : index
    %c0_7 = arith.constant 0 : index
    %9 = vector.load %arg2[%c0_5, %c0_6, %c0_7] : memref<25x32x64xf32, #tpu.memory_space<vmem>>, vector<1x32x64xf32>
    %10 = vector.shape_cast %9 : vector<1x32x64xf32> to vector<32x64xf32>
    %cst_8 = arith.constant dense<0.000000e+00> : vector<96x64xf32>
    %11 = tpu.matmul %8, %10, %cst_8 {dimension_numbers = #tpu.dot_dimension_numbers<[1], [0], [0], [1], [0, 0, 1, 1], [], []>} : vector<96x32xf32>, vector<32x64xf32>, vector<96x64xf32> -> vector<96x64xf32>
    %12 = arith.addf %2, %11 : vector<96x64xf32>
    %c0_i32_9 = arith.constant 0 : i32
    %13 = arith.addi %1, %c0_i32_9 : i32
    %c12_i32_10 = arith.constant 12 : i32
    %14 = arith.muli %13, %c12_i32_10 : i32
    %c1_i32 = arith.constant 1 : i32
    %15 = arith.addi %14, %c1_i32 : i32
    %c0_11 = arith.constant 0 : index
    %16 = arith.index_cast %15 : i32 to index
    %c0_12 = arith.constant 0 : index
    %17 = vector.load %arg1[%c0_11, %16, %c0_12] : memref<1x156x32xf32, #tpu.memory_space<vmem>>, vector<1x96x32xf32>
    %18 = vector.shape_cast %17 : vector<1x96x32xf32> to vector<96x32xf32>
    %c1 = arith.constant 1 : index
    %c0_13 = arith.constant 0 : index
    %c0_14 = arith.constant 0 : index
    %19 = vector.load %arg2[%c1, %c0_13, %c0_14] : memref<25x32x64xf32, #tpu.memory_space<vmem>>, vector<1x32x64xf32>
    %20 = vector.shape_cast %19 : vector<1x32x64xf32> to vector<32x64xf32>
    %cst_15 = arith.constant dense<0.000000e+00> : vector<96x64xf32>
    %21 = tpu.matmul %18, %20, %cst_15 {dimension_numbers = #tpu.dot_dimension_numbers<[1], [0], [0], [1], [0, 0, 1, 1], [], []>} : vector<96x32xf32>, vector<32x64xf32>, vector<96x64xf32> -> vector<96x64xf32>
    %22 = arith.addf %12, %21 : vector<96x64xf32>
    %c0_i32_16 = arith.constant 0 : i32
    %23 = arith.addi %1, %c0_i32_16 : i32
    %c12_i32_17 = arith.constant 12 : i32
    %24 = arith.muli %23, %c12_i32_17 : i32
    %c2_i32 = arith.constant 2 : i32
    %25 = arith.addi %24, %c2_i32 : i32
    %c0_18 = arith.constant 0 : index
    %26 = arith.index_cast %25 : i32 to index
    %c0_19 = arith.constant 0 : index
    %27 = vector.load %arg1[%c0_18, %26, %c0_19] : memref<1x156x32xf32, #tpu.memory_space<vmem>>, vector<1x96x32xf32>
    %28 = vector.shape_cast %27 : vector<1x96x32xf32> to vector<96x32xf32>
    %c2 = arith.constant 2 : index
    %c0_20 = arith.constant 0 : index
    %c0_21 = arith.constant 0 : index
    %29 = vector.load %arg2[%c2, %c0_20, %c0_21] : memref<25x32x64xf32, #tpu.memory_space<vmem>>, vector<1x32x64xf32>
    %30 = vector.shape_cast %29 : vector<1x32x64xf32> to vector<32x64xf32>
    %cst_22 = arith.constant dense<0.000000e+00> : vector<96x64xf32>
    %31 = tpu.matmul %28, %30, %cst_22 {dimension_numbers = #tpu.dot_dimension_numbers<[1], [0], [0], [1], [0, 0, 1, 1], [], []>} : vector<96x32xf32>, vector<32x64xf32>, vector<96x64xf32> -> vector<96x64xf32>
    %32 = arith.addf %22, %31 : vector<96x64xf32>
    %c0_i32_23 = arith.constant 0 : i32
    %33 = arith.addi %1, %c0_i32_23 : i32
    %c12_i32_24 = arith.constant 12 : i32
    %34 = arith.muli %33, %c12_i32_24 : i32
    %c3_i32 = arith.constant 3 : i32
    %35 = arith.addi %34, %c3_i32 : i32
    %c0_25 = arith.constant 0 : index
    %36 = arith.index_cast %35 : i32 to index
    %c0_26 = arith.constant 0 : index
    %37 = vector.load %arg1[%c0_25, %36, %c0_26] : memref<1x156x32xf32, #tpu.memory_space<vmem>>, vector<1x96x32xf32>
    %38 = vector.shape_cast %37 : vector<1x96x32xf32> to vector<96x32xf32>
    %c3 = arith.constant 3 : index
    %c0_27 = arith.constant 0 : index
    %c0_28 = arith.constant 0 : index
    %39 = vector.load %arg2[%c3, %c0_27, %c0_28] : memref<25x32x64xf32, #tpu.memory_space<vmem>>, vector<1x32x64xf32>
    %40 = vector.shape_cast %39 : vector<1x32x64xf32> to vector<32x64xf32>
    %cst_29 = arith.constant dense<0.000000e+00> : vector<96x64xf32>
    %41 = tpu.matmul %38, %40, %cst_29 {dimension_numbers = #tpu.dot_dimension_numbers<[1], [0], [0], [1], [0, 0, 1, 1], [], []>} : vector<96x32xf32>, vector<32x64xf32>, vector<96x64xf32> -> vector<96x64xf32>
    %42 = arith.addf %32, %41 : vector<96x64xf32>
    %c0_i32_30 = arith.constant 0 : i32
    %43 = arith.addi %1, %c0_i32_30 : i32
    %c12_i32_31 = arith.constant 12 : i32
    %44 = arith.muli %43, %c12_i32_31 : i32
    %c4_i32 = arith.constant 4 : i32
    %45 = arith.addi %44, %c4_i32 : i32
    %c0_32 = arith.constant 0 : index
    %46 = arith.index_cast %45 : i32 to index
    %c0_33 = arith.constant 0 : index
    %47 = vector.load %arg1[%c0_32, %46, %c0_33] : memref<1x156x32xf32, #tpu.memory_space<vmem>>, vector<1x96x32xf32>
    %48 = vector.shape_cast %47 : vector<1x96x32xf32> to vector<96x32xf32>
    %c4 = arith.constant 4 : index
    %c0_34 = arith.constant 0 : index
    %c0_35 = arith.constant 0 : index
    %49 = vector.load %arg2[%c4, %c0_34, %c0_35] : memref<25x32x64xf32, #tpu.memory_space<vmem>>, vector<1x32x64xf32>
    %50 = vector.shape_cast %49 : vector<1x32x64xf32> to vector<32x64xf32>
    %cst_36 = arith.constant dense<0.000000e+00> : vector<96x64xf32>
    %51 = tpu.matmul %48, %50, %cst_36 {dimension_numbers = #tpu.dot_dimension_numbers<[1], [0], [0], [1], [0, 0, 1, 1], [], []>} : vector<96x32xf32>, vector<32x64xf32>, vector<96x64xf32> -> vector<96x64xf32>
    %52 = arith.addf %42, %51 : vector<96x64xf32>
    %c1_i32_37 = arith.constant 1 : i32
    %53 = arith.addi %1, %c1_i32_37 : i32
    %c12_i32_38 = arith.constant 12 : i32
    %54 = arith.muli %53, %c12_i32_38 : i32
    %c0_i32_39 = arith.constant 0 : i32
    %55 = arith.addi %54, %c0_i32_39 : i32
    %c0_40 = arith.constant 0 : index
    %56 = arith.index_cast %55 : i32 to index
    %c0_41 = arith.constant 0 : index
    %57 = vector.load %arg1[%c0_40, %56, %c0_41] : memref<1x156x32xf32, #tpu.memory_space<vmem>>, vector<1x96x32xf32>
    %58 = vector.shape_cast %57 : vector<1x96x32xf32> to vector<96x32xf32>
    %c5 = arith.constant 5 : index
    %c0_42 = arith.constant 0 : index
    %c0_43 = arith.constant 0 : index
    %59 = vector.load %arg2[%c5, %c0_42, %c0_43] : memref<25x32x64xf32, #tpu.memory_space<vmem>>, vector<1x32x64xf32>
    %60 = vector.shape_cast %59 : vector<1x32x64xf32> to vector<32x64xf32>
    %cst_44 = arith.constant dense<0.000000e+00> : vector<96x64xf32>
    %61 = tpu.matmul %58, %60, %cst_44 {dimension_numbers = #tpu.dot_dimension_numbers<[1], [0], [0], [1], [0, 0, 1, 1], [], []>} : vector<96x32xf32>, vector<32x64xf32>, vector<96x64xf32> -> vector<96x64xf32>
    %62 = arith.addf %52, %61 : vector<96x64xf32>
    %c1_i32_45 = arith.constant 1 : i32
    %63 = arith.addi %1, %c1_i32_45 : i32
    %c12_i32_46 = arith.constant 12 : i32
    %64 = arith.muli %63, %c12_i32_46 : i32
    %c1_i32_47 = arith.constant 1 : i32
    %65 = arith.addi %64, %c1_i32_47 : i32
    %c0_48 = arith.constant 0 : index
    %66 = arith.index_cast %65 : i32 to index
    %c0_49 = arith.constant 0 : index
    %67 = vector.load %arg1[%c0_48, %66, %c0_49] : memref<1x156x32xf32, #tpu.memory_space<vmem>>, vector<1x96x32xf32>
    %68 = vector.shape_cast %67 : vector<1x96x32xf32> to vector<96x32xf32>
    %c6 = arith.constant 6 : index
    %c0_50 = arith.constant 0 : index
    %c0_51 = arith.constant 0 : index
    %69 = vector.load %arg2[%c6, %c0_50, %c0_51] : memref<25x32x64xf32, #tpu.memory_space<vmem>>, vector<1x32x64xf32>
    %70 = vector.shape_cast %69 : vector<1x32x64xf32> to vector<32x64xf32>
    %cst_52 = arith.constant dense<0.000000e+00> : vector<96x64xf32>
    %71 = tpu.matmul %68, %70, %cst_52 {dimension_numbers = #tpu.dot_dimension_numbers<[1], [0], [0], [1], [0, 0, 1, 1], [], []>} : vector<96x32xf32>, vector<32x64xf32>, vector<96x64xf32> -> vector<96x64xf32>
    %72 = arith.addf %62, %71 : vector<96x64xf32>
    %c1_i32_53 = arith.constant 1 : i32
    %73 = arith.addi %1, %c1_i32_53 : i32
    %c12_i32_54 = arith.constant 12 : i32
    %74 = arith.muli %73, %c12_i32_54 : i32
    %c2_i32_55 = arith.constant 2 : i32
    %75 = arith.addi %74, %c2_i32_55 : i32
    %c0_56 = arith.constant 0 : index
    %76 = arith.index_cast %75 : i32 to index
    %c0_57 = arith.constant 0 : index
    %77 = vector.load %arg1[%c0_56, %76, %c0_57] : memref<1x156x32xf32, #tpu.memory_space<vmem>>, vector<1x96x32xf32>
    %78 = vector.shape_cast %77 : vector<1x96x32xf32> to vector<96x32xf32>
    %c7 = arith.constant 7 : index
    %c0_58 = arith.constant 0 : index
    %c0_59 = arith.constant 0 : index
    %79 = vector.load %arg2[%c7, %c0_58, %c0_59] : memref<25x32x64xf32, #tpu.memory_space<vmem>>, vector<1x32x64xf32>
    %80 = vector.shape_cast %79 : vector<1x32x64xf32> to vector<32x64xf32>
    %cst_60 = arith.constant dense<0.000000e+00> : vector<96x64xf32>
    %81 = tpu.matmul %78, %80, %cst_60 {dimension_numbers = #tpu.dot_dimension_numbers<[1], [0], [0], [1], [0, 0, 1, 1], [], []>} : vector<96x32xf32>, vector<32x64xf32>, vector<96x64xf32> -> vector<96x64xf32>
    %82 = arith.addf %72, %81 : vector<96x64xf32>
    %c1_i32_61 = arith.constant 1 : i32
    %83 = arith.addi %1, %c1_i32_61 : i32
    %c12_i32_62 = arith.constant 12 : i32
    %84 = arith.muli %83, %c12_i32_62 : i32
    %c3_i32_63 = arith.constant 3 : i32
    %85 = arith.addi %84, %c3_i32_63 : i32
    %c0_64 = arith.constant 0 : index
    %86 = arith.index_cast %85 : i32 to index
    %c0_65 = arith.constant 0 : index
    %87 = vector.load %arg1[%c0_64, %86, %c0_65] : memref<1x156x32xf32, #tpu.memory_space<vmem>>, vector<1x96x32xf32>
    %88 = vector.shape_cast %87 : vector<1x96x32xf32> to vector<96x32xf32>
    %c8 = arith.constant 8 : index
    %c0_66 = arith.constant 0 : index
    %c0_67 = arith.constant 0 : index
    %89 = vector.load %arg2[%c8, %c0_66, %c0_67] : memref<25x32x64xf32, #tpu.memory_space<vmem>>, vector<1x32x64xf32>
    %90 = vector.shape_cast %89 : vector<1x32x64xf32> to vector<32x64xf32>
    %cst_68 = arith.constant dense<0.000000e+00> : vector<96x64xf32>
    %91 = tpu.matmul %88, %90, %cst_68 {dimension_numbers = #tpu.dot_dimension_numbers<[1], [0], [0], [1], [0, 0, 1, 1], [], []>} : vector<96x32xf32>, vector<32x64xf32>, vector<96x64xf32> -> vector<96x64xf32>
    %92 = arith.addf %82, %91 : vector<96x64xf32>
    %c1_i32_69 = arith.constant 1 : i32
    %93 = arith.addi %1, %c1_i32_69 : i32
    %c12_i32_70 = arith.constant 12 : i32
    %94 = arith.muli %93, %c12_i32_70 : i32
    %c4_i32_71 = arith.constant 4 : i32
    %95 = arith.addi %94, %c4_i32_71 : i32
    %c0_72 = arith.constant 0 : index
    %96 = arith.index_cast %95 : i32 to index
    %c0_73 = arith.constant 0 : index
    %97 = vector.load %arg1[%c0_72, %96, %c0_73] : memref<1x156x32xf32, #tpu.memory_space<vmem>>, vector<1x96x32xf32>
    %98 = vector.shape_cast %97 : vector<1x96x32xf32> to vector<96x32xf32>
    %c9 = arith.constant 9 : index
    %c0_74 = arith.constant 0 : index
    %c0_75 = arith.constant 0 : index
    %99 = vector.load %arg2[%c9, %c0_74, %c0_75] : memref<25x32x64xf32, #tpu.memory_space<vmem>>, vector<1x32x64xf32>
    %100 = vector.shape_cast %99 : vector<1x32x64xf32> to vector<32x64xf32>
    %cst_76 = arith.constant dense<0.000000e+00> : vector<96x64xf32>
    %101 = tpu.matmul %98, %100, %cst_76 {dimension_numbers = #tpu.dot_dimension_numbers<[1], [0], [0], [1], [0, 0, 1, 1], [], []>} : vector<96x32xf32>, vector<32x64xf32>, vector<96x64xf32> -> vector<96x64xf32>
    %102 = arith.addf %92, %101 : vector<96x64xf32>
    %c2_i32_77 = arith.constant 2 : i32
    %103 = arith.addi %1, %c2_i32_77 : i32
    %c12_i32_78 = arith.constant 12 : i32
    %104 = arith.muli %103, %c12_i32_78 : i32
    %c0_i32_79 = arith.constant 0 : i32
    %105 = arith.addi %104, %c0_i32_79 : i32
    %c0_80 = arith.constant 0 : index
    %106 = arith.index_cast %105 : i32 to index
    %c0_81 = arith.constant 0 : index
    %107 = vector.load %arg1[%c0_80, %106, %c0_81] : memref<1x156x32xf32, #tpu.memory_space<vmem>>, vector<1x96x32xf32>
    %108 = vector.shape_cast %107 : vector<1x96x32xf32> to vector<96x32xf32>
    %c10 = arith.constant 10 : index
    %c0_82 = arith.constant 0 : index
    %c0_83 = arith.constant 0 : index
    %109 = vector.load %arg2[%c10, %c0_82, %c0_83] : memref<25x32x64xf32, #tpu.memory_space<vmem>>, vector<1x32x64xf32>
    %110 = vector.shape_cast %109 : vector<1x32x64xf32> to vector<32x64xf32>
    %cst_84 = arith.constant dense<0.000000e+00> : vector<96x64xf32>
    %111 = tpu.matmul %108, %110, %cst_84 {dimension_numbers = #tpu.dot_dimension_numbers<[1], [0], [0], [1], [0, 0, 1, 1], [], []>} : vector<96x32xf32>, vector<32x64xf32>, vector<96x64xf32> -> vector<96x64xf32>
    %112 = arith.addf %102, %111 : vector<96x64xf32>
    %c2_i32_85 = arith.constant 2 : i32
    %113 = arith.addi %1, %c2_i32_85 : i32
    %c12_i32_86 = arith.constant 12 : i32
    %114 = arith.muli %113, %c12_i32_86 : i32
    %c1_i32_87 = arith.constant 1 : i32
    %115 = arith.addi %114, %c1_i32_87 : i32
    %c0_88 = arith.constant 0 : index
    %116 = arith.index_cast %115 : i32 to index
    %c0_89 = arith.constant 0 : index
    %117 = vector.load %arg1[%c0_88, %116, %c0_89] : memref<1x156x32xf32, #tpu.memory_space<vmem>>, vector<1x96x32xf32>
    %118 = vector.shape_cast %117 : vector<1x96x32xf32> to vector<96x32xf32>
    %c11 = arith.constant 11 : index
    %c0_90 = arith.constant 0 : index
    %c0_91 = arith.constant 0 : index
    %119 = vector.load %arg2[%c11, %c0_90, %c0_91] : memref<25x32x64xf32, #tpu.memory_space<vmem>>, vector<1x32x64xf32>
    %120 = vector.shape_cast %119 : vector<1x32x64xf32> to vector<32x64xf32>
    %cst_92 = arith.constant dense<0.000000e+00> : vector<96x64xf32>
    %121 = tpu.matmul %118, %120, %cst_92 {dimension_numbers = #tpu.dot_dimension_numbers<[1], [0], [0], [1], [0, 0, 1, 1], [], []>} : vector<96x32xf32>, vector<32x64xf32>, vector<96x64xf32> -> vector<96x64xf32>
    %122 = arith.addf %112, %121 : vector<96x64xf32>
    %c2_i32_93 = arith.constant 2 : i32
    %123 = arith.addi %1, %c2_i32_93 : i32
    %c12_i32_94 = arith.constant 12 : i32
    %124 = arith.muli %123, %c12_i32_94 : i32
    %c2_i32_95 = arith.constant 2 : i32
    %125 = arith.addi %124, %c2_i32_95 : i32
    %c0_96 = arith.constant 0 : index
    %126 = arith.index_cast %125 : i32 to index
    %c0_97 = arith.constant 0 : index
    %127 = vector.load %arg1[%c0_96, %126, %c0_97] : memref<1x156x32xf32, #tpu.memory_space<vmem>>, vector<1x96x32xf32>
    %128 = vector.shape_cast %127 : vector<1x96x32xf32> to vector<96x32xf32>
    %c12 = arith.constant 12 : index
    %c0_98 = arith.constant 0 : index
    %c0_99 = arith.constant 0 : index
    %129 = vector.load %arg2[%c12, %c0_98, %c0_99] : memref<25x32x64xf32, #tpu.memory_space<vmem>>, vector<1x32x64xf32>
    %130 = vector.shape_cast %129 : vector<1x32x64xf32> to vector<32x64xf32>
    %cst_100 = arith.constant dense<0.000000e+00> : vector<96x64xf32>
    %131 = tpu.matmul %128, %130, %cst_100 {dimension_numbers = #tpu.dot_dimension_numbers<[1], [0], [0], [1], [0, 0, 1, 1], [], []>} : vector<96x32xf32>, vector<32x64xf32>, vector<96x64xf32> -> vector<96x64xf32>
    %132 = arith.addf %122, %131 : vector<96x64xf32>
    %c2_i32_101 = arith.constant 2 : i32
    %133 = arith.addi %1, %c2_i32_101 : i32
    %c12_i32_102 = arith.constant 12 : i32
    %134 = arith.muli %133, %c12_i32_102 : i32
    %c3_i32_103 = arith.constant 3 : i32
    %135 = arith.addi %134, %c3_i32_103 : i32
    %c0_104 = arith.constant 0 : index
    %136 = arith.index_cast %135 : i32 to index
    %c0_105 = arith.constant 0 : index
    %137 = vector.load %arg1[%c0_104, %136, %c0_105] : memref<1x156x32xf32, #tpu.memory_space<vmem>>, vector<1x96x32xf32>
    %138 = vector.shape_cast %137 : vector<1x96x32xf32> to vector<96x32xf32>
    %c13 = arith.constant 13 : index
    %c0_106 = arith.constant 0 : index
    %c0_107 = arith.constant 0 : index
    %139 = vector.load %arg2[%c13, %c0_106, %c0_107] : memref<25x32x64xf32, #tpu.memory_space<vmem>>, vector<1x32x64xf32>
    %140 = vector.shape_cast %139 : vector<1x32x64xf32> to vector<32x64xf32>
    %cst_108 = arith.constant dense<0.000000e+00> : vector<96x64xf32>
    %141 = tpu.matmul %138, %140, %cst_108 {dimension_numbers = #tpu.dot_dimension_numbers<[1], [0], [0], [1], [0, 0, 1, 1], [], []>} : vector<96x32xf32>, vector<32x64xf32>, vector<96x64xf32> -> vector<96x64xf32>
    %142 = arith.addf %132, %141 : vector<96x64xf32>
    %c2_i32_109 = arith.constant 2 : i32
    %143 = arith.addi %1, %c2_i32_109 : i32
    %c12_i32_110 = arith.constant 12 : i32
    %144 = arith.muli %143, %c12_i32_110 : i32
    %c4_i32_111 = arith.constant 4 : i32
    %145 = arith.addi %144, %c4_i32_111 : i32
    %c0_112 = arith.constant 0 : index
    %146 = arith.index_cast %145 : i32 to index
    %c0_113 = arith.constant 0 : index
    %147 = vector.load %arg1[%c0_112, %146, %c0_113] : memref<1x156x32xf32, #tpu.memory_space<vmem>>, vector<1x96x32xf32>
    %148 = vector.shape_cast %147 : vector<1x96x32xf32> to vector<96x32xf32>
    %c14 = arith.constant 14 : index
    %c0_114 = arith.constant 0 : index
    %c0_115 = arith.constant 0 : index
    %149 = vector.load %arg2[%c14, %c0_114, %c0_115] : memref<25x32x64xf32, #tpu.memory_space<vmem>>, vector<1x32x64xf32>
    %150 = vector.shape_cast %149 : vector<1x32x64xf32> to vector<32x64xf32>
    %cst_116 = arith.constant dense<0.000000e+00> : vector<96x64xf32>
    %151 = tpu.matmul %148, %150, %cst_116 {dimension_numbers = #tpu.dot_dimension_numbers<[1], [0], [0], [1], [0, 0, 1, 1], [], []>} : vector<96x32xf32>, vector<32x64xf32>, vector<96x64xf32> -> vector<96x64xf32>
    %152 = arith.addf %142, %151 : vector<96x64xf32>
    %c3_i32_117 = arith.constant 3 : i32
    %153 = arith.addi %1, %c3_i32_117 : i32
    %c12_i32_118 = arith.constant 12 : i32
    %154 = arith.muli %153, %c12_i32_118 : i32
    %c0_i32_119 = arith.constant 0 : i32
    %155 = arith.addi %154, %c0_i32_119 : i32
    %c0_120 = arith.constant 0 : index
    %156 = arith.index_cast %155 : i32 to index
    %c0_121 = arith.constant 0 : index
    %157 = vector.load %arg1[%c0_120, %156, %c0_121] : memref<1x156x32xf32, #tpu.memory_space<vmem>>, vector<1x96x32xf32>
    %158 = vector.shape_cast %157 : vector<1x96x32xf32> to vector<96x32xf32>
    %c15 = arith.constant 15 : index
    %c0_122 = arith.constant 0 : index
    %c0_123 = arith.constant 0 : index
    %159 = vector.load %arg2[%c15, %c0_122, %c0_123] : memref<25x32x64xf32, #tpu.memory_space<vmem>>, vector<1x32x64xf32>
    %160 = vector.shape_cast %159 : vector<1x32x64xf32> to vector<32x64xf32>
    %cst_124 = arith.constant dense<0.000000e+00> : vector<96x64xf32>
    %161 = tpu.matmul %158, %160, %cst_124 {dimension_numbers = #tpu.dot_dimension_numbers<[1], [0], [0], [1], [0, 0, 1, 1], [], []>} : vector<96x32xf32>, vector<32x64xf32>, vector<96x64xf32> -> vector<96x64xf32>
    %162 = arith.addf %152, %161 : vector<96x64xf32>
    %c3_i32_125 = arith.constant 3 : i32
    %163 = arith.addi %1, %c3_i32_125 : i32
    %c12_i32_126 = arith.constant 12 : i32
    %164 = arith.muli %163, %c12_i32_126 : i32
    %c1_i32_127 = arith.constant 1 : i32
    %165 = arith.addi %164, %c1_i32_127 : i32
    %c0_128 = arith.constant 0 : index
    %166 = arith.index_cast %165 : i32 to index
    %c0_129 = arith.constant 0 : index
    %167 = vector.load %arg1[%c0_128, %166, %c0_129] : memref<1x156x32xf32, #tpu.memory_space<vmem>>, vector<1x96x32xf32>
    %168 = vector.shape_cast %167 : vector<1x96x32xf32> to vector<96x32xf32>
    %c16 = arith.constant 16 : index
    %c0_130 = arith.constant 0 : index
    %c0_131 = arith.constant 0 : index
    %169 = vector.load %arg2[%c16, %c0_130, %c0_131] : memref<25x32x64xf32, #tpu.memory_space<vmem>>, vector<1x32x64xf32>
    %170 = vector.shape_cast %169 : vector<1x32x64xf32> to vector<32x64xf32>
    %cst_132 = arith.constant dense<0.000000e+00> : vector<96x64xf32>
    %171 = tpu.matmul %168, %170, %cst_132 {dimension_numbers = #tpu.dot_dimension_numbers<[1], [0], [0], [1], [0, 0, 1, 1], [], []>} : vector<96x32xf32>, vector<32x64xf32>, vector<96x64xf32> -> vector<96x64xf32>
    %172 = arith.addf %162, %171 : vector<96x64xf32>
    %c3_i32_133 = arith.constant 3 : i32
    %173 = arith.addi %1, %c3_i32_133 : i32
    %c12_i32_134 = arith.constant 12 : i32
    %174 = arith.muli %173, %c12_i32_134 : i32
    %c2_i32_135 = arith.constant 2 : i32
    %175 = arith.addi %174, %c2_i32_135 : i32
    %c0_136 = arith.constant 0 : index
    %176 = arith.index_cast %175 : i32 to index
    %c0_137 = arith.constant 0 : index
    %177 = vector.load %arg1[%c0_136, %176, %c0_137] : memref<1x156x32xf32, #tpu.memory_space<vmem>>, vector<1x96x32xf32>
    %178 = vector.shape_cast %177 : vector<1x96x32xf32> to vector<96x32xf32>
    %c17 = arith.constant 17 : index
    %c0_138 = arith.constant 0 : index
    %c0_139 = arith.constant 0 : index
    %179 = vector.load %arg2[%c17, %c0_138, %c0_139] : memref<25x32x64xf32, #tpu.memory_space<vmem>>, vector<1x32x64xf32>
    %180 = vector.shape_cast %179 : vector<1x32x64xf32> to vector<32x64xf32>
    %cst_140 = arith.constant dense<0.000000e+00> : vector<96x64xf32>
    %181 = tpu.matmul %178, %180, %cst_140 {dimension_numbers = #tpu.dot_dimension_numbers<[1], [0], [0], [1], [0, 0, 1, 1], [], []>} : vector<96x32xf32>, vector<32x64xf32>, vector<96x64xf32> -> vector<96x64xf32>
    %182 = arith.addf %172, %181 : vector<96x64xf32>
    %c3_i32_141 = arith.constant 3 : i32
    %183 = arith.addi %1, %c3_i32_141 : i32
    %c12_i32_142 = arith.constant 12 : i32
    %184 = arith.muli %183, %c12_i32_142 : i32
    %c3_i32_143 = arith.constant 3 : i32
    %185 = arith.addi %184, %c3_i32_143 : i32
    %c0_144 = arith.constant 0 : index
    %186 = arith.index_cast %185 : i32 to index
    %c0_145 = arith.constant 0 : index
    %187 = vector.load %arg1[%c0_144, %186, %c0_145] : memref<1x156x32xf32, #tpu.memory_space<vmem>>, vector<1x96x32xf32>
    %188 = vector.shape_cast %187 : vector<1x96x32xf32> to vector<96x32xf32>
    %c18 = arith.constant 18 : index
    %c0_146 = arith.constant 0 : index
    %c0_147 = arith.constant 0 : index
    %189 = vector.load %arg2[%c18, %c0_146, %c0_147] : memref<25x32x64xf32, #tpu.memory_space<vmem>>, vector<1x32x64xf32>
    %190 = vector.shape_cast %189 : vector<1x32x64xf32> to vector<32x64xf32>
    %cst_148 = arith.constant dense<0.000000e+00> : vector<96x64xf32>
    %191 = tpu.matmul %188, %190, %cst_148 {dimension_numbers = #tpu.dot_dimension_numbers<[1], [0], [0], [1], [0, 0, 1, 1], [], []>} : vector<96x32xf32>, vector<32x64xf32>, vector<96x64xf32> -> vector<96x64xf32>
    %192 = arith.addf %182, %191 : vector<96x64xf32>
    %c3_i32_149 = arith.constant 3 : i32
    %193 = arith.addi %1, %c3_i32_149 : i32
    %c12_i32_150 = arith.constant 12 : i32
    %194 = arith.muli %193, %c12_i32_150 : i32
    %c4_i32_151 = arith.constant 4 : i32
    %195 = arith.addi %194, %c4_i32_151 : i32
    %c0_152 = arith.constant 0 : index
    %196 = arith.index_cast %195 : i32 to index
    %c0_153 = arith.constant 0 : index
    %197 = vector.load %arg1[%c0_152, %196, %c0_153] : memref<1x156x32xf32, #tpu.memory_space<vmem>>, vector<1x96x32xf32>
    %198 = vector.shape_cast %197 : vector<1x96x32xf32> to vector<96x32xf32>
    %c19 = arith.constant 19 : index
    %c0_154 = arith.constant 0 : index
    %c0_155 = arith.constant 0 : index
    %199 = vector.load %arg2[%c19, %c0_154, %c0_155] : memref<25x32x64xf32, #tpu.memory_space<vmem>>, vector<1x32x64xf32>
    %200 = vector.shape_cast %199 : vector<1x32x64xf32> to vector<32x64xf32>
    %cst_156 = arith.constant dense<0.000000e+00> : vector<96x64xf32>
    %201 = tpu.matmul %198, %200, %cst_156 {dimension_numbers = #tpu.dot_dimension_numbers<[1], [0], [0], [1], [0, 0, 1, 1], [], []>} : vector<96x32xf32>, vector<32x64xf32>, vector<96x64xf32> -> vector<96x64xf32>
    %202 = arith.addf %192, %201 : vector<96x64xf32>
    %c4_i32_157 = arith.constant 4 : i32
    %203 = arith.addi %1, %c4_i32_157 : i32
    %c12_i32_158 = arith.constant 12 : i32
    %204 = arith.muli %203, %c12_i32_158 : i32
    %c0_i32_159 = arith.constant 0 : i32
    %205 = arith.addi %204, %c0_i32_159 : i32
    %c0_160 = arith.constant 0 : index
    %206 = arith.index_cast %205 : i32 to index
    %c0_161 = arith.constant 0 : index
    %207 = vector.load %arg1[%c0_160, %206, %c0_161] : memref<1x156x32xf32, #tpu.memory_space<vmem>>, vector<1x96x32xf32>
    %208 = vector.shape_cast %207 : vector<1x96x32xf32> to vector<96x32xf32>
    %c20 = arith.constant 20 : index
    %c0_162 = arith.constant 0 : index
    %c0_163 = arith.constant 0 : index
    %209 = vector.load %arg2[%c20, %c0_162, %c0_163] : memref<25x32x64xf32, #tpu.memory_space<vmem>>, vector<1x32x64xf32>
    %210 = vector.shape_cast %209 : vector<1x32x64xf32> to vector<32x64xf32>
    %cst_164 = arith.constant dense<0.000000e+00> : vector<96x64xf32>
    %211 = tpu.matmul %208, %210, %cst_164 {dimension_numbers = #tpu.dot_dimension_numbers<[1], [0], [0], [1], [0, 0, 1, 1], [], []>} : vector<96x32xf32>, vector<32x64xf32>, vector<96x64xf32> -> vector<96x64xf32>
    %212 = arith.addf %202, %211 : vector<96x64xf32>
    %c4_i32_165 = arith.constant 4 : i32
    %213 = arith.addi %1, %c4_i32_165 : i32
    %c12_i32_166 = arith.constant 12 : i32
    %214 = arith.muli %213, %c12_i32_166 : i32
    %c1_i32_167 = arith.constant 1 : i32
    %215 = arith.addi %214, %c1_i32_167 : i32
    %c0_168 = arith.constant 0 : index
    %216 = arith.index_cast %215 : i32 to index
    %c0_169 = arith.constant 0 : index
    %217 = vector.load %arg1[%c0_168, %216, %c0_169] : memref<1x156x32xf32, #tpu.memory_space<vmem>>, vector<1x96x32xf32>
    %218 = vector.shape_cast %217 : vector<1x96x32xf32> to vector<96x32xf32>
    %c21 = arith.constant 21 : index
    %c0_170 = arith.constant 0 : index
    %c0_171 = arith.constant 0 : index
    %219 = vector.load %arg2[%c21, %c0_170, %c0_171] : memref<25x32x64xf32, #tpu.memory_space<vmem>>, vector<1x32x64xf32>
    %220 = vector.shape_cast %219 : vector<1x32x64xf32> to vector<32x64xf32>
    %cst_172 = arith.constant dense<0.000000e+00> : vector<96x64xf32>
    %221 = tpu.matmul %218, %220, %cst_172 {dimension_numbers = #tpu.dot_dimension_numbers<[1], [0], [0], [1], [0, 0, 1, 1], [], []>} : vector<96x32xf32>, vector<32x64xf32>, vector<96x64xf32> -> vector<96x64xf32>
    %222 = arith.addf %212, %221 : vector<96x64xf32>
    %c4_i32_173 = arith.constant 4 : i32
    %223 = arith.addi %1, %c4_i32_173 : i32
    %c12_i32_174 = arith.constant 12 : i32
    %224 = arith.muli %223, %c12_i32_174 : i32
    %c2_i32_175 = arith.constant 2 : i32
    %225 = arith.addi %224, %c2_i32_175 : i32
    %c0_176 = arith.constant 0 : index
    %226 = arith.index_cast %225 : i32 to index
    %c0_177 = arith.constant 0 : index
    %227 = vector.load %arg1[%c0_176, %226, %c0_177] : memref<1x156x32xf32, #tpu.memory_space<vmem>>, vector<1x96x32xf32>
    %228 = vector.shape_cast %227 : vector<1x96x32xf32> to vector<96x32xf32>
    %c22 = arith.constant 22 : index
    %c0_178 = arith.constant 0 : index
    %c0_179 = arith.constant 0 : index
    %229 = vector.load %arg2[%c22, %c0_178, %c0_179] : memref<25x32x64xf32, #tpu.memory_space<vmem>>, vector<1x32x64xf32>
    %230 = vector.shape_cast %229 : vector<1x32x64xf32> to vector<32x64xf32>
    %cst_180 = arith.constant dense<0.000000e+00> : vector<96x64xf32>
    %231 = tpu.matmul %228, %230, %cst_180 {dimension_numbers = #tpu.dot_dimension_numbers<[1], [0], [0], [1], [0, 0, 1, 1], [], []>} : vector<96x32xf32>, vector<32x64xf32>, vector<96x64xf32> -> vector<96x64xf32>
    %232 = arith.addf %222, %231 : vector<96x64xf32>
    %c4_i32_181 = arith.constant 4 : i32
    %233 = arith.addi %1, %c4_i32_181 : i32
    %c12_i32_182 = arith.constant 12 : i32
    %234 = arith.muli %233, %c12_i32_182 : i32
    %c3_i32_183 = arith.constant 3 : i32
    %235 = arith.addi %234, %c3_i32_183 : i32
    %c0_184 = arith.constant 0 : index
    %236 = arith.index_cast %235 : i32 to index
    %c0_185 = arith.constant 0 : index
    %237 = vector.load %arg1[%c0_184, %236, %c0_185] : memref<1x156x32xf32, #tpu.memory_space<vmem>>, vector<1x96x32xf32>
    %238 = vector.shape_cast %237 : vector<1x96x32xf32> to vector<96x32xf32>
    %c23 = arith.constant 23 : index
    %c0_186 = arith.constant 0 : index
    %c0_187 = arith.constant 0 : index
    %239 = vector.load %arg2[%c23, %c0_186, %c0_187] : memref<25x32x64xf32, #tpu.memory_space<vmem>>, vector<1x32x64xf32>
    %240 = vector.shape_cast %239 : vector<1x32x64xf32> to vector<32x64xf32>
    %cst_188 = arith.constant dense<0.000000e+00> : vector<96x64xf32>
    %241 = tpu.matmul %238, %240, %cst_188 {dimension_numbers = #tpu.dot_dimension_numbers<[1], [0], [0], [1], [0, 0, 1, 1], [], []>} : vector<96x32xf32>, vector<32x64xf32>, vector<96x64xf32> -> vector<96x64xf32>
    %242 = arith.addf %232, %241 : vector<96x64xf32>
    %c4_i32_189 = arith.constant 4 : i32
    %243 = arith.addi %1, %c4_i32_189 : i32
    %c12_i32_190 = arith.constant 12 : i32
    %244 = arith.muli %243, %c12_i32_190 : i32
    %c4_i32_191 = arith.constant 4 : i32
    %245 = arith.addi %244, %c4_i32_191 : i32
    %c0_192 = arith.constant 0 : index
    %246 = arith.index_cast %245 : i32 to index
    %c0_193 = arith.constant 0 : index
    %247 = vector.load %arg1[%c0_192, %246, %c0_193] : memref<1x156x32xf32, #tpu.memory_space<vmem>>, vector<1x96x32xf32>
    %248 = vector.shape_cast %247 : vector<1x96x32xf32> to vector<96x32xf32>
    %c24 = arith.constant 24 : index
    %c0_194 = arith.constant 0 : index
    %c0_195 = arith.constant 0 : index
    %249 = vector.load %arg2[%c24, %c0_194, %c0_195] : memref<25x32x64xf32, #tpu.memory_space<vmem>>, vector<1x32x64xf32>
    %250 = vector.shape_cast %249 : vector<1x32x64xf32> to vector<32x64xf32>
    %cst_196 = arith.constant dense<0.000000e+00> : vector<96x64xf32>
    %251 = tpu.matmul %248, %250, %cst_196 {dimension_numbers = #tpu.dot_dimension_numbers<[1], [0], [0], [1], [0, 0, 1, 1], [], []>} : vector<96x32xf32>, vector<32x64xf32>, vector<96x64xf32> -> vector<96x64xf32>
    %252 = arith.addf %242, %251 : vector<96x64xf32>
    %c0_197 = arith.constant 0 : index
    %c0_198 = arith.constant 0 : index
    %253 = vector.load %arg5[%c0_197, %c0_198] : memref<96x64xf32, #tpu.memory_space<vmem>>, vector<96x64xf32>
    tpu.vector_store %arg5[%c0_197, %c0_198], %252 {strides = array<i32>} : memref<96x64xf32, #tpu.memory_space<vmem>>, vector<96x64xf32>,
    %c0_199 = arith.constant 0 : index
    %c0_200 = arith.constant 0 : index
    %254 = tpu.strided_load %arg5[%c0_199, %c0_200] {strides = array<i32: 2, 1>} : memref<96x64xf32, #tpu.memory_space<vmem>>, vector<4x64xf32>
    %c1_201 = arith.constant 1 : index
    %c0_202 = arith.constant 0 : index
    %255 = tpu.strided_load %arg5[%c1_201, %c0_202] {strides = array<i32: 2, 1>} : memref<96x64xf32, #tpu.memory_space<vmem>>, vector<4x64xf32>
    %c12_203 = arith.constant 12 : index
    %c0_204 = arith.constant 0 : index
    %256 = tpu.strided_load %arg5[%c12_203, %c0_204] {strides = array<i32: 2, 1>} : memref<96x64xf32, #tpu.memory_space<vmem>>, vector<4x64xf32>
    %c13_205 = arith.constant 13 : index
    %c0_206 = arith.constant 0 : index
    %257 = tpu.strided_load %arg5[%c13_205, %c0_206] {strides = array<i32: 2, 1>} : memref<96x64xf32, #tpu.memory_space<vmem>>, vector<4x64xf32>
    %258 = arith.maximumf %254, %255 : vector<4x64xf32>
    %259 = arith.maximumf %256, %257 : vector<4x64xf32>
    %260 = arith.maximumf %258, %259 : vector<4x64xf32>
    %261 = vector.broadcast %0 : vector<1x64xf32> to vector<4x64xf32>
    %262 = arith.addf %260, %261 : vector<4x64xf32>
    %c4_i32_207 = arith.constant 4 : i32
    %263 = arith.muli %c0_i32, %c4_i32_207 : i32
    %c0_i32_208 = arith.constant 0 : i32
    %264 = arith.addi %263, %c0_i32_208 : i32
    %c0_209 = arith.constant 0 : index
    %265 = arith.index_cast %264 : i32 to index
    %c0_210 = arith.constant 0 : index
    %c0_211 = arith.constant 0 : index
    %266 = vector.load %arg4[%c0_209, %265, %c0_210, %c0_211] : memref<1x4x4x64xf32, #tpu.memory_space<vmem>>, vector<1x1x4x64xf32>
    %267 = vector.shape_cast %266 : vector<1x1x4x64xf32> to vector<4x64xf32>
    %268 = vector.shape_cast %262 : vector<4x64xf32> to vector<1x1x4x64xf32>
    tpu.vector_store %arg4[%c0_209, %265, %c0_210, %c0_211], %268 {strides = array<i32>} : memref<1x4x4x64xf32, #tpu.memory_space<vmem>>, vector<1x1x4x64xf32>,
    %c24_212 = arith.constant 24 : index
    %c0_213 = arith.constant 0 : index
    %269 = tpu.strided_load %arg5[%c24_212, %c0_213] {strides = array<i32: 2, 1>} : memref<96x64xf32, #tpu.memory_space<vmem>>, vector<4x64xf32>
    %c25 = arith.constant 25 : index
    %c0_214 = arith.constant 0 : index
    %270 = tpu.strided_load %arg5[%c25, %c0_214] {strides = array<i32: 2, 1>} : memref<96x64xf32, #tpu.memory_space<vmem>>, vector<4x64xf32>
    %c36 = arith.constant 36 : index
    %c0_215 = arith.constant 0 : index
    %271 = tpu.strided_load %arg5[%c36, %c0_215] {strides = array<i32: 2, 1>} : memref<96x64xf32, #tpu.memory_space<vmem>>, vector<4x64xf32>
    %c37 = arith.constant 37 : index
    %c0_216 = arith.constant 0 : index
    %272 = tpu.strided_load %arg5[%c37, %c0_216] {strides = array<i32: 2, 1>} : memref<96x64xf32, #tpu.memory_space<vmem>>, vector<4x64xf32>
    %273 = arith.maximumf %269, %270 : vector<4x64xf32>
    %274 = arith.maximumf %271, %272 : vector<4x64xf32>
    %275 = arith.maximumf %273, %274 : vector<4x64xf32>
    %276 = vector.broadcast %0 : vector<1x64xf32> to vector<4x64xf32>
    %277 = arith.addf %275, %276 : vector<4x64xf32>
    %c4_i32_217 = arith.constant 4 : i32
    %278 = arith.muli %c0_i32, %c4_i32_217 : i32
    %c1_i32_218 = arith.constant 1 : i32
    %279 = arith.addi %278, %c1_i32_218 : i32
    %c0_219 = arith.constant 0 : index
    %280 = arith.index_cast %279 : i32 to index
    %c0_220 = arith.constant 0 : index
    %c0_221 = arith.constant 0 : index
    %281 = vector.load %arg4[%c0_219, %280, %c0_220, %c0_221] : memref<1x4x4x64xf32, #tpu.memory_space<vmem>>, vector<1x1x4x64xf32>
    %282 = vector.shape_cast %281 : vector<1x1x4x64xf32> to vector<4x64xf32>
    %283 = vector.shape_cast %277 : vector<4x64xf32> to vector<1x1x4x64xf32>
    tpu.vector_store %arg4[%c0_219, %280, %c0_220, %c0_221], %283 {strides = array<i32>} : memref<1x4x4x64xf32, #tpu.memory_space<vmem>>, vector<1x1x4x64xf32>,
    %c48 = arith.constant 48 : index
    %c0_222 = arith.constant 0 : index
    %284 = tpu.strided_load %arg5[%c48, %c0_222] {strides = array<i32: 2, 1>} : memref<96x64xf32, #tpu.memory_space<vmem>>, vector<4x64xf32>
    %c49 = arith.constant 49 : index
    %c0_223 = arith.constant 0 : index
    %285 = tpu.strided_load %arg5[%c49, %c0_223] {strides = array<i32: 2, 1>} : memref<96x64xf32, #tpu.memory_space<vmem>>, vector<4x64xf32>
    %c60 = arith.constant 60 : index
    %c0_224 = arith.constant 0 : index
    %286 = tpu.strided_load %arg5[%c60, %c0_224] {strides = array<i32: 2, 1>} : memref<96x64xf32, #tpu.memory_space<vmem>>, vector<4x64xf32>
    %c61 = arith.constant 61 : index
    %c0_225 = arith.constant 0 : index
    %287 = tpu.strided_load %arg5[%c61, %c0_225] {strides = array<i32: 2, 1>} : memref<96x64xf32, #tpu.memory_space<vmem>>, vector<4x64xf32>
    %288 = arith.maximumf %284, %285 : vector<4x64xf32>
    %289 = arith.maximumf %286, %287 : vector<4x64xf32>
    %290 = arith.maximumf %288, %289 : vector<4x64xf32>
    %291 = vector.broadcast %0 : vector<1x64xf32> to vector<4x64xf32>
    %292 = arith.addf %290, %291 : vector<4x64xf32>
    %c4_i32_226 = arith.constant 4 : i32
    %293 = arith.muli %c0_i32, %c4_i32_226 : i32
    %c2_i32_227 = arith.constant 2 : i32
    %294 = arith.addi %293, %c2_i32_227 : i32
    %c0_228 = arith.constant 0 : index
    %295 = arith.index_cast %294 : i32 to index
    %c0_229 = arith.constant 0 : index
    %c0_230 = arith.constant 0 : index
    %296 = vector.load %arg4[%c0_228, %295, %c0_229, %c0_230] : memref<1x4x4x64xf32, #tpu.memory_space<vmem>>, vector<1x1x4x64xf32>
    %297 = vector.shape_cast %296 : vector<1x1x4x64xf32> to vector<4x64xf32>
    %298 = vector.shape_cast %292 : vector<4x64xf32> to vector<1x1x4x64xf32>
    tpu.vector_store %arg4[%c0_228, %295, %c0_229, %c0_230], %298 {strides = array<i32>} : memref<1x4x4x64xf32, #tpu.memory_space<vmem>>, vector<1x1x4x64xf32>,
    %c72 = arith.constant 72 : index
    %c0_231 = arith.constant 0 : index
    %299 = tpu.strided_load %arg5[%c72, %c0_231] {strides = array<i32: 2, 1>} : memref<96x64xf32, #tpu.memory_space<vmem>>, vector<4x64xf32>
    %c73 = arith.constant 73 : index
    %c0_232 = arith.constant 0 : index
    %300 = tpu.strided_load %arg5[%c73, %c0_232] {strides = array<i32: 2, 1>} : memref<96x64xf32, #tpu.memory_space<vmem>>, vector<4x64xf32>
    %c84 = arith.constant 84 : index
    %c0_233 = arith.constant 0 : index
    %301 = tpu.strided_load %arg5[%c84, %c0_233] {strides = array<i32: 2, 1>} : memref<96x64xf32, #tpu.memory_space<vmem>>, vector<4x64xf32>
    %c85 = arith.constant 85 : index
    %c0_234 = arith.constant 0 : index
    %302 = tpu.strided_load %arg5[%c85, %c0_234] {strides = array<i32: 2, 1>} : memref<96x64xf32, #tpu.memory_space<vmem>>, vector<4x64xf32>
    %303 = arith.maximumf %299, %300 : vector<4x64xf32>
    %304 = arith.maximumf %301, %302 : vector<4x64xf32>
    %305 = arith.maximumf %303, %304 : vector<4x64xf32>
    %306 = vector.broadcast %0 : vector<1x64xf32> to vector<4x64xf32>
    %307 = arith.addf %305, %306 : vector<4x64xf32>
    %c4_i32_235 = arith.constant 4 : i32
    %308 = arith.muli %c0_i32, %c4_i32_235 : i32
    %c3_i32_236 = arith.constant 3 : i32
    %309 = arith.addi %308, %c3_i32_236 : i32
    %c0_237 = arith.constant 0 : index
    %310 = arith.index_cast %309 : i32 to index
    %c0_238 = arith.constant 0 : index
    %c0_239 = arith.constant 0 : index
    %311 = vector.load %arg4[%c0_237, %310, %c0_238, %c0_239] : memref<1x4x4x64xf32, #tpu.memory_space<vmem>>, vector<1x1x4x64xf32>
    %312 = vector.shape_cast %311 : vector<1x1x4x64xf32> to vector<4x64xf32>
    %313 = vector.shape_cast %307 : vector<4x64xf32> to vector<1x1x4x64xf32>
    tpu.vector_store %arg4[%c0_237, %310, %c0_238, %c0_239], %313 {strides = array<i32>} : memref<1x4x4x64xf32, #tpu.memory_space<vmem>>, vector<1x1x4x64xf32>,
    %c1_i32_240 = arith.constant 1 : i32
    return
  }
  func.func @transform_0(%arg0: i32) -> (i32, i32, i32) {
    %c0_i32 = arith.constant 0 : i32
    %c0_i32_0 = arith.constant 0 : i32
    %c0_i32_1 = arith.constant 0 : i32
    return %arg0, %c0_i32, %c0_i32_0 : i32, i32, i32
  }
  func.func @transform_1(%arg0: i32) -> (i32, i32, i32) {
    %c0_i32 = arith.constant 0 : i32
    %c0_i32_0 = arith.constant 0 : i32
    %c0_i32_1 = arith.constant 0 : i32
    %c0_i32_2 = arith.constant 0 : i32
    return %c0_i32, %c0_i32_0, %c0_i32_1 : i32, i32, i32
  }
  func.func @transform_2(%arg0: i32) -> (i32, i32) {
    %c0_i32 = arith.constant 0 : i32
    %c0_i32_0 = arith.constant 0 : i32
    %c0_i32_1 = arith.constant 0 : i32
    return %c0_i32, %c0_i32_0 : i32, i32
  }
  func.func @transform_3(%arg0: i32) -> (i32, i32, i32, i32) {
    %c0_i32 = arith.constant 0 : i32
    %c0_i32_0 = arith.constant 0 : i32
    %c0_i32_1 = arith.constant 0 : i32
    %c0_i32_2 = arith.constant 0 : i32
    return %arg0, %c0_i32, %c0_i32_0, %c0_i32_1 : i32, i32, i32, i32
  }
}

module attributes {stable_mosaic.version = 11 : i64} {
  func.func @_fc_kernel(%arg0: memref<8x1024xf32, #tpu.memory_space<vmem>>, %arg1: memref<1024x64xf32, #tpu.memory_space<vmem>>, %arg2: memref<1x64xf32, #tpu.memory_space<vmem>>, %arg3: memref<64x128xf32, #tpu.memory_space<vmem>>, %arg4: memref<1x128xf32, #tpu.memory_space<vmem>>, %arg5: memref<8x128xf32, #tpu.memory_space<vmem>>) attributes {dimension_semantics = [], scalar_prefetch = 0 : i64, scratch_operands = 0 : i64, tpu.core_type = #tpu.core_type<tc>} {
    %c0 = arith.constant 0 : index
    %c0_0 = arith.constant 0 : index
    %0 = vector.load %arg0[%c0, %c0_0] : memref<8x1024xf32, #tpu.memory_space<vmem>>, vector<8x1024xf32>
    %c0_1 = arith.constant 0 : index
    %c0_2 = arith.constant 0 : index
    %1 = vector.load %arg1[%c0_1, %c0_2] : memref<1024x64xf32, #tpu.memory_space<vmem>>, vector<1024x64xf32>
    %cst = arith.constant dense<0.000000e+00> : vector<8x64xf32>
    %2 = tpu.matmul %0, %1, %cst {dimension_numbers = #tpu.dot_dimension_numbers<[1], [0], [0], [1], [0, 0, 1, 1], [], []>} : vector<8x1024xf32>, vector<1024x64xf32>, vector<8x64xf32> -> vector<8x64xf32>
    %c0_3 = arith.constant 0 : index
    %c0_4 = arith.constant 0 : index
    %3 = vector.load %arg2[%c0_3, %c0_4] : memref<1x64xf32, #tpu.memory_space<vmem>>, vector<1x64xf32>
    %4 = vector.broadcast %3 : vector<1x64xf32> to vector<8x64xf32>
    %5 = arith.addf %2, %4 : vector<8x64xf32>
    %c0_5 = arith.constant 0 : index
    %c0_6 = arith.constant 0 : index
    %6 = vector.load %arg3[%c0_5, %c0_6] : memref<64x128xf32, #tpu.memory_space<vmem>>, vector<64x128xf32>
    %cst_7 = arith.constant dense<0.000000e+00> : vector<8x128xf32>
    %7 = tpu.matmul %5, %6, %cst_7 {dimension_numbers = #tpu.dot_dimension_numbers<[1], [0], [0], [1], [0, 0, 1, 1], [], []>} : vector<8x64xf32>, vector<64x128xf32>, vector<8x128xf32> -> vector<8x128xf32>
    %c0_8 = arith.constant 0 : index
    %c0_9 = arith.constant 0 : index
    %8 = vector.load %arg4[%c0_8, %c0_9] : memref<1x128xf32, #tpu.memory_space<vmem>>, vector<1x128xf32>
    %9 = vector.broadcast %8 : vector<1x128xf32> to vector<8x128xf32>
    %10 = arith.addf %7, %9 : vector<8x128xf32>
    %c0_10 = arith.constant 0 : index
    %c0_11 = arith.constant 0 : index
    %11 = vector.load %arg5[%c0_10, %c0_11] : memref<8x128xf32, #tpu.memory_space<vmem>>, vector<8x128xf32>
    tpu.vector_store %arg5[%c0_10, %c0_11], %10 {strides = array<i32>} : memref<8x128xf32, #tpu.memory_space<vmem>>, vector<8x128xf32>,
    return
  }
}

</mosaic_0001>

<bundles_post_ra>
// kernel: my_module_forward.4
= control target key start
LH: loop header
LB: loop body
LE: loop exit
PB: predicated region body
PF: predicated region fallthrough
CT: control target
= control target key end

     0   :  { %s3259_s12 = smov 0   ;;  %s4083_s0 = inlined_call_operand.vmem [shape: f32[2,1332,8], index: 0, kind: input, shape index: {}]   ;;  %s4084_s1 = inlined_call_operand.vmem [shape: f32[25,8,32], index: 1, kind: input, shape index: {}]   ;;  %s4085_s2 = inlined_call_operand.vmem [shape: f32[1,32], index: 2, kind: input, shape index: {}]   ;;  %s4086_s3 = inlined_call_operand.vmem [shape: f32[2,16,16,32], index: 3, kind: output, shape index: {}]  }
   0x1 LB: > { %s2686_s13 = sadd.s32 4294967295, %s3233_s12   ;;  %p2690_p0 = scmp.ge.s32.totalorder %s3233_s12, 1  ;;  %s3233_s12 = sphi %s3259_s12, %s13_s12  }
   0x2   : > { %p137_p1 = scmp.lt.s32.totalorder %s3233_s12, 3 }
   0x4   : > { %p138_p2 = pnand %p2690_p0, %p137_p1 }
   0x5   : > { %p161_p3 = scmp.lt.s32.totalorder (!%p138_p2), %s2686_s13, 1  ;;  %s3282_s24 = smov (!%p138_p2), 0  }
   0x6   : > { %141 = sbr.rel (%p138_p2) target bundleno = 621 (0x26d), region = 32 }
   0xb   : > { %v3270_v0 = vld [vmem:[%s4085_s2] sm:$0x1]  ;;  %s4088_s13 = smov (!%p161_p3, %s2686_s13), 1 }
   0xc   : > { %s3206_s16 = smul.u32 1336, %s4088_s13  ;;  %s3202_s17 = sshll.u32 %s4088_s13, 8 }
   0xd   : > { %s3275_s20 = scalar_lea.vmem %s4086_s3, %s3202_s17 }
   0xe   : > { %s3280_s23 = scalar_lea.vmem %s4083_s0, %s3206_s16 }
   0xf LB: >> { %v2703_v1 = vld [vmem:[%s4084_s1 + $0x8] sm:$0xff]  ;;  %v2731_v2 = vld [vmem:[%s4084_s1 + $0x10] sm:$0xff]  ;;  %v190_v3 = vld [vmem:[%s4084_s1] sm:$0xff]  ;;  %s179_s8 = smul.u32 72, %s3237_s24  ;;  %vm204_vm0 = vcmask 64512   ;;  %vm2490_vm1 = vcmask 261120   ;;  %s3237_s24 = sphi %s3282_s24, %s177_s24  }
  0x10   : >> { %3203 = vmatpush.msra.mxu1 %v2703_v1  ;;  %3204 = vmatpush.msra.mxu2 %v2703_v1  ;;  %v2750_v4 = vld [vmem:[%s4084_s1 + $0x18] sm:$0xff]  ;;  %v2769_v5 = vld [vmem:[%s4084_s1 + $0x20] sm:$0xff]  ;;  %v2811_v6 = vld [vmem:[%s4084_s1 + $0x30] sm:$0xff] }
  0x11   : >> { %3205 = vmatpush.msra.mxu3 %v2703_v1  ;;  %247 = vmatpush.msra.mxu0 %v2703_v1  ;;  %s3304_s9 = scalar_lea.vmem %s3280_s23, %s179_s8  ;;  %v2832_v7 = vld [vmem:[%s4084_s1 + $0x38] sm:$0xff]  ;;  %v2790_v10 = vld [vmem:[%s4084_s1 + $0x28] sm:$0xff]  ;;  %v2853_v13 = vld [vmem:[%s4084_s1 + $0x40] sm:$0xff] }
  0x12   : >> { %402 = vmatpush.msrb.mxu2 %v2731_v2  ;;  %318 = vmatpush.msrb.mxu1 %v190_v3  ;;  %v2695_v8 = vld [vmem:[%s3304_s9 + $0x9] sm:$0xff]  ;;  %v2698_v9 = vld [vmem:[%s3304_s9 + $0x21] sm:$0xff]  ;;  %v2701_v11 = vld [vmem:[%s3304_s9 + $0x39] sm:$0xff] }
  0x13   : >> { %495 = vmatpush.msrb.mxu3 %v2750_v4  ;;  %588 = vmatpush.msrb.mxu0 %v2769_v5  ;;  %v2694_v12 = vld [vmem:[%s3304_s9 + $0x1] sm:$0xff]  ;;  %v2696_v14 = vld [vmem:[%s3304_s9 + $0x11] sm:$0xff]  ;;  %v2699_v15 = vld [vmem:[%s3304_s9 + $0x29] sm:$0xff] }
  0x14   : >> { %2705 = vmatmul.msk.f32.vlgmr.msra.gmra.mxu1 %vm204_vm0, %v2695_v8  ;;  %2708 = vmatmul.msk.f32.vlgmr.msra.gmra.mxu2 %vm204_vm0, %v2698_v9  ;;  %v2702_v16 = vld [vmem:[%s3304_s9 + $0x41] sm:$0xff]  ;;  %v2697_v18 = vld [vmem:[%s3304_s9 + $0x19] sm:$0xff]  ;;  %v2700_v19 = vld [vmem:[%s3304_s9 + $0x31] sm:$0xff] }
  0x15   : >> { %2711 = vmatmul.msk.f32.vlgmr.msra.gmra.mxu3 %vm204_vm0, %v2701_v11  ;;  %775 = vmatpush.msra.mxu2 %v2811_v6  ;;  %v2760_v17 = vld [vmem:[%s3304_s9 + $0x4] sm:$0xff]  ;;  %v2761_v21 = vld [vmem:[%s3304_s9 + $0xc] sm:$0xff]  ;;  %v2762_v25 = vld [vmem:[%s3304_s9 + $0x14] sm:$0xff] }
  0x16   : >> { %868 = vmatpush.msra.mxu3 %v2832_v7  ;;  %682 = vmatpush.msra.mxu1 %v2790_v10  ;;  %v2741_v20 = vld [vmem:[%s3304_s9 + $0x3] sm:$0xff]  ;;  %v2742_v24 = vld [vmem:[%s3304_s9 + $0xb] sm:$0xff]  ;;  %v2743_v28 = vld [vmem:[%s3304_s9 + $0x13] sm:$0xff] }
  0x17   : >> { %2704 = vmatmul.msk.f32.vlgmr.msra.gmra.mxu0 %vm204_vm0, %v2694_v12  ;;  %v181_v22 = vld [vmem:[%s3304_s9] sm:$0xff]  ;;  %v182_v26 = vld [vmem:[%s3304_s9 + $0x8] sm:$0xff]  ;;  %v183_v30 = vld [vmem:[%s3304_s9 + $0x10] sm:$0xff] }
  0x18   : >> { %961 = vmatpush.msra.mxu0 %v2853_v13  ;;  %v2722_v23 = vld [vmem:[%s3304_s9 + $0x2] sm:$0xff]  ;;  %v2723_v27 = vld [vmem:[%s3304_s9 + $0xa] sm:$0xff]  ;;  %v2724_v31 = vld [vmem:[%s3304_s9 + $0x12] sm:$0xff] }
  0x19   : >> { %v2763_v29 = vld [vmem:[%s3304_s9 + $0x1c] sm:$0xff]  ;;  %v2764_v33 = vld [vmem:[%s3304_s9 + $0x24] sm:$0xff]  ;;  %v2765_v37 = vld [vmem:[%s3304_s9 + $0x2c] sm:$0xff] }
  0x1a   : >> { %v2744_v32 = vld [vmem:[%s3304_s9 + $0x1b] sm:$0xff]  ;;  %v2745_v36 = vld [vmem:[%s3304_s9 + $0x23] sm:$0xff]  ;;  %v2746_v40 = vld [vmem:[%s3304_s9 + $0x2b] sm:$0xff] }
  0x1b   : >> { %v184_v34 = vld [vmem:[%s3304_s9 + $0x18] sm:$0xff]  ;;  %v185_v38 = vld [vmem:[%s3304_s9 + $0x20] sm:$0xff]  ;;  %v3383_v42 = vld [vmem:[%s3304_s9 + $0x28] sm:$0xff] }
  0x1c   : >> { %2706 = vmatmul.msk.f32.gmra.mxu1 %vm204_vm0, %v2696_v14  ;;  %2709 = vmatmul.msk.f32.gmra.mxu2 %vm204_vm0, %v2699_v15  ;;  %v2725_v35 = vld [vmem:[%s3304_s9 + $0x1a] sm:$0xff]  ;;  %v2726_v39 = vld [vmem:[%s3304_s9 + $0x22] sm:$0xff]  ;;  %v2727_v43 = vld [vmem:[%s3304_s9 + $0x2a] sm:$0xff] }
  0x1d   : >> { %2712 = vmatmul.msk.f32.gmra.mxu3 %vm204_vm0, %v2702_v16  ;;  %v2766_v41 = vld [vmem:[%s3304_s9 + $0x34] sm:$0xff]  ;;  %v2767_v45 = vld [vmem:[%s3304_s9 + $0x3c] sm:$0xff]  ;;  %v2874_v48 = vld [vmem:[%s4084_s1 + $0x48] sm:$0xff] }
  0x1e   : >> { %v2747_v44 = vld [vmem:[%s3304_s9 + $0x33] sm:$0xff]  ;;  %v2748_v51 = vld [vmem:[%s3304_s9 + $0x3b] sm:$0xff]  ;;  %v2768_v52 = vld [vmem:[%s3304_s9 + $0x44] sm:$0xff] }
  0x1f   : >> { %2770 = vmatmul.msk.f32.vlgmr.msrb.gmra.mxu0 %vm204_vm0, %v2760_v17  ;;  %v2895_v46 = vld [vmem:[%s4084_s1 + $0x50] sm:$0xff]  ;;  %v2916_v47 = vld [vmem:[%s4084_s1 + $0x58] sm:$0xff]  ;;  %v2937_v53 = vld [vmem:[%s4084_s1 + $0x60] sm:$0xff] }
  0x20   : >> { %v3403_v49 = vld [vmem:[%s3304_s9 + $0x30] sm:$0xff]  ;;  %1334 = vmatpush.msrb.mxu0 %v2937_v53  ;;  %v3417_v54 = vld [vmem:[%s3304_s9 + $0x38] sm:$0xff]  ;;  %v2749_v56 = vld [vmem:[%s3304_s9 + $0x43] sm:$0xff] }
  0x21   : >> { %v2728_v50 = vld [vmem:[%s3304_s9 + $0x32] sm:$0xff]  ;;  %v2729_v55 = vld [vmem:[%s3304_s9 + $0x3a] sm:$0xff]  ;;  %v2844_v57 = vld [vmem:[%s3304_s9 + $0x27] sm:$0xff] }
  0x22   : >> { %v3428_v58 = vld [vmem:[%s3304_s9 + $0x40] sm:$0xff]  ;;  %v2845_v61 = vld [vmem:[%s3304_s9 + $0x2f] sm:$0xff]  ;;  %v2846_v1 = vld [vmem:[%s3304_s9 + $0x37] sm:$0xff] }
  0x23   : >> { %v2730_v59 = vld [vmem:[%s3304_s9 + $0x42] sm:$0xff]  ;;  %v2824_v63 = vld [vmem:[%s3304_s9 + $0x2e] sm:$0xff]  ;;  %v2825_v3 = vld [vmem:[%s3304_s9 + $0x36] sm:$0xff] }
  0x24   : >> { %2707 = vmatmul.msk.f32.gmra.mxu1 %vm204_vm0, %v2697_v18  ;;  %2710 = vmatmul.msk.f32.gmra.mxu2 %vm204_vm0, %v2700_v19  ;;  %v2823_v60 = vld [vmem:[%s3304_s9 + $0x26] sm:$0xff]  ;;  %v2804_v5 = vld [vmem:[%s3304_s9 + $0x35] sm:$0xff]  ;;  %v2826_v6 = vld [vmem:[%s3304_s9 + $0x3e] sm:$0xff] }
  0x25   : >> { %2751 = vmatmul.msk.f32.vlgmr.msrb.gmra.mxu3 %vm204_vm0, %v2741_v20  ;;  %v2802_v62 = vld [vmem:[%s3304_s9 + $0x25] sm:$0xff]  ;;  %v2803_v2 = vld [vmem:[%s3304_s9 + $0x2d] sm:$0xff]  ;;  %v2805_v8 = vld [vmem:[%s3304_s9 + $0x3d] sm:$0xff] }
  0x26   : >> { %1241 = vmatpush.msrb.mxu3 %v2916_v47  ;;  %v2847_v4 = vld [vmem:[%s3304_s9 + $0x3f] sm:$0xff]  ;;  %v2848_v7 = vld [vmem:[%s3304_s9 + $0x47] sm:$0xff]  ;;  %v2849_v10 = vld [vmem:[%s3304_s9 + $0x4f] sm:$0xff] }
  0x27   : >> { %2771 = vmatmul.msk.f32.gmra.mxu0 %vm204_vm0, %v2761_v21  ;;  %v2827_v9 = vld [vmem:[%s3304_s9 + $0x46] sm:$0xff]  ;;  %v2828_v13 = vld [vmem:[%s3304_s9 + $0x4e] sm:$0xff]  ;;  %v2850_v15 = vld [vmem:[%s3304_s9 + $0x57] sm:$0xff] }
  0x28   : >> { %v2806_v12 = vld [vmem:[%s3304_s9 + $0x45] sm:$0xff]  ;;  %v2807_v20 = vld [vmem:[%s3304_s9 + $0x4d] sm:$0xff]  ;;  %v2829_v21 = vld [vmem:[%s3304_s9 + $0x56] sm:$0xff] }
  0x29   : >> { %v3482_v19 = vld [vmem:[%s3304_s9 + $0x4c] sm:$0xff] }
  0x2c   : >> { %2713 = vmatmul.msk.f32.vlgmr.msrb.gmra.mxu1 %vm204_vm0, %v181_v22  ;;  %2732 = vmatmul.msk.f32.vlgmr.msrb.gmra.mxu2 %vm204_vm0, %v2722_v23  ;;  %v2851_v23 = vld [vmem:[%s3304_s9 + $0x5f] sm:$0xff] }
  0x2d   : >> { %2752 = vmatmul.msk.f32.gmra.mxu3 %vm204_vm0, %v2742_v24  ;;  %1148 = vmatpush.msrb.mxu2 %v2895_v46  ;;  %v2979_v24 = vld [vmem:[%s4084_s1 + $0x70] sm:$0xff] }
  0x2e   : >> { %1054 = vmatpush.msrb.mxu1 %v2874_v48 }
  0x2f   : >> { %2772 = vmatmul.msk.f32.gmra.mxu0 %vm204_vm0, %v2762_v25  ;;  %v3000_v25 = vld [vmem:[%s4084_s1 + $0x78] sm:$0xff] }
  0x34   : >> { %2714 = vmatmul.msk.f32.gmra.mxu1 %vm204_vm0, %v182_v26  ;;  %2733 = vmatmul.msk.f32.gmra.mxu2 %vm204_vm0, %v2723_v27 }
  0x35   : >> { %2753 = vmatmul.msk.f32.gmra.mxu3 %vm204_vm0, %v2743_v28  ;;  %v2958_v28 = vld [vmem:[%s4084_s1 + $0x68] sm:$0xff] }
  0x37   : >> { %2773 = vmatmul.msk.f32.gmra.mxu0 %vm204_vm0, %v2763_v29 }
  0x3c   : >> { %2715 = vmatmul.msk.f32.gmra.mxu1 %vm204_vm0, %v183_v30  ;;  %2734 = vmatmul.msk.f32.gmra.mxu2 %vm204_vm0, %v2724_v31  ;;  %v3508_v30 = vld [vmem:[%s3304_s9 + $0x54] sm:$0xff] }
  0x3d   : >> { %2754 = vmatmul.msk.f32.gmra.mxu3 %vm204_vm0, %v2744_v32  ;;  %v2808_v31 = vld [vmem:[%s3304_s9 + $0x55] sm:$0xff]  ;;  %v2830_v32 = vld [vmem:[%s3304_s9 + $0x5e] sm:$0xff] }
  0x3f   : >> { %2774 = vmatmul.msk.f32.gmra.mxu0 %vm204_vm0, %v2764_v33 }
  0x44   : >> { %2716 = vmatmul.msk.f32.gmra.mxu1 %vm204_vm0, %v184_v34  ;;  %2735 = vmatmul.msk.f32.gmra.mxu2 %vm204_vm0, %v2725_v35  ;;  %v2852_v34 = vld [vmem:[%s3304_s9 + $0x67] sm:$0xff] }
  0x45   : >> { %2755 = vmatmul.msk.f32.gmra.mxu3 %vm204_vm0, %v2745_v36  ;;  %v3021_v35 = vld [vmem:[%s4084_s1 + $0x80] sm:$0xff] }
  0x47   : >> { %2775 = vmatmul.msk.f32.gmra.mxu0 %vm204_vm0, %v2765_v37 }
  0x4c   : >> { %2717 = vmatmul.msk.f32.gmra.mxu1 %vm204_vm0, %v185_v38  ;;  %2736 = vmatmul.msk.f32.gmra.mxu2 %vm204_vm0, %v2726_v39  ;;  %v3524_v39 = vld [vmem:[%s3304_s9 + $0x5c] sm:$0xff] }
  0x4d   : >> { %2756 = vmatmul.msk.f32.gmra.mxu3 %vm204_vm0, %v2746_v40  ;;  %v2809_v40 = vld [vmem:[%s3304_s9 + $0x5d] sm:$0xff] }
  0x4f   : >> { %2776 = vmatmul.msk.f32.gmra.mxu0 %vm204_vm0, %v2766_v41 }
  0x54   : >> { %2718 = vmatmul.msk.f32.gmra.mxu1 %vm204_vm0, %v3383_v42  ;;  %2737 = vmatmul.msk.f32.gmra.mxu2 %vm204_vm0, %v2727_v43 }
  0x55   : >> { %2757 = vmatmul.msk.f32.gmra.mxu3 %vm204_vm0, %v2747_v44  ;;  %v2928_v44 = vld [vmem:[%s3304_s9 + $0x4a] sm:$0xff] }
  0x57   : >> { %2777 = vmatmul.msk.f32.gmra.mxu0 %vm204_vm0, %v2767_v45 }
  0x5c   : >> { %2719 = vmatmul.msk.f32.gmra.mxu1 %vm204_vm0, %v3403_v49  ;;  %2738 = vmatmul.msk.f32.gmra.mxu2 %vm204_vm0, %v2728_v50 }
  0x5d   : >> { %2758 = vmatmul.msk.f32.gmra.mxu3 %vm204_vm0, %v2748_v51  ;;  %v3535_v51 = vld [vmem:[%s3304_s9 + $0x64] sm:$0xff] }
  0x5f   : >> { %2778 = vmatmul.msk.f32.gmra.mxu0 %vm204_vm0, %v2768_v52 }
  0x64   : >> { %2720 = vmatmul.msk.f32.gmra.mxu1 %vm204_vm0, %v3417_v54  ;;  %2739 = vmatmul.msk.f32.gmra.mxu2 %vm204_vm0, %v2729_v55  ;;  %v2907_v55 = vld [vmem:[%s3304_s9 + $0x49] sm:$0xff] }
  0x65   : >> { %2759 = vmatmul.msk.f32.gmra.mxu3 %vm204_vm0, %v2749_v56 }
  0x67   : >> { %2854 = vmatmul.msk.f32.vlgmr.msra.gmra.mxu0 %vm204_vm0, %v2844_v57 }
  0x68   : >> { %1707 = vmatpush.msra.mxu0 %v3021_v35 }
  0x6c   : >> { %2721 = vmatmul.msk.f32.gmra.mxu1 %vm204_vm0, %v3428_v58  ;;  %2740 = vmatmul.msk.f32.gmra.mxu2 %vm204_vm0, %v2730_v59  ;;  %v2929_v59 = vld [vmem:[%s3304_s9 + $0x52] sm:$0xff] }
  0x6d   : >> { %2833 = vmatmul.msk.f32.vlgmr.msra.gmra.mxu3 %vm204_vm0, %v2823_v60 }
  0x6e   : >> { %1614 = vmatpush.msra.mxu3 %v3000_v25 }
  0x6f   : >> { %2855 = vmatmul.msk.f32.gmra.mxu0 %vm204_vm0, %v2845_v61 }
  0x74   : >> { %2791 = vmatmul.msk.f32.vlgmr.msra.gmra.mxu1 %vm204_vm0, %v2764_v33  ;;  %2812 = vmatmul.msk.f32.vlgmr.msra.gmra.mxu2 %vm204_vm0, %v2802_v62 }
  0x75   : >> { %2834 = vmatmul.msk.f32.gmra.mxu3 %vm204_vm0, %v2824_v63  ;;  %1520 = vmatpush.msra.mxu2 %v2979_v24 }
  0x76   : >> { %1427 = vmatpush.msra.mxu1 %v2958_v28  ;;  %v3577_v28 = vld [vmem:[%s3304_s9 + $0x58] sm:$0xff] }
  0x77   : >> { %2856 = vmatmul.msk.f32.gmra.mxu0 %vm204_vm0, %v2846_v1 }
  0x7c   : >> { %2792 = vmatmul.msk.f32.gmra.mxu1 %vm204_vm0, %v2765_v37  ;;  %2813 = vmatmul.msk.f32.gmra.mxu2 %vm204_vm0, %v2803_v2  ;;  %v3549_v2 = vld [vmem:[%s3304_s9 + $0x48] sm:$0xff] }
  0x7d   : >> { %2835 = vmatmul.msk.f32.gmra.mxu3 %vm204_vm0, %v2825_v3 }
  0x7f   : >> { %2857 = vmatmul.msk.f32.gmra.mxu0 %vm204_vm0, %v2847_v4  ;;  %v2908_v4 = vld [vmem:[%s3304_s9 + $0x51] sm:$0xff] }
  0x84   : >> { %2793 = vmatmul.msk.f32.gmra.mxu1 %vm204_vm0, %v2766_v41  ;;  %2814 = vmatmul.msk.f32.gmra.mxu2 %vm204_vm0, %v2804_v5  ;;  %v2831_v41 = vld [vmem:[%s3304_s9 + $0x66] sm:$0xff] }
  0x85   : >> { %2836 = vmatmul.msk.f32.gmra.mxu3 %vm204_vm0, %v2826_v6 }
  0x87   : >> { %2858 = vmatmul.msk.f32.gmra.mxu0 %vm204_vm0, %v2848_v7  ;;  %v2930_v7 = vld [vmem:[%s3304_s9 + $0x5a] sm:$0xff] }
  0x8c   : >> { %2794 = vmatmul.msk.f32.gmra.mxu1 %vm204_vm0, %v2767_v45  ;;  %2815 = vmatmul.msk.f32.gmra.mxu2 %vm204_vm0, %v2805_v8 }
  0x8d   : >> { %2837 = vmatmul.msk.f32.gmra.mxu3 %vm204_vm0, %v2827_v9 }
  0x8f   : >> { %2859 = vmatmul.msk.f32.gmra.mxu0 %vm204_vm0, %v2849_v10 }
  0x91   : >> { %v3466_v11 = vpop.f32.mrf.mxu1 }
  0x94   : >> { %2795 = vmatmul.msk.f32.gmra.mxu1 %vm204_vm0, %v2768_v52  ;;  %2816 = vmatmul.msk.f32.gmra.mxu2 %vm204_vm0, %v2806_v12  ;;  %v249_v14 = vpop.f32.mrf.mxu0  ;;  %v2810_v52 = vld [vmem:[%s3304_s9 + $0x65] sm:$0xff] }
  0x95   : >> { %2838 = vmatmul.msk.f32.gmra.mxu3 %vm204_vm0, %v2828_v13  ;;  %v3563_v13 = vld [vmem:[%s3304_s9 + $0x50] sm:$0xff] }
  0x97   : >> { %v3474_v16 = vpop.f32.mrf.mxu2  ;;  %2860 = vmatmul.msk.f32.gmra.mxu0 %vm204_vm0, %v2850_v15 }
  0x98   : >> { %v3477_v17 = vpop.f32.mrf.mxu3 }
  0x99   : >> { %v3479_v18 = vpop.f32.mrf.mxu1 }
  0x9c   : >> { %2796 = vmatmul.msk.f32.gmra.mxu1 %vm204_vm0, %v3482_v19  ;;  %2817 = vmatmul.msk.f32.gmra.mxu2 %vm204_vm0, %v2807_v20  ;;  %v590_v22 = vpop.f32.mrf.mxu0  ;;  %v2931_v20 = vld [vmem:[%s3304_s9 + $0x62] sm:$0xff] }
  0x9d   : >> { %2839 = vmatmul.msk.f32.gmra.mxu3 %vm204_vm0, %v2829_v21 }
  0x9f   : >> { %v3497_v26 = vpop.f32.mrf.mxu2  ;;  %2861 = vmatmul.msk.f32.gmra.mxu0 %vm204_vm0, %v2851_v23 }
  0xa0   : >> { %v3500_v27 = vpop.f32.mrf.mxu3 }
  0xa1   : >> { %v3505_v29 = vpop.f32.mrf.mxu1 }
  0xa4   : >> { %2797 = vmatmul.msk.f32.gmra.mxu1 %vm204_vm0, %v3508_v30  ;;  %2818 = vmatmul.msk.f32.gmra.mxu2 %vm204_vm0, %v2808_v31  ;;  %v593_v33 = vpop.f32.mrf.mxu0  ;;  %v2910_v31 = vld [vmem:[%s3304_s9 + $0x61] sm:$0xff] }
  0xa5   : >> { %2840 = vmatmul.msk.f32.gmra.mxu3 %vm204_vm0, %v2830_v32 }
  0xa7   : >> { %v3520_v36 = vpop.f32.mrf.mxu2  ;;  %2862 = vmatmul.msk.f32.gmra.mxu0 %vm204_vm0, %v2852_v34 }
  0xa8   : >> { %v497_v37 = vpop.f32.mrf.mxu3 }
  0xa9   : >> { %v320_v38 = vpop.f32.mrf.mxu1 }
  0xaa   : >> { %v321_v45 = vadd.f32 %v320_v38, %v249_v14  ;;  %v2909_v14 = vld [vmem:[%s3304_s9 + $0x59] sm:$0xff] }
  0xac   : >> { %2798 = vmatmul.msk.f32.gmra.mxu1 %vm204_vm0, %v3524_v39  ;;  %2819 = vmatmul.msk.f32.gmra.mxu2 %vm204_vm0, %v2809_v40  ;;  %v596_v43 = vpop.f32.mrf.mxu0 }
  0xad   : >> { %2841 = vmatmul.msk.f32.gmra.mxu3 %vm204_vm0, %v2831_v41  ;;  %v3591_v41 = vld [vmem:[%s3304_s9 + $0x60] sm:$0xff] }
  0xaf   : >> { %v404_v46 = vpop.f32.mrf.mxu2  ;;  %2938 = vmatmul.msk.f32.vlgmr.msrb.gmra.mxu0 %vm204_vm0, %v2928_v44 }
  0xb0   : >> { %v431_v47 = vadd.f32 %v404_v46, %v321_v45  ;;  %v500_v48 = vpop.f32.mrf.mxu3  ;;  %v2933_v45 = vld [vmem:[%s3304_s9 + $0x72] sm:$0xff] }
  0xb1   : >> { %v323_v50 = vpop.f32.mrf.mxu1 }
  0xb2   : >> { %v524_v53 = vadd.f32 %v497_v37, %v431_v47  ;;  %v324_v60 = vadd.f32 %v323_v50, %v3466_v11 }
  0xb4   : >> { %v3539_v56 = vadd.f32 %v590_v22, %v524_v53  ;;  %2799 = vmatmul.msk.f32.gmra.mxu1 %vm204_vm0, %v3535_v51  ;;  %2820 = vmatmul.msk.f32.gmra.mxu2 %vm204_vm0, %v2810_v52  ;;  %v599_v57 = vpop.f32.mrf.mxu0  ;;  %v3605_v53 = vld [vmem:[%s3304_s9 + $0x68] sm:$0xff] }
  0xb5   : >> { %2917 = vmatmul.msk.f32.vlgmr.msrb.gmra.mxu3 %vm204_vm0, %v2907_v55  ;;  %v2912_v55 = vld [vmem:[%s3304_s9 + $0x71] sm:$0xff] }
  0xb7   : >> { %v407_v61 = vpop.f32.mrf.mxu2  ;;  %2939 = vmatmul.msk.f32.gmra.mxu0 %vm204_vm0, %v2929_v59  ;;  %v2934_v59 = vld [vmem:[%s3304_s9 + $0x7a] sm:$0xff] }
  0xb8   : >> { %v432_v62 = vadd.f32 %v407_v61, %v324_v60  ;;  %v503_v63 = vpop.f32.mrf.mxu3 }
  0xb9   : >> { %v326_v1 = vpop.f32.mrf.mxu1 }
  0xba   : >> { %v525_v3 = vadd.f32 %v500_v48, %v432_v62  ;;  %v327_v8 = vadd.f32 %v326_v1, %v3479_v18 }
  0xbc   : >> { %v3552_v5 = vadd.f32 %v593_v33, %v525_v3  ;;  %2875 = vmatmul.msk.f32.vlgmr.msrb.gmra.mxu1 %vm204_vm0, %v3383_v42  ;;  %2896 = vmatmul.msk.f32.vlgmr.msrb.gmra.mxu2 %vm204_vm0, %v3549_v2  ;;  %v602_v6 = vpop.f32.mrf.mxu0  ;;  %v2932_v33 = vld [vmem:[%s3304_s9 + $0x6a] sm:$0xff] }
  0xbd   : >> { %2918 = vmatmul.msk.f32.gmra.mxu3 %vm204_vm0, %v2908_v4  ;;  %v3619_v3 = vld [vmem:[%s3304_s9 + $0x70] sm:$0xff] }
  0xbf   : >> { %v410_v9 = vpop.f32.mrf.mxu2  ;;  %2940 = vmatmul.msk.f32.gmra.mxu0 %vm204_vm0, %v2930_v7  ;;  %v2935_v7 = vld [vmem:[%s3304_s9 + $0x82] sm:$0xff] }
  0xc0   : >> { %v433_v10 = vadd.f32 %v410_v9, %v327_v8  ;;  %v506_v11 = vpop.f32.mrf.mxu3  ;;  %v3063_v8 = vld [vmem:[%s4084_s1 + $0x90] sm:$0xff]  ;;  %v3084_v9 = vld [vmem:[%s4084_s1 + $0x98] sm:$0xff] }
  0xc1   : >> { %v329_v12 = vpop.f32.mrf.mxu1  ;;  %1893 = vmatpush.msrb.mxu2 %v3063_v8  ;;  %1986 = vmatpush.msrb.mxu3 %v3084_v9  ;;  %v2950_v8 = vld [vmem:[%s3304_s9 + $0x53] sm:$0xff] }
  0xc2   : >> { %v526_v42 = vadd.f32 %v503_v63, %v433_v10  ;;  %v330_v21 = vadd.f32 %v329_v12, %v3505_v29 }
  0xc4   : >> { %v3566_v15 = vadd.f32 %v596_v43, %v526_v42  ;;  %2876 = vmatmul.msk.f32.gmra.mxu1 %vm204_vm0, %v3403_v49  ;;  %2897 = vmatmul.msk.f32.gmra.mxu2 %vm204_vm0, %v3563_v13  ;;  %v605_v18 = vpop.f32.mrf.mxu0  ;;  %v2911_v43 = vld [vmem:[%s3304_s9 + $0x69] sm:$0xff] }
  0xc5   : >> { %2919 = vmatmul.msk.f32.gmra.mxu3 %vm204_vm0, %v2909_v14  ;;  %v3042_v42 = vld [vmem:[%s4084_s1 + $0x88] sm:$0xff] }
  0xc6   : >> { %1800 = vmatpush.msrb.mxu1 %v3042_v42 }
  0xc7   : >> { %v413_v22 = vpop.f32.mrf.mxu2  ;;  %2941 = vmatmul.msk.f32.gmra.mxu0 %vm204_vm0, %v2931_v20 }
  0xc8   : >> { %v434_v23 = vadd.f32 %v413_v22, %v330_v21  ;;  %v509_v24 = vpop.f32.mrf.mxu3  ;;  %v2914_v21 = vld [vmem:[%s3304_s9 + $0x81] sm:$0xff] }
  0xc9   : >> { %v332_v25 = vpop.f32.mrf.mxu1 }
  0xca   : >> { %v527_v49 = vadd.f32 %v506_v11, %v434_v23  ;;  %v333_v34 = vadd.f32 %v332_v25, %v3474_v16  ;;  %v2936_v23 = vld [vmem:[%s3304_s9 + $0x8a] sm:$0xff] }
  0xcc   : >> { %v3580_v32 = vadd.f32 %v599_v57, %v527_v49  ;;  %2877 = vmatmul.msk.f32.gmra.mxu1 %vm204_vm0, %v3417_v54  ;;  %2898 = vmatmul.msk.f32.gmra.mxu2 %vm204_vm0, %v3577_v28  ;;  %v608_v29 = vpop.f32.mrf.mxu0 }
  0xcd   : >> { %2920 = vmatmul.msk.f32.gmra.mxu3 %vm204_vm0, %v2910_v31 }
  0xcf   : >> { %v416_v35 = vpop.f32.mrf.mxu2  ;;  %2942 = vmatmul.msk.f32.gmra.mxu0 %vm204_vm0, %v2932_v33  ;;  %v3659_v33 = vld [vmem:[%s3304_s9 + $0x80] sm:$0xff] }
  0xd0   : >> { %v435_v37 = vadd.f32 %v416_v35, %v333_v34  ;;  %v512_v38 = vpop.f32.mrf.mxu3  ;;  %v2915_v35 = vld [vmem:[%s3304_s9 + $0x89] sm:$0xff] }
  0xd1   : >> { %v335_v40 = vpop.f32.mrf.mxu1 }
  0xd2   : >> { %v528_v54 = vadd.f32 %v509_v24, %v435_v37  ;;  %v336_v46 = vadd.f32 %v335_v40, %v3497_v26  ;;  %v3105_v24 = vld [vmem:[%s4084_s1 + $0xa0] sm:$0xff] }
  0xd3   : >> { %2080 = vmatpush.msrb.mxu0 %v3105_v24  ;;  %v3016_v24 = vld [vmem:[%s3304_s9 + $0x8d] sm:$0xff] }
  0xd4   : >> { %v3594_v44 = vadd.f32 %v602_v6, %v528_v54  ;;  %2878 = vmatmul.msk.f32.gmra.mxu1 %vm204_vm0, %v3428_v58  ;;  %2899 = vmatmul.msk.f32.gmra.mxu2 %vm204_vm0, %v3591_v41  ;;  %v611_v16 = vpop.f32.mrf.mxu0 }
  0xd5   : >> { %2921 = vmatmul.msk.f32.gmra.mxu3 %vm204_vm0, %v2911_v43 }
  0xd7   : >> { %v419_v47 = vpop.f32.mrf.mxu2  ;;  %2943 = vmatmul.msk.f32.gmra.mxu0 %vm204_vm0, %v2933_v45 }
  0xd8   : >> { %v436_v48 = vadd.f32 %v419_v47, %v336_v46  ;;  %v515_v50 = vpop.f32.mrf.mxu3  ;;  %v3673_v46 = vld [vmem:[%s3304_s9 + $0x88] sm:$0xff] }
  0xd9   : >> { %v338_v52 = vpop.f32.mrf.mxu1  ;;  %v3676_v47 = vld [vmem:[%s3304_s9 + $0x6c] sm:$0xff] }
  0xda   : >> { %v529_v58 = vadd.f32 %v512_v38, %v436_v48  ;;  %v339_v60 = vadd.f32 %v338_v52, %v3520_v36  ;;  %v3012_v38 = vld [vmem:[%s3304_s9 + $0x6d] sm:$0xff] }
  0xdc   : >> { %v3608_v57 = vadd.f32 %v605_v18, %v529_v58  ;;  %2879 = vmatmul.msk.f32.gmra.mxu1 %vm204_vm0, %v3549_v2  ;;  %2900 = vmatmul.msk.f32.gmra.mxu2 %vm204_vm0, %v3605_v53  ;;  %v614_v26 = vpop.f32.mrf.mxu0  ;;  %v2913_v2 = vld [vmem:[%s3304_s9 + $0x79] sm:$0xff] }
  0xdd   : >> { %2922 = vmatmul.msk.f32.gmra.mxu3 %vm204_vm0, %v2912_v55  ;;  %v3642_v18 = vld [vmem:[%s3304_s9 + $0x78] sm:$0xff] }
  0xdf   : >> { %v422_v61 = vpop.f32.mrf.mxu2  ;;  %2944 = vmatmul.msk.f32.gmra.mxu0 %vm204_vm0, %v2934_v59 }
  0xe0   : >> { %v437_v62 = vadd.f32 %v422_v61, %v339_v60  ;;  %v518_v63 = vpop.f32.mrf.mxu3  ;;  %v2949_v60 = vld [vmem:[%s3304_s9 + $0x4b] sm:$0xff]  ;;  %v3691_v61 = vld [vmem:[%s3304_s9 + $0x74] sm:$0xff] }
  0xe1   : >> { %v341_v1 = vpop.f32.mrf.mxu1 }
  0xe2   : >> { %v530_v4 = vadd.f32 %v515_v50, %v437_v62  ;;  %v342_v10 = vadd.f32 %v341_v1, %v3477_v17  ;;  %v3013_v50 = vld [vmem:[%s3304_s9 + $0x75] sm:$0xff] }
  0xe4   : >> { %v3622_v6 = vadd.f32 %v608_v29, %v530_v4  ;;  %2880 = vmatmul.msk.f32.gmra.mxu1 %vm204_vm0, %v3563_v13  ;;  %2901 = vmatmul.msk.f32.gmra.mxu2 %vm204_vm0, %v3619_v3  ;;  %v963_v36 = vpop.f32.mrf.mxu0 }
  0xe5   : >> { %2923 = vmatmul.msk.f32.gmra.mxu3 %vm204_vm0, %v2913_v2 }
  0xe7   : >> { %v425_v11 = vpop.f32.mrf.mxu2  ;;  %2945 = vmatmul.msk.f32.gmra.mxu0 %vm204_vm0, %v2935_v7 }
  0xe8   : >> { %v438_v12 = vadd.f32 %v425_v11, %v342_v10  ;;  %v521_v13 = vpop.f32.mrf.mxu3  ;;  %v3705_v10 = vld [vmem:[%s3304_s9 + $0x7c] sm:$0xff]  ;;  %v3015_v11 = vld [vmem:[%s3304_s9 + $0x85] sm:$0xff] }
  0xe9   : >> { %v344_v14 = vpop.f32.mrf.mxu1 }
  0xea   : >> { %v531_v20 = vadd.f32 %v518_v63, %v438_v12  ;;  %v345_v25 = vadd.f32 %v344_v14, %v3500_v27  ;;  %v3014_v63 = vld [vmem:[%s3304_s9 + $0x7d] sm:$0xff] }
  0xec   : >> { %v3645_v22 = vadd.f32 %v611_v16, %v531_v20  ;;  %2881 = vmatmul.msk.f32.gmra.mxu1 %vm204_vm0, %v3577_v28  ;;  %2902 = vmatmul.msk.f32.gmra.mxu2 %vm204_vm0, %v3642_v18  ;;  %v966_v17 = vpop.f32.mrf.mxu0 }
  0xed   : >> { %2924 = vmatmul.msk.f32.gmra.mxu3 %vm204_vm0, %v2914_v21  ;;  %v2951_v21 = vld [vmem:[%s3304_s9 + $0x5b] sm:$0xff] }
  0xef   : >> { %v428_v49 = vpop.f32.mrf.mxu2  ;;  %2946 = vmatmul.msk.f32.gmra.mxu0 %vm204_vm0, %v2936_v23  ;;  %v3719_v23 = vld [vmem:[%s3304_s9 + $0x84] sm:$0xff] }
  0xf0   : >> { %v439_v31 = vadd.f32 %v428_v49, %v345_v25  ;;  %v870_v28 = vpop.f32.mrf.mxu3 }
  0xf1   : >> { %v684_v29 = vpop.f32.mrf.mxu1 }
  0xf2   : >> { %v532_v34 = vadd.f32 %v521_v13, %v439_v31  ;;  %v711_v40 = vadd.f32 %v684_v29, %v3539_v56 }
  0xf4   : >> { %v3662_v37 = vadd.f32 %v614_v26, %v532_v34  ;;  %2882 = vmatmul.msk.f32.gmra.mxu1 %vm204_vm0, %v3591_v41  ;;  %2903 = vmatmul.msk.f32.gmra.mxu2 %vm204_vm0, %v3659_v33  ;;  %v969_v27 = vpop.f32.mrf.mxu0  ;;  %v2952_v34 = vld [vmem:[%s3304_s9 + $0x63] sm:$0xff] }
  0xf5   : >> { %2925 = vmatmul.msk.f32.gmra.mxu3 %vm204_vm0, %v2915_v35 }
  0xf7   : >> { %v777_v54 = vpop.f32.mrf.mxu2  ;;  %3022 = vmatmul.msk.f32.vlgmr.msra.gmra.mxu0 %vm204_vm0, %v3012_v38  ;;  %v3017_v38 = vld [vmem:[%s3304_s9 + $0x95] sm:$0xff] }
  0xf8   : >> { %v804_v43 = vadd.f32 %v777_v54, %v711_v40  ;;  %v873_v16 = vpop.f32.mrf.mxu3 }
  0xf9   : >> { %v687_v45 = vpop.f32.mrf.mxu1 }
  0xfa   : >> { %v897_v41 = vadd.f32 %v870_v28, %v804_v43  ;;  %v712_v52 = vadd.f32 %v687_v45, %v3552_v5 }
  0xfc   : >> { %v3678_v48 = vadd.f32 %v963_v36, %v897_v41  ;;  %2883 = vmatmul.msk.f32.gmra.mxu1 %vm204_vm0, %v3605_v53  ;;  %2904 = vmatmul.msk.f32.gmra.mxu2 %vm204_vm0, %v3673_v46  ;;  %v972_v56 = vpop.f32.mrf.mxu0  ;;  %v2953_v41 = vld [vmem:[%s3304_s9 + $0x6b] sm:$0xff] }
  0xfd   : >> { %3001 = vmatmul.msk.f32.vlgmr.msra.gmra.mxu3 %vm204_vm0, %v3676_v47 }
  0xff   : >> { %v780_v58 = vpop.f32.mrf.mxu2  ;;  %3023 = vmatmul.msk.f32.gmra.mxu0 %vm204_vm0, %v3013_v50  ;;  %v3747_v50 = vld [vmem:[%s3304_s9 + $0x94] sm:$0xff] }
 0x100   : >> { %v805_v55 = vadd.f32 %v780_v58, %v712_v52  ;;  %v876_v26 = vpop.f32.mrf.mxu3  ;;  %v3018_v52 = vld [vmem:[%s3304_s9 + $0x9d] sm:$0xff] }
 0x101   : >> { %v690_v59 = vpop.f32.mrf.mxu1 }
 0x102   : >> { %v898_v53 = vadd.f32 %v873_v16, %v805_v55  ;;  %v713_v1 = vadd.f32 %v690_v59, %v3566_v15 }
 0x104   : >> { %v3693_v62 = vadd.f32 %v966_v17, %v898_v53  ;;  %2959 = vmatmul.msk.f32.vlgmr.msra.gmra.mxu1 %vm204_vm0, %v2949_v60  ;;  %2980 = vmatmul.msk.f32.vlgmr.msra.gmra.mxu2 %vm204_vm0, %v3482_v19  ;;  %v975_v5 = vpop.f32.mrf.mxu0  ;;  %v2954_v53 = vld [vmem:[%s3304_s9 + $0x73] sm:$0xff] }
 0x105   : >> { %3002 = vmatmul.msk.f32.gmra.mxu3 %vm204_vm0, %v3691_v61 }
 0x107   : >> { %v783_v4 = vpop.f32.mrf.mxu2  ;;  %3024 = vmatmul.msk.f32.gmra.mxu0 %vm204_vm0, %v3014_v63  ;;  %v3761_v63 = vld [vmem:[%s3304_s9 + $0x9c] sm:$0xff] }
 0x108   : >> { %v806_v2 = vadd.f32 %v783_v4, %v713_v1  ;;  %v879_v36 = vpop.f32.mrf.mxu3  ;;  %v3147_v4 = vld [vmem:[%s4084_s1 + $0xb0] sm:$0xff] }
 0x109   : >> { %v693_v7 = vpop.f32.mrf.mxu1  ;;  %2266 = vmatpush.msra.mxu2 %v3147_v4  ;;  %v3055_v4 = vld [vmem:[%s3304_s9 + $0x77] sm:$0xff] }
 0x10a   : >> { %v899_v9 = vadd.f32 %v876_v26, %v806_v2  ;;  %v714_v12 = vadd.f32 %v693_v7, %v3580_v32  ;;  %v3168_v2 = vld [vmem:[%s4084_s1 + $0xb8] sm:$0xff] }
 0x10b   : >> { %2359 = vmatpush.msra.mxu3 %v3168_v2 }
 0x10c   : >> { %v3707_v19 = vadd.f32 %v969_v27, %v899_v9  ;;  %2960 = vmatmul.msk.f32.gmra.mxu1 %vm204_vm0, %v2950_v8  ;;  %2981 = vmatmul.msk.f32.gmra.mxu2 %vm204_vm0, %v3508_v30  ;;  %v978_v15 = vpop.f32.mrf.mxu0  ;;  %v3733_v27 = vld [vmem:[%s3304_s9 + $0x8c] sm:$0xff] }
 0x10d   : >> { %3003 = vmatmul.msk.f32.gmra.mxu3 %vm204_vm0, %v3705_v10  ;;  %v3126_v9 = vld [vmem:[%s4084_s1 + $0xa8] sm:$0xff] }
 0x10e   : >> { %2173 = vmatpush.msra.mxu1 %v3126_v9 }
 0x10f   : >> { %v786_v13 = vpop.f32.mrf.mxu2  ;;  %3025 = vmatmul.msk.f32.gmra.mxu0 %vm204_vm0, %v3015_v11  ;;  %v2955_v11 = vld [vmem:[%s3304_s9 + $0x7b] sm:$0xff] }
 0x110   : >> { %v807_v42 = vadd.f32 %v786_v13, %v714_v12  ;;  %v882_v14 = vpop.f32.mrf.mxu3  ;;  %v3784_v13 = vld [vmem:[%s3304_s9 + $0xa4] sm:$0xff] }
 0x111   : >> { %v696_v20 = vpop.f32.mrf.mxu1 }
 0x112   : >> { %v900_v17 = vadd.f32 %v879_v36, %v807_v42  ;;  %v715_v25 = vadd.f32 %v696_v20, %v3594_v44  ;;  %v3189_v20 = vld [vmem:[%s4084_s1 + $0xc0] sm:$0xff] }
 0x113   : >> { %2452 = vmatpush.msra.mxu0 %v3189_v20 }
 0x114   : >> { %v3721_v30 = vadd.f32 %v972_v56, %v900_v17  ;;  %2961 = vmatmul.msk.f32.gmra.mxu1 %vm204_vm0, %v2951_v21  ;;  %2982 = vmatmul.msk.f32.gmra.mxu2 %vm204_vm0, %v3524_v39  ;;  %v981_v32 = vpop.f32.mrf.mxu0 }
 0x115   : >> { %3004 = vmatmul.msk.f32.gmra.mxu3 %vm204_vm0, %v3719_v23 }
 0x117   : >> { %v789_v49 = vpop.f32.mrf.mxu2  ;;  %3026 = vmatmul.msk.f32.gmra.mxu0 %vm204_vm0, %v3016_v24 }
 0x118   : >> { %v808_v31 = vadd.f32 %v789_v49, %v715_v25  ;;  %v885_v28 = vpop.f32.mrf.mxu3 }
 0x119   : >> { %v699_v29 = vpop.f32.mrf.mxu1 }
 0x11a   : >> { %v901_v35 = vadd.f32 %v882_v14, %v808_v31  ;;  %v716_v40 = vadd.f32 %v699_v29, %v3608_v57  ;;  %v3020_v14 = vld [vmem:[%s3304_s9 + $0xad] sm:$0xff] }
 0x11b   : >> { %v3801_v31 = vld [vmem:[%s3304_s9 + $0xac] sm:$0xff] }
 0x11c   : >> { %v3735_v39 = vadd.f32 %v975_v5, %v901_v35  ;;  %2962 = vmatmul.msk.f32.gmra.mxu1 %vm204_vm0, %v2952_v34  ;;  %2983 = vmatmul.msk.f32.gmra.mxu2 %vm204_vm0, %v3535_v51  ;;  %v984_v44 = vpop.f32.mrf.mxu0  ;;  %v3809_v29 = vld [vmem:[%s3304_s9 + $0x90] sm:$0xff] }
 0x11d   : >> { %3005 = vmatmul.msk.f32.gmra.mxu3 %vm204_vm0, %v3733_v27 }
 0x11f   : >> { %v792_v54 = vpop.f32.mrf.mxu2  ;;  %3027 = vmatmul.msk.f32.gmra.mxu0 %vm204_vm0, %v3017_v38 }
 0x120   : >> { %v809_v43 = vadd.f32 %v792_v54, %v716_v40  ;;  %v888_v16 = vpop.f32.mrf.mxu3  ;;  %v2957_v54 = vld [vmem:[%s3304_s9 + $0x8b] sm:$0xff] }
 0x121   : >> { %v702_v45 = vpop.f32.mrf.mxu1 }
 0x122   : >> { %v902_v56 = vadd.f32 %v885_v28, %v809_v43  ;;  %v717_v58 = vadd.f32 %v702_v45, %v3622_v6  ;;  %v3019_v6 = vld [vmem:[%s3304_s9 + $0xa5] sm:$0xff] }
 0x124   : >> { %v3749_v51 = vadd.f32 %v978_v15, %v902_v56  ;;  %2963 = vmatmul.msk.f32.gmra.mxu1 %vm204_vm0, %v2953_v41  ;;  %2984 = vmatmul.msk.f32.gmra.mxu2 %vm204_vm0, %v3676_v47  ;;  %v987_v57 = vpop.f32.mrf.mxu0 }
 0x125   : >> { %3006 = vmatmul.msk.f32.gmra.mxu3 %vm204_vm0, %v3747_v50 }
 0x127   : >> { %v795_v55 = vpop.f32.mrf.mxu2  ;;  %3028 = vmatmul.msk.f32.gmra.mxu0 %vm204_vm0, %v3018_v52 }
 0x128   : >> { %v810_v26 = vadd.f32 %v795_v55, %v717_v58  ;;  %v891_v59 = vpop.f32.mrf.mxu3  ;;  %v3033_v58 = vld [vmem:[%s3304_s9 + $0x6e] sm:$0xff] }
 0x129   : >> { %v705_v60 = vpop.f32.mrf.mxu1 }
 0x12a   : >> { %v903_v5 = vadd.f32 %v888_v16, %v810_v26  ;;  %v718_v36 = vadd.f32 %v705_v60, %v3645_v22 }
 0x12c   : >> { %v3763_v1 = vadd.f32 %v981_v32, %v903_v5  ;;  %2964 = vmatmul.msk.f32.gmra.mxu1 %vm204_vm0, %v2954_v53  ;;  %2985 = vmatmul.msk.f32.gmra.mxu2 %vm204_vm0, %v3691_v61  ;;  %v1336_v47 = vpop.f32.mrf.mxu0 }
 0x12d   : >> { %3007 = vmatmul.msk.f32.gmra.mxu3 %vm204_vm0, %v3761_v63 }
 0x12f   : >> { %v798_v61 = vpop.f32.mrf.mxu2  ;;  %3029 = vmatmul.msk.f32.gmra.mxu0 %vm204_vm0, %v3019_v6  ;;  %v3034_v6 = vld [vmem:[%s3304_s9 + $0x76] sm:$0xff] }
 0x130   : >> { %v811_v7 = vadd.f32 %v798_v61, %v718_v36  ;;  %v894_v8 = vpop.f32.mrf.mxu3 }
 0x131   : >> { %v708_v15 = vpop.f32.mrf.mxu1 }
 0x132   : >> { %v904_v12 = vadd.f32 %v891_v59, %v811_v7  ;;  %v719_v21 = vadd.f32 %v708_v15, %v3662_v37 }
 0x134   : >> { %v3786_v42 = vadd.f32 %v984_v44, %v904_v12  ;;  %2965 = vmatmul.msk.f32.gmra.mxu1 %vm204_vm0, %v2955_v11  ;;  %2986 = vmatmul.msk.f32.gmra.mxu2 %vm204_vm0, %v3705_v10  ;;  %v1339_v22 = vpop.f32.mrf.mxu0  ;;  %v2956_v10 = vld [vmem:[%s3304_s9 + $0x83] sm:$0xff] }
 0x135   : >> { %3008 = vmatmul.msk.f32.gmra.mxu3 %vm204_vm0, %v3784_v13  ;;  %v3035_v11 = vld [vmem:[%s3304_s9 + $0x7e] sm:$0xff] }
 0x136   : >> { %v3056_v12 = vld [vmem:[%s3304_s9 + $0x7f] sm:$0xff] }
 0x137   : >> { %v801_v17 = vpop.f32.mrf.mxu2  ;;  %3030 = vmatmul.msk.f32.gmra.mxu0 %vm204_vm0, %v3020_v14 }
 0x138   : >> { %v812_v32 = vadd.f32 %v801_v17, %v719_v21  ;;  %v1243_v24 = vpop.f32.mrf.mxu3 }
 0x139   : >> { %v1056_v25 = vpop.f32.mrf.mxu1 }
 0x13a   : >> { %v905_v49 = vadd.f32 %v894_v8, %v812_v32  ;;  %v1083_v34 = vadd.f32 %v1056_v25, %v3678_v48  ;;  %v3823_v48 = vld [vmem:[%s3304_s9 + $0x98] sm:$0xff]  ;;  %v3036_v25 = vld [vmem:[%s3304_s9 + $0x86] sm:$0xff] }
 0x13c   : >> { %v3803_v28 = vadd.f32 %v987_v57, %v905_v49  ;;  %2966 = vmatmul.msk.f32.gmra.mxu1 %vm204_vm0, %v2956_v10  ;;  %2987 = vmatmul.msk.f32.gmra.mxu2 %vm204_vm0, %v3719_v23  ;;  %v1342_v37 = vpop.f32.mrf.mxu0  ;;  %v3057_v10 = vld [vmem:[%s3304_s9 + $0x87] sm:$0xff] }
 0x13d   : >> { %3009 = vmatmul.msk.f32.gmra.mxu3 %vm204_vm0, %v3801_v31 }
 0x13f   : >> { %v1150_v35 = vpop.f32.mrf.mxu2  ;;  %3106 = vmatmul.msk.f32.vlgmr.msrb.gmra.mxu0 %vm204_vm0, %v3809_v29 }
 0x140   : >> { %v1177_v44 = vadd.f32 %v1150_v35, %v1083_v34  ;;  %v1246_v38 = vpop.f32.mrf.mxu3 }
 0x141   : >> { %v1059_v40 = vpop.f32.mrf.mxu1 }
 0x142   : >> { %v1270_v23 = vadd.f32 %v1243_v24, %v1177_v44  ;;  %v1084_v45 = vadd.f32 %v1059_v40, %v3693_v62  ;;  %v3837_v62 = vld [vmem:[%s3304_s9 + $0xa0] sm:$0xff] }
 0x144   : >> { %v3817_v43 = vadd.f32 %v1336_v47, %v1270_v23  ;;  %2967 = vmatmul.msk.f32.gmra.mxu1 %vm204_vm0, %v2957_v54  ;;  %2988 = vmatmul.msk.f32.gmra.mxu2 %vm204_vm0, %v3733_v27  ;;  %v1345_v16 = vpop.f32.mrf.mxu0  ;;  %v3054_v27 = vld [vmem:[%s3304_s9 + $0x6f] sm:$0xff] }
 0x145   : >> { %3085 = vmatmul.msk.f32.vlgmr.msrb.gmra.mxu3 %vm204_vm0, %v3619_v3  ;;  %v3037_v54 = vld [vmem:[%s3304_s9 + $0x8e] sm:$0xff] }
 0x146   : >> { %v3058_v23 = vld [vmem:[%s3304_s9 + $0x8f] sm:$0xff] }
 0x147   : >> { %v1153_v41 = vpop.f32.mrf.mxu2  ;;  %3107 = vmatmul.msk.f32.gmra.mxu0 %vm204_vm0, %v3823_v48 }
 0x148   : >> { %v1178_v56 = vadd.f32 %v1153_v41, %v1084_v45  ;;  %v1249_v57 = vpop.f32.mrf.mxu3 }
 0x149   : >> { %v1062_v52 = vpop.f32.mrf.mxu1 }
 0x14a   : >> { %v1271_v55 = vadd.f32 %v1246_v38, %v1178_v56  ;;  %v1085_v59 = vadd.f32 %v1062_v52, %v3707_v19  ;;  %v3851_v19 = vld [vmem:[%s3304_s9 + $0xa8] sm:$0xff] }
 0x14c   : >> { %v3832_v26 = vadd.f32 %v1339_v22, %v1271_v55  ;;  %3043 = vmatmul.msk.f32.vlgmr.msrb.gmra.mxu1 %vm204_vm0, %v3033_v58  ;;  %3064 = vmatmul.msk.f32.vlgmr.msrb.gmra.mxu2 %vm204_vm0, %v3054_v27  ;;  %v1348_v3 = vpop.f32.mrf.mxu0  ;;  %v3038_v27 = vld [vmem:[%s3304_s9 + $0x96] sm:$0xff] }
 0x14d   : >> { %3086 = vmatmul.msk.f32.gmra.mxu3 %vm204_vm0, %v3642_v18  ;;  %v3059_v55 = vld [vmem:[%s3304_s9 + $0x97] sm:$0xff] }
 0x14f   : >> { %v1156_v60 = vpop.f32.mrf.mxu2  ;;  %3108 = vmatmul.msk.f32.gmra.mxu0 %vm204_vm0, %v3837_v62 }
 0x150   : >> { %v1179_v53 = vadd.f32 %v1156_v60, %v1085_v59  ;;  %v1252_v5 = vpop.f32.mrf.mxu3 }
 0x151   : >> { %v1065_v47 = vpop.f32.mrf.mxu1 }
 0x152   : >> { %v1272_v2 = vadd.f32 %v1249_v57, %v1179_v53  ;;  %v1086_v61 = vadd.f32 %v1065_v47, %v3721_v30  ;;  %v3865_v30 = vld [vmem:[%s3304_s9 + $0xb0] sm:$0xff] }
 0x154   : >> { %v3846_v36 = vadd.f32 %v1342_v37, %v1272_v2  ;;  %3044 = vmatmul.msk.f32.gmra.mxu1 %vm204_vm0, %v3034_v6  ;;  %3065 = vmatmul.msk.f32.gmra.mxu2 %vm204_vm0, %v3055_v4  ;;  %v1351_v18 = vpop.f32.mrf.mxu0  ;;  %v3039_v4 = vld [vmem:[%s3304_s9 + $0x9e] sm:$0xff] }
 0x155   : >> { %3087 = vmatmul.msk.f32.gmra.mxu3 %vm204_vm0, %v3659_v33  ;;  %v3060_v2 = vld [vmem:[%s3304_s9 + $0x9f] sm:$0xff] }
 0x157   : >> { %v1159_v7 = vpop.f32.mrf.mxu2  ;;  %3109 = vmatmul.msk.f32.gmra.mxu0 %vm204_vm0, %v3851_v19 }
 0x158   : >> { %v1180_v8 = vadd.f32 %v1159_v7, %v1086_v61  ;;  %v1255_v9 = vpop.f32.mrf.mxu3  ;;  %v3104_v7 = vld [vmem:[%s3304_s9 + $0xd0] sm:$0xff] }
 0x159   : >> { %v1068_v15 = vpop.f32.mrf.mxu1 }
 0x15a   : >> { %v1273_v22 = vadd.f32 %v1252_v5, %v1180_v8  ;;  %v1087_v20 = vadd.f32 %v1068_v15, %v3735_v39  ;;  %v3101_v39 = vld [vmem:[%s3304_s9 + $0xb8] sm:$0xff] }
 0x15c   : >> { %v3860_v14 = vadd.f32 %v1345_v16, %v1273_v22  ;;  %3045 = vmatmul.msk.f32.gmra.mxu1 %vm204_vm0, %v3035_v11  ;;  %3066 = vmatmul.msk.f32.gmra.mxu2 %vm204_vm0, %v3056_v12  ;;  %v1354_v33 = vpop.f32.mrf.mxu0  ;;  %v3040_v12 = vld [vmem:[%s3304_s9 + $0xa6] sm:$0xff] }
 0x15d   : >> { %3088 = vmatmul.msk.f32.gmra.mxu3 %vm204_vm0, %v3673_v46  ;;  %v3061_v22 = vld [vmem:[%s3304_s9 + $0xa7] sm:$0xff] }
 0x15f   : >> { %v1162_v21 = vpop.f32.mrf.mxu2  ;;  %3110 = vmatmul.msk.f32.gmra.mxu0 %vm204_vm0, %v3865_v30 }
 0x160   : >> { %v1181_v17 = vadd.f32 %v1162_v21, %v1087_v20  ;;  %v1258_v32 = vpop.f32.mrf.mxu3 }
 0x161   : >> { %v1071_v24 = vpop.f32.mrf.mxu1 }
 0x162   : >> { %v1274_v49 = vadd.f32 %v1255_v9, %v1181_v17  ;;  %v1088_v34 = vadd.f32 %v1071_v24, %v3749_v51  ;;  %v3102_v51 = vld [vmem:[%s3304_s9 + $0xc0] sm:$0xff] }
 0x164   : >> { %v3874_v37 = vadd.f32 %v1348_v3, %v1274_v49  ;;  %3046 = vmatmul.msk.f32.gmra.mxu1 %vm204_vm0, %v3036_v25  ;;  %3067 = vmatmul.msk.f32.gmra.mxu2 %vm204_vm0, %v3057_v10  ;;  %v1357_v46 = vpop.f32.mrf.mxu0  ;;  %v3041_v25 = vld [vmem:[%s3304_s9 + $0xae] sm:$0xff] }
 0x165   : >> { %3089 = vmatmul.msk.f32.gmra.mxu3 %vm204_vm0, %v3809_v29  ;;  %v3062_v10 = vld [vmem:[%s3304_s9 + $0xaf] sm:$0xff] }
 0x167   : >> { %v1165_v35 = vpop.f32.mrf.mxu2  ;;  %3111 = vmatmul.msk.f32.gmra.mxu0 %vm204_vm0, %v3101_v39 }
 0x168   : >> { %v1182_v44 = vadd.f32 %v1165_v35, %v1088_v34  ;;  %v1261_v38 = vpop.f32.mrf.mxu3 }
 0x169   : >> { %v1074_v40 = vpop.f32.mrf.mxu1 }
 0x16a   : >> { %v1275_v16 = vadd.f32 %v1258_v32, %v1182_v44  ;;  %v1089_v41 = vadd.f32 %v1074_v40, %v3763_v1  ;;  %v3103_v1 = vld [vmem:[%s3304_s9 + $0xc8] sm:$0xff]  ;;  %v3138_v40 = vld [vmem:[%s3304_s9 + $0x92] sm:$0xff] }
 0x16c   : >> { %v3885_v45 = vadd.f32 %v1351_v18, %v1275_v16  ;;  %3047 = vmatmul.msk.f32.gmra.mxu1 %vm204_vm0, %v3037_v54  ;;  %3068 = vmatmul.msk.f32.gmra.mxu2 %vm204_vm0, %v3058_v23  ;;  %v1360_v29 = vpop.f32.mrf.mxu0  ;;  %v3160_v23 = vld [vmem:[%s3304_s9 + $0x9b] sm:$0xff] }
 0x16d   : >> { %3090 = vmatmul.msk.f32.gmra.mxu3 %vm204_vm0, %v3823_v48 }
 0x16f   : >> { %v1168_v56 = vpop.f32.mrf.mxu2  ;;  %3112 = vmatmul.msk.f32.gmra.mxu0 %vm204_vm0, %v3102_v51 }
 0x170   : >> { %v1183_v57 = vadd.f32 %v1168_v56, %v1089_v41  ;;  %v1264_v52 = vpop.f32.mrf.mxu3 }
 0x171   : >> { %v1077_v58 = vpop.f32.mrf.mxu1 }
 0x172   : >> { %v1276_v3 = vadd.f32 %v1261_v38, %v1183_v57  ;;  %v1090_v60 = vadd.f32 %v1077_v58, %v3786_v42  ;;  %v3117_v38 = vld [vmem:[%s3304_s9 + $0x91] sm:$0xff]  ;;  %v3118_v57 = vld [vmem:[%s3304_s9 + $0x99] sm:$0xff] }
 0x174   : >> { %v3896_v59 = vadd.f32 %v1354_v33, %v1276_v3  ;;  %3048 = vmatmul.msk.f32.gmra.mxu1 %vm204_vm0, %v3038_v27  ;;  %3069 = vmatmul.msk.f32.gmra.mxu2 %vm204_vm0, %v3059_v55  ;;  %v1709_v48 = vpop.f32.mrf.mxu0  ;;  %v3161_v55 = vld [vmem:[%s3304_s9 + $0xa3] sm:$0xff] }
 0x175   : >> { %3091 = vmatmul.msk.f32.gmra.mxu3 %vm204_vm0, %v3837_v62 }
 0x177   : >> { %v1171_v53 = vpop.f32.mrf.mxu2  ;;  %3113 = vmatmul.msk.f32.gmra.mxu0 %vm204_vm0, %v3103_v1 }
 0x178   : >> { %v1184_v5 = vadd.f32 %v1171_v53, %v1090_v60  ;;  %v1267_v47 = vpop.f32.mrf.mxu3  ;;  %v3119_v60 = vld [vmem:[%s3304_s9 + $0xa1] sm:$0xff] }
 0x179   : >> { %v1080_v6 = vpop.f32.mrf.mxu1  ;;  %v3140_v53 = vld [vmem:[%s3304_s9 + $0xa2] sm:$0xff] }
 0x17a   : >> { %v1277_v18 = vadd.f32 %v1264_v52, %v1184_v5  ;;  %v1091_v42 = vadd.f32 %v1080_v6, %v3803_v28  ;;  %v3139_v52 = vld [vmem:[%s3304_s9 + $0x9a] sm:$0xff]  ;;  %v3162_v6 = vld [vmem:[%s3304_s9 + $0xab] sm:$0xff] }
 0x17c   : >> { %v3907_v61 = vadd.f32 %v1357_v46, %v1277_v18  ;;  %3049 = vmatmul.msk.f32.gmra.mxu1 %vm204_vm0, %v3039_v4  ;;  %3070 = vmatmul.msk.f32.gmra.mxu2 %vm204_vm0, %v3060_v2  ;;  %v1712_v62 = vpop.f32.mrf.mxu0  ;;  %v3159_v46 = vld [vmem:[%s3304_s9 + $0x93] sm:$0xff] }
 0x17d   : >> { %3092 = vmatmul.msk.f32.gmra.mxu3 %vm204_vm0, %v3851_v19 }
 0x17f   : >> { %v1174_v8 = vpop.f32.mrf.mxu2  ;;  %3114 = vmatmul.msk.f32.gmra.mxu0 %vm204_vm0, %v3104_v7 }
 0x180   : >> { %v1185_v9 = vadd.f32 %v1174_v8, %v1091_v42  ;;  %v1616_v15 = vpop.f32.mrf.mxu3  ;;  %v3120_v42 = vld [vmem:[%s3304_s9 + $0xa9] sm:$0xff] }
 0x181   : >> { %v1429_v11 = vpop.f32.mrf.mxu1  ;;  %v3141_v8 = vld [vmem:[%s3304_s9 + $0xaa] sm:$0xff] }
 0x182   : >> { %v1278_v33 = vadd.f32 %v1267_v47, %v1185_v9  ;;  %v1456_v28 = vadd.f32 %v1429_v11, %v3817_v43  ;;  %v3163_v11 = vld [vmem:[%s3304_s9 + $0xb3] sm:$0xff] }
 0x184   : >> { %v3918_v20 = vadd.f32 %v1360_v29, %v1278_v33  ;;  %3050 = vmatmul.msk.f32.gmra.mxu1 %vm204_vm0, %v3040_v12  ;;  %3071 = vmatmul.msk.f32.gmra.mxu2 %vm204_vm0, %v3061_v22  ;;  %v1715_v19 = vpop.f32.mrf.mxu0  ;;  %v3185_v33 = vld [vmem:[%s3304_s9 + $0xbc] sm:$0xff] }
 0x185   : >> { %3093 = vmatmul.msk.f32.gmra.mxu3 %vm204_vm0, %v3865_v30 }
 0x187   : >> { %v1522_v21 = vpop.f32.mrf.mxu2  ;;  %3190 = vmatmul.msk.f32.vlgmr.msra.gmra.mxu0 %vm204_vm0, %v3747_v50 }
 0x188   : >> { %v1549_v17 = vadd.f32 %v1522_v21, %v1456_v28  ;;  %v1619_v32 = vpop.f32.mrf.mxu3 }
 0x189   : >> { %v1432_v24 = vpop.f32.mrf.mxu1 }
 0x18a   : >> { %v1643_v49 = vadd.f32 %v1616_v15, %v1549_v17  ;;  %v1457_v50 = vadd.f32 %v1432_v24, %v3832_v26  ;;  %v3121_v17 = vld [vmem:[%s3304_s9 + $0xb1] sm:$0xff] }
 0x18c   : >> { %v3930_v39 = vadd.f32 %v1709_v48, %v1643_v49  ;;  %3051 = vmatmul.msk.f32.gmra.mxu1 %vm204_vm0, %v3041_v25  ;;  %3072 = vmatmul.msk.f32.gmra.mxu2 %vm204_vm0, %v3062_v10  ;;  %v1718_v43 = vpop.f32.mrf.mxu0  ;;  %v3164_v10 = vld [vmem:[%s3304_s9 + $0xbb] sm:$0xff] }
 0x18d   : >> { %3169 = vmatmul.msk.f32.vlgmr.msra.gmra.mxu3 %vm204_vm0, %v3159_v46 }
 0x18f   : >> { %v1525_v30 = vpop.f32.mrf.mxu2  ;;  %3191 = vmatmul.msk.f32.gmra.mxu0 %vm204_vm0, %v3761_v63 }
 0x190   : >> { %v1550_v34 = vadd.f32 %v1525_v30, %v1457_v50  ;;  %v1622_v35 = vpop.f32.mrf.mxu3 }
 0x191   : >> { %v1435_v44 = vpop.f32.mrf.mxu1 }
 0x192   : >> { %v1644_v54 = vadd.f32 %v1619_v32, %v1550_v34  ;;  %v1458_v63 = vadd.f32 %v1435_v44, %v3846_v36  ;;  %v3142_v32 = vld [vmem:[%s3304_s9 + $0xb2] sm:$0xff]  ;;  %v3143_v44 = vld [vmem:[%s3304_s9 + $0xba] sm:$0xff] }
 0x194   : >> { %v3941_v16 = vadd.f32 %v1712_v62, %v1644_v54  ;;  %3127 = vmatmul.msk.f32.vlgmr.msra.gmra.mxu1 %vm204_vm0, %v3117_v38  ;;  %3148 = vmatmul.msk.f32.vlgmr.msra.gmra.mxu2 %vm204_vm0, %v3138_v40  ;;  %v1721_v26 = vpop.f32.mrf.mxu0  ;;  %v3165_v54 = vld [vmem:[%s3304_s9 + $0xc3] sm:$0xff] }
 0x195   : >> { %3170 = vmatmul.msk.f32.gmra.mxu3 %vm204_vm0, %v3160_v23 }
 0x197   : >> { %v1528_v29 = vpop.f32.mrf.mxu2  ;;  %3192 = vmatmul.msk.f32.gmra.mxu0 %vm204_vm0, %v3784_v13 }
 0x198   : >> { %v1551_v51 = vadd.f32 %v1528_v29, %v1458_v63  ;;  %v1625_v41 = vpop.f32.mrf.mxu3  ;;  %v3187_v63 = vld [vmem:[%s3304_s9 + $0xcc] sm:$0xff] }
 0x199   : >> { %v1438_v56 = vpop.f32.mrf.mxu1 }
 0x19a   : >> { %v1459_v58 = vadd.f32 %v1438_v56, %v3860_v14  ;;  %v1645_v27 = vadd.f32 %v1622_v35, %v1551_v51  ;;  %v3122_v35 = vld [vmem:[%s3304_s9 + $0xb9] sm:$0xff]  ;;  %v3123_v56 = vld [vmem:[%s3304_s9 + $0xc1] sm:$0xff] }
 0x19c   : >> { %v3953_v3 = vadd.f32 %v1715_v19, %v1645_v27  ;;  %3128 = vmatmul.msk.f32.gmra.mxu1 %vm204_vm0, %v3118_v57  ;;  %3149 = vmatmul.msk.f32.gmra.mxu2 %vm204_vm0, %v3139_v52  ;;  %v1724_v36 = vpop.f32.mrf.mxu0  ;;  %v3144_v57 = vld [vmem:[%s3304_s9 + $0xc2] sm:$0xff]  ;;  %v3166_v27 = vld [vmem:[%s3304_s9 + $0xcb] sm:$0xff] }
 0x19d   : >> { %3171 = vmatmul.msk.f32.gmra.mxu3 %vm204_vm0, %v3161_v55 }
 0x19f   : >> { %v1531_v13 = vpop.f32.mrf.mxu2  ;;  %3193 = vmatmul.msk.f32.gmra.mxu0 %vm204_vm0, %v3801_v31  ;;  %v3184_v31 = vld [vmem:[%s3304_s9 + $0xb4] sm:$0xff] }
 0x1a0   : >> { %v1552_v48 = vadd.f32 %v1531_v13, %v1459_v58  ;;  %v1628_v1 = vpop.f32.mrf.mxu3  ;;  %v3188_v13 = vld [vmem:[%s3304_s9 + $0xd4] sm:$0xff] }
 0x1a1   : >> { %v1441_v14 = vpop.f32.mrf.mxu1 }
 0x1a2   : >> { %v1460_v5 = vadd.f32 %v1441_v14, %v3874_v37  ;;  %v1646_v47 = vadd.f32 %v1625_v41, %v1552_v48 }
 0x1a4   : >> { %v3964_v4 = vadd.f32 %v1718_v43, %v1646_v47  ;;  %3129 = vmatmul.msk.f32.gmra.mxu1 %vm204_vm0, %v3119_v60  ;;  %3150 = vmatmul.msk.f32.gmra.mxu2 %vm204_vm0, %v3140_v53  ;;  %v1727_v2 = vpop.f32.mrf.mxu0  ;;  %v3186_v43 = vld [vmem:[%s3304_s9 + $0xc4] sm:$0xff] }
 0x1a5   : >> { %3172 = vmatmul.msk.f32.gmra.mxu3 %vm204_vm0, %v3162_v6  ;;  %v3124_v60 = vld [vmem:[%s3304_s9 + $0xc9] sm:$0xff]  ;;  %v3167_v6 = vld [vmem:[%s3304_s9 + $0xd3] sm:$0xff] }
 0x1a6   : >> { %v3145_v53 = vld [vmem:[%s3304_s9 + $0xca] sm:$0xff] }
 0x1a7   : >> { %v1534_v18 = vpop.f32.mrf.mxu2  ;;  %3194 = vmatmul.msk.f32.gmra.mxu0 %vm204_vm0, %v3184_v31 }
 0x1a8   : >> { %v1553_v62 = vadd.f32 %v1534_v18, %v1460_v5  ;;  %v1631_v7 = vpop.f32.mrf.mxu3 }
 0x1a9   : >> { %v1444_v37 = vpop.f32.mrf.mxu1 }
 0x1aa   : >> { %v1461_v9 = vadd.f32 %v1444_v37, %v3885_v45  ;;  %v1647_v15 = vadd.f32 %v1628_v1, %v1553_v62 }
 0x1ac   : >> { %v3975_v12 = vadd.f32 %v1721_v26, %v1647_v15  ;;  %3130 = vmatmul.msk.f32.gmra.mxu1 %vm204_vm0, %v3120_v42  ;;  %3151 = vmatmul.msk.f32.gmra.mxu2 %vm204_vm0, %v3141_v8  ;;  %v1730_v22 = vpop.f32.mrf.mxu0  ;;  %v3125_v42 = vld [vmem:[%s3304_s9 + $0xd1] sm:$0xff] }
 0x1ad   : >> { %3173 = vmatmul.msk.f32.gmra.mxu3 %vm204_vm0, %v3163_v11  ;;  %v3146_v8 = vld [vmem:[%s3304_s9 + $0xd2] sm:$0xff]  ;;  %s3199_s9 = sshll.u32 %s3237_s24, 4  ;;  %s177_s24 = sadd.s32 1, %s3237_s24  }
 0x1ae   : >> { %s2527_s5 = scalar_lea.vmem %s3275_s20, %s3199_s9  ;;  %p174_p4 = scmp.ge.s32.totalorder %s177_s24, 16  }
 0x1af   : >> { %v1537_v19 = vpop.f32.mrf.mxu2  ;;  %3195 = vmatmul.msk.f32.gmra.mxu0 %vm204_vm0, %v3185_v33 }
 0x1b0   : >> { %v1554_v28 = vadd.f32 %v1537_v19, %v1461_v9  ;;  %v1634_v21 = vpop.f32.mrf.mxu3 }
 0x1b1   : >> { %v1447_v45 = vpop.f32.mrf.mxu1 }
 0x1b2   : >> { %v1462_v24 = vadd.f32 %v1447_v45, %v3896_v59  ;;  %v1648_v25 = vadd.f32 %v1631_v7, %v1554_v28 }
 0x1b4   : >> { %v3986_v49 = vadd.f32 %v1724_v36, %v1648_v25  ;;  %3131 = vmatmul.msk.f32.gmra.mxu1 %vm204_vm0, %v3121_v17  ;;  %3152 = vmatmul.msk.f32.gmra.mxu2 %vm204_vm0, %v3142_v32  ;;  %v1733_v46 = vpop.f32.mrf.mxu0 }
 0x1b5   : >> { %3174 = vmatmul.msk.f32.gmra.mxu3 %vm204_vm0, %v3164_v10 }
 0x1b7   : >> { %v1540_v50 = vpop.f32.mrf.mxu2  ;;  %3196 = vmatmul.msk.f32.gmra.mxu0 %vm204_vm0, %v3186_v43 }
 0x1b8   : >> { %v1555_v30 = vadd.f32 %v1540_v50, %v1462_v24  ;;  %v1637_v34 = vpop.f32.mrf.mxu3 }
 0x1b9   : >> { %v1450_v59 = vpop.f32.mrf.mxu1 }
 0x1ba   : >> { %v1463_v38 = vadd.f32 %v1450_v59, %v3907_v61  ;;  %v1649_v40 = vadd.f32 %v1634_v21, %v1555_v30 }
 0x1bc   : >> { %v3997_v23 = vadd.f32 %v1727_v2, %v1649_v40  ;;  %3132 = vmatmul.msk.f32.gmra.mxu1 %vm204_vm0, %v3122_v35  ;;  %3153 = vmatmul.msk.f32.gmra.mxu2 %vm204_vm0, %v3143_v44  ;;  %v2082_v26 = vpop.f32.mrf.mxu0 }
 0x1bd   : >> { %3175 = vmatmul.msk.f32.gmra.mxu3 %vm204_vm0, %v3165_v54 }
 0x1bf   : >> { %v1543_v29 = vpop.f32.mrf.mxu2  ;;  %3197 = vmatmul.msk.f32.gmra.mxu0 %vm204_vm0, %v3187_v63 }
 0x1c0   : >> { %v1556_v51 = vadd.f32 %v1543_v29, %v1463_v38  ;;  %v1640_v41 = vpop.f32.mrf.mxu3 }
 0x1c1   : >> { %v1453_v61 = vpop.f32.mrf.mxu1 }
 0x1c2   : >> { %v1464_v52 = vadd.f32 %v1453_v61, %v3918_v20  ;;  %v1650_v58 = vadd.f32 %v1637_v34, %v1556_v51 }
 0x1c4   : >> { %v4008_v55 = vadd.f32 %v1730_v22, %v1650_v58  ;;  %3133 = vmatmul.msk.f32.gmra.mxu1 %vm204_vm0, %v3123_v56  ;;  %3154 = vmatmul.msk.f32.gmra.mxu2 %vm204_vm0, %v3144_v57  ;;  %v2085_v36 = vpop.f32.mrf.mxu0 }
 0x1c5   : >> { %3176 = vmatmul.msk.f32.gmra.mxu3 %vm204_vm0, %v3166_v27 }
 0x1c7   : >> { %v1546_v48 = vpop.f32.mrf.mxu2  ;;  %3198 = vmatmul.msk.f32.gmra.mxu0 %vm204_vm0, %v3188_v13 }
 0x1c8   : >> { %v1557_v1 = vadd.f32 %v1546_v48, %v1464_v52  ;;  %v1988_v14 = vpop.f32.mrf.mxu3 }
 0x1c9   : >> { %v1802_v20 = vpop.f32.mrf.mxu1 }
 0x1ca   : >> { %v1651_v5 = vadd.f32 %v1640_v41, %v1557_v1  ;;  %v1829_v47 = vadd.f32 %v1802_v20, %v3930_v39 }
 0x1cc   : >> { %v4019_v2 = vadd.f32 %v1733_v46, %v1651_v5  ;;  %3134 = vmatmul.msk.f32.gmra.mxu1 %vm204_vm0, %v3124_v60  ;;  %3155 = vmatmul.msk.f32.gmra.mxu2 %vm204_vm0, %v3145_v53  ;;  %v2088_v31 = vpop.f32.mrf.mxu0 }
 0x1cd   : >> { %3177 = vmatmul.msk.f32.gmra.mxu3 %vm204_vm0, %v3167_v6 }
 0x1cf   : >> { %v1895_v18 = vpop.f32.mrf.mxu2 }
 0x1d0   : >> { %v1922_v62 = vadd.f32 %v1895_v18, %v1829_v47  ;;  %v1991_v7 = vpop.f32.mrf.mxu3 }
 0x1d1   : >> { %v1805_v37 = vpop.f32.mrf.mxu1 }
 0x1d2   : >> { %v1830_v9 = vadd.f32 %v1805_v37, %v3941_v16  ;;  %v2015_v15 = vadd.f32 %v1988_v14, %v1922_v62 }
 0x1d4   : >> { %v4027_v39 = vadd.f32 %v2082_v26, %v2015_v15  ;;  %3135 = vmatmul.msk.f32.gmra.mxu1 %vm204_vm0, %v3125_v42  ;;  %3156 = vmatmul.msk.f32.gmra.mxu2 %vm204_vm0, %v3146_v8  ;;  %v2091_v11 = vpop.f32.mrf.mxu0 }
 0x1d7   : >> { %v1898_v22 = vpop.f32.mrf.mxu2 }
 0x1d8   : >> { %v1923_v33 = vadd.f32 %v1898_v22, %v1830_v9  ;;  %v1994_v19 = vpop.f32.mrf.mxu3 }
 0x1d9   : >> { %v1808_v28 = vpop.f32.mrf.mxu1 }
 0x1da   : >> { %v1831_v21 = vadd.f32 %v1808_v28, %v3953_v3  ;;  %v2016_v45 = vadd.f32 %v1991_v7, %v1923_v33 }
 0x1dc   : >> { %v4032_v17 = vadd.f32 %v2085_v36, %v2016_v45  ;;  %v2094_v32 = vpop.f32.mrf.mxu0 }
 0x1df   : >> { %v1901_v24 = vpop.f32.mrf.mxu2 }
 0x1e0   : >> { %v1924_v16 = vadd.f32 %v1901_v24, %v1831_v21  ;;  %v1997_v25 = vpop.f32.mrf.mxu3 }
 0x1e1   : >> { %v1811_v10 = vpop.f32.mrf.mxu1 }
 0x1e2   : >> { %v1832_v46 = vadd.f32 %v1811_v10, %v3964_v4  ;;  %v2017_v43 = vadd.f32 %v1994_v19, %v1924_v16 }
 0x1e4   : >> { %v4035_v50 = vadd.f32 %v2088_v31, %v2017_v43  ;;  %v2097_v30 = vpop.f32.mrf.mxu0 }
 0x1e7   : >> { %v1904_v34 = vpop.f32.mrf.mxu2 }
 0x1e8   : >> { %v1925_v59 = vadd.f32 %v1904_v34, %v1832_v46  ;;  %v2000_v35 = vpop.f32.mrf.mxu3 }
 0x1e9   : >> { %v1814_v44 = vpop.f32.mrf.mxu1 }
 0x1ea   : >> { %v1833_v3 = vadd.f32 %v1814_v44, %v3975_v12  ;;  %v2018_v38 = vadd.f32 %v1997_v25, %v1925_v59 }
 0x1ec   : >> { %v4038_v40 = vadd.f32 %v2091_v11, %v2018_v38  ;;  %v2100_v54 = vpop.f32.mrf.mxu0 }
 0x1ef   : >> { %v1907_v26 = vpop.f32.mrf.mxu2 }
 0x1f0   : >> { %v1926_v63 = vadd.f32 %v1907_v26, %v1833_v3  ;;  %v2003_v29 = vpop.f32.mrf.mxu3 }
 0x1f1   : >> { %v1817_v51 = vpop.f32.mrf.mxu1 }
 0x1f2   : >> { %v1834_v4 = vadd.f32 %v1817_v51, %v3986_v49  ;;  %v2019_v41 = vadd.f32 %v2000_v35, %v1926_v63 }
 0x1f4   : >> { %v4041_v61 = vadd.f32 %v2094_v32, %v2019_v41  ;;  %v2103_v56 = vpop.f32.mrf.mxu0 }
 0x1f7   : >> { %v1910_v57 = vpop.f32.mrf.mxu2 }
 0x1f8   : >> { %v1927_v52 = vadd.f32 %v1910_v57, %v1834_v4  ;;  %v2006_v58 = vpop.f32.mrf.mxu3 }
 0x1f9   : >> { %v1820_v27 = vpop.f32.mrf.mxu1 }
 0x1fa   : >> { %v1835_v12 = vadd.f32 %v1820_v27, %v3997_v23  ;;  %v2020_v36 = vadd.f32 %v2003_v29, %v1927_v52 }
 0x1fc   : >> { %v4044_v13 = vadd.f32 %v2097_v30, %v2020_v36  ;;  %v2106_v1 = vpop.f32.mrf.mxu0 }
 0x1ff   : >> { %v1913_v48 = vpop.f32.mrf.mxu2 }
 0x200   : >> { %v1928_v14 = vadd.f32 %v1913_v48, %v1835_v12  ;;  %v2009_v20 = vpop.f32.mrf.mxu3 }
 0x201   : >> { %v1823_v60 = vpop.f32.mrf.mxu1 }
 0x202   : >> { %v1836_v49 = vadd.f32 %v1823_v60, %v4008_v55  ;;  %v2021_v53 = vadd.f32 %v2006_v58, %v1928_v14 }
 0x204   : >> { %v4047_v5 = vadd.f32 %v2100_v54, %v2021_v53  ;;  %v2454_v62 = vpop.f32.mrf.mxu0 }
 0x207   : >> { %v1916_v47 = vpop.f32.mrf.mxu2 }
 0x208   : >> { %v1929_v6 = vadd.f32 %v1916_v47, %v1836_v49  ;;  %v2012_v31 = vpop.f32.mrf.mxu3 }
 0x209   : >> { %v1826_v18 = vpop.f32.mrf.mxu1 }
 0x20a   : >> { %v1837_v23 = vadd.f32 %v1826_v18, %v4019_v2  ;;  %v2022_v7 = vadd.f32 %v2009_v20, %v1929_v6 }
 0x20c   : >> { %v4050_v37 = vadd.f32 %v2103_v56, %v2022_v7  ;;  %v2457_v22 = vpop.f32.mrf.mxu0 }
 0x20f   : >> { %v1919_v42 = vpop.f32.mrf.mxu2 }
 0x210   : >> { %v1930_v8 = vadd.f32 %v1919_v42, %v1837_v23  ;;  %v2361_v9 = vpop.f32.mrf.mxu3 }
 0x211   : >> { %v2175_v15 = vpop.f32.mrf.mxu1 }
 0x212   : >> { %v2023_v11 = vadd.f32 %v2012_v31, %v1930_v8  ;;  %v2202_v33 = vadd.f32 %v2175_v15, %v4027_v39 }
 0x214   : >> { %v4052_v55 = vadd.f32 %v2106_v1, %v2023_v11  ;;  %v2460_v24 = vpop.f32.mrf.mxu0 }
 0x217   : >> { %v2268_v19 = vpop.f32.mrf.mxu2 }
 0x218   : >> { %v2295_v28 = vadd.f32 %v2268_v19, %v2202_v33  ;;  %v2364_v21 = vpop.f32.mrf.mxu3 }
 0x219   : >> { %v2178_v45 = vpop.f32.mrf.mxu1 }
 0x21a   : >> { %v2388_v32 = vadd.f32 %v2361_v9, %v2295_v28  ;;  %v2203_v16 = vadd.f32 %v2178_v45, %v4032_v17 }
 0x21c   : >> { %v2481_v2 = vadd.f32 %v2454_v62, %v2388_v32  ;;  %v2463_v35 = vpop.f32.mrf.mxu0 }
 0x21e   : >> { %2491 = vst.msk [vmem:[#allocation2] sm:$0xff] %vm2490_vm1, %v2481_v2  ;;  %v2522_v2 = vperm.slane %v3270_v0, 0 }
 0x21f   : >> { %v2271_v25 = vpop.f32.mrf.mxu2 }
 0x220   : >> { %v2296_v10 = vadd.f32 %v2271_v25, %v2203_v16  ;;  %v2367_v46 = vpop.f32.mrf.mxu3 }
 0x221   : >> { %v2181_v43 = vpop.f32.mrf.mxu1 }
 0x222   : >> { %v2389_v30 = vadd.f32 %v2364_v21, %v2296_v10  ;;  %v2204_v39 = vadd.f32 %v2181_v43, %v4035_v50 }
 0x224   : >> { %v2482_v34 = vadd.f32 %v2457_v22, %v2389_v30  ;;  %v2466_v41 = vpop.f32.mrf.mxu0 }
 0x226   : >> { %2492 = vst.msk [vmem:[#allocation2 + $0x8] sm:$0xff] %vm2490_vm1, %v2482_v34 }
 0x227   : >> { %v2274_v59 = vpop.f32.mrf.mxu2 }
 0x228   : >> { %v2297_v44 = vadd.f32 %v2274_v59, %v2204_v39  ;;  %v2370_v3 = vpop.f32.mrf.mxu3 }
 0x229   : >> { %v2184_v38 = vpop.f32.mrf.mxu1 }
 0x22a   : >> { %v2390_v54 = vadd.f32 %v2367_v46, %v2297_v44  ;;  %v2205_v17 = vadd.f32 %v2184_v38, %v4038_v40 }
 0x22c   : >> { %v2483_v26 = vadd.f32 %v2460_v24, %v2390_v54  ;;  %v2469_v48 = vpop.f32.mrf.mxu0 }
 0x22d   : >> { %v2500_v22 = vld [vmem:[#allocation2] ss:$2 sm:$0xff] }
 0x22e   : >> { %2493 = vst.msk [vmem:[#allocation2 + $0x10] sm:$0xff] %vm2490_vm1, %v2483_v26 }
 0x22f   : >> { %v2277_v63 = vpop.f32.mrf.mxu2 }
 0x230   : >> { %v2298_v29 = vadd.f32 %v2277_v63, %v2205_v17  ;;  %v2373_v51 = vpop.f32.mrf.mxu3 }
 0x231   : >> { %v2187_v4 = vpop.f32.mrf.mxu1 }
 0x232   : >> { %v2391_v56 = vadd.f32 %v2370_v3, %v2298_v29  ;;  %v2206_v57 = vadd.f32 %v2187_v4, %v4041_v61 }
 0x234   : >> { %v2484_v50 = vadd.f32 %v2463_v35, %v2391_v56  ;;  %v2472_v61 = vpop.f32.mrf.mxu0 }
 0x236   : >> { %2494 = vst.msk [vmem:[#allocation2 + $0x18] sm:$0xff] %vm2490_vm1, %v2484_v50 }
 0x237   : >> { %v2280_v52 = vpop.f32.mrf.mxu2 }
 0x238   : >> { %v2299_v58 = vadd.f32 %v2280_v52, %v2206_v57  ;;  %v2376_v12 = vpop.f32.mrf.mxu3 }
 0x239   : >> { %v2190_v27 = vpop.f32.mrf.mxu1 }
 0x23a   : >> { %v2392_v36 = vadd.f32 %v2373_v51, %v2299_v58  ;;  %v2207_v1 = vadd.f32 %v2190_v27, %v4044_v13 }
 0x23c   : >> { %v2485_v40 = vadd.f32 %v2466_v41, %v2392_v36  ;;  %v2475_v9 = vpop.f32.mrf.mxu0 }
 0x23d   : >> { %v2502_v39 = vld [vmem:[#allocation2 + $0x10] ss:$2 sm:$0xff]  ;;  %v2506_v59 = vld [vmem:[#allocation2 + $0x11] ss:$2 sm:$0xff] }
 0x23e   : >> { %2495 = vst.msk [vmem:[#allocation2 + $0x20] sm:$0xff] %vm2490_vm1, %v2485_v40 }
 0x23f   : >> { %v2283_v14 = vpop.f32.mrf.mxu2 }
 0x240   : >> { %v2300_v20 = vadd.f32 %v2283_v14, %v2207_v1  ;;  %v2379_v53 = vpop.f32.mrf.mxu3 }
 0x241   : >> { %v2193_v60 = vpop.f32.mrf.mxu1 }
 0x242   : >> { %v2393_v49 = vadd.f32 %v2376_v12, %v2300_v20  ;;  %v2208_v6 = vadd.f32 %v2193_v60, %v4047_v5  ;;  %v2504_v5 = vld [vmem:[#allocation2 + $0x1] ss:$2 sm:$0xff] }
 0x243   : >> { %v2515_v45 = vmax.f32 %v2500_v22, %v2504_v5 }
 0x244   : >> { %v2486_v47 = vadd.f32 %v2469_v48, %v2393_v49  ;;  %v2478_v46 = vpop.f32.mrf.mxu0 }
 0x246   : >> { %2496 = vst.msk [vmem:[#allocation2 + $0x28] sm:$0xff] %vm2490_vm1, %v2486_v47 }
 0x247   : >> { %v2286_v31 = vpop.f32.mrf.mxu2 }
 0x248   : >> { %v2301_v18 = vadd.f32 %v2286_v31, %v2208_v6  ;;  %v2382_v42 = vpop.f32.mrf.mxu3 }
 0x249   : >> { %v2196_v62 = vpop.f32.mrf.mxu1 }
 0x24a   : >> { %v2394_v23 = vadd.f32 %v2379_v53, %v2301_v18  ;;  %v2209_v13 = vadd.f32 %v2196_v62, %v4050_v37 }
 0x24c   : >> { %v2487_v7 = vadd.f32 %v2472_v61, %v2394_v23 }
 0x24e   : >> { %2497 = vst.msk [vmem:[#allocation2 + $0x30] sm:$0xff] %vm2490_vm1, %v2487_v7 }
 0x24f   : >> { %v2289_v8 = vpop.f32.mrf.mxu2 }
 0x250   : >> { %v2302_v15 = vadd.f32 %v2289_v8, %v2209_v13  ;;  %v2385_v16 = vpop.f32.mrf.mxu3 }
 0x251   : >> { %v2199_v33 = vpop.f32.mrf.mxu1 }
 0x252   : >> { %v2395_v11 = vadd.f32 %v2382_v42, %v2302_v15  ;;  %v2210_v37 = vadd.f32 %v2199_v33, %v4052_v55  ;;  %v2516_v55 = vmax.f32 %v2502_v39, %v2506_v59 }
 0x254   : >> { %v2488_v19 = vadd.f32 %v2475_v9, %v2395_v11 }
 0x255   : >> { %v2508_v28 = vld [vmem:[#allocation2 + $0x24] ss:$2 sm:$0xff]  ;;  %v2512_v21 = vld [vmem:[#allocation2 + $0x25] ss:$2 sm:$0xff] }
 0x256   : >> { %v2517_v32 = vmax.f32 %v2508_v28, %v2512_v21  ;;  %2498 = vst.msk [vmem:[#allocation2 + $0x38] sm:$0xff] %vm2490_vm1, %v2488_v19 }
 0x257   : >> { %v2292_v24 = vpop.f32.mrf.mxu2 }
 0x258   : >> { %v2519_v25 = vmax.f32 %v2515_v45, %v2517_v32  ;;  %v2303_v10 = vadd.f32 %v2292_v24, %v2210_v37 }
 0x25a   : >> { %v2524_v43 = vadd.f32 %v2522_v2, %v2519_v25  ;;  %v2396_v30 = vadd.f32 %v2385_v16, %v2303_v10 }
 0x25c   : >> { %2528 = vst.msk [vmem:[%s2527_s5] sm:$0xff] %vm2490_vm1, %v2524_v43  ;;  %v2489_v34 = vadd.f32 %v2478_v46, %v2396_v30 }
 0x25e   : >> { %2499 = vst.msk [vmem:[#allocation2 + $0x40] sm:$0xff] %vm2490_vm1, %v2489_v34 }
 0x265   : >> { %v2510_v35 = vld [vmem:[#allocation2 + $0x34] ss:$2 sm:$0xff]  ;;  %v2514_v44 = vld [vmem:[#allocation2 + $0x35] ss:$2 sm:$0xff] }
 0x266   : >> { %v2518_v3 = vmax.f32 %v2510_v35, %v2514_v44 }
 0x268   : >> { %v2520_v38 = vmax.f32 %v2516_v55, %v2518_v3  ;;  %176 = sbr.rel (!%p174_p4) target bundleno = 15 (0xf), region = 126 }
 0x26a   : >> { %v2525_v54 = vadd.f32 %v2522_v2, %v2520_v38 }
 0x26c   : >> { %2529 = vst.msk [vmem:[%s2527_s5 + $0x8] sm:$0xff] %vm2490_vm1, %v2525_v54 }
 0x26d PF: > { %s13_s12 = sadd.s32 1, %s3233_s12  }
 0x26e   : > { %p10_p5 = scmp.ge.s32.totalorder %s13_s12, 4  }
 0x270   :  { %12 = sbr.rel (!%p10_p5) target bundleno = 1 (0x1), region = 137 }

// kernel: my_module_forward.5
= control target key start
LH: loop header
LB: loop body
LE: loop exit
PB: predicated region body
PF: predicated region fallthrough
CT: control target
= control target key end

     0   :  { %s3676_s12 = smov 0   ;;  %s4917_s0 = inlined_call_operand.vmem [shape: f32[2,420,32], index: 0, kind: input, shape index: {}]   ;;  %s4918_s1 = inlined_call_operand.vmem [shape: f32[25,32,32], index: 1, kind: input, shape index: {}]   ;;  %s4919_s2 = inlined_call_operand.vmem [shape: f32[1,32], index: 2, kind: input, shape index: {}]   ;;  %s4920_s3 = inlined_call_operand.vmem [shape: f32[2,8,8,32], index: 3, kind: output, shape index: {}]  }
   0x1 LB: > { %s2967_s13 = sadd.s32 4294967295, %s3650_s12   ;;  %p2971_p0 = scmp.ge.s32.totalorder %s3650_s12, 1  ;;  %s3650_s12 = sphi %s3676_s12, %s13_s12  }
   0x2   : > { %p137_p1 = scmp.lt.s32.totalorder %s3650_s12, 3 }
   0x4   : > { %p138_p2 = pnand %p2971_p0, %p137_p1 }
   0x5   : > { %p161_p3 = scmp.lt.s32.totalorder (!%p138_p2), %s2967_s13, 1  ;;  %s3699_s24 = smov (!%p138_p2), 0  }
   0x6   : > { %141 = sbr.rel (%p138_p2) target bundleno = 670 (0x29e), region = 32 }
   0xb   : > { %v3687_v0 = vld [vmem:[%s4919_s2] sm:$0x1]  ;;  %s4924_s13 = smov (!%p161_p3, %s2967_s13), 1 }
   0xc   : > { %4921 = vst [vmem:[#allocation3_spill] sm:$0xff] %v3687_v0  ;;  %s3623_s16 = smul.u32 424, %s4924_s13  ;;  %s3608_s17 = sshll.u32 %s4924_s13, 6 }
   0xd   : > { %s3692_s20 = scalar_lea.vmem %s4920_s3, %s3608_s17 }
   0xe   : > { %s3697_s23 = scalar_lea.vmem %s4917_s0, %s3623_s16 }
   0xf LB: >> { %v2988_v1 = vld [vmem:[%s4918_s1 + $0x38] sm:$0xff]  ;;  %v2987_v2 = vld [vmem:[%s4918_s1 + $0x30] sm:$0xff]  ;;  %v2986_v3 = vld [vmem:[%s4918_s1 + $0x28] sm:$0xff]  ;;  %s179_s4 = smul.u32 80, %s3654_s24  ;;  %vm212_vm0 = vcmask 261120   ;;  %s3654_s24 = sphi %s3699_s24, %s177_s24  }
  0x10   : >> { %3611 = vmatpush.msra.mxu1 %v2988_v1  ;;  %3613 = vmatpush.msra.mxu3 %v2988_v1  ;;  %v2985_v4 = vld [vmem:[%s4918_s1 + $0x20] sm:$0xff]  ;;  %v3046_v7 = vld [vmem:[%s4918_s1 + $0x78] sm:$0xff]  ;;  %v3045_v9 = vld [vmem:[%s4918_s1 + $0x70] sm:$0xff] }
  0x11   : >> { %255 = vmatpush.msra.mxu0 %v2988_v1  ;;  %3612 = vmatpush.msra.mxu2 %v2988_v1  ;;  %s3718_s7 = scalar_lea.vmem %s3697_s23, %s179_s4  ;;  %v194_v8 = vld [vmem:[%s4918_s1 + $0x18] sm:$0xff]  ;;  %v193_v11 = vld [vmem:[%s4918_s1 + $0x10] sm:$0xff]  ;;  %v3044_v14 = vld [vmem:[%s4918_s1 + $0x68] sm:$0xff] }
  0x12   : >> { %3614 = vmatpush.msra.mxu1 %v2987_v2  ;;  %3616 = vmatpush.msra.mxu3 %v2987_v2  ;;  %v2978_v5 = vld [vmem:[%s3718_s7 + $0x19] sm:$0xff]  ;;  %v2975_v10 = vld [vmem:[%s3718_s7 + $0x1] sm:$0xff]  ;;  %v3744_v13 = vld [vmem:[%s3718_s7 + $0x31] sm:$0xff] }
  0x13   : >> { %256 = vmatpush.msra.mxu0 %v2987_v2  ;;  %3615 = vmatpush.msra.mxu2 %v2987_v2  ;;  %v3722_v6 = vld [vmem:[%s3718_s7 + $0x39] sm:$0xff]  ;;  %v192_v16 = vld [vmem:[%s4918_s1 + $0x8] sm:$0xff]  ;;  %v3069_v17 = vld [vmem:[%s4918_s1 + $0x90] sm:$0xff] }
  0x14   : >> { %3617 = vmatpush.msra.mxu1 %v2986_v3  ;;  %3619 = vmatpush.msra.mxu3 %v2986_v3  ;;  %v3070_v12 = vld [vmem:[%s4918_s1 + $0x98] sm:$0xff]  ;;  %v3043_v18 = vld [vmem:[%s4918_s1 + $0x60] sm:$0xff]  ;;  %v3021_v21 = vld [vmem:[%s4918_s1 + $0x50] sm:$0xff] }
  0x15   : >> { %257 = vmatpush.msra.mxu0 %v2986_v3  ;;  %3618 = vmatpush.msra.mxu2 %v2986_v3  ;;  %v3022_v15 = vld [vmem:[%s4918_s1 + $0x58] sm:$0xff]  ;;  %v2979_v19 = vld [vmem:[%s3718_s7 + $0x21] sm:$0xff]  ;;  %v2976_v25 = vld [vmem:[%s3718_s7 + $0x9] sm:$0xff] }
  0x16   : >> { %3620 = vmatpush.msra.mxu1 %v2985_v4  ;;  %3622 = vmatpush.msra.mxu3 %v2985_v4  ;;  %v3764_v20 = vld [vmem:[%s3718_s7 + $0x41] sm:$0xff]  ;;  %v3148_v24 = vld [vmem:[%s4918_s1 + $0xf8] sm:$0xff]  ;;  %v3147_v32 = vld [vmem:[%s4918_s1 + $0xf0] sm:$0xff] }
  0x17   : >> { %2992 = vmatmul.msk.f32.vlgmr.msra.gmra.mxu1 %vm212_vm0, %v2978_v5  ;;  %2996 = vmatmul.msk.f32.vlgmr.msra.gmra.mxu3 %vm212_vm0, %v3722_v6  ;;  %v191_v22 = vld [vmem:[%s4918_s1] sm:$0xff]  ;;  %v3068_v23 = vld [vmem:[%s4918_s1 + $0x88] sm:$0xff]  ;;  %v3096_v28 = vld [vmem:[%s4918_s1 + $0xb8] sm:$0xff] }
  0x18   : >> { %530 = vmatpush.msrb.mxu3 %v3046_v7  ;;  %332 = vmatpush.msrb.mxu1 %v194_v8  ;;  %v3020_v26 = vld [vmem:[%s4918_s1 + $0x48] sm:$0xff]  ;;  %v3067_v27 = vld [vmem:[%s4918_s1 + $0x80] sm:$0xff]  ;;  %v3174_v30 = vld [vmem:[%s4918_s1 + $0x118] sm:$0xff] }
  0x19   : >> { %258 = vmatpush.msra.mxu0 %v2985_v4  ;;  %3621 = vmatpush.msra.mxu2 %v2985_v4  ;;  %v3019_v29 = vld [vmem:[%s4918_s1 + $0x40] sm:$0xff]  ;;  %v3122_v33 = vld [vmem:[%s4918_s1 + $0xd8] sm:$0xff]  ;;  %v3095_v34 = vld [vmem:[%s4918_s1 + $0xb0] sm:$0xff] }
  0x1a   : >> { %531 = vmatpush.msrb.mxu3 %v3045_v9  ;;  %2989 = vmatmul.msk.f32.vlgmr.msra.gmra.mxu0 %vm212_vm0, %v2975_v10  ;;  %v3009_v31 = vld [vmem:[%s3718_s7 + $0x2] sm:$0xff]  ;;  %v3121_v37 = vld [vmem:[%s4918_s1 + $0xd0] sm:$0xff]  ;;  %v3012_v51 = vld [vmem:[%s3718_s7 + $0x1a] sm:$0xff] }
  0x1b   : >> { %333 = vmatpush.msrb.mxu1 %v193_v11  ;;  %634 = vmatpush.msrb.mxu0 %v3070_v12  ;;  %v3811_v35 = vld [vmem:[%s3718_s7 + $0x29] sm:$0xff]  ;;  %v2977_v38 = vld [vmem:[%s3718_s7 + $0x11] sm:$0xff]  ;;  %v181_v41 = vld [vmem:[%s3718_s7] sm:$0xff] }
  0x1c   : >> { %2995 = vmatmul.msk.f32.vlgmr.msra.gmra.mxu2 %vm212_vm0, %v3744_v13  ;;  %532 = vmatpush.msrb.mxu3 %v3044_v14  ;;  %v3814_v36 = vld [vmem:[%s3718_s7 + $0x49] sm:$0xff]  ;;  %v3011_v45 = vld [vmem:[%s3718_s7 + $0x12] sm:$0xff]  ;;  %v3036_v58 = vld [vmem:[%s3718_s7 + $0x1b] sm:$0xff] }
  0x1d   : >> { %426 = vmatpush.msrb.mxu2 %v3022_v15  ;;  %334 = vmatpush.msrb.mxu1 %v192_v16  ;;  %v3173_v39 = vld [vmem:[%s4918_s1 + $0x110] sm:$0xff]  ;;  %v3033_v42 = vld [vmem:[%s3718_s7 + $0x3] sm:$0xff]  ;;  %v3870_v57 = vld [vmem:[%s3718_s7 + $0x18] sm:$0xff] }
  0x1e   : >> { %635 = vmatpush.msrb.mxu0 %v3069_v17  ;;  %533 = vmatpush.msrb.mxu3 %v3043_v18  ;;  %v3010_v40 = vld [vmem:[%s3718_s7 + $0xa] sm:$0xff]  ;;  %v3035_v53 = vld [vmem:[%s3718_s7 + $0x13] sm:$0xff]  ;;  %v3013_v56 = vld [vmem:[%s3718_s7 + $0x22] sm:$0xff] }
  0x1f   : >> { %2993 = vmatmul.msk.f32.gmra.mxu1 %vm212_vm0, %v2979_v19  ;;  %2997 = vmatmul.msk.f32.gmra.mxu3 %vm212_vm0, %v3764_v20  ;;  %v3057_v43 = vld [vmem:[%s3718_s7 + $0x4] sm:$0xff]  ;;  %v3058_v48 = vld [vmem:[%s3718_s7 + $0xc] sm:$0xff]  ;;  %v3861_v54 = vld [vmem:[%s3718_s7 + $0x14] sm:$0xff] }
  0x20   : >> { %427 = vmatpush.msrb.mxu2 %v3021_v21  ;;  %335 = vmatpush.msrb.mxu1 %v191_v22  ;;  %v3120_v44 = vld [vmem:[%s4918_s1 + $0xc8] sm:$0xff]  ;;  %v183_v52 = vld [vmem:[%s3718_s7 + $0x10] sm:$0xff]  ;;  %v3878_v59 = vld [vmem:[%s3718_s7 + $0x1c] sm:$0xff] }
  0x21   : >> { %636 = vmatpush.msrb.mxu0 %v3068_v23  ;;  %947 = vmatpush.msra.mxu3 %v3148_v24  ;;  %v182_v46 = vld [vmem:[%s3718_s7 + $0x8] sm:$0xff]  ;;  %v3119_v60 = vld [vmem:[%s4918_s1 + $0xc0] sm:$0xff]  ;;  %v3912_v5 = vld [vmem:[%s3718_s7 + $0x32] sm:$0xff] }
  0x22   : >> { %2990 = vmatmul.msk.f32.gmra.mxu0 %vm212_vm0, %v2976_v25  ;;  %428 = vmatpush.msrb.mxu2 %v3020_v26  ;;  %v3034_v47 = vld [vmem:[%s3718_s7 + $0xb] sm:$0xff]  ;;  %v3145_v61 = vld [vmem:[%s4918_s1 + $0xe0] sm:$0xff]  ;;  %v3226_v10 = vld [vmem:[%s4918_s1 + $0x158] sm:$0xff] }
  0x23   : >> { %637 = vmatpush.msrb.mxu0 %v3067_v27  ;;  %739 = vmatpush.msra.mxu1 %v3096_v28  ;;  %v3146_v49 = vld [vmem:[%s4918_s1 + $0xe8] sm:$0xff]  ;;  %v3093_v62 = vld [vmem:[%s4918_s1 + $0xa0] sm:$0xff]  ;;  %v3938_v12 = vld [vmem:[%s3718_s7 + $0x30] sm:$0xff] }
  0x24   : >> { %429 = vmatpush.msrb.mxu2 %v3019_v29  ;;  %948 = vmatpush.msra.mxu3 %v3147_v32  ;;  %v3094_v50 = vld [vmem:[%s4918_s1 + $0xa8] sm:$0xff]  ;;  %v3895_v1 = vld [vmem:[%s3718_s7 + $0x20] sm:$0xff]  ;;  %v3941_v14 = vld [vmem:[%s3718_s7 + $0x33] sm:$0xff] }
  0x25   : >> { %1051 = vmatpush.msra.mxu0 %v3174_v30  ;;  %3023 = vmatmul.msk.f32.vlgmr.msrb.gmra.mxu2 %vm212_vm0, %v3009_v31  ;;  %v3172_v55 = vld [vmem:[%s4918_s1 + $0x108] sm:$0xff]  ;;  %v3171_v4 = vld [vmem:[%s4918_s1 + $0x100] sm:$0xff]  ;;  %v3950_v15 = vld [vmem:[%s3718_s7 + $0x34] sm:$0xff] }
  0x26   : >> { %843 = vmatpush.msra.mxu2 %v3122_v33  ;;  %740 = vmatpush.msra.mxu1 %v3095_v34  ;;  %v3892_v63 = vld [vmem:[%s3718_s7 + $0x2a] sm:$0xff]  ;;  %v3935_v11 = vld [vmem:[%s3718_s7 + $0x3a] sm:$0xff]  ;;  %v3961_v18 = vld [vmem:[%s3718_s7 + $0x42] sm:$0xff] }
  0x27   : >> { %2994 = vmatmul.msk.f32.gmra.mxu1 %vm212_vm0, %v3811_v35  ;;  %2998 = vmatmul.msk.f32.gmra.mxu3 %vm212_vm0, %v3814_v36  ;;  %v3037_v2 = vld [vmem:[%s3718_s7 + $0x23] sm:$0xff]  ;;  %v3918_v8 = vld [vmem:[%s3718_s7 + $0x2b] sm:$0xff]  ;;  %v3252_v16 = vld [vmem:[%s4918_s1 + $0x178] sm:$0xff] }
  0x28   : >> { %844 = vmatpush.msra.mxu2 %v3121_v37  ;;  %1052 = vmatpush.msra.mxu0 %v3173_v39  ;;  %v3904_v3 = vld [vmem:[%s3718_s7 + $0x24] sm:$0xff]  ;;  %v3927_v9 = vld [vmem:[%s3718_s7 + $0x2c] sm:$0xff]  ;;  %v3200_v17 = vld [vmem:[%s4918_s1 + $0x138] sm:$0xff] }
  0x29   : >> { %949 = vmatpush.msra.mxu3 %v3146_v49  ;;  %741 = vmatpush.msra.mxu1 %v3094_v50  ;;  %v3915_v7 = vld [vmem:[%s3718_s7 + $0x28] sm:$0xff]  ;;  %v3964_v19 = vld [vmem:[%s3718_s7 + $0x38] sm:$0xff]  ;;  %v3987_v25 = vld [vmem:[%s3718_s7 + $0x40] sm:$0xff] }
  0x2a   : >> { %2991 = vmatmul.msk.f32.gmra.mxu0 %vm212_vm0, %v2977_v38  ;;  %845 = vmatpush.msra.mxu2 %v3120_v44  ;;  %v3967_v21 = vld [vmem:[%s3718_s7 + $0x3b] sm:$0xff]  ;;  %v3984_v24 = vld [vmem:[%s3718_s7 + $0x4a] sm:$0xff] }
  0x2b   : >> { %1053 = vmatpush.msra.mxu0 %v3172_v55  ;;  %950 = vmatpush.msra.mxu3 %v3145_v61  ;;  %v3976_v22 = vld [vmem:[%s3718_s7 + $0x3c] sm:$0xff]  ;;  %v3999_v27 = vld [vmem:[%s3718_s7 + $0x44] sm:$0xff]  ;;  %v3225_v28 = vld [vmem:[%s4918_s1 + $0x150] sm:$0xff] }
  0x2c   : >> { %846 = vmatpush.msra.mxu2 %v3119_v60  ;;  %742 = vmatpush.msra.mxu1 %v3093_v62  ;;  %v3278_v23 = vld [vmem:[%s4918_s1 + $0x198] sm:$0xff]  ;;  %v3990_v26 = vld [vmem:[%s3718_s7 + $0x43] sm:$0xff]  ;;  %v3251_v29 = vld [vmem:[%s4918_s1 + $0x170] sm:$0xff] }
  0x2d   : >> { %3024 = vmatmul.msk.f32.gmra.mxu2 %vm212_vm0, %v3010_v40  ;;  %1054 = vmatpush.msra.mxu0 %v3171_v4  ;;  %v3109_v30 = vld [vmem:[%s3718_s7 + $0x15] sm:$0xff]  ;;  %v4011_v31 = vld [vmem:[%s3718_s7 + $0x48] sm:$0xff]  ;;  %v3110_v37 = vld [vmem:[%s3718_s7 + $0x1d] sm:$0xff] }
  0x2e   : >> { %1260 = vmatpush.msrb.mxu2 %v3226_v10  ;;  %v4014_v32 = vld [vmem:[%s3718_s7 + $0x4b] sm:$0xff]  ;;  %v3135_v39 = vld [vmem:[%s3718_s7 + $0x16] sm:$0xff]  ;;  %v3162_v44 = vld [vmem:[%s3718_s7 + $0x1f] sm:$0xff] }
  0x2f   : >> { %2999 = vmatmul.msk.f32.vlgmr.msrb.gmra.mxu1 %vm212_vm0, %v181_v41  ;;  %3047 = vmatmul.msk.f32.vlgmr.msrb.gmra.mxu3 %vm212_vm0, %v3033_v42  ;;  %v3199_v33 = vld [vmem:[%s4918_s1 + $0x130] sm:$0xff]  ;;  %v3111_v41 = vld [vmem:[%s3718_s7 + $0x25] sm:$0xff] }
  0x30   : >> { %1364 = vmatpush.msrb.mxu3 %v3252_v16  ;;  %1155 = vmatpush.msrb.mxu1 %v3200_v17  ;;  %v4025_v34 = vld [vmem:[%s3718_s7 + $0x4c] sm:$0xff]  ;;  %v3161_v40 = vld [vmem:[%s3718_s7 + $0x17] sm:$0xff]  ;;  %v3249_v60 = vld [vmem:[%s4918_s1 + $0x160] sm:$0xff] }
  0x31   : >> { %1261 = vmatpush.msrb.mxu2 %v3225_v28  ;;  %v3277_v38 = vld [vmem:[%s4918_s1 + $0x190] sm:$0xff]  ;;  %v3136_v42 = vld [vmem:[%s3718_s7 + $0x1e] sm:$0xff]  ;;  %v3163_v49 = vld [vmem:[%s3718_s7 + $0x27] sm:$0xff] }
  0x32   : >> { %3071 = vmatmul.msk.f32.vlgmr.msrb.gmra.mxu0 %vm212_vm0, %v3057_v43  ;;  %1365 = vmatpush.msrb.mxu3 %v3251_v29  ;;  %v3224_v43 = vld [vmem:[%s4918_s1 + $0x148] sm:$0xff]  ;;  %v3139_v62 = vld [vmem:[%s3718_s7 + $0x36] sm:$0xff]  ;;  %v4115_v29 = vld [vmem:[%s3718_s7 + $0x3e] sm:$0xff] }
  0x33   : >> { %1468 = vmatpush.msrb.mxu0 %v3278_v23  ;;  %1156 = vmatpush.msrb.mxu1 %v3199_v33  ;;  %v3276_v50 = vld [vmem:[%s4918_s1 + $0x188] sm:$0xff]  ;;  %v3165_v10 = vld [vmem:[%s3718_s7 + $0x37] sm:$0xff]  ;;  %v3275_v23 = vld [vmem:[%s4918_s1 + $0x180] sm:$0xff] }
  0x34   : >> { %1262 = vmatpush.msrb.mxu2 %v3224_v43  ;;  %v3164_v55 = vld [vmem:[%s3718_s7 + $0x2f] sm:$0xff]  ;;  %v4107_v17 = vld [vmem:[%s3718_s7 + $0x45] sm:$0xff]  ;;  %v3330_v43 = vld [vmem:[%s4918_s1 + $0x1d8] sm:$0xff] }
  0x35   : >> { %3025 = vmatmul.msk.f32.gmra.mxu2 %vm212_vm0, %v3011_v45  ;;  %1469 = vmatpush.msrb.mxu0 %v3277_v38  ;;  %v3250_v45 = vld [vmem:[%s4918_s1 + $0x168] sm:$0xff]  ;;  %v4124_v33 = vld [vmem:[%s3718_s7 + $0x3f] sm:$0xff] }
  0x36   : >> { %1366 = vmatpush.msrb.mxu3 %v3250_v45 }
  0x37   : >> { %3000 = vmatmul.msk.f32.gmra.mxu1 %vm212_vm0, %v182_v46  ;;  %3048 = vmatmul.msk.f32.gmra.mxu3 %vm212_vm0, %v3034_v47  ;;  %v3198_v46 = vld [vmem:[%s4918_s1 + $0x128] sm:$0xff] }
  0x38   : >> { %1157 = vmatpush.msrb.mxu1 %v3198_v46  ;;  %v3112_v47 = vld [vmem:[%s3718_s7 + $0x2d] sm:$0xff]  ;;  %1470 = vmatpush.msrb.mxu0 %v3276_v50 }
  0x39   : >> { %1367 = vmatpush.msrb.mxu3 %v3249_v60  ;;  %v4146_v46 = vld [vmem:[%s3718_s7 + $0x47] sm:$0xff] }
  0x3a   : >> { %3072 = vmatmul.msk.f32.gmra.mxu0 %vm212_vm0, %v3058_v48  ;;  %v3137_v48 = vld [vmem:[%s3718_s7 + $0x26] sm:$0xff] }
  0x3b   : >> { %1471 = vmatpush.msrb.mxu0 %v3275_v23 }
  0x3d   : >> { %3026 = vmatmul.msk.f32.gmra.mxu2 %vm212_vm0, %v3012_v51  ;;  %v3113_v51 = vld [vmem:[%s3718_s7 + $0x35] sm:$0xff] }
  0x3f   : >> { %3001 = vmatmul.msk.f32.gmra.mxu1 %vm212_vm0, %v183_v52  ;;  %3049 = vmatmul.msk.f32.gmra.mxu3 %vm212_vm0, %v3035_v53  ;;  %v3138_v53 = vld [vmem:[%s3718_s7 + $0x2e] sm:$0xff] }
  0x42   : >> { %3073 = vmatmul.msk.f32.gmra.mxu0 %vm212_vm0, %v3861_v54 }
  0x45   : >> { %3027 = vmatmul.msk.f32.gmra.mxu2 %vm212_vm0, %v3013_v56  ;;  %v3223_v56 = vld [vmem:[%s4918_s1 + $0x140] sm:$0xff] }
  0x46   : >> { %1263 = vmatpush.msrb.mxu2 %v3223_v56 }
  0x47   : >> { %3002 = vmatmul.msk.f32.gmra.mxu1 %vm212_vm0, %v3870_v57  ;;  %3050 = vmatmul.msk.f32.gmra.mxu3 %vm212_vm0, %v3036_v58 }
  0x4a   : >> { %3074 = vmatmul.msk.f32.gmra.mxu0 %vm212_vm0, %v3878_v59 }
  0x4d   : >> { %3028 = vmatmul.msk.f32.gmra.mxu2 %vm212_vm0, %v3892_v63 }
  0x4f   : >> { %3003 = vmatmul.msk.f32.gmra.mxu1 %vm212_vm0, %v3895_v1  ;;  %3051 = vmatmul.msk.f32.gmra.mxu3 %vm212_vm0, %v3037_v2  ;;  %v3197_v2 = vld [vmem:[%s4918_s1 + $0x120] sm:$0xff] }
  0x50   : >> { %1158 = vmatpush.msrb.mxu1 %v3197_v2 }
  0x52   : >> { %3075 = vmatmul.msk.f32.gmra.mxu0 %vm212_vm0, %v3904_v3 }
  0x55   : >> { %3029 = vmatmul.msk.f32.gmra.mxu2 %vm212_vm0, %v3912_v5 }
  0x57   : >> { %3004 = vmatmul.msk.f32.gmra.mxu1 %vm212_vm0, %v3915_v7  ;;  %3052 = vmatmul.msk.f32.gmra.mxu3 %vm212_vm0, %v3918_v8 }
  0x5a   : >> { %3076 = vmatmul.msk.f32.gmra.mxu0 %vm212_vm0, %v3927_v9 }
  0x5d   : >> { %3030 = vmatmul.msk.f32.gmra.mxu2 %vm212_vm0, %v3935_v11 }
  0x5f   : >> { %3005 = vmatmul.msk.f32.gmra.mxu1 %vm212_vm0, %v3938_v12  ;;  %3053 = vmatmul.msk.f32.gmra.mxu3 %vm212_vm0, %v3941_v14 }
  0x62   : >> { %3077 = vmatmul.msk.f32.gmra.mxu0 %vm212_vm0, %v3950_v15 }
  0x65   : >> { %3031 = vmatmul.msk.f32.gmra.mxu2 %vm212_vm0, %v3961_v18 }
  0x67   : >> { %3006 = vmatmul.msk.f32.gmra.mxu1 %vm212_vm0, %v3964_v19  ;;  %3054 = vmatmul.msk.f32.gmra.mxu3 %vm212_vm0, %v3967_v21 }
  0x6a   : >> { %3078 = vmatmul.msk.f32.gmra.mxu0 %vm212_vm0, %v3976_v22 }
  0x6d   : >> { %3032 = vmatmul.msk.f32.gmra.mxu2 %vm212_vm0, %v3984_v24 }
  0x6f   : >> { %3007 = vmatmul.msk.f32.gmra.mxu1 %vm212_vm0, %v3987_v25  ;;  %3055 = vmatmul.msk.f32.gmra.mxu3 %vm212_vm0, %v3990_v26 }
  0x72   : >> { %3079 = vmatmul.msk.f32.gmra.mxu0 %vm212_vm0, %v3999_v27 }
  0x75   : >> { %3123 = vmatmul.msk.f32.vlgmr.msra.gmra.mxu2 %vm212_vm0, %v3109_v30 }
  0x76   : >> { %1676 = vmatpush.msra.mxu2 %v3330_v43 }
  0x77   : >> { %3008 = vmatmul.msk.f32.gmra.mxu1 %vm212_vm0, %v4011_v31  ;;  %3056 = vmatmul.msk.f32.gmra.mxu3 %vm212_vm0, %v4014_v32 }
  0x7a   : >> { %3080 = vmatmul.msk.f32.gmra.mxu0 %vm212_vm0, %v4025_v34 }
  0x7d   : >> { %3124 = vmatmul.msk.f32.gmra.mxu2 %vm212_vm0, %v3110_v37 }
  0x7f   : >> { %3097 = vmatmul.msk.f32.vlgmr.msra.gmra.mxu1 %vm212_vm0, %v3861_v54  ;;  %3149 = vmatmul.msk.f32.vlgmr.msra.gmra.mxu3 %vm212_vm0, %v3135_v39  ;;  %v4131_v39 = vld [vmem:[%s3718_s7 + $0x4d] sm:$0xff] }
  0x82   : >> { %3175 = vmatmul.msk.f32.vlgmr.msra.gmra.mxu0 %vm212_vm0, %v3161_v40 }
  0x85   : >> { %3125 = vmatmul.msk.f32.gmra.mxu2 %vm212_vm0, %v3111_v41  ;;  %v4134_v41 = vld [vmem:[%s3718_s7 + $0x46] sm:$0xff] }
  0x87   : >> { %3098 = vmatmul.msk.f32.gmra.mxu1 %vm212_vm0, %v3878_v59  ;;  %3150 = vmatmul.msk.f32.gmra.mxu3 %vm212_vm0, %v3136_v42  ;;  %v4084_v59 = vld [vmem:[%s3718_s7 + $0x3d] sm:$0xff] }
  0x8a   : >> { %3176 = vmatmul.msk.f32.gmra.mxu0 %vm212_vm0, %v3162_v44 }
  0x8d   : >> { %3126 = vmatmul.msk.f32.gmra.mxu2 %vm212_vm0, %v3112_v47  ;;  %v3356_v47 = vld [vmem:[%s4918_s1 + $0x1f8] sm:$0xff] }
  0x8e   : >> { %1781 = vmatpush.msra.mxu3 %v3356_v47 }
  0x8f   : >> { %3099 = vmatmul.msk.f32.gmra.mxu1 %vm212_vm0, %v3904_v3  ;;  %3151 = vmatmul.msk.f32.gmra.mxu3 %vm212_vm0, %v3137_v48  ;;  %v3304_v48 = vld [vmem:[%s4918_s1 + $0x1b8] sm:$0xff] }
  0x90   : >> { %1572 = vmatpush.msra.mxu1 %v3304_v48 }
  0x92   : >> { %3177 = vmatmul.msk.f32.gmra.mxu0 %vm212_vm0, %v3163_v49 }
  0x94   : >> { %v4069_v52 = vpop.f32.mrf.mxu1 }
  0x95   : >> { %3127 = vmatmul.msk.f32.gmra.mxu2 %vm212_vm0, %v3113_v51  ;;  %v4157_v51 = vld [vmem:[%s3718_s7 + $0x55] sm:$0xff] }
  0x97   : >> { %3100 = vmatmul.msk.f32.gmra.mxu1 %vm212_vm0, %v3927_v9  ;;  %3152 = vmatmul.msk.f32.gmra.mxu3 %vm212_vm0, %v3138_v53  ;;  %v260_v54 = vpop.f32.mrf.mxu0 }
  0x9a   : >> { %v4080_v58 = vpop.f32.mrf.mxu3  ;;  %3178 = vmatmul.msk.f32.gmra.mxu0 %vm212_vm0, %v3164_v55  ;;  %v4160_v55 = vld [vmem:[%s3718_s7 + $0x4e] sm:$0xff] }
  0x9c   : >> { %v4089_v61 = vpop.f32.mrf.mxu1 }
  0x9d   : >> { %3128 = vmatmul.msk.f32.gmra.mxu2 %vm212_vm0, %v4084_v59 }
  0x9f   : >> { %3101 = vmatmul.msk.f32.gmra.mxu1 %vm212_vm0, %v3950_v15  ;;  %3153 = vmatmul.msk.f32.gmra.mxu3 %vm212_vm0, %v3139_v62  ;;  %v263_v3 = vpop.f32.mrf.mxu0  ;;  %v4100_v4 = vpop.f32.mrf.mxu2 }
  0xa2   : >> { %v4103_v16 = vpop.f32.mrf.mxu3  ;;  %3179 = vmatmul.msk.f32.gmra.mxu0 %vm212_vm0, %v3165_v10  ;;  %v4171_v10 = vld [vmem:[%s3718_s7 + $0x4f] sm:$0xff] }
  0xa4   : >> { %v4112_v28 = vpop.f32.mrf.mxu1 }
  0xa5   : >> { %3129 = vmatmul.msk.f32.gmra.mxu2 %vm212_vm0, %v4107_v17 }
  0xa7   : >> { %3102 = vmatmul.msk.f32.gmra.mxu1 %vm212_vm0, %v3976_v22  ;;  %3154 = vmatmul.msk.f32.gmra.mxu3 %vm212_vm0, %v4115_v29  ;;  %v266_v30 = vpop.f32.mrf.mxu0 }
  0xa8   : >> { %v431_v37 = vpop.f32.mrf.mxu2 }
  0xaa   : >> { %v4126_v38 = vpop.f32.mrf.mxu3  ;;  %3180 = vmatmul.msk.f32.gmra.mxu0 %vm212_vm0, %v4124_v33 }
  0xac   : >> { %v337_v40 = vpop.f32.mrf.mxu1 }
  0xad   : >> { %v338_v42 = vadd.f32 %v337_v40, %v260_v54  ;;  %3130 = vmatmul.msk.f32.gmra.mxu2 %vm212_vm0, %v4131_v39  ;;  %v4179_v40 = vld [vmem:[%s3718_s7 + $0x5d] sm:$0xff] }
  0xaf   : >> { %v461_v44 = vadd.f32 %v431_v37, %v338_v42  ;;  %3103 = vmatmul.msk.f32.gmra.mxu1 %vm212_vm0, %v3999_v27  ;;  %3155 = vmatmul.msk.f32.gmra.mxu3 %vm212_vm0, %v4134_v41  ;;  %v639_v45 = vpop.f32.mrf.mxu0 }
  0xb0   : >> { %v434_v49 = vpop.f32.mrf.mxu2 }
  0xb2   : >> { %v535_v50 = vpop.f32.mrf.mxu3  ;;  %3181 = vmatmul.msk.f32.gmra.mxu0 %vm212_vm0, %v4146_v46 }
  0xb3   : >> { %v565_v53 = vadd.f32 %v535_v50, %v461_v44  ;;  %v4182_v44 = vld [vmem:[%s3718_s7 + $0x54] sm:$0xff] }
  0xb4   : >> { %v340_v54 = vpop.f32.mrf.mxu1 }
  0xb5   : >> { %v341_v56 = vadd.f32 %v340_v54, %v263_v3  ;;  %v4162_v60 = vadd.f32 %v639_v45, %v565_v53  ;;  %3131 = vmatmul.msk.f32.gmra.mxu2 %vm212_vm0, %v4157_v51  ;;  %v3382_v3 = vld [vmem:[%s4918_s1 + $0x218] sm:$0xff] }
  0xb6   : >> { %1885 = vmatpush.msra.mxu0 %v3382_v3  ;;  %v4185_v45 = vld [vmem:[%s3718_s7 + $0x56] sm:$0xff] }
  0xb7   : >> { %v462_v62 = vadd.f32 %v434_v49, %v341_v56  ;;  %3104 = vmatmul.msk.f32.gmra.mxu1 %vm212_vm0, %v4025_v34  ;;  %3156 = vmatmul.msk.f32.gmra.mxu3 %vm212_vm0, %v4160_v55  ;;  %v642_v2 = vpop.f32.mrf.mxu0  ;;  %v4196_v53 = vld [vmem:[%s3718_s7 + $0x57] sm:$0xff] }
  0xb8   : >> { %v437_v23 = vpop.f32.mrf.mxu2 }
  0xba   : >> { %v538_v37 = vpop.f32.mrf.mxu3  ;;  %3182 = vmatmul.msk.f32.gmra.mxu0 %vm212_vm0, %v4171_v10 }
  0xbb   : >> { %v566_v42 = vadd.f32 %v538_v37, %v462_v62  ;;  %v4210_v37 = vld [vmem:[%s3718_s7 + $0x5e] sm:$0xff] }
  0xbc   : >> { %v343_v43 = vpop.f32.mrf.mxu1 }
  0xbd   : >> { %v344_v47 = vadd.f32 %v343_v43, %v266_v30  ;;  %v4187_v48 = vadd.f32 %v642_v2, %v566_v42  ;;  %3132 = vmatmul.msk.f32.gmra.mxu2 %vm212_vm0, %v4179_v40  ;;  %v3329_v30 = vld [vmem:[%s4918_s1 + $0x1d0] sm:$0xff] }
  0xbe   : >> { %1677 = vmatpush.msra.mxu2 %v3329_v30  ;;  %v3355_v2 = vld [vmem:[%s4918_s1 + $0x1f0] sm:$0xff] }
  0xbf   : >> { %v463_v49 = vadd.f32 %v437_v23, %v344_v47  ;;  %3105 = vmatmul.msk.f32.gmra.mxu1 %vm212_vm0, %v4182_v44  ;;  %3157 = vmatmul.msk.f32.gmra.mxu3 %vm212_vm0, %v4185_v45  ;;  %v645_v50 = vpop.f32.mrf.mxu0  ;;  %v4207_v23 = vld [vmem:[%s3718_s7 + $0x5c] sm:$0xff]  ;;  %v3303_v47 = vld [vmem:[%s4918_s1 + $0x1b0] sm:$0xff] }
  0xc0   : >> { %v440_v54 = vpop.f32.mrf.mxu2  ;;  %1782 = vmatpush.msra.mxu3 %v3355_v2  ;;  %1573 = vmatpush.msra.mxu1 %v3303_v47  ;;  %v3381_v2 = vld [vmem:[%s4918_s1 + $0x210] sm:$0xff] }
  0xc1   : >> { %1886 = vmatpush.msra.mxu0 %v3381_v2 }
  0xc2   : >> { %v541_v56 = vpop.f32.mrf.mxu3  ;;  %3183 = vmatmul.msk.f32.gmra.mxu0 %vm212_vm0, %v4196_v53 }
  0xc3   : >> { %v567_v62 = vadd.f32 %v541_v56, %v463_v49  ;;  %v4225_v56 = vld [vmem:[%s3718_s7 + $0x5f] sm:$0xff] }
  0xc4   : >> { %v346_v3 = vpop.f32.mrf.mxu1 }
  0xc5   : >> { %v347_v42 = vadd.f32 %v346_v3, %v4069_v52  ;;  %v4213_v43 = vadd.f32 %v645_v50, %v567_v62  ;;  %3227 = vmatmul.msk.f32.vlgmr.msrb.gmra.mxu2 %vm212_vm0, %v3915_v7 }
  0xc7   : >> { %v464_v49 = vadd.f32 %v440_v54, %v347_v42  ;;  %3106 = vmatmul.msk.f32.gmra.mxu1 %vm212_vm0, %v4207_v23  ;;  %3158 = vmatmul.msk.f32.gmra.mxu3 %vm212_vm0, %v4210_v37  ;;  %v648_v30 = vpop.f32.mrf.mxu0 }
  0xc8   : >> { %v443_v52 = vpop.f32.mrf.mxu2 }
  0xca   : >> { %v544_v50 = vpop.f32.mrf.mxu3  ;;  %3184 = vmatmul.msk.f32.gmra.mxu0 %vm212_vm0, %v4225_v56 }
  0xcb   : >> { %v568_v62 = vadd.f32 %v544_v50, %v464_v49 }
  0xcc   : >> { %v349_v54 = vpop.f32.mrf.mxu1 }
  0xcd   : >> { %v350_v3 = vadd.f32 %v349_v54, %v4089_v61  ;;  %v4233_v42 = vadd.f32 %v648_v30, %v568_v62  ;;  %3228 = vmatmul.msk.f32.gmra.mxu2 %vm212_vm0, %v3938_v12 }
  0xcf   : >> { %v465_v47 = vadd.f32 %v443_v52, %v350_v3  ;;  %3201 = vmatmul.msk.f32.vlgmr.msrb.gmra.mxu1 %vm212_vm0, %v3870_v57  ;;  %3253 = vmatmul.msk.f32.vlgmr.msrb.gmra.mxu3 %vm212_vm0, %v3811_v35  ;;  %v651_v49 = vpop.f32.mrf.mxu0  ;;  %v3328_v57 = vld [vmem:[%s4918_s1 + $0x1c8] sm:$0xff] }
  0xd0   : >> { %v446_v50 = vpop.f32.mrf.mxu2  ;;  %1678 = vmatpush.msra.mxu2 %v3328_v57 }
  0xd2   : >> { %v547_v0 = vpop.f32.mrf.mxu3  ;;  %3279 = vmatmul.msk.f32.vlgmr.msrb.gmra.mxu0 %vm212_vm0, %v3892_v63  ;;  %v3354_v63 = vld [vmem:[%s4918_s1 + $0x1e8] sm:$0xff] }
  0xd3   : >> { %v569_v2 = vadd.f32 %v547_v0, %v465_v47  ;;  %1783 = vmatpush.msra.mxu3 %v3354_v63  ;;  %v4292_v63 = vld [vmem:[%s3718_s7 + $0x50] sm:$0xff] }
  0xd4   : >> { %v352_v61 = vpop.f32.mrf.mxu1 }
  0xd5   : >> { %v353_v30 = vadd.f32 %v352_v61, %v4112_v28  ;;  %v4244_v62 = vadd.f32 %v651_v49, %v569_v2  ;;  %3229 = vmatmul.msk.f32.gmra.mxu2 %vm212_vm0, %v3964_v19  ;;  %v3302_v28 = vld [vmem:[%s4918_s1 + $0x1a8] sm:$0xff] }
  0xd6   : >> { %1574 = vmatpush.msra.mxu1 %v3302_v28 }
  0xd7   : >> { %v466_v35 = vadd.f32 %v446_v50, %v353_v30  ;;  %3202 = vmatmul.msk.f32.gmra.mxu1 %vm212_vm0, %v3895_v1  ;;  %3254 = vmatmul.msk.f32.gmra.mxu3 %vm212_vm0, %v3744_v13  ;;  %v654_v0 = vpop.f32.mrf.mxu0 }
  0xd8   : >> { %v449_v52 = vpop.f32.mrf.mxu2 }
  0xda   : >> { %v550_v54 = vpop.f32.mrf.mxu3  ;;  %3280 = vmatmul.msk.f32.gmra.mxu0 %vm212_vm0, %v3912_v5  ;;  %v3380_v5 = vld [vmem:[%s4918_s1 + $0x208] sm:$0xff] }
  0xdb   : >> { %v570_v1 = vadd.f32 %v550_v54, %v466_v35  ;;  %1887 = vmatpush.msra.mxu0 %v3380_v5  ;;  %v3379_v5 = vld [vmem:[%s4918_s1 + $0x200] sm:$0xff] }
  0xdc   : >> { %v355_v3 = vpop.f32.mrf.mxu1 }
  0xdd   : >> { %v356_v13 = vadd.f32 %v355_v3, %v4100_v4  ;;  %v4264_v47 = vadd.f32 %v654_v0, %v570_v1  ;;  %3230 = vmatmul.msk.f32.gmra.mxu2 %vm212_vm0, %v3987_v25  ;;  %1888 = vmatpush.msra.mxu0 %v3379_v5 }
  0xdf   : >> { %v467_v49 = vadd.f32 %v449_v52, %v356_v13  ;;  %3203 = vmatmul.msk.f32.gmra.mxu1 %vm212_vm0, %v3915_v7  ;;  %3255 = vmatmul.msk.f32.gmra.mxu3 %vm212_vm0, %v3722_v6  ;;  %v657_v50 = vpop.f32.mrf.mxu0 }
  0xe0   : >> { %v452_v2 = vpop.f32.mrf.mxu2 }
  0xe2   : >> { %v553_v4 = vpop.f32.mrf.mxu3  ;;  %3281 = vmatmul.msk.f32.gmra.mxu0 %vm212_vm0, %v3935_v11  ;;  %v3327_v11 = vld [vmem:[%s4918_s1 + $0x1c0] sm:$0xff] }
  0xe3   : >> { %v571_v61 = vadd.f32 %v553_v4, %v467_v49  ;;  %1679 = vmatpush.msra.mxu2 %v3327_v11  ;;  %v4312_v49 = vld [vmem:[%s3718_s7 + $0x58] sm:$0xff] }
  0xe4   : >> { %v358_v30 = vpop.f32.mrf.mxu1 }
  0xe5   : >> { %v359_v57 = vadd.f32 %v358_v30, %v4080_v58  ;;  %v4278_v7 = vadd.f32 %v657_v50, %v571_v61  ;;  %3231 = vmatmul.msk.f32.gmra.mxu2 %vm212_vm0, %v4011_v31  ;;  %v4330_v61 = vld [vmem:[%s3718_s7 + $0x52] sm:$0xff] }
  0xe7   : >> { %3204 = vmatmul.msk.f32.gmra.mxu1 %vm212_vm0, %v3938_v12  ;;  %3256 = vmatmul.msk.f32.gmra.mxu3 %vm212_vm0, %v3764_v20  ;;  %v660_v6 = vpop.f32.mrf.mxu0  ;;  %v468_v0 = vadd.f32 %v452_v2, %v359_v57  ;;  %v3353_v20 = vld [vmem:[%s4918_s1 + $0x1e0] sm:$0xff]  ;;  %v4318_v2 = vld [vmem:[%s3718_s7 + $0x51] sm:$0xff] }
  0xe8   : >> { %v455_v35 = vpop.f32.mrf.mxu2  ;;  %1784 = vmatpush.msra.mxu3 %v3353_v20 }
  0xea   : >> { %v556_v58 = vpop.f32.mrf.mxu3  ;;  %3282 = vmatmul.msk.f32.gmra.mxu0 %vm212_vm0, %v3961_v18  ;;  %v3301_v18 = vld [vmem:[%s4918_s1 + $0x1a0] sm:$0xff] }
  0xeb   : >> { %v572_v28 = vadd.f32 %v556_v58, %v468_v0  ;;  %1575 = vmatpush.msra.mxu1 %v3301_v18  ;;  %v4338_v0 = vld [vmem:[%s3718_s7 + $0x59] sm:$0xff] }
  0xec   : >> { %v361_v12 = vpop.f32.mrf.mxu1  ;;  %v3408_v18 = vld [vmem:[%s4918_s1 + $0x238] sm:$0xff] }
  0xed   : >> { %v362_v52 = vadd.f32 %v361_v12, %v4103_v16  ;;  %v4298_v54 = vadd.f32 %v660_v6, %v572_v28  ;;  %3232 = vmatmul.msk.f32.gmra.mxu2 %vm212_vm0, %v4292_v63  ;;  %v3434_v28 = vld [vmem:[%s4918_s1 + $0x258] sm:$0xff]  ;;  %1989 = vmatpush.msrb.mxu1 %v3408_v18 }
  0xee   : >> { %2093 = vmatpush.msrb.mxu2 %v3434_v28  ;;  %v4390_v28 = vld [vmem:[%s3718_s7 + $0x69] sm:$0xff] }
  0xef   : >> { %3205 = vmatmul.msk.f32.gmra.mxu1 %vm212_vm0, %v3964_v19  ;;  %3257 = vmatmul.msk.f32.gmra.mxu3 %vm212_vm0, %v3814_v36  ;;  %v663_v1 = vpop.f32.mrf.mxu0  ;;  %v469_v16 = vadd.f32 %v455_v35, %v362_v52  ;;  %v4353_v52 = vld [vmem:[%s3718_s7 + $0x5a] sm:$0xff] }
  0xf0   : >> { %v458_v3 = vpop.f32.mrf.mxu2 }
  0xf2   : >> { %v559_v13 = vpop.f32.mrf.mxu3  ;;  %3283 = vmatmul.msk.f32.gmra.mxu0 %vm212_vm0, %v3984_v24 }
  0xf3   : >> { %v573_v50 = vadd.f32 %v559_v13, %v469_v16 }
  0xf4   : >> { %v364_v19 = vpop.f32.mrf.mxu1 }
  0xf5   : >> { %v365_v36 = vadd.f32 %v364_v19, %v4126_v38  ;;  %v4321_v4 = vadd.f32 %v663_v1, %v573_v50  ;;  %3233 = vmatmul.msk.f32.gmra.mxu2 %vm212_vm0, %v4312_v49  ;;  %v4335_v38 = vld [vmem:[%s3718_s7 + $0x60] sm:$0xff] }
  0xf6   : >> { %v4367_v50 = vld [vmem:[%s3718_s7 + $0x61] sm:$0xff] }
  0xf7   : >> { %3206 = vmatmul.msk.f32.gmra.mxu1 %vm212_vm0, %v3987_v25  ;;  %3258 = vmatmul.msk.f32.gmra.mxu3 %vm212_vm0, %v4318_v2  ;;  %v666_v24 = vpop.f32.mrf.mxu0  ;;  %v470_v57 = vadd.f32 %v458_v3, %v365_v36 }
  0xf8   : >> { %v848_v30 = vpop.f32.mrf.mxu2 }
  0xfa   : >> { %v562_v6 = vpop.f32.mrf.mxu3  ;;  %3284 = vmatmul.msk.f32.gmra.mxu0 %vm212_vm0, %v4330_v61 }
  0xfb   : >> { %v574_v11 = vadd.f32 %v562_v6, %v470_v57 }
  0xfc   : >> { %v744_v35 = vpop.f32.mrf.mxu1 }
  0xfd   : >> { %v4340_v25 = vadd.f32 %v666_v24, %v574_v11  ;;  %v774_v58 = vadd.f32 %v744_v35, %v4162_v60  ;;  %3234 = vmatmul.msk.f32.gmra.mxu2 %vm212_vm0, %v4335_v38  ;;  %v3460_v60 = vld [vmem:[%s4918_s1 + $0x278] sm:$0xff]  ;;  %v4387_v11 = vld [vmem:[%s3718_s7 + $0x70] sm:$0xff] }
  0xfe   : >> { %2197 = vmatpush.msrb.mxu3 %v3460_v60 }
  0xff   : >> { %v878_v20 = vadd.f32 %v848_v30, %v774_v58  ;;  %3207 = vmatmul.msk.f32.gmra.mxu1 %vm212_vm0, %v4011_v31  ;;  %3259 = vmatmul.msk.f32.gmra.mxu3 %vm212_vm0, %v4338_v0  ;;  %v1056_v12 = vpop.f32.mrf.mxu0  ;;  %v4364_v31 = vld [vmem:[%s3718_s7 + $0x68] sm:$0xff] }
 0x100   : >> { %v851_v1 = vpop.f32.mrf.mxu2  ;;  %v4379_v30 = vld [vmem:[%s3718_s7 + $0x62] sm:$0xff] }
 0x102   : >> { %v952_v3 = vpop.f32.mrf.mxu3  ;;  %3285 = vmatmul.msk.f32.gmra.mxu0 %vm212_vm0, %v4353_v52 }
 0x103   : >> { %v982_v16 = vadd.f32 %v952_v3, %v878_v20 }
 0x104   : >> { %v747_v13 = vpop.f32.mrf.mxu1 }
 0x105   : >> { %v775_v5 = vadd.f32 %v747_v13, %v4187_v48  ;;  %v4370_v19 = vadd.f32 %v1056_v12, %v982_v16  ;;  %3235 = vmatmul.msk.f32.gmra.mxu2 %vm212_vm0, %v4364_v31  ;;  %v3486_v48 = vld [vmem:[%s4918_s1 + $0x298] sm:$0xff] }
 0x106   : >> { %2302 = vmatpush.msrb.mxu0 %v3486_v48 }
 0x107   : >> { %v879_v36 = vadd.f32 %v851_v1, %v775_v5  ;;  %3208 = vmatmul.msk.f32.gmra.mxu1 %vm212_vm0, %v4292_v63  ;;  %3260 = vmatmul.msk.f32.gmra.mxu3 %vm212_vm0, %v4367_v50  ;;  %v1059_v24 = vpop.f32.mrf.mxu0  ;;  %v4402_v1 = vld [vmem:[%s3718_s7 + $0x6a] sm:$0xff] }
 0x108   : >> { %v854_v57 = vpop.f32.mrf.mxu2  ;;  %v3459_v5 = vld [vmem:[%s4918_s1 + $0x270] sm:$0xff] }
 0x109   : >> { %2198 = vmatpush.msrb.mxu3 %v3459_v5 }
 0x10a   : >> { %v955_v6 = vpop.f32.mrf.mxu3  ;;  %3286 = vmatmul.msk.f32.gmra.mxu0 %vm212_vm0, %v4379_v30 }
 0x10b   : >> { %v983_v35 = vadd.f32 %v955_v6, %v879_v36  ;;  %v3407_v6 = vld [vmem:[%s4918_s1 + $0x230] sm:$0xff] }
 0x10c   : >> { %v750_v58 = vpop.f32.mrf.mxu1  ;;  %1990 = vmatpush.msrb.mxu1 %v3407_v6 }
 0x10d   : >> { %v776_v20 = vadd.f32 %v750_v58, %v4213_v43  ;;  %v4393_v12 = vadd.f32 %v1059_v24, %v983_v35  ;;  %3236 = vmatmul.msk.f32.gmra.mxu2 %vm212_vm0, %v4387_v11  ;;  %v3433_v43 = vld [vmem:[%s4918_s1 + $0x250] sm:$0xff] }
 0x10e   : >> { %2094 = vmatpush.msrb.mxu2 %v3433_v43  ;;  %v4413_v24 = vld [vmem:[%s3718_s7 + $0x71] sm:$0xff] }
 0x10f   : >> { %v880_v60 = vadd.f32 %v854_v57, %v776_v20  ;;  %3209 = vmatmul.msk.f32.gmra.mxu1 %vm212_vm0, %v4312_v49  ;;  %3261 = vmatmul.msk.f32.gmra.mxu3 %vm212_vm0, %v4390_v28  ;;  %v1062_v18 = vpop.f32.mrf.mxu0  ;;  %v4428_v20 = vld [vmem:[%s3718_s7 + $0x72] sm:$0xff] }
 0x110   : >> { %v857_v3 = vpop.f32.mrf.mxu2 }
 0x112   : >> { %v958_v16 = vpop.f32.mrf.mxu3  ;;  %3287 = vmatmul.msk.f32.gmra.mxu0 %vm212_vm0, %v4402_v1 }
 0x113   : >> { %v984_v13 = vadd.f32 %v958_v16, %v880_v60 }
 0x114   : >> { %v753_v36 = vpop.f32.mrf.mxu1 }
 0x115   : >> { %v777_v48 = vadd.f32 %v753_v36, %v4233_v42  ;;  %v4416_v57 = vadd.f32 %v1062_v18, %v984_v13  ;;  %3331 = vmatmul.msk.f32.vlgmr.msra.gmra.mxu2 %vm212_vm0, %v3927_v9  ;;  %v3485_v18 = vld [vmem:[%s4918_s1 + $0x290] sm:$0xff] }
 0x116   : >> { %2303 = vmatpush.msrb.mxu0 %v3485_v18 }
 0x117   : >> { %v881_v35 = vadd.f32 %v857_v3, %v777_v48  ;;  %3210 = vmatmul.msk.f32.gmra.mxu1 %vm212_vm0, %v4335_v38  ;;  %3262 = vmatmul.msk.f32.gmra.mxu3 %vm212_vm0, %v4413_v24  ;;  %v1065_v58 = vpop.f32.mrf.mxu0 }
 0x118   : >> { %v860_v42 = vpop.f32.mrf.mxu2 }
 0x11a   : >> { %v961_v60 = vpop.f32.mrf.mxu3  ;;  %3288 = vmatmul.msk.f32.gmra.mxu0 %vm212_vm0, %v4428_v20 }
 0x11b   : >> { %v985_v9 = vadd.f32 %v961_v60, %v881_v35 }
 0x11c   : >> { %v756_v43 = vpop.f32.mrf.mxu1 }
 0x11d   : >> { %v778_v3 = vadd.f32 %v756_v43, %v4244_v62  ;;  %v4436_v16 = vadd.f32 %v1065_v58, %v985_v9  ;;  %3332 = vmatmul.msk.f32.gmra.mxu2 %vm212_vm0, %v3950_v15 }
 0x11f   : >> { %v882_v13 = vadd.f32 %v860_v42, %v778_v3  ;;  %3305 = vmatmul.msk.f32.vlgmr.msra.gmra.mxu1 %vm212_vm0, %v3918_v8  ;;  %3357 = vmatmul.msk.f32.vlgmr.msra.gmra.mxu3 %vm212_vm0, %v3976_v22  ;;  %v1068_v5 = vpop.f32.mrf.mxu0  ;;  %v3432_v8 = vld [vmem:[%s4918_s1 + $0x248] sm:$0xff] }
 0x120   : >> { %v863_v36 = vpop.f32.mrf.mxu2  ;;  %2095 = vmatpush.msrb.mxu2 %v3432_v8 }
 0x122   : >> { %v964_v48 = vpop.f32.mrf.mxu3  ;;  %3383 = vmatmul.msk.f32.vlgmr.msra.gmra.mxu0 %vm212_vm0, %v4084_v59 }
 0x123   : >> { %v986_v6 = vadd.f32 %v964_v48, %v882_v13 }
 0x124   : >> { %v759_v62 = vpop.f32.mrf.mxu1 }
 0x125   : >> { %v779_v35 = vadd.f32 %v759_v62, %v4264_v47  ;;  %v4447_v58 = vadd.f32 %v1068_v5, %v986_v6  ;;  %3333 = vmatmul.msk.f32.gmra.mxu2 %vm212_vm0, %v3976_v22  ;;  %v3458_v47 = vld [vmem:[%s4918_s1 + $0x268] sm:$0xff] }
 0x126   : >> { %v3406_v22 = vld [vmem:[%s4918_s1 + $0x228] sm:$0xff]  ;;  %2199 = vmatpush.msrb.mxu3 %v3458_v47 }
 0x127   : >> { %v883_v15 = vadd.f32 %v863_v36, %v779_v35  ;;  %3306 = vmatmul.msk.f32.gmra.mxu1 %vm212_vm0, %v3941_v14  ;;  %3358 = vmatmul.msk.f32.gmra.mxu3 %vm212_vm0, %v3999_v27  ;;  %v1071_v59 = vpop.f32.mrf.mxu0 }
 0x128   : >> { %v866_v42 = vpop.f32.mrf.mxu2  ;;  %1991 = vmatpush.msrb.mxu1 %v3406_v22 }
 0x12a   : >> { %v967_v60 = vpop.f32.mrf.mxu3  ;;  %3384 = vmatmul.msk.f32.gmra.mxu0 %vm212_vm0, %v4107_v17  ;;  %v3484_v17 = vld [vmem:[%s4918_s1 + $0x288] sm:$0xff] }
 0x12b   : >> { %v987_v14 = vadd.f32 %v967_v60, %v883_v15  ;;  %2304 = vmatpush.msrb.mxu0 %v3484_v17  ;;  %v3483_v60 = vld [vmem:[%s4918_s1 + $0x280] sm:$0xff] }
 0x12c   : >> { %v762_v9 = vpop.f32.mrf.mxu1  ;;  %v3374_v17 = vld [vmem:[%s3718_s7 + $0x65] sm:$0xff] }
 0x12d   : >> { %v780_v18 = vadd.f32 %v762_v9, %v4278_v7  ;;  %v4467_v43 = vadd.f32 %v1071_v59, %v987_v14  ;;  %3334 = vmatmul.msk.f32.gmra.mxu2 %vm212_vm0, %v3999_v27  ;;  %v4515_v9 = vld [vmem:[%s3718_s7 + $0x53] sm:$0xff]  ;;  %2305 = vmatpush.msrb.mxu0 %v3483_v60 }
 0x12f   : >> { %v884_v3 = vadd.f32 %v866_v42, %v780_v18  ;;  %3307 = vmatmul.msk.f32.gmra.mxu1 %vm212_vm0, %v3967_v21  ;;  %3359 = vmatmul.msk.f32.gmra.mxu3 %vm212_vm0, %v4025_v34  ;;  %v1074_v13 = vpop.f32.mrf.mxu0 }
 0x130   : >> { %v869_v5 = vpop.f32.mrf.mxu2 }
 0x132   : >> { %v970_v7 = vpop.f32.mrf.mxu3  ;;  %3385 = vmatmul.msk.f32.gmra.mxu0 %vm212_vm0, %v4131_v39  ;;  %v3431_v39 = vld [vmem:[%s4918_s1 + $0x240] sm:$0xff] }
 0x133   : >> { %v988_v36 = vadd.f32 %v970_v7, %v884_v3  ;;  %2096 = vmatpush.msrb.mxu2 %v3431_v39 }
 0x134   : >> { %v765_v27 = vpop.f32.mrf.mxu1 }
 0x135   : >> { %v781_v48 = vadd.f32 %v765_v27, %v4298_v54  ;;  %v4481_v6 = vadd.f32 %v1074_v13, %v988_v36  ;;  %3335 = vmatmul.msk.f32.gmra.mxu2 %vm212_vm0, %v4025_v34  ;;  %v3457_v34 = vld [vmem:[%s4918_s1 + $0x260] sm:$0xff] }
 0x136   : >> { %2200 = vmatpush.msrb.mxu3 %v3457_v34  ;;  %v4532_v27 = vld [vmem:[%s3718_s7 + $0x5b] sm:$0xff] }
 0x137   : >> { %v885_v21 = vadd.f32 %v869_v5, %v781_v48  ;;  %3308 = vmatmul.msk.f32.gmra.mxu1 %vm212_vm0, %v3990_v26  ;;  %3360 = vmatmul.msk.f32.gmra.mxu3 %vm212_vm0, %v4182_v44  ;;  %v1077_v62 = vpop.f32.mrf.mxu0  ;;  %v4535_v48 = vld [vmem:[%s3718_s7 + $0x6c] sm:$0xff] }
 0x138   : >> { %v872_v35 = vpop.f32.mrf.mxu2 }
 0x13a   : >> { %v973_v54 = vpop.f32.mrf.mxu3  ;;  %3386 = vmatmul.msk.f32.gmra.mxu0 %vm212_vm0, %v4157_v51  ;;  %v3405_v51 = vld [vmem:[%s4918_s1 + $0x220] sm:$0xff] }
 0x13b   : >> { %v989_v8 = vadd.f32 %v973_v54, %v885_v21  ;;  %1992 = vmatpush.msrb.mxu1 %v3405_v51  ;;  %v3375_v54 = vld [vmem:[%s3718_s7 + $0x6d] sm:$0xff] }
 0x13c   : >> { %v768_v26 = vpop.f32.mrf.mxu1 }
 0x13d   : >> { %v782_v15 = vadd.f32 %v768_v26, %v4321_v4  ;;  %v4498_v59 = vadd.f32 %v1077_v62, %v989_v8  ;;  %3336 = vmatmul.msk.f32.gmra.mxu2 %vm212_vm0, %v4182_v44  ;;  %v3538_v62 = vld [vmem:[%s4918_s1 + $0x2d8] sm:$0xff] }
 0x13e   : >> { %2510 = vmatpush.msra.mxu2 %v3538_v62  ;;  %v3512_v8 = vld [vmem:[%s4918_s1 + $0x2b8] sm:$0xff] }
 0x13f   : >> { %v886_v47 = vadd.f32 %v872_v35, %v782_v15  ;;  %3309 = vmatmul.msk.f32.gmra.mxu1 %vm212_vm0, %v4014_v32  ;;  %3361 = vmatmul.msk.f32.gmra.mxu3 %vm212_vm0, %v4207_v23  ;;  %v1080_v22 = vpop.f32.mrf.mxu0  ;;  %v4518_v32 = vld [vmem:[%s3718_s7 + $0x64] sm:$0xff] }
 0x140   : >> { %v875_v4 = vpop.f32.mrf.mxu2  ;;  %2406 = vmatpush.msra.mxu1 %v3512_v8  ;;  %v3563_v8 = vld [vmem:[%s4918_s1 + $0x2f0] sm:$0xff] }
 0x142   : >> { %v976_v42 = vpop.f32.mrf.mxu3  ;;  %3387 = vmatmul.msk.f32.gmra.mxu0 %vm212_vm0, %v4179_v40 }
 0x143   : >> { %v990_v44 = vadd.f32 %v976_v42, %v886_v47  ;;  %v4558_v47 = vld [vmem:[%s3718_s7 + $0x63] sm:$0xff] }
 0x144   : >> { %v771_v14 = vpop.f32.mrf.mxu1 }
 0x145   : >> { %v783_v18 = vadd.f32 %v771_v14, %v4340_v25  ;;  %v4521_v3 = vadd.f32 %v1080_v22, %v990_v44  ;;  %3337 = vmatmul.msk.f32.gmra.mxu2 %vm212_vm0, %v4207_v23  ;;  %v4561_v22 = vld [vmem:[%s3718_s7 + $0x74] sm:$0xff] }
 0x146   : >> { %v3376_v14 = vld [vmem:[%s3718_s7 + $0x75] sm:$0xff] }
 0x147   : >> { %v887_v40 = vadd.f32 %v875_v4, %v783_v18  ;;  %3310 = vmatmul.msk.f32.gmra.mxu1 %vm212_vm0, %v4515_v9  ;;  %3362 = vmatmul.msk.f32.gmra.mxu3 %vm212_vm0, %v4518_v32  ;;  %v1083_v13 = vpop.f32.mrf.mxu0  ;;  %v3590_v18 = vld [vmem:[%s4918_s1 + $0x318] sm:$0xff] }
 0x148   : >> { %v1265_v5 = vpop.f32.mrf.mxu2  ;;  %2718 = vmatpush.msra.mxu0 %v3590_v18 }
 0x14a   : >> { %v979_v7 = vpop.f32.mrf.mxu3  ;;  %3388 = vmatmul.msk.f32.gmra.mxu0 %vm212_vm0, %v3374_v17 }
 0x14b   : >> { %v991_v25 = vadd.f32 %v979_v7, %v887_v40  ;;  %v4581_v7 = vld [vmem:[%s3718_s7 + $0x7c] sm:$0xff] }
 0x14c   : >> { %v1160_v36 = vpop.f32.mrf.mxu1 }
 0x14d   : >> { %v4537_v23 = vadd.f32 %v1083_v13, %v991_v25  ;;  %v1190_v21 = vadd.f32 %v1160_v36, %v4370_v19  ;;  %3338 = vmatmul.msk.f32.gmra.mxu2 %vm212_vm0, %v4518_v32  ;;  %v3564_v19 = vld [vmem:[%s4918_s1 + $0x2f8] sm:$0xff] }
 0x14e   : >> { %2614 = vmatpush.msra.mxu3 %v3564_v19 }
 0x14f   : >> { %v1295_v39 = vadd.f32 %v1265_v5, %v1190_v21  ;;  %3311 = vmatmul.msk.f32.gmra.mxu1 %vm212_vm0, %v4532_v27  ;;  %3363 = vmatmul.msk.f32.gmra.mxu3 %vm212_vm0, %v4535_v48  ;;  %v1473_v35 = vpop.f32.mrf.mxu0  ;;  %v4578_v5 = vld [vmem:[%s3718_s7 + $0x6b] sm:$0xff] }
 0x150   : >> { %v1268_v34 = vpop.f32.mrf.mxu2  ;;  %2615 = vmatpush.msra.mxu3 %v3563_v8 }
 0x152   : >> { %v1369_v26 = vpop.f32.mrf.mxu3  ;;  %3389 = vmatmul.msk.f32.gmra.mxu0 %vm212_vm0, %v3375_v54 }
 0x153   : >> { %v1399_v15 = vadd.f32 %v1369_v26, %v1295_v39  ;;  %v3377_v39 = vld [vmem:[%s3718_s7 + $0x7d] sm:$0xff]  ;;  %v4601_v26 = vld [vmem:[%s3718_s7 + $0x73] sm:$0xff] }
 0x154   : >> { %v1163_v51 = vpop.f32.mrf.mxu1 }
 0x155   : >> { %v1191_v4 = vadd.f32 %v1163_v51, %v4393_v12  ;;  %v4564_v42 = vadd.f32 %v1473_v35, %v1399_v15  ;;  %3339 = vmatmul.msk.f32.gmra.mxu2 %vm212_vm0, %v4535_v48  ;;  %v4604_v15 = vld [vmem:[%s3718_s7 + $0x84] sm:$0xff] }
 0x157   : >> { %v1296_v44 = vadd.f32 %v1268_v34, %v1191_v4  ;;  %3312 = vmatmul.msk.f32.gmra.mxu1 %vm212_vm0, %v4558_v47  ;;  %3364 = vmatmul.msk.f32.gmra.mxu3 %vm212_vm0, %v4561_v22  ;;  %v1476_v60 = vpop.f32.mrf.mxu0 }
 0x158   : >> { %v1271_v12 = vpop.f32.mrf.mxu2 }
 0x15a   : >> { %v1372_v40 = vpop.f32.mrf.mxu3  ;;  %3390 = vmatmul.msk.f32.gmra.mxu0 %vm212_vm0, %v3376_v14 }
 0x15b   : >> { %v1400_v13 = vadd.f32 %v1372_v40, %v1296_v44  ;;  %v3511_v44 = vld [vmem:[%s4918_s1 + $0x2b0] sm:$0xff] }
 0x15c   : >> { %v1166_v17 = vpop.f32.mrf.mxu1  ;;  %2407 = vmatpush.msra.mxu1 %v3511_v44 }
 0x15d   : >> { %v1192_v25 = vadd.f32 %v1166_v17, %v4416_v57  ;;  %v4584_v36 = vadd.f32 %v1476_v60, %v1400_v13  ;;  %3340 = vmatmul.msk.f32.gmra.mxu2 %vm212_vm0, %v4561_v22  ;;  %v3537_v57 = vld [vmem:[%s4918_s1 + $0x2d0] sm:$0xff]  ;;  %v3447_v17 = vld [vmem:[%s3718_s7 + $0x40] sm:$0xff] }
 0x15e   : >> { %2511 = vmatpush.msra.mxu2 %v3537_v57 }
 0x15f   : >> { %v1297_v21 = vadd.f32 %v1271_v12, %v1192_v25  ;;  %3313 = vmatmul.msk.f32.gmra.mxu1 %vm212_vm0, %v4578_v5  ;;  %3365 = vmatmul.msk.f32.gmra.mxu3 %vm212_vm0, %v4581_v7  ;;  %v1479_v62 = vpop.f32.mrf.mxu0 }
 0x160   : >> { %v1274_v35 = vpop.f32.mrf.mxu2 }
 0x162   : >> { %v1375_v54 = vpop.f32.mrf.mxu3  ;;  %3391 = vmatmul.msk.f32.gmra.mxu0 %vm212_vm0, %v3377_v39 }
 0x163   : >> { %v1401_v19 = vadd.f32 %v1375_v54, %v1297_v21 }
 0x164   : >> { %v1169_v34 = vpop.f32.mrf.mxu1 }
 0x165   : >> { %v1193_v51 = vadd.f32 %v1169_v34, %v4436_v16  ;;  %v4607_v4 = vadd.f32 %v1479_v62, %v1401_v19  ;;  %3435 = vmatmul.msk.f32.vlgmr.msrb.gmra.mxu2 %vm212_vm0, %v4124_v33  ;;  %v3378_v16 = vld [vmem:[%s3718_s7 + $0x85] sm:$0xff]  ;;  %v3589_v33 = vld [vmem:[%s4918_s1 + $0x310] sm:$0xff] }
 0x166   : >> { %2719 = vmatpush.msra.mxu0 %v3589_v33  ;;  %v3588_v33 = vld [vmem:[%s4918_s1 + $0x308] sm:$0xff] }
 0x167   : >> { %v1298_v60 = vadd.f32 %v1274_v35, %v1193_v51  ;;  %3314 = vmatmul.msk.f32.gmra.mxu1 %vm212_vm0, %v4601_v26  ;;  %3366 = vmatmul.msk.f32.gmra.mxu3 %vm212_vm0, %v4604_v15  ;;  %v1482_v14 = vpop.f32.mrf.mxu0 }
 0x168   : >> { %v1277_v18 = vpop.f32.mrf.mxu2  ;;  %2720 = vmatpush.msra.mxu0 %v3588_v33  ;;  %v3428_v33 = vld [vmem:[%s3718_s7 + $0x77] sm:$0xff] }
 0x16a   : >> { %v1378_v12 = vpop.f32.mrf.mxu3  ;;  %3392 = vmatmul.msk.f32.gmra.mxu0 %vm212_vm0, %v3378_v16 }
 0x16b   : >> { %v1402_v40 = vadd.f32 %v1378_v12, %v1298_v60 }
 0x16c   : >> { %v1172_v13 = vpop.f32.mrf.mxu1 }
 0x16d   : >> { %v1194_v25 = vadd.f32 %v1172_v13, %v4447_v58  ;;  %v4625_v21 = vadd.f32 %v1482_v14, %v1402_v40  ;;  %3436 = vmatmul.msk.f32.gmra.mxu2 %vm212_vm0, %v4146_v46  ;;  %v3448_v58 = vld [vmem:[%s3718_s7 + $0x48] sm:$0xff] }
 0x16f   : >> { %v1299_v62 = vadd.f32 %v1277_v18, %v1194_v25  ;;  %3409 = vmatmul.msk.f32.vlgmr.msrb.gmra.mxu1 %vm212_vm0, %v4115_v29  ;;  %3461 = vmatmul.msk.f32.vlgmr.msrb.gmra.mxu3 %vm212_vm0, %v3447_v17  ;;  %v1485_v39 = vpop.f32.mrf.mxu0  ;;  %v3536_v29 = vld [vmem:[%s4918_s1 + $0x2c8] sm:$0xff] }
 0x170   : >> { %v1280_v57 = vpop.f32.mrf.mxu2  ;;  %2512 = vmatpush.msra.mxu2 %v3536_v29 }
 0x172   : >> { %v1381_v35 = vpop.f32.mrf.mxu3  ;;  %3487 = vmatmul.msk.f32.vlgmr.msrb.gmra.mxu0 %vm212_vm0, %v4292_v63 }
 0x173   : >> { %v1403_v54 = vadd.f32 %v1381_v35, %v1299_v62  ;;  %v3426_v35 = vld [vmem:[%s3718_s7 + $0x67] sm:$0xff] }
 0x174   : >> { %v1175_v19 = vpop.f32.mrf.mxu1 }
 0x175   : >> { %v1195_v8 = vadd.f32 %v1175_v19, %v4467_v43  ;;  %v4636_v34 = vadd.f32 %v1485_v39, %v1403_v54  ;;  %3437 = vmatmul.msk.f32.gmra.mxu2 %vm212_vm0, %v4171_v10  ;;  %v3562_v43 = vld [vmem:[%s4918_s1 + $0x2e8] sm:$0xff]  ;;  %v3535_v39 = vld [vmem:[%s4918_s1 + $0x2c0] sm:$0xff] }
 0x176   : >> { %v3510_v10 = vld [vmem:[%s4918_s1 + $0x2a8] sm:$0xff]  ;;  %2616 = vmatpush.msra.mxu3 %v3562_v43  ;;  %2513 = vmatpush.msra.mxu2 %v3535_v39 }
 0x177   : >> { %v1300_v46 = vadd.f32 %v1280_v57, %v1195_v8  ;;  %3410 = vmatmul.msk.f32.gmra.mxu1 %vm212_vm0, %v4134_v41  ;;  %3462 = vmatmul.msk.f32.gmra.mxu3 %vm212_vm0, %v3448_v58  ;;  %v1488_v51 = vpop.f32.mrf.mxu0  ;;  %v3509_v58 = vld [vmem:[%s4918_s1 + $0x2a0] sm:$0xff] }
 0x178   : >> { %v1283_v44 = vpop.f32.mrf.mxu2  ;;  %2408 = vmatpush.msra.mxu1 %v3510_v10  ;;  %v3587_v10 = vld [vmem:[%s4918_s1 + $0x300] sm:$0xff] }
 0x179   : >> { %2721 = vmatpush.msra.mxu0 %v3587_v10 }
 0x17a   : >> { %v1384_v60 = vpop.f32.mrf.mxu3  ;;  %3488 = vmatmul.msk.f32.gmra.mxu0 %vm212_vm0, %v4312_v49  ;;  %2409 = vmatpush.msra.mxu1 %v3509_v58 }
 0x17b   : >> { %v1404_v14 = vadd.f32 %v1384_v60, %v1300_v46  ;;  %v3400_v60 = vld [vmem:[%s3718_s7 + $0x66] sm:$0xff] }
 0x17c   : >> { %v1178_v41 = vpop.f32.mrf.mxu1 }
 0x17d   : >> { %v1196_v16 = vadd.f32 %v1178_v41, %v4481_v6  ;;  %v4655_v18 = vadd.f32 %v1488_v51, %v1404_v14  ;;  %3438 = vmatmul.msk.f32.gmra.mxu2 %vm212_vm0, %v4196_v53  ;;  %v3427_v51 = vld [vmem:[%s3718_s7 + $0x6f] sm:$0xff] }
 0x17f   : >> { %v1301_v12 = vadd.f32 %v1283_v44, %v1196_v16  ;;  %3411 = vmatmul.msk.f32.gmra.mxu1 %vm212_vm0, %v4160_v55  ;;  %3463 = vmatmul.msk.f32.gmra.mxu3 %vm212_vm0, %v4292_v63  ;;  %v1491_v40 = vpop.f32.mrf.mxu0  ;;  %v3478_v16 = vld [vmem:[%s3718_s7 + $0x78] sm:$0xff] }
 0x180   : >> { %v1286_v13 = vpop.f32.mrf.mxu2 }
 0x182   : >> { %v1387_v6 = vpop.f32.mrf.mxu3  ;;  %3489 = vmatmul.msk.f32.gmra.mxu0 %vm212_vm0, %v4335_v38 }
 0x183   : >> { %v1405_v53 = vadd.f32 %v1387_v6, %v1301_v12  ;;  %v3401_v6 = vld [vmem:[%s3718_s7 + $0x6e] sm:$0xff] }
 0x184   : >> { %v1181_v17 = vpop.f32.mrf.mxu1 }
 0x185   : >> { %v1197_v25 = vadd.f32 %v1181_v17, %v4498_v59  ;;  %v4669_v55 = vadd.f32 %v1491_v40, %v1405_v53  ;;  %3439 = vmatmul.msk.f32.gmra.mxu2 %vm212_vm0, %v4225_v56 }
 0x187   : >> { %v1302_v63 = vadd.f32 %v1286_v13, %v1197_v25  ;;  %3412 = vmatmul.msk.f32.gmra.mxu1 %vm212_vm0, %v4185_v45  ;;  %3464 = vmatmul.msk.f32.gmra.mxu3 %vm212_vm0, %v4312_v49  ;;  %v1494_v62 = vpop.f32.mrf.mxu0  ;;  %v3561_v45 = vld [vmem:[%s4918_s1 + $0x2e0] sm:$0xff] }
 0x188   : >> { %v1289_v57 = vpop.f32.mrf.mxu2  ;;  %2617 = vmatpush.msra.mxu3 %v3561_v45 }
 0x18a   : >> { %v1390_v59 = vpop.f32.mrf.mxu3  ;;  %3490 = vmatmul.msk.f32.gmra.mxu0 %vm212_vm0, %v4364_v31 }
 0x18b   : >> { %v1406_v56 = vadd.f32 %v1390_v59, %v1302_v63  ;;  %v3479_v63 = vld [vmem:[%s3718_s7 + $0x80] sm:$0xff] }
 0x18c   : >> { %v1184_v54 = vpop.f32.mrf.mxu1 }
 0x18d   : >> { %v1198_v49 = vadd.f32 %v1184_v54, %v4521_v3  ;;  %v4687_v19 = vadd.f32 %v1494_v62, %v1406_v56  ;;  %3440 = vmatmul.msk.f32.gmra.mxu2 %vm212_vm0, %v3426_v35 }
 0x18f   : >> { %v1303_v8 = vadd.f32 %v1289_v57, %v1198_v49  ;;  %3413 = vmatmul.msk.f32.gmra.mxu1 %vm212_vm0, %v4210_v37  ;;  %3465 = vmatmul.msk.f32.gmra.mxu3 %vm212_vm0, %v4335_v38  ;;  %v1497_v29 = vpop.f32.mrf.mxu0  ;;  %v3429_v57 = vld [vmem:[%s3718_s7 + $0x7f] sm:$0xff]  ;;  %v3480_v49 = vld [vmem:[%s3718_s7 + $0x88] sm:$0xff] }
 0x190   : >> { %v1292_v46 = vpop.f32.mrf.mxu2 }
 0x192   : >> { %v1393_v3 = vpop.f32.mrf.mxu3  ;;  %3491 = vmatmul.msk.f32.gmra.mxu0 %vm212_vm0, %v4387_v11 }
 0x193   : >> { %v1407_v43 = vadd.f32 %v1393_v3, %v1303_v8  ;;  %v3403_v3 = vld [vmem:[%s3718_s7 + $0x7e] sm:$0xff] }
 0x194   : >> { %v1187_v44 = vpop.f32.mrf.mxu1 }
 0x195   : >> { %v1199_v37 = vadd.f32 %v1187_v44, %v4537_v23  ;;  %v4705_v38 = vadd.f32 %v1497_v29, %v1407_v43  ;;  %3441 = vmatmul.msk.f32.gmra.mxu2 %vm212_vm0, %v3427_v51  ;;  %v3430_v29 = vld [vmem:[%s3718_s7 + $0x87] sm:$0xff] }
 0x197   : >> { %v1304_v14 = vadd.f32 %v1292_v46, %v1199_v37  ;;  %3414 = vmatmul.msk.f32.gmra.mxu1 %vm212_vm0, %v3400_v60  ;;  %3466 = vmatmul.msk.f32.gmra.mxu3 %vm212_vm0, %v4364_v31  ;;  %v1500_v41 = vpop.f32.mrf.mxu0  ;;  %v3481_v60 = vld [vmem:[%s3718_s7 + $0x90] sm:$0xff] }
 0x198   : >> { %v1681_v12 = vpop.f32.mrf.mxu2 }
 0x19a   : >> { %v1396_v40 = vpop.f32.mrf.mxu3  ;;  %3492 = vmatmul.msk.f32.gmra.mxu0 %vm212_vm0, %v3478_v16 }
 0x19b   : >> { %v1408_v23 = vadd.f32 %v1396_v40, %v1304_v14 }
 0x19c   : >> { %v1577_v13 = vpop.f32.mrf.mxu1 }
 0x19d   : >> { %v4715_v53 = vadd.f32 %v1500_v41, %v1408_v23  ;;  %v1607_v17 = vadd.f32 %v1577_v13, %v4564_v42  ;;  %3442 = vmatmul.msk.f32.gmra.mxu2 %vm212_vm0, %v3428_v33  ;;  %v3402_v42 = vld [vmem:[%s3718_s7 + $0x76] sm:$0xff] }
 0x19e   : >> { %v3482_v13 = vld [vmem:[%s3718_s7 + $0x98] sm:$0xff] }
 0x19f   : >> { %v1711_v31 = vadd.f32 %v1681_v12, %v1607_v17  ;;  %3415 = vmatmul.msk.f32.gmra.mxu1 %vm212_vm0, %v3401_v6  ;;  %3467 = vmatmul.msk.f32.gmra.mxu3 %vm212_vm0, %v4387_v11  ;;  %v1890_v25 = vpop.f32.mrf.mxu0  ;;  %v3404_v12 = vld [vmem:[%s3718_s7 + $0x86] sm:$0xff] }
 0x1a0   : >> { %v1684_v62 = vpop.f32.mrf.mxu2 }
 0x1a2   : >> { %v1786_v39 = vpop.f32.mrf.mxu3  ;;  %3493 = vmatmul.msk.f32.gmra.mxu0 %vm212_vm0, %v3479_v63 }
 0x1a3   : >> { %v1816_v59 = vadd.f32 %v1786_v39, %v1711_v31  ;;  %v3577_v39 = vld [vmem:[%s3718_s7 + $0x54] sm:$0xff] }
 0x1a4   : >> { %v1580_v35 = vpop.f32.mrf.mxu1 }
 0x1a5   : >> { %v1608_v56 = vadd.f32 %v1580_v35, %v4584_v36  ;;  %v4727_v45 = vadd.f32 %v1890_v25, %v1816_v59  ;;  %3443 = vmatmul.msk.f32.gmra.mxu2 %vm212_vm0, %v3429_v57 }
 0x1a7   : >> { %v1712_v11 = vadd.f32 %v1684_v62, %v1608_v56  ;;  %3416 = vmatmul.msk.f32.gmra.mxu1 %vm212_vm0, %v3402_v42  ;;  %3468 = vmatmul.msk.f32.gmra.mxu3 %vm212_vm0, %v3478_v16  ;;  %v1893_v54 = vpop.f32.mrf.mxu0 }
 0x1a8   : >> { %v1687_v58 = vpop.f32.mrf.mxu2 }
 0x1aa   : >> { %v1789_v8 = vpop.f32.mrf.mxu3  ;;  %3494 = vmatmul.msk.f32.gmra.mxu0 %vm212_vm0, %v3480_v49 }
 0x1ab   : >> { %v1817_v46 = vadd.f32 %v1789_v8, %v1712_v11 }
 0x1ac   : >> { %v1583_v36 = vpop.f32.mrf.mxu1 }
 0x1ad   : >> { %v1609_v51 = vadd.f32 %v1583_v36, %v4607_v4  ;;  %v4737_v43 = vadd.f32 %v1893_v54, %v1817_v46  ;;  %3444 = vmatmul.msk.f32.gmra.mxu2 %vm212_vm0, %v3430_v29 }
 0x1af   : >> { %v1713_v10 = vadd.f32 %v1687_v58, %v1609_v51  ;;  %3417 = vmatmul.msk.f32.gmra.mxu1 %vm212_vm0, %v3403_v3  ;;  %3469 = vmatmul.msk.f32.gmra.mxu3 %vm212_vm0, %v3479_v63  ;;  %v1896_v44 = vpop.f32.mrf.mxu0 }
 0x1b0   : >> { %v1690_v37 = vpop.f32.mrf.mxu2 }
 0x1b2   : >> { %v1792_v14 = vpop.f32.mrf.mxu3  ;;  %3495 = vmatmul.msk.f32.gmra.mxu0 %vm212_vm0, %v3481_v60 }
 0x1b3   : >> { %v1818_v41 = vadd.f32 %v1792_v14, %v1713_v10 }
 0x1b4   : >> { %v1586_v16 = vpop.f32.mrf.mxu1 }
 0x1b5   : >> { %v1610_v4 = vadd.f32 %v1586_v16, %v4625_v21  ;;  %v4746_v40 = vadd.f32 %v1896_v44, %v1818_v41  ;;  %3539 = vmatmul.msk.f32.vlgmr.msra.gmra.mxu2 %vm212_vm0, %v4330_v61  ;;  %v3504_v41 = vld [vmem:[%s3718_s7 + $0x79] sm:$0xff] }
 0x1b6   : >> { %v3556_v16 = vld [vmem:[%s3718_s7 + $0x7b] sm:$0xff] }
 0x1b7   : >> { %v1714_v33 = vadd.f32 %v1690_v37, %v1610_v4  ;;  %3418 = vmatmul.msk.f32.gmra.mxu1 %vm212_vm0, %v3404_v12  ;;  %3470 = vmatmul.msk.f32.gmra.mxu3 %vm212_vm0, %v3480_v49  ;;  %v1899_v23 = vpop.f32.mrf.mxu0  ;;  %v3531_v37 = vld [vmem:[%s3718_s7 + $0x82] sm:$0xff] }
 0x1b8   : >> { %v1693_v6 = vpop.f32.mrf.mxu2 }
 0x1ba   : >> { %v1795_v17 = vpop.f32.mrf.mxu3  ;;  %3496 = vmatmul.msk.f32.gmra.mxu0 %vm212_vm0, %v3482_v13 }
 0x1bb   : >> { %v1819_v31 = vadd.f32 %v1795_v17, %v1714_v33  ;;  %v3557_v17 = vld [vmem:[%s3718_s7 + $0x83] sm:$0xff] }
 0x1bc   : >> { %v1589_v25 = vpop.f32.mrf.mxu1 }
 0x1bd   : >> { %v1611_v21 = vadd.f32 %v1589_v25, %v4636_v34  ;;  %v4755_v63 = vadd.f32 %v1899_v23, %v1819_v31  ;;  %3540 = vmatmul.msk.f32.gmra.mxu2 %vm212_vm0, %v4353_v52  ;;  %v3532_v23 = vld [vmem:[%s3718_s7 + $0x8a] sm:$0xff] }
 0x1bf   : >> { %v1715_v61 = vadd.f32 %v1693_v6, %v1611_v21  ;;  %3513 = vmatmul.msk.f32.vlgmr.msra.gmra.mxu1 %vm212_vm0, %v4318_v2  ;;  %3565 = vmatmul.msk.f32.vlgmr.msra.gmra.mxu3 %vm212_vm0, %v4515_v9  ;;  %v1902_v62 = vpop.f32.mrf.mxu0  ;;  %v3578_v9 = vld [vmem:[%s3718_s7 + $0x5c] sm:$0xff] }
 0x1c0   : >> { %v1696_v57 = vpop.f32.mrf.mxu2 }
 0x1c2   : >> { %v1798_v59 = vpop.f32.mrf.mxu3  ;;  %3591 = vmatmul.msk.f32.vlgmr.msra.gmra.mxu0 %vm212_vm0, %v3577_v39  ;;  %v3533_v39 = vld [vmem:[%s3718_s7 + $0x92] sm:$0xff] }
 0x1c3   : >> { %v1820_v34 = vadd.f32 %v1798_v59, %v1715_v61 }
 0x1c4   : >> { %v1592_v35 = vpop.f32.mrf.mxu1 }
 0x1c5   : >> { %v1612_v42 = vadd.f32 %v1592_v35, %v4655_v18  ;;  %v4766_v56 = vadd.f32 %v1902_v62, %v1820_v34  ;;  %3541 = vmatmul.msk.f32.gmra.mxu2 %vm212_vm0, %v4379_v30  ;;  %v3506_v34 = vld [vmem:[%s3718_s7 + $0x89] sm:$0xff] }
 0x1c7   : >> { %v1716_v2 = vadd.f32 %v1696_v57, %v1612_v42  ;;  %3514 = vmatmul.msk.f32.gmra.mxu1 %vm212_vm0, %v4338_v0  ;;  %3566 = vmatmul.msk.f32.gmra.mxu3 %vm212_vm0, %v4532_v27  ;;  %v1905_v52 = vpop.f32.mrf.mxu0 }
 0x1c8   : >> { %v1699_v11 = vpop.f32.mrf.mxu2 }
 0x1ca   : >> { %v1801_v54 = vpop.f32.mrf.mxu3  ;;  %3592 = vmatmul.msk.f32.gmra.mxu0 %vm212_vm0, %v3578_v9 }
 0x1cb   : >> { %v1821_v49 = vadd.f32 %v1801_v54, %v1716_v2  ;;  %v3534_v54 = vld [vmem:[%s3718_s7 + $0x9a] sm:$0xff] }
 0x1cc   : >> { %v1595_v18 = vpop.f32.mrf.mxu1 }
 0x1cd   : >> { %v1613_v58 = vadd.f32 %v1595_v18, %v4669_v55  ;;  %v4777_v8 = vadd.f32 %v1905_v52, %v1821_v49  ;;  %3542 = vmatmul.msk.f32.gmra.mxu2 %vm212_vm0, %v4402_v1  ;;  %v3584_v52 = vld [vmem:[%s3718_s7 + $0x8c] sm:$0xff] }
 0x1cf   : >> { %v1717_v30 = vadd.f32 %v1699_v11, %v1613_v58  ;;  %3515 = vmatmul.msk.f32.gmra.mxu1 %vm212_vm0, %v4367_v50  ;;  %3567 = vmatmul.msk.f32.gmra.mxu3 %vm212_vm0, %v4558_v47  ;;  %v1908_v0 = vpop.f32.mrf.mxu0  ;;  %v3559_v58 = vld [vmem:[%s3718_s7 + $0x93] sm:$0xff] }
 0x1d0   : >> { %v1702_v27 = vpop.f32.mrf.mxu2 }
 0x1d2   : >> { %v1804_v29 = vpop.f32.mrf.mxu3  ;;  %3593 = vmatmul.msk.f32.gmra.mxu0 %vm212_vm0, %v4518_v32 }
 0x1d3   : >> { %v1822_v55 = vadd.f32 %v1804_v29, %v1717_v30 }
 0x1d4   : >> { %v1598_v46 = vpop.f32.mrf.mxu1 }
 0x1d5   : >> { %v1614_v36 = vadd.f32 %v1598_v46, %v4687_v19  ;;  %v4788_v3 = vadd.f32 %v1908_v0, %v1822_v55  ;;  %3543 = vmatmul.msk.f32.gmra.mxu2 %vm212_vm0, %v4428_v20  ;;  %v3530_v19 = vld [vmem:[%s3718_s7 + $0x7a] sm:$0xff] }
 0x1d6   : >> { %v3585_v55 = vld [vmem:[%s3718_s7 + $0x94] sm:$0xff] }
 0x1d7   : >> { %v1718_v50 = vadd.f32 %v1702_v27, %v1614_v36  ;;  %3516 = vmatmul.msk.f32.gmra.mxu1 %vm212_vm0, %v4390_v28  ;;  %3568 = vmatmul.msk.f32.gmra.mxu3 %vm212_vm0, %v4578_v5  ;;  %v1911_v1 = vpop.f32.mrf.mxu0 }
 0x1d8   : >> { %v1705_v47 = vpop.f32.mrf.mxu2 }
 0x1da   : >> { %v1807_v32 = vpop.f32.mrf.mxu3  ;;  %3594 = vmatmul.msk.f32.gmra.mxu0 %vm212_vm0, %v4535_v48 }
 0x1db   : >> { %v1823_v51 = vadd.f32 %v1807_v32, %v1718_v50 }
 0x1dc   : >> { %v1601_v10 = vpop.f32.mrf.mxu1 }
 0x1dd   : >> { %v1615_v20 = vadd.f32 %v1601_v10, %v4705_v38  ;;  %v4800_v44 = vadd.f32 %v1911_v1, %v1823_v51  ;;  %3544 = vmatmul.msk.f32.gmra.mxu2 %vm212_vm0, %v3530_v19 }
 0x1df   : >> { %v1719_v28 = vadd.f32 %v1705_v47, %v1615_v20  ;;  %3517 = vmatmul.msk.f32.gmra.mxu1 %vm212_vm0, %v4413_v24  ;;  %3569 = vmatmul.msk.f32.gmra.mxu3 %vm212_vm0, %v4601_v26  ;;  %v1914_v5 = vpop.f32.mrf.mxu0  ;;  %v3508_v47 = vld [vmem:[%s3718_s7 + $0x99] sm:$0xff] }
 0x1e0   : >> { %v1708_v48 = vpop.f32.mrf.mxu2  ;;  %v3586_v20 = vld [vmem:[%s3718_s7 + $0x9c] sm:$0xff] }
 0x1e2   : >> { %v1810_v60 = vpop.f32.mrf.mxu3  ;;  %3595 = vmatmul.msk.f32.gmra.mxu0 %vm212_vm0, %v4561_v22 }
 0x1e3   : >> { %v1824_v38 = vadd.f32 %v1810_v60, %v1719_v28 }
 0x1e4   : >> { %v1604_v14 = vpop.f32.mrf.mxu1 }
 0x1e5   : >> { %v1616_v12 = vadd.f32 %v1604_v14, %v4715_v53  ;;  %v4813_v24 = vadd.f32 %v1914_v5, %v1824_v38  ;;  %3545 = vmatmul.msk.f32.gmra.mxu2 %vm212_vm0, %v3531_v37  ;;  %v3505_v53 = vld [vmem:[%s3718_s7 + $0x81] sm:$0xff] }
 0x1e7   : >> { %v1720_v26 = vadd.f32 %v1708_v48, %v1616_v12  ;;  %3518 = vmatmul.msk.f32.gmra.mxu1 %vm212_vm0, %v3504_v41  ;;  %3570 = vmatmul.msk.f32.gmra.mxu3 %vm212_vm0, %v3556_v16  ;;  %v1917_v22 = vpop.f32.mrf.mxu0 }
 0x1e8   : >> { %v2098_v4 = vpop.f32.mrf.mxu2 }
 0x1ea   : >> { %v1813_v33 = vpop.f32.mrf.mxu3  ;;  %3596 = vmatmul.msk.f32.gmra.mxu0 %vm212_vm0, %v4581_v7 }
 0x1eb   : >> { %v1825_v13 = vadd.f32 %v1813_v33, %v1720_v26 }
 0x1ec   : >> { %v1994_v6 = vpop.f32.mrf.mxu1 }
 0x1ed   : >> { %v4823_v31 = vadd.f32 %v1917_v22, %v1825_v13  ;;  %v2024_v25 = vadd.f32 %v1994_v6, %v4727_v45  ;;  %3546 = vmatmul.msk.f32.gmra.mxu2 %vm212_vm0, %v3532_v23  ;;  %v3558_v45 = vld [vmem:[%s3718_s7 + $0x8b] sm:$0xff] }
 0x1ef   : >> { %v2128_v21 = vadd.f32 %v2098_v4, %v2024_v25  ;;  %3519 = vmatmul.msk.f32.gmra.mxu1 %vm212_vm0, %v3505_v53  ;;  %3571 = vmatmul.msk.f32.gmra.mxu3 %vm212_vm0, %v3557_v17  ;;  %v2307_v7 = vpop.f32.mrf.mxu0 }
 0x1f0   : >> { %v2101_v61 = vpop.f32.mrf.mxu2 }
 0x1f2   : >> { %v2202_v62 = vpop.f32.mrf.mxu3  ;;  %3597 = vmatmul.msk.f32.gmra.mxu0 %vm212_vm0, %v4604_v15 }
 0x1f3   : >> { %v2232_v57 = vadd.f32 %v2202_v62, %v2128_v21 }
 0x1f4   : >> { %v1997_v59 = vpop.f32.mrf.mxu1 }
 0x1f5   : >> { %v2025_v35 = vadd.f32 %v1997_v59, %v4737_v43  ;;  %v4835_v42 = vadd.f32 %v2307_v7, %v2232_v57  ;;  %3547 = vmatmul.msk.f32.gmra.mxu2 %vm212_vm0, %v3533_v39  ;;  %v3507_v43 = vld [vmem:[%s3718_s7 + $0x91] sm:$0xff] }
 0x1f7   : >> { %v2129_v2 = vadd.f32 %v2101_v61, %v2025_v35  ;;  %3520 = vmatmul.msk.f32.gmra.mxu1 %vm212_vm0, %v3506_v34  ;;  %3572 = vmatmul.msk.f32.gmra.mxu3 %vm212_vm0, %v3558_v45  ;;  %v2310_v15 = vpop.f32.mrf.mxu0 }
 0x1f8   : >> { %v2104_v9 = vpop.f32.mrf.mxu2 }
 0x1fa   : >> { %v2205_v11 = vpop.f32.mrf.mxu3  ;;  %3598 = vmatmul.msk.f32.gmra.mxu0 %vm212_vm0, %v3584_v52 }
 0x1fb   : >> { %v2233_v49 = vadd.f32 %v2205_v11, %v2129_v2 }
 0x1fc   : >> { %v2000_v18 = vpop.f32.mrf.mxu1 }
 0x1fd   : >> { %v2026_v30 = vadd.f32 %v2000_v18, %v4746_v40  ;;  %v4846_v0 = vadd.f32 %v2310_v15, %v2233_v49  ;;  %3548 = vmatmul.msk.f32.gmra.mxu2 %vm212_vm0, %v3534_v54  ;;  %v3560_v40 = vld [vmem:[%s3718_s7 + $0x9b] sm:$0xff]  ;;  %s3609_s7 = sshll.u32 %s3654_s24, 4  ;;  %s177_s24 = sadd.s32 1, %s3654_s24  }
 0x1fe   : >> { %s4898_s28 = scalar_lea.vmem %s3692_s20, %s3609_s7  ;;  %p174_p4 = scmp.ge.s32.totalorder %s177_s24, 4  }
 0x1ff   : >> { %v2130_v27 = vadd.f32 %v2104_v9, %v2026_v30  ;;  %3521 = vmatmul.msk.f32.gmra.mxu1 %vm212_vm0, %v3507_v43  ;;  %3573 = vmatmul.msk.f32.gmra.mxu3 %vm212_vm0, %v3559_v58  ;;  %v2313_v29 = vpop.f32.mrf.mxu0 }
 0x200   : >> { %v2107_v46 = vpop.f32.mrf.mxu2 }
 0x202   : >> { %v2208_v36 = vpop.f32.mrf.mxu3  ;;  %3599 = vmatmul.msk.f32.gmra.mxu0 %vm212_vm0, %v3585_v55 }
 0x203   : >> { %v2234_v50 = vadd.f32 %v2208_v36, %v2130_v27 }
 0x204   : >> { %v2003_v1 = vpop.f32.mrf.mxu1 }
 0x205   : >> { %v2027_v32 = vadd.f32 %v2003_v1, %v4755_v63  ;;  %v4856_v19 = vadd.f32 %v2313_v29, %v2234_v50 }
 0x207   : >> { %v2131_v51 = vadd.f32 %v2107_v46, %v2027_v32  ;;  %3522 = vmatmul.msk.f32.gmra.mxu1 %vm212_vm0, %v3508_v47  ;;  %3574 = vmatmul.msk.f32.gmra.mxu3 %vm212_vm0, %v3560_v40  ;;  %v2316_v10 = vpop.f32.mrf.mxu0 }
 0x208   : >> { %v2110_v28 = vpop.f32.mrf.mxu2 }
 0x20a   : >> { %v2211_v5 = vpop.f32.mrf.mxu3  ;;  %3600 = vmatmul.msk.f32.gmra.mxu0 %vm212_vm0, %v3586_v20 }
 0x20b   : >> { %v2235_v48 = vadd.f32 %v2211_v5, %v2131_v51 }
 0x20c   : >> { %v2006_v60 = vpop.f32.mrf.mxu1 }
 0x20d   : >> { %v2028_v37 = vadd.f32 %v2006_v60, %v4766_v56  ;;  %v4863_v38 = vadd.f32 %v2316_v10, %v2235_v48 }
 0x20f   : >> { %v2132_v63 = vadd.f32 %v2110_v28, %v2028_v37  ;;  %v2319_v14 = vpop.f32.mrf.mxu0 }
 0x210   : >> { %v2113_v41 = vpop.f32.mrf.mxu2 }
 0x212   : >> { %v2214_v16 = vpop.f32.mrf.mxu3 }
 0x213   : >> { %v2236_v12 = vadd.f32 %v2214_v16, %v2132_v63 }
 0x214   : >> { %v2009_v26 = vpop.f32.mrf.mxu1 }
 0x215   : >> { %v2029_v22 = vadd.f32 %v2009_v26, %v4777_v8  ;;  %v4866_v4 = vadd.f32 %v2319_v14, %v2236_v12 }
 0x217   : >> { %v2133_v33 = vadd.f32 %v2113_v41, %v2029_v22  ;;  %v2322_v23 = vpop.f32.mrf.mxu0 }
 0x218   : >> { %v2116_v13 = vpop.f32.mrf.mxu2 }
 0x21a   : >> { %v2217_v6 = vpop.f32.mrf.mxu3 }
 0x21b   : >> { %v2237_v53 = vadd.f32 %v2217_v6, %v2133_v33 }
 0x21c   : >> { %v2012_v17 = vpop.f32.mrf.mxu1 }
 0x21d   : >> { %v2030_v56 = vadd.f32 %v2012_v17, %v4788_v3  ;;  %v4869_v25 = vadd.f32 %v2322_v23, %v2237_v53 }
 0x21f   : >> { %v2134_v21 = vadd.f32 %v2116_v13, %v2030_v56  ;;  %v2325_v7 = vpop.f32.mrf.mxu0 }
 0x220   : >> { %v2119_v61 = vpop.f32.mrf.mxu2 }
 0x222   : >> { %v2220_v62 = vpop.f32.mrf.mxu3 }
 0x223   : >> { %v2238_v39 = vadd.f32 %v2220_v62, %v2134_v21 }
 0x224   : >> { %v2015_v57 = vpop.f32.mrf.mxu1 }
 0x225   : >> { %v2031_v8 = vadd.f32 %v2015_v57, %v4800_v44  ;;  %v4872_v59 = vadd.f32 %v2325_v7, %v2238_v39 }
 0x227   : >> { %v2135_v34 = vadd.f32 %v2119_v61, %v2031_v8  ;;  %v2328_v45 = vpop.f32.mrf.mxu0 }
 0x228   : >> { %v2122_v35 = vpop.f32.mrf.mxu2 }
 0x22a   : >> { %v2223_v2 = vpop.f32.mrf.mxu3 }
 0x22b   : >> { %v2239_v15 = vadd.f32 %v2223_v2, %v2135_v34 }
 0x22c   : >> { %v2018_v52 = vpop.f32.mrf.mxu1 }
 0x22d   : >> { %v2032_v3 = vadd.f32 %v2018_v52, %v4813_v24  ;;  %v4875_v9 = vadd.f32 %v2328_v45, %v2239_v15 }
 0x22f   : >> { %v2136_v11 = vadd.f32 %v2122_v35, %v2032_v3  ;;  %v2331_v54 = vpop.f32.mrf.mxu0 }
 0x230   : >> { %v2125_v49 = vpop.f32.mrf.mxu2 }
 0x232   : >> { %v2226_v18 = vpop.f32.mrf.mxu3 }
 0x233   : >> { %v2240_v43 = vadd.f32 %v2226_v18, %v2136_v11 }
 0x234   : >> { %v2021_v58 = vpop.f32.mrf.mxu1 }
 0x235   : >> { %v2033_v44 = vadd.f32 %v2021_v58, %v4823_v31  ;;  %v4878_v30 = vadd.f32 %v2331_v54, %v2240_v43 }
 0x237   : >> { %v2137_v27 = vadd.f32 %v2125_v49, %v2033_v44  ;;  %v2334_v29 = vpop.f32.mrf.mxu0 }
 0x238   : >> { %v2515_v55 = vpop.f32.mrf.mxu2 }
 0x23a   : >> { %v2229_v46 = vpop.f32.mrf.mxu3 }
 0x23b   : >> { %v2241_v36 = vadd.f32 %v2229_v46, %v2137_v27 }
 0x23c   : >> { %v2411_v50 = vpop.f32.mrf.mxu1 }
 0x23d   : >> { %v4880_v1 = vadd.f32 %v2334_v29, %v2241_v36  ;;  %v2441_v24 = vadd.f32 %v2411_v50, %v4835_v42  ;;  %v4922_v29 = vld [vmem:[#allocation3_spill] sm:$0xff] }
 0x23f   : >> { %v2723_v47 = vpop.f32.mrf.mxu0  ;;  %v2545_v32 = vadd.f32 %v2515_v55, %v2441_v24  ;;  %v2784_v55 = vperm.slane %v4922_v29, 0 }
 0x240   : >> { %v2518_v40 = vpop.f32.mrf.mxu2 }
 0x242   : >> { %v2619_v51 = vpop.f32.mrf.mxu3 }
 0x243   : >> { %v2649_v10 = vadd.f32 %v2619_v51, %v2545_v32 }
 0x244   : >> { %v2414_v20 = vpop.f32.mrf.mxu1 }
 0x245   : >> { %v2442_v31 = vadd.f32 %v2414_v20, %v4846_v0  ;;  %v2753_v28 = vadd.f32 %v2723_v47, %v2649_v10 }
 0x247   : >> { %2763 = vst.msk [vmem:[#allocation2] sm:$0xff] %vm212_vm0, %v2753_v28  ;;  %v2726_v5 = vpop.f32.mrf.mxu0  ;;  %v2546_v60 = vadd.f32 %v2518_v40, %v2442_v31 }
 0x248   : >> { %v2521_v48 = vpop.f32.mrf.mxu2 }
 0x24a   : >> { %v2622_v37 = vpop.f32.mrf.mxu3 }
 0x24b   : >> { %v2650_v63 = vadd.f32 %v2622_v37, %v2546_v60 }
 0x24c   : >> { %v2417_v14 = vpop.f32.mrf.mxu1 }
 0x24d   : >> { %v2443_v41 = vadd.f32 %v2417_v14, %v4856_v19  ;;  %v2754_v42 = vadd.f32 %v2726_v5, %v2650_v63 }
 0x24f   : >> { %2764 = vst.msk [vmem:[#allocation2 + $0x8] sm:$0xff] %vm212_vm0, %v2754_v42  ;;  %v2729_v16 = vpop.f32.mrf.mxu0  ;;  %v2547_v26 = vadd.f32 %v2521_v48, %v2443_v41 }
 0x250   : >> { %v2524_v12 = vpop.f32.mrf.mxu2 }
 0x252   : >> { %v2625_v22 = vpop.f32.mrf.mxu3 }
 0x253   : >> { %v2651_v33 = vadd.f32 %v2625_v22, %v2547_v26 }
 0x254   : >> { %v2420_v0 = vpop.f32.mrf.mxu1 }
 0x255   : >> { %v2444_v23 = vadd.f32 %v2420_v0, %v4863_v38  ;;  %v2755_v13 = vadd.f32 %v2729_v16, %v2651_v33 }
 0x256   : >> { %v2773_v11 = vld [vmem:[#allocation2] ss:$2 sm:$0xff]  ;;  %v2775_v54 = vld [vmem:[#allocation2 + $0x1] ss:$2 sm:$0xff] }
 0x257   : >> { %2765 = vst.msk [vmem:[#allocation2 + $0x10] sm:$0xff] %vm212_vm0, %v2755_v13  ;;  %v2732_v6 = vpop.f32.mrf.mxu0  ;;  %v2548_v17 = vadd.f32 %v2524_v12, %v2444_v23  ;;  %v2780_v27 = vmax.f32 %v2773_v11, %v2775_v54 }
 0x258   : >> { %v2527_v53 = vpop.f32.mrf.mxu2 }
 0x25a   : >> { %v2628_v56 = vpop.f32.mrf.mxu3 }
 0x25b   : >> { %v2652_v21 = vadd.f32 %v2628_v56, %v2548_v17 }
 0x25c   : >> { %v2423_v19 = vpop.f32.mrf.mxu1 }
 0x25d   : >> { %v2445_v7 = vadd.f32 %v2423_v19, %v4866_v4  ;;  %v2756_v61 = vadd.f32 %v2732_v6, %v2652_v21 }
 0x25f   : >> { %2766 = vst.msk [vmem:[#allocation2 + $0x18] sm:$0xff] %vm212_vm0, %v2756_v61  ;;  %v2735_v62 = vpop.f32.mrf.mxu0  ;;  %v2549_v57 = vadd.f32 %v2527_v53, %v2445_v7 }
 0x260   : >> { %v2530_v39 = vpop.f32.mrf.mxu2 }
 0x262   : >> { %v2631_v8 = vpop.f32.mrf.mxu3 }
 0x263   : >> { %v2653_v34 = vadd.f32 %v2631_v8, %v2549_v57 }
 0x264   : >> { %v2426_v38 = vpop.f32.mrf.mxu1 }
 0x265   : >> { %v2446_v45 = vadd.f32 %v2426_v38, %v4869_v25  ;;  %v2757_v35 = vadd.f32 %v2735_v62, %v2653_v34 }
 0x267   : >> { %2767 = vst.msk [vmem:[#allocation2 + $0x20] sm:$0xff] %vm212_vm0, %v2757_v35  ;;  %v2738_v2 = vpop.f32.mrf.mxu0  ;;  %v2550_v52 = vadd.f32 %v2530_v39, %v2446_v45 }
 0x268   : >> { %v2533_v15 = vpop.f32.mrf.mxu2 }
 0x26a   : >> { %v2634_v3 = vpop.f32.mrf.mxu3 }
 0x26b   : >> { %v2654_v4 = vadd.f32 %v2634_v3, %v2550_v52 }
 0x26c   : >> { %v2429_v49 = vpop.f32.mrf.mxu1 }
 0x26d   : >> { %v2447_v18 = vadd.f32 %v2429_v49, %v4872_v59  ;;  %v2758_v43 = vadd.f32 %v2738_v2, %v2654_v4 }
 0x26e   : >> { %v2777_v58 = vld [vmem:[#allocation2 + $0x14] ss:$2 sm:$0xff]  ;;  %v2779_v44 = vld [vmem:[#allocation2 + $0x15] ss:$2 sm:$0xff] }
 0x26f   : >> { %v2781_v25 = vmax.f32 %v2777_v58, %v2779_v44  ;;  %2768 = vst.msk [vmem:[#allocation2 + $0x28] sm:$0xff] %vm212_vm0, %v2758_v43  ;;  %v2741_v46 = vpop.f32.mrf.mxu0  ;;  %v2551_v50 = vadd.f32 %v2533_v15, %v2447_v18 }
 0x270   : >> { %v2536_v47 = vpop.f32.mrf.mxu2 }
 0x271   : >> { %v2782_v36 = vmax.f32 %v2780_v27, %v2781_v25 }
 0x272   : >> { %v2637_v24 = vpop.f32.mrf.mxu3 }
 0x273   : >> { %v2786_v40 = vadd.f32 %v2784_v55, %v2782_v36  ;;  %v2655_v59 = vadd.f32 %v2637_v24, %v2551_v50 }
 0x274   : >> { %v2432_v32 = vpop.f32.mrf.mxu1 }
 0x275   : >> { %2790 = vst.msk [vmem:[%s4898_s28] sm:$0xff] %vm212_vm0, %v2786_v40  ;;  %v2448_v51 = vadd.f32 %v2432_v32, %v4875_v9  ;;  %v2759_v10 = vadd.f32 %v2741_v46, %v2655_v59 }
 0x277   : >> { %2769 = vst.msk [vmem:[#allocation2 + $0x30] sm:$0xff] %vm212_vm0, %v2759_v10  ;;  %v2744_v20 = vpop.f32.mrf.mxu0  ;;  %v2552_v31 = vadd.f32 %v2536_v47, %v2448_v51 }
 0x278   : >> { %v2539_v60 = vpop.f32.mrf.mxu2 }
 0x27a   : >> { %v2640_v28 = vpop.f32.mrf.mxu3 }
 0x27b   : >> { %v2656_v5 = vadd.f32 %v2640_v28, %v2552_v31 }
 0x27c   : >> { %v2435_v48 = vpop.f32.mrf.mxu1 }
 0x27d   : >> { %v2449_v37 = vadd.f32 %v2435_v48, %v4878_v30  ;;  %v2760_v63 = vadd.f32 %v2744_v20, %v2656_v5 }
 0x27e   : >> { %v2792_v6 = vld [vmem:[#allocation2 + $0x28] ss:$2 sm:$0xff]  ;;  %v2794_v53 = vld [vmem:[#allocation2 + $0x29] ss:$2 sm:$0xff] }
 0x27f   : >> { %2770 = vst.msk [vmem:[#allocation2 + $0x38] sm:$0xff] %vm212_vm0, %v2760_v63  ;;  %v2747_v14 = vpop.f32.mrf.mxu0  ;;  %v2553_v41 = vadd.f32 %v2539_v60, %v2449_v37  ;;  %v2799_v21 = vmax.f32 %v2792_v6, %v2794_v53 }
 0x280   : >> { %v2542_v22 = vpop.f32.mrf.mxu2 }
 0x282   : >> { %v2643_v42 = vpop.f32.mrf.mxu3 }
 0x283   : >> { %v2657_v16 = vadd.f32 %v2643_v42, %v2553_v41 }
 0x284   : >> { %v2438_v12 = vpop.f32.mrf.mxu1 }
 0x285   : >> { %v2450_v9 = vadd.f32 %v2438_v12, %v4880_v1  ;;  %v2761_v26 = vadd.f32 %v2747_v14, %v2657_v16 }
 0x287   : >> { %2771 = vst.msk [vmem:[#allocation2 + $0x40] sm:$0xff] %vm212_vm0, %v2761_v26  ;;  %v2554_v33 = vadd.f32 %v2542_v22, %v2450_v9  ;;  %v2750_v23 = vpop.f32.mrf.mxu0 }
 0x28a   : >> { %v2646_v0 = vpop.f32.mrf.mxu3 }
 0x28b   : >> { %v2658_v13 = vadd.f32 %v2646_v0, %v2554_v33 }
 0x28d   : >> { %v2762_v30 = vadd.f32 %v2750_v23, %v2658_v13 }
 0x28f   : >> { %2772 = vst.msk [vmem:[#allocation2 + $0x48] sm:$0xff] %vm212_vm0, %v2762_v30 }
 0x296   : >> { %v2796_v17 = vld [vmem:[#allocation2 + $0x3c] ss:$2 sm:$0xff]  ;;  %v2798_v56 = vld [vmem:[#allocation2 + $0x3d] ss:$2 sm:$0xff] }
 0x297   : >> { %v2800_v19 = vmax.f32 %v2796_v17, %v2798_v56 }
 0x299   : >> { %v2801_v7 = vmax.f32 %v2799_v21, %v2800_v19  ;;  %176 = sbr.rel (!%p174_p4) target bundleno = 15 (0xf), region = 127 }
 0x29b   : >> { %v2802_v1 = vadd.f32 %v2801_v7, %v2784_v55 }
 0x29d   : >> { %3605 = vst.msk [vmem:[%s4898_s28 + $0x8] sm:$0xff] %vm212_vm0, %v2802_v1 }
 0x29e PF: > { %s13_s12 = sadd.s32 1, %s3650_s12  }
 0x29f   : > { %p10_p5 = scmp.ge.s32.totalorder %s13_s12, 4  }
 0x2a1   :  { %12 = sbr.rel (!%p10_p5) target bundleno = 1 (0x1), region = 138 }

// kernel: my_module_forward.7
= control target key start
LH: loop header
LB: loop body
LE: loop exit
PB: predicated region body
PF: predicated region fallthrough
CT: control target
= control target key end

     0   :  { %vm332_vm0 = vcmask 523264   ;;  %s835_s1 = inlined_call_operand.vmem [shape: f32[1024,64], index: 1, kind: input, shape index: {}]   ;;  %s836_s2 = inlined_call_operand.vmem [shape: f32[1,64], index: 2, kind: input, shape index: {}]   ;;  %s837_s0 = inlined_call_operand.vmem [shape: f32[8,1024], index: 0, kind: input, shape index: {}]   ;;  %s838_s4 = inlined_call_operand.vmem [shape: f32[1,128], index: 4, kind: input, shape index: {}]   ;;  %s839_s3 = inlined_call_operand.vmem [shape: f32[64,128], index: 3, kind: input, shape index: {}]   ;;  %s840_s5 = inlined_call_operand.vmem [shape: f32[8,128], index: 5, kind: output, shape index: {}]  }
   0x1   :  { %v75_v0 = vld [vmem:[%s835_s1 + $0x178] sm:$0xff]  ;;  %v74_v2 = vld [vmem:[%s835_s1 + $0x170] sm:$0xff]  ;;  %v73_v6 = vld [vmem:[%s835_s1 + $0x168] sm:$0xff] }
   0x2   :  { %v43_v1 = vld [vmem:[%s835_s1 + $0x78] sm:$0xff]  ;;  %200 = vmatpush.msra.mxu2 %v75_v0  ;;  %v42_v4 = vld [vmem:[%s835_s1 + $0x70] sm:$0xff]  ;;  %v41_v8 = vld [vmem:[%s835_s1 + $0x68] sm:$0xff] }
   0x3   :  { %160 = vmatpush.msra.mxu0 %v43_v1  ;;  %v91_v3 = vld [vmem:[%s835_s1 + $0x1f8] sm:$0xff]  ;;  %v90_v7 = vld [vmem:[%s835_s1 + $0x1f0] sm:$0xff]  ;;  %v89_v10 = vld [vmem:[%s835_s1 + $0x1e8] sm:$0xff] }
   0x4   :  { %v59_v5 = vld [vmem:[%s835_s1 + $0xf8] sm:$0xff]  ;;  %220 = vmatpush.msra.mxu3 %v91_v3  ;;  %201 = vmatpush.msra.mxu2 %v74_v2  ;;  %v58_v9 = vld [vmem:[%s835_s1 + $0xf0] sm:$0xff]  ;;  %v72_v11 = vld [vmem:[%s835_s1 + $0x160] sm:$0xff] }
   0x5   :  { %180 = vmatpush.msra.mxu1 %v59_v5  ;;  %161 = vmatpush.msra.mxu0 %v42_v4  ;;  %v40_v12 = vld [vmem:[%s835_s1 + $0x60] sm:$0xff]  ;;  %v57_v13 = vld [vmem:[%s835_s1 + $0xe8] sm:$0xff]  ;;  %v71_v16 = vld [vmem:[%s835_s1 + $0x158] sm:$0xff] }
   0x6   :  { %221 = vmatpush.msra.mxu3 %v90_v7  ;;  %202 = vmatpush.msra.mxu2 %v73_v6  ;;  %v88_v14 = vld [vmem:[%s835_s1 + $0x1e0] sm:$0xff]  ;;  %v39_v17 = vld [vmem:[%s835_s1 + $0x58] sm:$0xff]  ;;  %v70_v20 = vld [vmem:[%s835_s1 + $0x150] sm:$0xff] }
   0x7   :  { %181 = vmatpush.msra.mxu1 %v58_v9  ;;  %162 = vmatpush.msra.mxu0 %v41_v8  ;;  %v56_v15 = vld [vmem:[%s835_s1 + $0xe0] sm:$0xff]  ;;  %v87_v18 = vld [vmem:[%s835_s1 + $0x1d8] sm:$0xff]  ;;  %v38_v21 = vld [vmem:[%s835_s1 + $0x50] sm:$0xff] }
   0x8   :  { %222 = vmatpush.msra.mxu3 %v89_v10  ;;  %203 = vmatpush.msra.mxu2 %v72_v11  ;;  %v55_v19 = vld [vmem:[%s835_s1 + $0xd8] sm:$0xff]  ;;  %v86_v22 = vld [vmem:[%s835_s1 + $0x1d0] sm:$0xff]  ;;  %v69_v24 = vld [vmem:[%s835_s1 + $0x148] sm:$0xff] }
   0x9   :  { %182 = vmatpush.msra.mxu1 %v57_v13  ;;  %163 = vmatpush.msra.mxu0 %v40_v12  ;;  %v54_v23 = vld [vmem:[%s835_s1 + $0xd0] sm:$0xff]  ;;  %v37_v25 = vld [vmem:[%s835_s1 + $0x48] sm:$0xff]  ;;  %v68_v28 = vld [vmem:[%s835_s1 + $0x140] sm:$0xff] }
   0xa   :  { %223 = vmatpush.msra.mxu3 %v88_v14  ;;  %204 = vmatpush.msra.mxu2 %v71_v16  ;;  %v85_v26 = vld [vmem:[%s835_s1 + $0x1c8] sm:$0xff]  ;;  %v36_v29 = vld [vmem:[%s835_s1 + $0x40] sm:$0xff]  ;;  %v67_v32 = vld [vmem:[%s835_s1 + $0x138] sm:$0xff] }
   0xb   :  { %183 = vmatpush.msra.mxu1 %v56_v15  ;;  %164 = vmatpush.msra.mxu0 %v39_v17  ;;  %v53_v27 = vld [vmem:[%s835_s1 + $0xc8] sm:$0xff]  ;;  %v84_v30 = vld [vmem:[%s835_s1 + $0x1c0] sm:$0xff]  ;;  %v35_v33 = vld [vmem:[%s835_s1 + $0x38] sm:$0xff] }
   0xc   :  { %224 = vmatpush.msra.mxu3 %v87_v18  ;;  %205 = vmatpush.msra.mxu2 %v70_v20  ;;  %v52_v31 = vld [vmem:[%s835_s1 + $0xc0] sm:$0xff]  ;;  %v83_v34 = vld [vmem:[%s835_s1 + $0x1b8] sm:$0xff]  ;;  %v66_v36 = vld [vmem:[%s835_s1 + $0x130] sm:$0xff] }
   0xd   :  { %184 = vmatpush.msra.mxu1 %v55_v19  ;;  %165 = vmatpush.msra.mxu0 %v38_v21  ;;  %v51_v35 = vld [vmem:[%s835_s1 + $0xb8] sm:$0xff]  ;;  %v34_v37 = vld [vmem:[%s835_s1 + $0x30] sm:$0xff]  ;;  %v65_v40 = vld [vmem:[%s835_s1 + $0x128] sm:$0xff] }
   0xe   :  { %225 = vmatpush.msra.mxu3 %v86_v22  ;;  %206 = vmatpush.msra.mxu2 %v69_v24  ;;  %v82_v38 = vld [vmem:[%s835_s1 + $0x1b0] sm:$0xff]  ;;  %v33_v41 = vld [vmem:[%s835_s1 + $0x28] sm:$0xff]  ;;  %v64_v44 = vld [vmem:[%s835_s1 + $0x120] sm:$0xff] }
   0xf   :  { %185 = vmatpush.msra.mxu1 %v54_v23  ;;  %166 = vmatpush.msra.mxu0 %v37_v25  ;;  %v50_v39 = vld [vmem:[%s835_s1 + $0xb0] sm:$0xff]  ;;  %v81_v42 = vld [vmem:[%s835_s1 + $0x1a8] sm:$0xff]  ;;  %v32_v45 = vld [vmem:[%s835_s1 + $0x20] sm:$0xff] }
  0x10   :  { %226 = vmatpush.msra.mxu3 %v85_v26  ;;  %207 = vmatpush.msra.mxu2 %v68_v28  ;;  %v49_v43 = vld [vmem:[%s835_s1 + $0xa8] sm:$0xff]  ;;  %v80_v46 = vld [vmem:[%s835_s1 + $0x1a0] sm:$0xff]  ;;  %v63_v48 = vld [vmem:[%s835_s1 + $0x118] sm:$0xff] }
  0x11   :  { %186 = vmatpush.msra.mxu1 %v53_v27  ;;  %167 = vmatpush.msra.mxu0 %v36_v29  ;;  %v48_v47 = vld [vmem:[%s835_s1 + $0xa0] sm:$0xff]  ;;  %v31_v49 = vld [vmem:[%s835_s1 + $0x18] sm:$0xff]  ;;  %v62_v52 = vld [vmem:[%s835_s1 + $0x110] sm:$0xff] }
  0x12   :  { %227 = vmatpush.msra.mxu3 %v84_v30  ;;  %208 = vmatpush.msra.mxu2 %v67_v32  ;;  %v79_v50 = vld [vmem:[%s835_s1 + $0x198] sm:$0xff]  ;;  %v30_v53 = vld [vmem:[%s835_s1 + $0x10] sm:$0xff]  ;;  %v61_v56 = vld [vmem:[%s835_s1 + $0x108] sm:$0xff] }
  0x13   :  { %187 = vmatpush.msra.mxu1 %v52_v31  ;;  %168 = vmatpush.msra.mxu0 %v35_v33  ;;  %v47_v51 = vld [vmem:[%s835_s1 + $0x98] sm:$0xff]  ;;  %v78_v54 = vld [vmem:[%s835_s1 + $0x190] sm:$0xff]  ;;  %v29_v57 = vld [vmem:[%s835_s1 + $0x8] sm:$0xff] }
  0x14   :  { %228 = vmatpush.msra.mxu3 %v83_v34  ;;  %209 = vmatpush.msra.mxu2 %v66_v36  ;;  %v46_v55 = vld [vmem:[%s835_s1 + $0x90] sm:$0xff]  ;;  %v77_v58 = vld [vmem:[%s835_s1 + $0x188] sm:$0xff]  ;;  %v60_v60 = vld [vmem:[%s835_s1 + $0x100] sm:$0xff] }
  0x15   :  { %188 = vmatpush.msra.mxu1 %v51_v35  ;;  %169 = vmatpush.msra.mxu0 %v34_v37  ;;  %v45_v59 = vld [vmem:[%s835_s1 + $0x88] sm:$0xff]  ;;  %v28_v61 = vld [vmem:[%s835_s1] sm:$0xff]  ;;  %v139_v62 = vld [vmem:[%s835_s1 + $0x378] sm:$0xff] }
  0x16   :  { %229 = vmatpush.msra.mxu3 %v82_v38  ;;  %210 = vmatpush.msra.mxu2 %v65_v40  ;;  %v76_v63 = vld [vmem:[%s835_s1 + $0x180] sm:$0xff]  ;;  %v107_v0 = vld [vmem:[%s835_s1 + $0x278] sm:$0xff]  ;;  %v138_v2 = vld [vmem:[%s835_s1 + $0x370] sm:$0xff] }
  0x17   :  { %189 = vmatpush.msra.mxu1 %v50_v39  ;;  %170 = vmatpush.msra.mxu0 %v33_v41  ;;  %v155_v1 = vld [vmem:[%s835_s1 + $0x3f8] sm:$0xff]  ;;  %v44_v3 = vld [vmem:[%s835_s1 + $0x80] sm:$0xff]  ;;  %v106_v4 = vld [vmem:[%s835_s1 + $0x270] sm:$0xff] }
  0x18   :  { %230 = vmatpush.msra.mxu3 %v81_v42  ;;  %211 = vmatpush.msra.mxu2 %v64_v44  ;;  %v123_v5 = vld [vmem:[%s835_s1 + $0x2f8] sm:$0xff]  ;;  %v137_v6 = vld [vmem:[%s835_s1 + $0x368] sm:$0xff]  ;;  %v154_v7 = vld [vmem:[%s835_s1 + $0x3f0] sm:$0xff] }
  0x19   :  { %190 = vmatpush.msra.mxu1 %v49_v43  ;;  %171 = vmatpush.msra.mxu0 %v32_v45  ;;  %v105_v8 = vld [vmem:[%s835_s1 + $0x268] sm:$0xff]  ;;  %v122_v9 = vld [vmem:[%s835_s1 + $0x2f0] sm:$0xff]  ;;  %v136_v10 = vld [vmem:[%s835_s1 + $0x360] sm:$0xff] }
  0x1a   :  { %231 = vmatpush.msra.mxu3 %v80_v46  ;;  %212 = vmatpush.msra.mxu2 %v63_v48  ;;  %v153_v11 = vld [vmem:[%s835_s1 + $0x3e8] sm:$0xff]  ;;  %v104_v12 = vld [vmem:[%s835_s1 + $0x260] sm:$0xff]  ;;  %v135_v14 = vld [vmem:[%s835_s1 + $0x358] sm:$0xff] }
  0x1b   :  { %191 = vmatpush.msra.mxu1 %v48_v47  ;;  %172 = vmatpush.msra.mxu0 %v31_v49  ;;  %v121_v13 = vld [vmem:[%s835_s1 + $0x2e8] sm:$0xff]  ;;  %v152_v15 = vld [vmem:[%s835_s1 + $0x3e0] sm:$0xff]  ;;  %v103_v16 = vld [vmem:[%s835_s1 + $0x258] sm:$0xff] }
  0x1c   :  { %232 = vmatpush.msra.mxu3 %v79_v50  ;;  %213 = vmatpush.msra.mxu2 %v62_v52  ;;  %v120_v17 = vld [vmem:[%s835_s1 + $0x2e0] sm:$0xff]  ;;  %v134_v18 = vld [vmem:[%s835_s1 + $0x350] sm:$0xff]  ;;  %v151_v19 = vld [vmem:[%s835_s1 + $0x3d8] sm:$0xff] }
  0x1d   :  { %192 = vmatpush.msra.mxu1 %v47_v51  ;;  %173 = vmatpush.msra.mxu0 %v30_v53  ;;  %v102_v20 = vld [vmem:[%s835_s1 + $0x250] sm:$0xff]  ;;  %v119_v21 = vld [vmem:[%s835_s1 + $0x2d8] sm:$0xff]  ;;  %v133_v22 = vld [vmem:[%s835_s1 + $0x348] sm:$0xff] }
  0x1e   :  { %233 = vmatpush.msra.mxu3 %v78_v54  ;;  %214 = vmatpush.msra.mxu2 %v61_v56  ;;  %v150_v23 = vld [vmem:[%s835_s1 + $0x3d0] sm:$0xff]  ;;  %v101_v24 = vld [vmem:[%s835_s1 + $0x248] sm:$0xff]  ;;  %v132_v26 = vld [vmem:[%s835_s1 + $0x340] sm:$0xff] }
  0x1f   :  { %193 = vmatpush.msra.mxu1 %v46_v55  ;;  %174 = vmatpush.msra.mxu0 %v29_v57  ;;  %v118_v25 = vld [vmem:[%s835_s1 + $0x2d0] sm:$0xff]  ;;  %v149_v27 = vld [vmem:[%s835_s1 + $0x3c8] sm:$0xff]  ;;  %v100_v28 = vld [vmem:[%s835_s1 + $0x240] sm:$0xff] }
  0x20   :  { %234 = vmatpush.msra.mxu3 %v77_v58  ;;  %215 = vmatpush.msra.mxu2 %v60_v60  ;;  %v117_v29 = vld [vmem:[%s835_s1 + $0x2c8] sm:$0xff]  ;;  %v131_v30 = vld [vmem:[%s835_s1 + $0x338] sm:$0xff]  ;;  %v148_v31 = vld [vmem:[%s835_s1 + $0x3c0] sm:$0xff] }
  0x21   :  { %194 = vmatpush.msra.mxu1 %v45_v59  ;;  %175 = vmatpush.msra.mxu0 %v28_v61  ;;  %v99_v32 = vld [vmem:[%s835_s1 + $0x238] sm:$0xff]  ;;  %v116_v33 = vld [vmem:[%s835_s1 + $0x2c0] sm:$0xff]  ;;  %v130_v34 = vld [vmem:[%s835_s1 + $0x330] sm:$0xff] }
  0x22   :  { %280 = vmatpush.msrb.mxu2 %v139_v62  ;;  %235 = vmatpush.msra.mxu3 %v76_v63  ;;  %v147_v35 = vld [vmem:[%s835_s1 + $0x3b8] sm:$0xff]  ;;  %v98_v36 = vld [vmem:[%s835_s1 + $0x230] sm:$0xff]  ;;  %v129_v38 = vld [vmem:[%s835_s1 + $0x328] sm:$0xff] }
  0x23   :  { %240 = vmatpush.msrb.mxu0 %v107_v0  ;;  %195 = vmatpush.msra.mxu1 %v44_v3  ;;  %v115_v37 = vld [vmem:[%s835_s1 + $0x2b8] sm:$0xff]  ;;  %v146_v39 = vld [vmem:[%s835_s1 + $0x3b0] sm:$0xff]  ;;  %v97_v40 = vld [vmem:[%s835_s1 + $0x228] sm:$0xff] }
  0x24   :  { %300 = vmatpush.msrb.mxu3 %v155_v1  ;;  %281 = vmatpush.msrb.mxu2 %v138_v2  ;;  %v114_v41 = vld [vmem:[%s835_s1 + $0x2b0] sm:$0xff]  ;;  %v128_v42 = vld [vmem:[%s835_s1 + $0x320] sm:$0xff]  ;;  %v145_v43 = vld [vmem:[%s835_s1 + $0x3a8] sm:$0xff] }
  0x25   :  { %241 = vmatpush.msrb.mxu0 %v106_v4  ;;  %260 = vmatpush.msrb.mxu1 %v123_v5  ;;  %v22_v44 = vld [vmem:[%s837_s0 + $0x10] sm:$0xff]  ;;  %v96_v45 = vld [vmem:[%s835_s1 + $0x220] sm:$0xff]  ;;  %v113_v46 = vld [vmem:[%s835_s1 + $0x2a8] sm:$0xff] }
  0x26   :  { %282 = vmatpush.msrb.mxu2 %v137_v6  ;;  %301 = vmatpush.msrb.mxu3 %v154_v7  ;;  %v127_v47 = vld [vmem:[%s835_s1 + $0x318] sm:$0xff]  ;;  %v144_v48 = vld [vmem:[%s835_s1 + $0x3a0] sm:$0xff]  ;;  %v126_v53 = vld [vmem:[%s835_s1 + $0x310] sm:$0xff] }
  0x27   :  { %242 = vmatpush.msrb.mxu0 %v105_v8  ;;  %261 = vmatpush.msrb.mxu1 %v122_v9  ;;  %v20_v49 = vld [vmem:[%s837_s0] sm:$0xff]  ;;  %v23_v50 = vld [vmem:[%s837_s0 + $0x18] sm:$0xff]  ;;  %v21_v55 = vld [vmem:[%s837_s0 + $0x8] sm:$0xff] }
  0x28   :  { %283 = vmatpush.msrb.mxu2 %v136_v10  ;;  %302 = vmatpush.msrb.mxu3 %v153_v11  ;;  %v95_v51 = vld [vmem:[%s835_s1 + $0x218] sm:$0xff]  ;;  %v112_v52 = vld [vmem:[%s835_s1 + $0x2a0] sm:$0xff]  ;;  %v94_v56 = vld [vmem:[%s835_s1 + $0x210] sm:$0xff] }
  0x29   :  { %243 = vmatpush.msrb.mxu0 %v104_v12  ;;  %262 = vmatpush.msrb.mxu1 %v121_v13  ;;  %v143_v54 = vld [vmem:[%s835_s1 + $0x398] sm:$0xff]  ;;  %v125_v58 = vld [vmem:[%s835_s1 + $0x308] sm:$0xff]  ;;  %v142_v59 = vld [vmem:[%s835_s1 + $0x390] sm:$0xff] }
  0x2a   :  { %284 = vmatpush.msrb.mxu2 %v135_v14  ;;  %303 = vmatpush.msrb.mxu3 %v152_v15  ;;  %v111_v57 = vld [vmem:[%s835_s1 + $0x298] sm:$0xff]  ;;  %v93_v60 = vld [vmem:[%s835_s1 + $0x208] sm:$0xff]  ;;  %v110_v61 = vld [vmem:[%s835_s1 + $0x290] sm:$0xff] }
  0x2b   :  { %244 = vmatpush.msrb.mxu0 %v103_v16  ;;  %263 = vmatpush.msrb.mxu1 %v120_v17  ;;  %v124_v62 = vld [vmem:[%s835_s1 + $0x300] sm:$0xff]  ;;  %v141_v63 = vld [vmem:[%s835_s1 + $0x388] sm:$0xff]  ;;  %v26_v0 = vld [vmem:[%s837_s0 + $0x30] sm:$0xff] }
  0x2c   :  { %285 = vmatpush.msrb.mxu2 %v134_v18  ;;  %304 = vmatpush.msrb.mxu3 %v151_v19  ;;  %v92_v1 = vld [vmem:[%s835_s1 + $0x200] sm:$0xff]  ;;  %v109_v2 = vld [vmem:[%s835_s1 + $0x288] sm:$0xff]  ;;  %v27_v5 = vld [vmem:[%s837_s0 + $0x38] sm:$0xff] }
  0x2d   :  { %245 = vmatpush.msrb.mxu0 %v102_v20  ;;  %264 = vmatpush.msrb.mxu1 %v119_v21  ;;  %v140_v3 = vld [vmem:[%s835_s1 + $0x380] sm:$0xff]  ;;  %v25_v7 = vld [vmem:[%s837_s0 + $0x28] sm:$0xff]  ;;  %v327_v8 = vld [vmem:[%s839_s3 + $0x38] sm:$0xff] }
  0x2e   :  { %286 = vmatpush.msrb.mxu2 %v133_v22  ;;  %305 = vmatpush.msrb.mxu3 %v150_v23  ;;  %v24_v4 = vld [vmem:[%s837_s0 + $0x20] sm:$0xff]  ;;  %v326_v9 = vld [vmem:[%s839_s3 + $0x30] sm:$0xff]  ;;  %v325_v10 = vld [vmem:[%s839_s3 + $0x28] sm:$0xff] }
  0x2f   :  { %246 = vmatpush.msrb.mxu0 %v101_v24  ;;  %265 = vmatpush.msrb.mxu1 %v118_v25  ;;  %v108_v6 = vld [vmem:[%s835_s1 + $0x280] sm:$0xff]  ;;  %v323_v12 = vld [vmem:[%s839_s3 + $0x18] sm:$0xff]  ;;  %v322_v13 = vld [vmem:[%s839_s3 + $0x10] sm:$0xff] }
  0x30   :  { %287 = vmatpush.msrb.mxu2 %v132_v26  ;;  %306 = vmatpush.msrb.mxu3 %v149_v27  ;;  %v324_v11 = vld [vmem:[%s839_s3 + $0x20] sm:$0xff]  ;;  %v321_v14 = vld [vmem:[%s839_s3 + $0x8] sm:$0xff] }
  0x31   :  { %247 = vmatpush.msrb.mxu0 %v100_v28  ;;  %266 = vmatpush.msrb.mxu1 %v117_v29  ;;  %v320_v15 = vld [vmem:[%s839_s3] sm:$0xff] }
  0x32   :  { %288 = vmatpush.msrb.mxu2 %v131_v30  ;;  %307 = vmatpush.msrb.mxu3 %v148_v31  ;;  %v362_v16 = vld [vmem:[%s836_s2] ss:$0 sm:$0xff] }
  0x33   :  { %248 = vmatpush.msrb.mxu0 %v99_v32  ;;  %267 = vmatpush.msrb.mxu1 %v116_v33  ;;  %v363_v33 = vld [vmem:[%s838_s4] ss:$0 sm:$0xff] }
  0x34   :  { %289 = vmatpush.msrb.mxu2 %v130_v34  ;;  %308 = vmatpush.msrb.mxu3 %v147_v35 }
  0x35   :  { %249 = vmatpush.msrb.mxu0 %v98_v36  ;;  %268 = vmatpush.msrb.mxu1 %v115_v37 }
  0x36   :  { %290 = vmatpush.msrb.mxu2 %v129_v38  ;;  %309 = vmatpush.msrb.mxu3 %v146_v39 }
  0x37   :  { %250 = vmatpush.msrb.mxu0 %v97_v40  ;;  %269 = vmatpush.msrb.mxu1 %v114_v41 }
  0x38   :  { %291 = vmatpush.msrb.mxu2 %v128_v42  ;;  %310 = vmatpush.msrb.mxu3 %v145_v43 }
  0x39   :  { %216 = vmatmul.f32.vlgmr.msra.gmra.mxu2 %v22_v44  ;;  %251 = vmatpush.msrb.mxu0 %v96_v45 }
  0x3a   :  { %270 = vmatpush.msrb.mxu1 %v113_v46  ;;  %292 = vmatpush.msrb.mxu2 %v127_v47 }
  0x3b   :  { %311 = vmatpush.msrb.mxu3 %v144_v48  ;;  %176 = vmatmul.f32.vlgmr.msra.gmra.mxu0 %v20_v49 }
  0x3c   :  { %236 = vmatmul.f32.vlgmr.msra.gmra.mxu3 %v23_v50  ;;  %252 = vmatpush.msrb.mxu0 %v95_v51 }
  0x3d   :  { %271 = vmatpush.msrb.mxu1 %v112_v52  ;;  %293 = vmatpush.msrb.mxu2 %v126_v53 }
  0x3e   :  { %312 = vmatpush.msrb.mxu3 %v143_v54  ;;  %196 = vmatmul.f32.vlgmr.msra.gmra.mxu1 %v21_v55 }
  0x3f   :  { %253 = vmatpush.msrb.mxu0 %v94_v56  ;;  %272 = vmatpush.msrb.mxu1 %v111_v57 }
  0x40   :  { %294 = vmatpush.msrb.mxu2 %v125_v58  ;;  %313 = vmatpush.msrb.mxu3 %v142_v59 }
  0x41   :  { %254 = vmatpush.msrb.mxu0 %v93_v60  ;;  %273 = vmatpush.msrb.mxu1 %v110_v61 }
  0x42   :  { %295 = vmatpush.msrb.mxu2 %v124_v62  ;;  %314 = vmatpush.msrb.mxu3 %v141_v63 }
  0x43   :  { %296 = vmatmul.f32.vlgmr.msrb.gmra.mxu2 %v26_v0  ;;  %255 = vmatpush.msrb.mxu0 %v92_v1 }
  0x44   :  { %274 = vmatpush.msrb.mxu1 %v109_v2  ;;  %315 = vmatpush.msrb.mxu3 %v140_v3 }
  0x45   :  { %256 = vmatmul.f32.vlgmr.msrb.gmra.mxu0 %v24_v4  ;;  %316 = vmatmul.f32.vlgmr.msrb.gmra.mxu3 %v27_v5 }
  0x46   :  { %275 = vmatpush.msrb.mxu1 %v108_v6  ;;  %344 = vmatpush.msra.mxu0 %v327_v8 }
  0x47   :  { %276 = vmatmul.f32.vlgmr.msrb.gmra.mxu1 %v25_v7 }
  0x48   :  { %345 = vmatpush.msra.mxu0 %v326_v9 }
  0x4a   :  { %346 = vmatpush.msra.mxu0 %v325_v10 }
  0x4c   :  { %347 = vmatpush.msra.mxu0 %v324_v11 }
  0x4e   :  { %348 = vmatpush.msra.mxu0 %v323_v12 }
  0x50   :  { %349 = vmatpush.msra.mxu0 %v322_v13 }
  0x52   :  { %350 = vmatpush.msra.mxu0 %v321_v14 }
  0x54   :  { %351 = vmatpush.msra.mxu0 %v320_v15 }
  0xb8   :  { %v177_v17 = vpop.f32.mrf.mxu0 }
  0xb9   :  { %v178_v18 = vadd.f32 %v362_v16, %v177_v17 }
  0xbb   :  { %v197_v19 = vpop.f32.mrf.mxu1 }
  0xbc   :  { %v198_v20 = vadd.f32 %v197_v19, %v178_v18  ;;  %v217_v21 = vpop.f32.mrf.mxu2 }
  0xbe   :  { %v218_v22 = vadd.f32 %v217_v21, %v198_v20 }
  0xbf   :  { %v237_v23 = vpop.f32.mrf.mxu3 }
  0xc0   :  { %v238_v24 = vadd.f32 %v237_v23, %v218_v22 }
  0xc2   :  { %v257_v25 = vpop.f32.mrf.mxu0 }
  0xc3   :  { %v258_v26 = vadd.f32 %v257_v25, %v238_v24 }
  0xc4   :  { %v277_v27 = vpop.f32.mrf.mxu1 }
  0xc5   :  { %v278_v28 = vadd.f32 %v277_v27, %v258_v26 }
  0xc6   :  { %v297_v29 = vpop.f32.mrf.mxu2 }
  0xc7   :  { %v298_v30 = vadd.f32 %v297_v29, %v278_v28 }
  0xc8   :  { %v317_v31 = vpop.f32.mrf.mxu3 }
  0xc9   :  { %v318_v32 = vadd.f32 %v317_v31, %v298_v30 }
  0xcb   :  { %361 = vmatmul.msk.f32.vlgmr.msra.gmra.mxu0 %vm332_vm0, %v318_v32 }
 0x148   :  { %v353_v34 = vpop.f32.mrf.mxu0 }
 0x149   :  { %v354_v35 = vadd.f32 %v363_v33, %v353_v34 }
 0x14b   :  { %356 = vst [vmem:[%s840_s5] sm:$0xff] %v354_v35 }

// kernel: my_module_forward.6
= control target key start
LH: loop header
LB: loop body
LE: loop exit
PB: predicated region body
PF: predicated region fallthrough
CT: control target
= control target key end

     0   :  { %s3683_s12 = smov 0   ;;  %s5046_s0 = inlined_call_operand.vmem [shape: f32[2,156,32], index: 0, kind: input, shape index: {}]   ;;  %s5047_s1 = inlined_call_operand.vmem [shape: f32[25,32,64], index: 1, kind: input, shape index: {}]   ;;  %s5048_s2 = inlined_call_operand.vmem [shape: f32[1,64], index: 2, kind: input, shape index: {}]   ;;  %s5049_s3 = inlined_call_operand.vmem [shape: f32[2,4,4,64], index: 3, kind: output, shape index: {}]  }
   0x1 LB: > { %s3224_s13 = sadd.s32 4294967295, %s3661_s12   ;;  %p3228_p0 = scmp.ge.s32.totalorder %s3661_s12, 1  ;;  %s3661_s12 = sphi %s3683_s12, %s13_s12  }
   0x2   : > { %p137_p1 = scmp.lt.s32.totalorder %s3661_s12, 3 }
   0x4   : > { %p138_p2 = pnand %p3228_p0, %p137_p1 }
   0x6   : > { %141 = sbr.rel (%p138_p2) target bundleno = 765 (0x2fd), region = 32 }
   0xb   : > { %v3235_v0 = vld [vmem:[%s5047_s1 + $0x38] sm:$0xff]  ;;  %v3234_v1 = vld [vmem:[%s5047_s1 + $0x30] sm:$0xff]  ;;  %p161_p3 = scmp.lt.s32.totalorder %s3224_s13, 1  ;;  %v3233_v2 = vld [vmem:[%s5047_s1 + $0x28] sm:$0xff]  ;;  %vm205_vm0 = vcmask 261120   ;;  %vm3098_vm1 = vcmask 523264  }
   0xc   : > { %3634 = vmatpush.msra.mxu1 %v3235_v0  ;;  %3635 = vmatpush.msra.mxu2 %v3235_v0  ;;  %v3232_v3 = vld [vmem:[%s5047_s1 + $0x20] sm:$0xff]  ;;  %v3263_v4 = vld [vmem:[%s5047_s1 + $0x58] sm:$0xff]  ;;  %v3262_v10 = vld [vmem:[%s5047_s1 + $0x50] sm:$0xff]  ;;  %vm3125_vm2 = vcmask 519168  }
   0xd   : > { %3636 = vmatpush.msra.mxu3 %v3235_v0  ;;  %s5054_s13 = smov (!%p161_p3, %s3224_s13), 1  ;;  %254 = vmatpush.msra.mxu0 %v3235_v0  ;;  %v187_v5 = vld [vmem:[%s5047_s1 + $0x18] sm:$0xff]  ;;  %v186_v11 = vld [vmem:[%s5047_s1 + $0x10] sm:$0xff]  ;;  %v3261_v15 = vld [vmem:[%s5047_s1 + $0x48] sm:$0xff] }
   0xe   : > { %3637 = vmatpush.msra.mxu1 %v3234_v1  ;;  %3638 = vmatpush.msra.mxu2 %v3234_v1  ;;  %s3646_s22 = smul.u32 160, %s5054_s13  ;;  %v3279_v9 = vld [vmem:[%s5047_s1 + $0x78] sm:$0xff]  ;;  %v3278_v12 = vld [vmem:[%s5047_s1 + $0x70] sm:$0xff]  ;;  %v3277_v16 = vld [vmem:[%s5047_s1 + $0x68] sm:$0xff]  ;;  %s3633_s27 = sshll.u32 %s5054_s13, 4 }
   0xf   : > { %3639 = vmatpush.msra.mxu3 %v3234_v1  ;;  %255 = vmatpush.msra.mxu0 %v3234_v1  ;;  %v3295_v14 = vld [vmem:[%s5047_s1 + $0x98] sm:$0xff]  ;;  %v185_v17 = vld [vmem:[%s5047_s1 + $0x8] sm:$0xff]  ;;  %v3294_v20 = vld [vmem:[%s5047_s1 + $0x90] sm:$0xff]  ;;  %s5014_s30 = scalar_lea.vmem %s5049_s3, %s3633_s27 }
  0x10   : > { %3640 = vmatpush.msra.mxu1 %v3233_v2  ;;  %3641 = vmatpush.msra.mxu2 %v3233_v2  ;;  %s3709_s25 = scalar_lea.vmem %s5046_s0, %s3646_s22  ;;  %v3260_v21 = vld [vmem:[%s5047_s1 + $0x40] sm:$0xff]  ;;  %v3293_v25 = vld [vmem:[%s5047_s1 + $0x88] sm:$0xff]  ;;  %v3327_v26 = vld [vmem:[%s5047_s1 + $0xd8] sm:$0xff] }
  0x11   : > { %3642 = vmatpush.msra.mxu3 %v3233_v2  ;;  %256 = vmatpush.msra.mxu0 %v3233_v2  ;;  %v3718_v6 = vld [vmem:[%s3709_s25 + $0x19] sm:$0xff]  ;;  %v3721_v7 = vld [vmem:[%s3709_s25 + $0x31] sm:$0xff]  ;;  %v3724_v8 = vld [vmem:[%s3709_s25 + $0x49] sm:$0xff] }
  0x12   : > { %3643 = vmatpush.msra.mxu1 %v3232_v3  ;;  %3644 = vmatpush.msra.mxu2 %v3232_v3  ;;  %v188_v13 = vld [vmem:[%s3709_s25 + $0x1] sm:$0xff]  ;;  %v3761_v19 = vld [vmem:[%s3709_s25 + $0x39] sm:$0xff]  ;;  %v3771_v22 = vld [vmem:[%s3709_s25 + $0x51] sm:$0xff] }
  0x13   : > { %3239 = vmatmul.msk.f32.vlgmr.msra.gmra.mxu1 %vm205_vm0, %v3718_v6  ;;  %3242 = vmatmul.msk.f32.vlgmr.msra.gmra.mxu2 %vm205_vm0, %v3721_v7  ;;  %v3758_v18 = vld [vmem:[%s3709_s25 + $0x21] sm:$0xff]  ;;  %v3343_v27 = vld [vmem:[%s5047_s1 + $0xf8] sm:$0xff]  ;;  %v189_v28 = vld [vmem:[%s3709_s25 + $0x9] sm:$0xff] }
  0x14   : > { %449 = vmatpush.msrb.mxu2 %v3263_v4  ;;  %3645 = vmatpush.msra.mxu3 %v3232_v3  ;;  %v184_v23 = vld [vmem:[%s5047_s1] sm:$0xff]  ;;  %v3311_v29 = vld [vmem:[%s5047_s1 + $0xb8] sm:$0xff]  ;;  %v3805_v32 = vld [vmem:[%s3709_s25 + $0x29] sm:$0xff] }
  0x15   : > { %3245 = vmatmul.msk.f32.vlgmr.msra.gmra.mxu3 %vm205_vm0, %v3724_v8  ;;  %343 = vmatpush.msrb.mxu1 %v187_v5  ;;  %v3276_v24 = vld [vmem:[%s5047_s1 + $0x60] sm:$0xff]  ;;  %v3359_v31 = vld [vmem:[%s5047_s1 + $0x118] sm:$0xff]  ;;  %v3326_v35 = vld [vmem:[%s5047_s1 + $0xd0] sm:$0xff] }
  0x16   : > { %567 = vmatpush.msrb.mxu3 %v3279_v9  ;;  %450 = vmatpush.msrb.mxu2 %v3262_v10  ;;  %v3292_v30 = vld [vmem:[%s5047_s1 + $0x80] sm:$0xff]  ;;  %v190_v36 = vld [vmem:[%s3709_s25 + $0x11] sm:$0xff]  ;;  %v173_v44 = vld [vmem:[%s3709_s25 + $0x8] sm:$0xff] }
  0x17   : > { %257 = vmatpush.msra.mxu0 %v3232_v3  ;;  %344 = vmatpush.msrb.mxu1 %v186_v11  ;;  %v3808_v33 = vld [vmem:[%s3709_s25 + $0x41] sm:$0xff]  ;;  %v3812_v34 = vld [vmem:[%s3709_s25 + $0x59] sm:$0xff]  ;;  %v3342_v37 = vld [vmem:[%s5047_s1 + $0xf0] sm:$0xff] }
  0x18   : > { %568 = vmatpush.msrb.mxu3 %v3278_v12  ;;  %3236 = vmatmul.msk.f32.vlgmr.msra.gmra.mxu0 %vm205_vm0, %v188_v13  ;;  %v3310_v38 = vld [vmem:[%s5047_s1 + $0xb0] sm:$0xff]  ;;  %v172_v39 = vld [vmem:[%s3709_s25] sm:$0xff]  ;;  %v3325_v51 = vld [vmem:[%s5047_s1 + $0xc8] sm:$0xff] }
  0x19   : > { %685 = vmatpush.msrb.mxu0 %v3295_v14  ;;  %451 = vmatpush.msrb.mxu2 %v3261_v15  ;;  %v384_v40 = vld [vmem:[%s3709_s25 + $0x2] sm:$0xff]  ;;  %v3358_v43 = vld [vmem:[%s5047_s1 + $0x110] sm:$0xff]  ;;  %v3875_v55 = vld [vmem:[%s3709_s25 + $0x18] sm:$0xff] }
  0x1a   : > { %569 = vmatpush.msrb.mxu3 %v3277_v16  ;;  %345 = vmatpush.msrb.mxu1 %v185_v17  ;;  %v502_v41 = vld [vmem:[%s3709_s25 + $0x3] sm:$0xff]  ;;  %v503_v46 = vld [vmem:[%s3709_s25 + $0xb] sm:$0xff]  ;;  %v504_v50 = vld [vmem:[%s3709_s25 + $0x13] sm:$0xff] }
  0x1b   : > { %3240 = vmatmul.msk.f32.gmra.mxu1 %vm205_vm0, %v3758_v18  ;;  %3243 = vmatmul.msk.f32.gmra.mxu2 %vm205_vm0, %v3761_v19  ;;  %v620_v42 = vld [vmem:[%s3709_s25 + $0x4] sm:$0xff]  ;;  %v3849_v47 = vld [vmem:[%s3709_s25 + $0xc] sm:$0xff]  ;;  %v3866_v52 = vld [vmem:[%s3709_s25 + $0x14] sm:$0xff] }
  0x1c   : > { %686 = vmatpush.msrb.mxu0 %v3294_v20  ;;  %452 = vmatpush.msrb.mxu2 %v3260_v21  ;;  %v385_v45 = vld [vmem:[%s3709_s25 + $0xa] sm:$0xff]  ;;  %v386_v49 = vld [vmem:[%s3709_s25 + $0x12] sm:$0xff]  ;;  %v3878_v56 = vld [vmem:[%s3709_s25 + $0x1a] sm:$0xff] }
  0x1d   : > { %3246 = vmatmul.msk.f32.gmra.mxu3 %vm205_vm0, %v3771_v22  ;;  %346 = vmatpush.msrb.mxu1 %v184_v23  ;;  %v3852_v48 = vld [vmem:[%s3709_s25 + $0x10] sm:$0xff]  ;;  %v3341_v53 = vld [vmem:[%s5047_s1 + $0xe8] sm:$0xff]  ;;  %v505_v57 = vld [vmem:[%s3709_s25 + $0x1b] sm:$0xff] }
  0x1e   : > { %570 = vmatpush.msrb.mxu3 %v3276_v24  ;;  %687 = vmatpush.msrb.mxu0 %v3293_v25  ;;  %v3309_v54 = vld [vmem:[%s5047_s1 + $0xa8] sm:$0xff]  ;;  %v3889_v58 = vld [vmem:[%s3709_s25 + $0x1c] sm:$0xff]  ;;  %v3938_v10 = vld [vmem:[%s3709_s25 + $0x30] sm:$0xff] }
  0x1f   : > { %921 = vmatpush.msra.mxu2 %v3327_v26  ;;  %803 = vmatpush.msra.mxu1 %v3311_v29  ;;  %v3357_v59 = vld [vmem:[%s5047_s1 + $0x108] sm:$0xff]  ;;  %v3895_v60 = vld [vmem:[%s3709_s25 + $0x20] sm:$0xff]  ;;  %v3941_v11 = vld [vmem:[%s3709_s25 + $0x32] sm:$0xff] }
  0x20   : > { %1039 = vmatpush.msra.mxu3 %v3343_v27  ;;  %3237 = vmatmul.msk.f32.gmra.mxu0 %vm205_vm0, %v189_v28  ;;  %v3898_v61 = vld [vmem:[%s3709_s25 + $0x22] sm:$0xff]  ;;  %v3915_v1 = vld [vmem:[%s3709_s25 + $0x2a] sm:$0xff]  ;;  %v508_v12 = vld [vmem:[%s3709_s25 + $0x33] sm:$0xff] }
  0x21   : > { %688 = vmatpush.msrb.mxu0 %v3292_v30  ;;  %922 = vmatpush.msra.mxu2 %v3326_v35  ;;  %v506_v62 = vld [vmem:[%s3709_s25 + $0x23] sm:$0xff]  ;;  %v507_v2 = vld [vmem:[%s3709_s25 + $0x2b] sm:$0xff]  ;;  %v3952_v13 = vld [vmem:[%s3709_s25 + $0x34] sm:$0xff] }
  0x22   : > { %1040 = vmatpush.msra.mxu3 %v3342_v37  ;;  %804 = vmatpush.msra.mxu1 %v3310_v38  ;;  %v3909_v63 = vld [vmem:[%s3709_s25 + $0x24] sm:$0xff]  ;;  %v3929_v4 = vld [vmem:[%s3709_s25 + $0x2c] sm:$0xff]  ;;  %v3958_v15 = vld [vmem:[%s3709_s25 + $0x38] sm:$0xff] }
  0x23   : > { %1157 = vmatpush.msra.mxu0 %v3359_v31  ;;  %3241 = vmatmul.msk.f32.gmra.mxu1 %vm205_vm0, %v3805_v32  ;;  %v3912_v0 = vld [vmem:[%s3709_s25 + $0x28] sm:$0xff]  ;;  %v3324_v3 = vld [vmem:[%s5047_s1 + $0xc0] sm:$0xff]  ;;  %v3391_v25 = vld [vmem:[%s5047_s1 + $0x158] sm:$0xff] }
  0x24   : > { %3244 = vmatmul.msk.f32.gmra.mxu2 %vm205_vm0, %v3808_v33  ;;  %1041 = vmatpush.msra.mxu3 %v3341_v53  ;;  %v3340_v5 = vld [vmem:[%s5047_s1 + $0xe0] sm:$0xff]  ;;  %v3407_v27 = vld [vmem:[%s5047_s1 + $0x178] sm:$0xff]  ;;  %v4001_v29 = vld [vmem:[%s3709_s25 + $0x48] sm:$0xff] }
  0x25   : > { %3247 = vmatmul.msk.f32.gmra.mxu3 %vm205_vm0, %v3812_v34  ;;  %1158 = vmatpush.msra.mxu0 %v3358_v43  ;;  %v3308_v9 = vld [vmem:[%s5047_s1 + $0xa0] sm:$0xff]  ;;  %v3375_v28 = vld [vmem:[%s5047_s1 + $0x138] sm:$0xff]  ;;  %v4004_v30 = vld [vmem:[%s3709_s25 + $0x4a] sm:$0xff] }
  0x26   : > { %923 = vmatpush.msra.mxu2 %v3325_v51  ;;  %805 = vmatpush.msra.mxu1 %v3309_v54  ;;  %v3356_v14 = vld [vmem:[%s5047_s1 + $0x100] sm:$0xff]  ;;  %v511_v31 = vld [vmem:[%s3709_s25 + $0x4b] sm:$0xff] }
  0x27   : > { %1159 = vmatpush.msra.mxu0 %v3357_v59  ;;  %1042 = vmatpush.msra.mxu3 %v3340_v5  ;;  %v3961_v16 = vld [vmem:[%s3709_s25 + $0x3a] sm:$0xff]  ;;  %v3978_v23 = vld [vmem:[%s3709_s25 + $0x42] sm:$0xff]  ;;  %v4015_v35 = vld [vmem:[%s3709_s25 + $0x4c] sm:$0xff] }
  0x28   : > { %3238 = vmatmul.msk.f32.gmra.mxu0 %vm205_vm0, %v190_v36  ;;  %924 = vmatpush.msra.mxu2 %v3324_v3  ;;  %v509_v17 = vld [vmem:[%s3709_s25 + $0x3b] sm:$0xff]  ;;  %v510_v24 = vld [vmem:[%s3709_s25 + $0x43] sm:$0xff]  ;;  %v4021_v37 = vld [vmem:[%s3709_s25 + $0x50] sm:$0xff] }
  0x29   : > { %806 = vmatpush.msra.mxu1 %v3308_v9  ;;  %1160 = vmatpush.msra.mxu0 %v3356_v14  ;;  %v3972_v20 = vld [vmem:[%s3709_s25 + $0x3c] sm:$0xff]  ;;  %v3992_v26 = vld [vmem:[%s3709_s25 + $0x44] sm:$0xff]  ;;  %v4024_v38 = vld [vmem:[%s3709_s25 + $0x52] sm:$0xff] }
  0x2a   : > { %v3975_v21 = vld [vmem:[%s3709_s25 + $0x40] sm:$0xff]  ;;  %v3423_v36 = vld [vmem:[%s5047_s1 + $0x198] sm:$0xff]  ;;  %v974_v51 = vld [vmem:[%s3709_s25 + $0xe] sm:$0xff] }
  0x2b   : > { %3248 = vmatmul.msk.f32.vlgmr.msrb.gmra.mxu1 %vm205_vm0, %v172_v39  ;;  %v512_v39 = vld [vmem:[%s3709_s25 + $0x53] sm:$0xff]  ;;  %v513_v43 = vld [vmem:[%s3709_s25 + $0x5b] sm:$0xff] }
  0x2c   : > { %3264 = vmatmul.msk.f32.vlgmr.msrb.gmra.mxu2 %vm205_vm0, %v384_v40  ;;  %1275 = vmatpush.msrb.mxu1 %v3375_v28  ;;  %v4035_v40 = vld [vmem:[%s3709_s25 + $0x54] sm:$0xff]  ;;  %v976_v14 = vld [vmem:[%s3709_s25 + $0x1e] sm:$0xff]  ;;  %v3373_v28 = vld [vmem:[%s5047_s1 + $0x128] sm:$0xff] }
  0x2d   : > { %3280 = vmatmul.msk.f32.vlgmr.msrb.gmra.mxu3 %vm205_vm0, %v502_v41  ;;  %1393 = vmatpush.msrb.mxu2 %v3391_v25  ;;  %v4038_v41 = vld [vmem:[%s3709_s25 + $0x58] sm:$0xff]  ;;  %v1092_v53 = vld [vmem:[%s3709_s25 + $0xf] sm:$0xff] }
  0x2e   : > { %1511 = vmatpush.msrb.mxu3 %v3407_v27  ;;  %v3422_v54 = vld [vmem:[%s5047_s1 + $0x190] sm:$0xff]  ;;  %v3405_v25 = vld [vmem:[%s5047_s1 + $0x168] sm:$0xff] }
  0x2f   : > { %v857_v59 = vld [vmem:[%s3709_s25 + $0x15] sm:$0xff] }
  0x30   : > { %3296 = vmatmul.msk.f32.vlgmr.msrb.gmra.mxu0 %vm205_vm0, %v620_v42  ;;  %v4041_v42 = vld [vmem:[%s3709_s25 + $0x5a] sm:$0xff] }
  0x31   : > { %1629 = vmatpush.msrb.mxu0 %v3423_v36 }
  0x33   : > { %3249 = vmatmul.msk.f32.gmra.mxu1 %vm205_vm0, %v173_v44  ;;  %v3390_v44 = vld [vmem:[%s5047_s1 + $0x150] sm:$0xff]  ;;  %1630 = vmatpush.msrb.mxu0 %v3422_v54 }
  0x34   : > { %3265 = vmatmul.msk.f32.gmra.mxu2 %vm205_vm0, %v385_v45  ;;  %v4055_v45 = vld [vmem:[%s3709_s25 + $0x5c] sm:$0xff]  ;;  %v4133_v54 = vld [vmem:[%s3709_s25 + $0x2d] sm:$0xff] }
  0x35   : > { %3281 = vmatmul.msk.f32.gmra.mxu3 %vm205_vm0, %v503_v46  ;;  %1394 = vmatpush.msrb.mxu2 %v3390_v44  ;;  %v3406_v46 = vld [vmem:[%s5047_s1 + $0x170] sm:$0xff] }
  0x36   : > { %1512 = vmatpush.msrb.mxu3 %v3406_v46  ;;  %v1095_v46 = vld [vmem:[%s3709_s25 + $0x27] sm:$0xff] }
  0x38   : > { %3297 = vmatmul.msk.f32.gmra.mxu0 %vm205_vm0, %v3849_v47  ;;  %1513 = vmatpush.msrb.mxu3 %v3405_v25 }
  0x3b   : > { %3250 = vmatmul.msk.f32.gmra.mxu1 %vm205_vm0, %v3852_v48 }
  0x3c   : > { %3266 = vmatmul.msk.f32.gmra.mxu2 %vm205_vm0, %v386_v49  ;;  %v3374_v49 = vld [vmem:[%s5047_s1 + $0x130] sm:$0xff] }
  0x3d   : > { %3282 = vmatmul.msk.f32.gmra.mxu3 %vm205_vm0, %v504_v50  ;;  %1276 = vmatpush.msrb.mxu1 %v3374_v49  ;;  %v856_v50 = vld [vmem:[%s3709_s25 + $0xd] sm:$0xff] }
  0x3e   : > { %v3421_v49 = vld [vmem:[%s5047_s1 + $0x188] sm:$0xff] }
  0x3f   : > { %1277 = vmatpush.msrb.mxu1 %v3373_v28  ;;  %1631 = vmatpush.msrb.mxu0 %v3421_v49  ;;  %v4144_v28 = vld [vmem:[%s3709_s25 + $0x35] sm:$0xff] }
  0x40   : > { %3298 = vmatmul.msk.f32.gmra.mxu0 %vm205_vm0, %v3866_v52 }
  0x43   : > { %3251 = vmatmul.msk.f32.gmra.mxu1 %vm205_vm0, %v3875_v55 }
  0x44   : > { %3267 = vmatmul.msk.f32.gmra.mxu2 %vm205_vm0, %v3878_v56 }
  0x45   : > { %3283 = vmatmul.msk.f32.gmra.mxu3 %vm205_vm0, %v505_v57 }
  0x48   : > { %3299 = vmatmul.msk.f32.gmra.mxu0 %vm205_vm0, %v3889_v58 }
  0x4b   : > { %3252 = vmatmul.msk.f32.gmra.mxu1 %vm205_vm0, %v3895_v60 }
  0x4c   : > { %3268 = vmatmul.msk.f32.gmra.mxu2 %vm205_vm0, %v3898_v61 }
  0x4d   : > { %3284 = vmatmul.msk.f32.gmra.mxu3 %vm205_vm0, %v506_v62  ;;  %v975_v62 = vld [vmem:[%s3709_s25 + $0x16] sm:$0xff] }
  0x50   : > { %3300 = vmatmul.msk.f32.gmra.mxu0 %vm205_vm0, %v3909_v63 }
  0x53   : > { %3253 = vmatmul.msk.f32.gmra.mxu1 %vm205_vm0, %v3912_v0 }
  0x54   : > { %3269 = vmatmul.msk.f32.gmra.mxu2 %vm205_vm0, %v3915_v1 }
  0x55   : > { %3285 = vmatmul.msk.f32.gmra.mxu3 %vm205_vm0, %v507_v2  ;;  %v1093_v2 = vld [vmem:[%s3709_s25 + $0x17] sm:$0xff] }
  0x58   : > { %3301 = vmatmul.msk.f32.gmra.mxu0 %vm205_vm0, %v3929_v4 }
  0x5b   : > { %3254 = vmatmul.msk.f32.gmra.mxu1 %vm205_vm0, %v3938_v10 }
  0x5c   : > { %3270 = vmatmul.msk.f32.gmra.mxu2 %vm205_vm0, %v3941_v11 }
  0x5d   : > { %3286 = vmatmul.msk.f32.gmra.mxu3 %vm205_vm0, %v508_v12  ;;  %v858_v12 = vld [vmem:[%s3709_s25 + $0x1d] sm:$0xff] }
  0x60   : > { %3302 = vmatmul.msk.f32.gmra.mxu0 %vm205_vm0, %v3952_v13 }
  0x63   : > { %3255 = vmatmul.msk.f32.gmra.mxu1 %vm205_vm0, %v3958_v15 }
  0x64   : > { %3271 = vmatmul.msk.f32.gmra.mxu2 %vm205_vm0, %v3961_v16 }
  0x65   : > { %3287 = vmatmul.msk.f32.gmra.mxu3 %vm205_vm0, %v509_v17 }
  0x68   : > { %3303 = vmatmul.msk.f32.gmra.mxu0 %vm205_vm0, %v3972_v20 }
  0x6b   : > { %3256 = vmatmul.msk.f32.gmra.mxu1 %vm205_vm0, %v3975_v21 }
  0x6c   : > { %3272 = vmatmul.msk.f32.gmra.mxu2 %vm205_vm0, %v3978_v23 }
  0x6d   : > { %3288 = vmatmul.msk.f32.gmra.mxu3 %vm205_vm0, %v510_v24  ;;  %v1094_v24 = vld [vmem:[%s3709_s25 + $0x1f] sm:$0xff] }
  0x70   : > { %3304 = vmatmul.msk.f32.gmra.mxu0 %vm205_vm0, %v3992_v26 }
  0x73   : > { %3257 = vmatmul.msk.f32.gmra.mxu1 %vm205_vm0, %v4001_v29 }
  0x74   : > { %3273 = vmatmul.msk.f32.gmra.mxu2 %vm205_vm0, %v4004_v30 }
  0x75   : > { %3289 = vmatmul.msk.f32.gmra.mxu3 %vm205_vm0, %v511_v31 }
  0x78   : > { %3305 = vmatmul.msk.f32.gmra.mxu0 %vm205_vm0, %v4015_v35 }
  0x7b   : > { %3258 = vmatmul.msk.f32.gmra.mxu1 %vm205_vm0, %v4021_v37 }
  0x7c   : > { %3274 = vmatmul.msk.f32.gmra.mxu2 %vm205_vm0, %v4024_v38 }
  0x7d   : > { %3290 = vmatmul.msk.f32.gmra.mxu3 %vm205_vm0, %v512_v39  ;;  %v4115_v39 = vld [vmem:[%s3709_s25 + $0x25] sm:$0xff] }
  0x80   : > { %3306 = vmatmul.msk.f32.gmra.mxu0 %vm205_vm0, %v4035_v40 }
  0x83   : > { %3259 = vmatmul.msk.f32.gmra.mxu1 %vm205_vm0, %v4038_v41 }
  0x84   : > { %3275 = vmatmul.msk.f32.gmra.mxu2 %vm205_vm0, %v4041_v42 }
  0x85   : > { %3291 = vmatmul.msk.f32.gmra.mxu3 %vm205_vm0, %v513_v43  ;;  %v977_v43 = vld [vmem:[%s3709_s25 + $0x26] sm:$0xff] }
  0x88   : > { %3307 = vmatmul.msk.f32.gmra.mxu0 %vm205_vm0, %v4055_v45 }
  0x8b   : > { %3312 = vmatmul.msk.f32.vlgmr.msra.gmra.mxu1 %vm205_vm0, %v3849_v47 }
  0x8c   : > { %3328 = vmatmul.msk.f32.vlgmr.msra.gmra.mxu2 %vm205_vm0, %v856_v50 }
  0x8d   : > { %3344 = vmatmul.msk.f32.vlgmr.msra.gmra.mxu3 %vm205_vm0, %v974_v51 }
  0x90   : > { %v4075_v57 = vpop.f32.mrf.mxu1  ;;  %3360 = vmatmul.msk.f32.vlgmr.msra.gmra.mxu0 %vm205_vm0, %v1092_v53 }
  0x93   : > { %3313 = vmatmul.msk.f32.gmra.mxu1 %vm205_vm0, %v3866_v52  ;;  %v3389_v52 = vld [vmem:[%s5047_s1 + $0x148] sm:$0xff] }
  0x94   : > { %3329 = vmatmul.msk.f32.gmra.mxu2 %vm205_vm0, %v857_v59  ;;  %v978_v59 = vld [vmem:[%s3709_s25 + $0x2e] sm:$0xff] }
  0x95   : > { %3345 = vmatmul.msk.f32.gmra.mxu3 %vm205_vm0, %v975_v62  ;;  %v259_v47 = vpop.f32.mrf.mxu0  ;;  %1395 = vmatpush.msrb.mxu2 %v3389_v52 }
  0x96   : > { %v4085_v3 = vpop.f32.mrf.mxu2 }
  0x98   : > { %v4087_v5 = vpop.f32.mrf.mxu1  ;;  %v4089_v9 = vpop.f32.mrf.mxu3  ;;  %3361 = vmatmul.msk.f32.gmra.mxu0 %vm205_vm0, %v1093_v2 }
  0x9b   : > { %3314 = vmatmul.msk.f32.gmra.mxu1 %vm205_vm0, %v3889_v58 }
  0x9c   : > { %3330 = vmatmul.msk.f32.gmra.mxu2 %vm205_vm0, %v858_v12  ;;  %v1096_v12 = vld [vmem:[%s3709_s25 + $0x2f] sm:$0xff] }
  0x9d   : > { %3346 = vmatmul.msk.f32.gmra.mxu3 %vm205_vm0, %v976_v14  ;;  %v262_v17 = vpop.f32.mrf.mxu0 }
  0x9e   : > { %v4105_v27 = vpop.f32.mrf.mxu2 }
  0xa0   : > { %v4110_v31 = vpop.f32.mrf.mxu1  ;;  %v4112_v36 = vpop.f32.mrf.mxu3  ;;  %3362 = vmatmul.msk.f32.gmra.mxu0 %vm205_vm0, %v1094_v24 }
  0xa3   : > { %3315 = vmatmul.msk.f32.gmra.mxu1 %vm205_vm0, %v3909_v63 }
  0xa4   : > { %3331 = vmatmul.msk.f32.gmra.mxu2 %vm205_vm0, %v4115_v39 }
  0xa5   : > { %3347 = vmatmul.msk.f32.gmra.mxu3 %vm205_vm0, %v977_v43  ;;  %v265_v44 = vpop.f32.mrf.mxu0 }
  0xa7   : > { %v4128_v50 = vpop.f32.mrf.mxu2 }
  0xa8   : > { %v4130_v51 = vpop.f32.mrf.mxu3  ;;  %v348_v53 = vpop.f32.mrf.mxu1  ;;  %3363 = vmatmul.msk.f32.gmra.mxu0 %vm205_vm0, %v1095_v46  ;;  %v979_v46 = vld [vmem:[%s3709_s25 + $0x36] sm:$0xff] }
  0xa9   : > { %v349_v62 = vadd.f32 %v348_v53, %v259_v47  ;;  %v3388_v47 = vld [vmem:[%s5047_s1 + $0x140] sm:$0xff] }
  0xaa   : > { %1396 = vmatpush.msrb.mxu2 %v3388_v47 }
  0xab   : > { %3316 = vmatmul.msk.f32.gmra.mxu1 %vm205_vm0, %v3929_v4 }
  0xac   : > { %3332 = vmatmul.msk.f32.gmra.mxu2 %vm205_vm0, %v4133_v54 }
  0xad   : > { %3348 = vmatmul.msk.f32.gmra.mxu3 %vm205_vm0, %v978_v59  ;;  %v690_v2 = vpop.f32.mrf.mxu0 }
  0xaf   : > { %v454_v14 = vpop.f32.mrf.mxu2 }
  0xb0   : > { %v490_v52 = vadd.f32 %v454_v14, %v349_v62  ;;  %v351_v24 = vpop.f32.mrf.mxu1  ;;  %v572_v25 = vpop.f32.mrf.mxu3  ;;  %3364 = vmatmul.msk.f32.gmra.mxu0 %vm205_vm0, %v1096_v12  ;;  %v1097_v62 = vld [vmem:[%s3709_s25 + $0x37] sm:$0xff]  ;;  %v3372_v14 = vld [vmem:[%s5047_s1 + $0x120] sm:$0xff] }
  0xb1   : > { %v352_v53 = vadd.f32 %v351_v24, %v262_v17  ;;  %1278 = vmatpush.msrb.mxu1 %v3372_v14  ;;  %v980_v24 = vld [vmem:[%s3709_s25 + $0x3e] sm:$0xff] }
  0xb2   : > { %v608_v43 = vadd.f32 %v572_v25, %v490_v52 }
  0xb3   : > { %3317 = vmatmul.msk.f32.gmra.mxu1 %vm205_vm0, %v3952_v13 }
  0xb4   : > { %v4148_v49 = vadd.f32 %v690_v2, %v608_v43  ;;  %3333 = vmatmul.msk.f32.gmra.mxu2 %vm205_vm0, %v4144_v28  ;;  %v3404_v2 = vld [vmem:[%s5047_s1 + $0x160] sm:$0xff] }
  0xb5   : > { %3349 = vmatmul.msk.f32.gmra.mxu3 %vm205_vm0, %v979_v46  ;;  %v693_v59 = vpop.f32.mrf.mxu0  ;;  %v4166_v43 = vld [vmem:[%s3709_s25 + $0x3d] sm:$0xff] }
  0xb6   : > { %1514 = vmatpush.msrb.mxu3 %v3404_v2  ;;  %v1098_v2 = vld [vmem:[%s3709_s25 + $0x3f] sm:$0xff] }
  0xb7   : > { %v457_v12 = vpop.f32.mrf.mxu2 }
  0xb8   : > { %v491_v13 = vadd.f32 %v457_v12, %v352_v53  ;;  %v354_v52 = vpop.f32.mrf.mxu1  ;;  %v575_v25 = vpop.f32.mrf.mxu3  ;;  %3365 = vmatmul.msk.f32.gmra.mxu0 %vm205_vm0, %v1097_v62  ;;  %v3420_v62 = vld [vmem:[%s5047_s1 + $0x180] sm:$0xff] }
  0xb9   : > { %v355_v47 = vadd.f32 %v354_v52, %v265_v44  ;;  %1632 = vmatpush.msrb.mxu0 %v3420_v62  ;;  %v981_v52 = vld [vmem:[%s3709_s25 + $0x46] sm:$0xff] }
  0xba   : > { %v609_v17 = vadd.f32 %v575_v25, %v491_v13 }
  0xbb   : > { %3318 = vmatmul.msk.f32.gmra.mxu1 %vm205_vm0, %v3972_v20  ;;  %v4182_v20 = vld [vmem:[%s3709_s25 + $0x45] sm:$0xff] }
  0xbc   : > { %v4170_v46 = vadd.f32 %v693_v59, %v609_v17  ;;  %3334 = vmatmul.msk.f32.gmra.mxu2 %vm205_vm0, %v4166_v43 }
  0xbd   : > { %3350 = vmatmul.msk.f32.gmra.mxu3 %vm205_vm0, %v980_v24  ;;  %v696_v53 = vpop.f32.mrf.mxu0 }
  0xbf   : > { %v460_v12 = vpop.f32.mrf.mxu2 }
  0xc0   : > { %v492_v59 = vadd.f32 %v460_v12, %v355_v47  ;;  %v357_v13 = vpop.f32.mrf.mxu1  ;;  %v578_v14 = vpop.f32.mrf.mxu3  ;;  %3366 = vmatmul.msk.f32.gmra.mxu0 %vm205_vm0, %v1098_v2  ;;  %v1099_v47 = vld [vmem:[%s3709_s25 + $0x47] sm:$0xff] }
  0xc1   : > { %v358_v17 = vadd.f32 %v357_v13, %v4075_v57  ;;  %v3455_v57 = vld [vmem:[%s5047_s1 + $0x1d8] sm:$0xff] }
  0xc2   : > { %v610_v44 = vadd.f32 %v578_v14, %v492_v59  ;;  %v4196_v14 = vld [vmem:[%s3709_s25 + $0x4d] sm:$0xff]  ;;  %1865 = vmatpush.msra.mxu2 %v3455_v57 }
  0xc3   : > { %3319 = vmatmul.msk.f32.gmra.mxu1 %vm205_vm0, %v3992_v26  ;;  %v982_v26 = vld [vmem:[%s3709_s25 + $0x4e] sm:$0xff] }
  0xc4   : > { %v4186_v25 = vadd.f32 %v696_v53, %v610_v44  ;;  %3335 = vmatmul.msk.f32.gmra.mxu2 %vm205_vm0, %v4182_v20 }
  0xc5   : > { %3351 = vmatmul.msk.f32.gmra.mxu3 %vm205_vm0, %v981_v52  ;;  %v699_v24 = vpop.f32.mrf.mxu0 }
  0xc7   : > { %v463_v62 = vpop.f32.mrf.mxu2 }
  0xc8   : > { %v493_v2 = vadd.f32 %v463_v62, %v358_v17  ;;  %v360_v12 = vpop.f32.mrf.mxu1  ;;  %v581_v59 = vpop.f32.mrf.mxu3  ;;  %3367 = vmatmul.msk.f32.gmra.mxu0 %vm205_vm0, %v1099_v47  ;;  %v1100_v17 = vld [vmem:[%s3709_s25 + $0x4f] sm:$0xff]  ;;  %v3439_v62 = vld [vmem:[%s5047_s1 + $0x1b8] sm:$0xff] }
  0xc9   : > { %v361_v13 = vadd.f32 %v360_v12, %v4087_v5  ;;  %1747 = vmatpush.msra.mxu1 %v3439_v62  ;;  %v983_v12 = vld [vmem:[%s3709_s25 + $0x56] sm:$0xff] }
  0xca   : > { %v611_v53 = vadd.f32 %v581_v59, %v493_v2 }
  0xcb   : > { %3320 = vmatmul.msk.f32.gmra.mxu1 %vm205_vm0, %v4015_v35 }
  0xcc   : > { %v4200_v44 = vadd.f32 %v699_v24, %v611_v53  ;;  %3336 = vmatmul.msk.f32.gmra.mxu2 %vm205_vm0, %v4196_v14  ;;  %v3471_v24 = vld [vmem:[%s5047_s1 + $0x1f8] sm:$0xff] }
  0xcd   : > { %3352 = vmatmul.msk.f32.gmra.mxu3 %vm205_vm0, %v982_v26  ;;  %v702_v52 = vpop.f32.mrf.mxu0  ;;  %v4219_v53 = vld [vmem:[%s3709_s25 + $0x55] sm:$0xff] }
  0xce   : > { %1983 = vmatpush.msra.mxu3 %v3471_v24  ;;  %v1101_v24 = vld [vmem:[%s3709_s25 + $0x57] sm:$0xff] }
  0xcf   : > { %v466_v35 = vpop.f32.mrf.mxu2 }
  0xd0   : > { %v494_v47 = vadd.f32 %v466_v35, %v361_v13  ;;  %v363_v2 = vpop.f32.mrf.mxu1  ;;  %v584_v59 = vpop.f32.mrf.mxu3  ;;  %3368 = vmatmul.msk.f32.gmra.mxu0 %vm205_vm0, %v1100_v17  ;;  %v3487_v17 = vld [vmem:[%s5047_s1 + $0x218] sm:$0xff] }
  0xd1   : > { %v364_v57 = vadd.f32 %v363_v2, %v4110_v31  ;;  %2101 = vmatpush.msra.mxu0 %v3487_v17  ;;  %v984_v2 = vld [vmem:[%s3709_s25 + $0x5e] sm:$0xff] }
  0xd2   : > { %v612_v5 = vadd.f32 %v584_v59, %v494_v47 }
  0xd3   : > { %3321 = vmatmul.msk.f32.gmra.mxu1 %vm205_vm0, %v4035_v40  ;;  %v4236_v40 = vld [vmem:[%s3709_s25 + $0x5d] sm:$0xff] }
  0xd4   : > { %v4223_v26 = vadd.f32 %v702_v52, %v612_v5  ;;  %3337 = vmatmul.msk.f32.gmra.mxu2 %vm205_vm0, %v4219_v53  ;;  %5051 = vst [vmem:[#allocation3_spill] sm:$0xff] %v4236_v40 }
  0xd5   : > { %3353 = vmatmul.msk.f32.gmra.mxu3 %vm205_vm0, %v983_v12  ;;  %v705_v13 = vpop.f32.mrf.mxu0 }
  0xd7   : > { %v469_v52 = vpop.f32.mrf.mxu2 }
  0xd8   : > { %v495_v35 = vadd.f32 %v469_v52, %v364_v57  ;;  %v366_v47 = vpop.f32.mrf.mxu1  ;;  %v587_v62 = vpop.f32.mrf.mxu3  ;;  %3369 = vmatmul.msk.f32.gmra.mxu0 %vm205_vm0, %v1101_v24  ;;  %v1102_v57 = vld [vmem:[%s3709_s25 + $0x5f] sm:$0xff] }
  0xd9   : > { %v367_v5 = vadd.f32 %v366_v47, %v4085_v3  ;;  %v3454_v3 = vld [vmem:[%s5047_s1 + $0x1d0] sm:$0xff] }
  0xda   : > { %v613_v31 = vadd.f32 %v587_v62, %v495_v35  ;;  %v4250_v62 = vld [vmem:[%s3709_s25 + $0x64] sm:$0xff]  ;;  %1866 = vmatpush.msra.mxu2 %v3454_v3 }
  0xdb   : > { %3322 = vmatmul.msk.f32.gmra.mxu1 %vm205_vm0, %v4055_v45 }
  0xdc   : > { %v4240_v59 = vadd.f32 %v705_v13, %v613_v31  ;;  %3338 = vmatmul.msk.f32.gmra.mxu2 %vm205_vm0, %v4236_v40  ;;  %v4253_v13 = vld [vmem:[%s3709_s25 + $0x65] sm:$0xff] }
  0xdd   : > { %3354 = vmatmul.msk.f32.gmra.mxu3 %vm205_vm0, %v984_v2  ;;  %v708_v12 = vpop.f32.mrf.mxu0  ;;  %v985_v31 = vld [vmem:[%s3709_s25 + $0x66] sm:$0xff] }
  0xdf   : > { %v472_v17 = vpop.f32.mrf.mxu2 }
  0xe0   : > { %v496_v52 = vadd.f32 %v472_v17, %v367_v5  ;;  %v369_v24 = vpop.f32.mrf.mxu1  ;;  %v590_v35 = vpop.f32.mrf.mxu3  ;;  %3370 = vmatmul.msk.f32.gmra.mxu0 %vm205_vm0, %v1102_v57  ;;  %v1103_v5 = vld [vmem:[%s3709_s25 + $0x67] sm:$0xff] }
  0xe1   : > { %v370_v47 = vadd.f32 %v369_v24, %v4105_v27 }
  0xe2   : > { %v614_v45 = vadd.f32 %v590_v35, %v496_v52  ;;  %v3438_v52 = vld [vmem:[%s5047_s1 + $0x1b0] sm:$0xff] }
  0xe3   : > { %3323 = vmatmul.msk.f32.gmra.mxu1 %vm205_vm0, %v4250_v62 }
  0xe4   : > { %v4257_v40 = vadd.f32 %v708_v12, %v614_v45  ;;  %3339 = vmatmul.msk.f32.gmra.mxu2 %vm205_vm0, %v4253_v13  ;;  %v3470_v12 = vld [vmem:[%s5047_s1 + $0x1f0] sm:$0xff]  ;;  %1748 = vmatpush.msra.mxu1 %v3438_v52 }
  0xe5   : > { %3355 = vmatmul.msk.f32.gmra.mxu3 %vm205_vm0, %v985_v31  ;;  %v711_v2 = vpop.f32.mrf.mxu0 }
  0xe6   : > { %1984 = vmatpush.msra.mxu3 %v3470_v12 }
  0xe7   : > { %v475_v57 = vpop.f32.mrf.mxu2 }
  0xe8   : > { %v497_v17 = vadd.f32 %v475_v57, %v370_v47  ;;  %v372_v35 = vpop.f32.mrf.mxu1  ;;  %v593_v45 = vpop.f32.mrf.mxu3  ;;  %3371 = vmatmul.msk.f32.gmra.mxu0 %vm205_vm0, %v1103_v5  ;;  %v3486_v47 = vld [vmem:[%s5047_s1 + $0x210] sm:$0xff] }
  0xe9   : > { %v373_v31 = vadd.f32 %v372_v35, %v4128_v50  ;;  %2102 = vmatpush.msra.mxu0 %v3486_v47  ;;  %v3437_v47 = vld [vmem:[%s5047_s1 + $0x1a8] sm:$0xff] }
  0xea   : > { %v615_v27 = vadd.f32 %v593_v45, %v497_v17  ;;  %1749 = vmatpush.msra.mxu1 %v3437_v47 }
  0xeb   : > { %3376 = vmatmul.msk.f32.vlgmr.msrb.gmra.mxu1 %vm205_vm0, %v3852_v48 }
  0xec   : > { %v4276_v24 = vadd.f32 %v711_v2, %v615_v27  ;;  %3392 = vmatmul.msk.f32.vlgmr.msrb.gmra.mxu2 %vm205_vm0, %v3875_v55 }
  0xed   : > { %3408 = vmatmul.msk.f32.vlgmr.msrb.gmra.mxu3 %vm205_vm0, %v3718_v6  ;;  %v714_v3 = vpop.f32.mrf.mxu0 }
  0xef   : > { %v478_v5 = vpop.f32.mrf.mxu2 }
  0xf0   : > { %v498_v2 = vadd.f32 %v478_v5, %v373_v31  ;;  %v375_v12 = vpop.f32.mrf.mxu1  ;;  %v596_v57 = vpop.f32.mrf.mxu3  ;;  %3424 = vmatmul.msk.f32.vlgmr.msrb.gmra.mxu0 %vm205_vm0, %v3878_v56 }
  0xf1   : > { %v376_v6 = vadd.f32 %v375_v12, %v4089_v9  ;;  %v3469_v9 = vld [vmem:[%s5047_s1 + $0x1e8] sm:$0xff] }
  0xf2   : > { %v616_v48 = vadd.f32 %v596_v57, %v498_v2  ;;  %1985 = vmatpush.msra.mxu3 %v3469_v9  ;;  %v3436_v9 = vld [vmem:[%s5047_s1 + $0x1a0] sm:$0xff] }
  0xf3   : > { %3377 = vmatmul.msk.f32.gmra.mxu1 %vm205_vm0, %v3875_v55 }
  0xf4   : > { %v4290_v17 = vadd.f32 %v714_v3, %v616_v48  ;;  %3393 = vmatmul.msk.f32.gmra.mxu2 %vm205_vm0, %v3895_v60  ;;  %1750 = vmatpush.msra.mxu1 %v3436_v9  ;;  %v1456_v9 = vld [vmem:[%s3709_s25 + $0x69] sm:$0xff] }
  0xf5   : > { %3409 = vmatmul.msk.f32.gmra.mxu3 %vm205_vm0, %v3758_v18  ;;  %v717_v50 = vpop.f32.mrf.mxu0  ;;  %v3453_v18 = vld [vmem:[%s5047_s1 + $0x1c8] sm:$0xff] }
  0xf6   : > { %1867 = vmatpush.msra.mxu2 %v3453_v18 }
  0xf7   : > { %v481_v52 = vpop.f32.mrf.mxu2 }
  0xf8   : > { %v499_v35 = vadd.f32 %v481_v52, %v376_v6  ;;  %v378_v45 = vpop.f32.mrf.mxu1  ;;  %v599_v27 = vpop.f32.mrf.mxu3  ;;  %3425 = vmatmul.msk.f32.gmra.mxu0 %vm205_vm0, %v3898_v61 }
  0xf9   : > { %v379_v55 = vadd.f32 %v378_v45, %v4112_v36 }
  0xfa   : > { %v617_v56 = vadd.f32 %v599_v27, %v499_v35 }
  0xfb   : > { %3378 = vmatmul.msk.f32.gmra.mxu1 %vm205_vm0, %v3895_v60 }
  0xfc   : > { %v4301_v31 = vadd.f32 %v717_v50, %v617_v56  ;;  %3394 = vmatmul.msk.f32.gmra.mxu2 %vm205_vm0, %v3912_v0 }
  0xfd   : > { %3410 = vmatmul.msk.f32.gmra.mxu3 %vm205_vm0, %v3805_v32  ;;  %v720_v61 = vpop.f32.mrf.mxu0 }
  0xff   : > { %v484_v3 = vpop.f32.mrf.mxu2 }
 0x100   : > { %v500_v60 = vadd.f32 %v484_v3, %v379_v55  ;;  %v381_v5 = vpop.f32.mrf.mxu1  ;;  %v602_v2 = vpop.f32.mrf.mxu3  ;;  %3426 = vmatmul.msk.f32.gmra.mxu0 %vm205_vm0, %v3915_v1  ;;  %v3485_v1 = vld [vmem:[%s5047_s1 + $0x208] sm:$0xff] }
 0x101   : > { %v382_v12 = vadd.f32 %v381_v5, %v4130_v51  ;;  %2103 = vmatpush.msra.mxu0 %v3485_v1 }
 0x102   : > { %v618_v36 = vadd.f32 %v602_v2, %v500_v60 }
 0x103   : > { %3379 = vmatmul.msk.f32.gmra.mxu1 %vm205_vm0, %v3912_v0 }
 0x104   : > { %v4321_v32 = vadd.f32 %v720_v61, %v618_v36  ;;  %3395 = vmatmul.msk.f32.gmra.mxu2 %vm205_vm0, %v3938_v10 }
 0x105   : > { %3411 = vmatmul.msk.f32.gmra.mxu3 %vm205_vm0, %v3721_v7  ;;  %v723_v57 = vpop.f32.mrf.mxu0 }
 0x107   : > { %v487_v48 = vpop.f32.mrf.mxu2 }
 0x108   : > { %v501_v6 = vadd.f32 %v487_v48, %v382_v12  ;;  %v605_v50 = vpop.f32.mrf.mxu3  ;;  %v808_v52 = vpop.f32.mrf.mxu1  ;;  %3427 = vmatmul.msk.f32.gmra.mxu0 %vm205_vm0, %v3941_v11 }
 0x109   : > { %v844_v7 = vadd.f32 %v808_v52, %v4148_v49  ;;  %v3468_v49 = vld [vmem:[%s5047_s1 + $0x1e0] sm:$0xff] }
 0x10a   : > { %v619_v0 = vadd.f32 %v605_v50, %v501_v6  ;;  %1986 = vmatpush.msra.mxu3 %v3468_v49 }
 0x10b   : > { %3380 = vmatmul.msk.f32.gmra.mxu1 %vm205_vm0, %v3938_v10 }
 0x10c   : > { %v4335_v35 = vadd.f32 %v723_v57, %v619_v0  ;;  %3396 = vmatmul.msk.f32.gmra.mxu2 %vm205_vm0, %v3958_v15 }
 0x10d   : > { %3412 = vmatmul.msk.f32.gmra.mxu3 %vm205_vm0, %v3761_v19  ;;  %v1162_v51 = vpop.f32.mrf.mxu0  ;;  %v3452_v19 = vld [vmem:[%s5047_s1 + $0x1c0] sm:$0xff] }
 0x10e   : > { %1868 = vmatpush.msra.mxu2 %v3452_v19 }
 0x10f   : > { %v926_v45 = vpop.f32.mrf.mxu2 }
 0x110   : > { %v962_v27 = vadd.f32 %v926_v45, %v844_v7  ;;  %v811_v56 = vpop.f32.mrf.mxu1  ;;  %v1044_v18 = vpop.f32.mrf.mxu3  ;;  %3428 = vmatmul.msk.f32.gmra.mxu0 %vm205_vm0, %v3961_v16 }
 0x111   : > { %v845_v10 = vadd.f32 %v811_v56, %v4170_v46  ;;  %v4410_v56 = vld [vmem:[%s3709_s25 + $0x60] sm:$0xff] }
 0x112   : > { %v1080_v11 = vadd.f32 %v1044_v18, %v962_v27 }
 0x113   : > { %3381 = vmatmul.msk.f32.gmra.mxu1 %vm205_vm0, %v3958_v15 }
 0x114   : > { %v4346_v55 = vadd.f32 %v1162_v51, %v1080_v11  ;;  %3397 = vmatmul.msk.f32.gmra.mxu2 %vm205_vm0, %v3975_v21  ;;  %v3503_v51 = vld [vmem:[%s5047_s1 + $0x238] sm:$0xff] }
 0x115   : > { %3413 = vmatmul.msk.f32.gmra.mxu3 %vm205_vm0, %v3808_v33  ;;  %v1165_v16 = vpop.f32.mrf.mxu0  ;;  %2219 = vmatpush.msrb.mxu1 %v3503_v51 }
 0x117   : > { %v929_v61 = vpop.f32.mrf.mxu2 }
 0x118   : > { %v963_v15 = vadd.f32 %v929_v61, %v845_v10  ;;  %v814_v3 = vpop.f32.mrf.mxu1  ;;  %v1047_v60 = vpop.f32.mrf.mxu3  ;;  %3429 = vmatmul.msk.f32.gmra.mxu0 %vm205_vm0, %v3978_v23  ;;  %v3484_v23 = vld [vmem:[%s5047_s1 + $0x200] sm:$0xff] }
 0x119   : > { %v846_v47 = vadd.f32 %v814_v3, %v4186_v25  ;;  %2104 = vmatpush.msra.mxu0 %v3484_v23  ;;  %v1573_v10 = vld [vmem:[%s3709_s25 + $0x62] sm:$0xff] }
 0x11a   : > { %v1081_v46 = vadd.f32 %v1047_v60, %v963_v15 }
 0x11b   : > { %3382 = vmatmul.msk.f32.gmra.mxu1 %vm205_vm0, %v3975_v21 }
 0x11c   : > { %v4366_v33 = vadd.f32 %v1165_v16, %v1081_v46  ;;  %3398 = vmatmul.msk.f32.gmra.mxu2 %vm205_vm0, %v4001_v29 }
 0x11d   : > { %3414 = vmatmul.msk.f32.gmra.mxu3 %vm205_vm0, %v3724_v8  ;;  %v1168_v5 = vpop.f32.mrf.mxu0 }
 0x11f   : > { %v932_v2 = vpop.f32.mrf.mxu2 }
 0x120   : > { %v964_v36 = vadd.f32 %v932_v2, %v846_v47  ;;  %v817_v12 = vpop.f32.mrf.mxu1  ;;  %v1050_v57 = vpop.f32.mrf.mxu3  ;;  %3430 = vmatmul.msk.f32.gmra.mxu0 %vm205_vm0, %v4004_v30  ;;  %v1574_v47 = vld [vmem:[%s3709_s25 + $0x6a] sm:$0xff] }
 0x121   : > { %v847_v8 = vadd.f32 %v817_v12, %v4200_v44  ;;  %v3535_v44 = vld [vmem:[%s5047_s1 + $0x278] sm:$0xff]  ;;  %v4442_v12 = vld [vmem:[%s3709_s25 + $0x70] sm:$0xff] }
 0x122   : > { %v1082_v21 = vadd.f32 %v1050_v57, %v964_v36  ;;  %2455 = vmatpush.msrb.mxu3 %v3535_v44  ;;  %v1682_v44 = vld [vmem:[%s3709_s25 + $0x1b] sm:$0xff] }
 0x123   : > { %3383 = vmatmul.msk.f32.gmra.mxu1 %vm205_vm0, %v4001_v29 }
 0x124   : > { %v4380_v1 = vadd.f32 %v1168_v5, %v1082_v21  ;;  %3399 = vmatmul.msk.f32.gmra.mxu2 %vm205_vm0, %v4021_v37  ;;  %v1457_v21 = vld [vmem:[%s3709_s25 + $0x71] sm:$0xff] }
 0x125   : > { %3415 = vmatmul.msk.f32.gmra.mxu3 %vm205_vm0, %v3771_v22  ;;  %v1171_v25 = vpop.f32.mrf.mxu0  ;;  %v3519_v22 = vld [vmem:[%s5047_s1 + $0x258] sm:$0xff] }
 0x126   : > { %2337 = vmatpush.msrb.mxu2 %v3519_v22  ;;  %v3502_v22 = vld [vmem:[%s5047_s1 + $0x230] sm:$0xff] }
 0x127   : > { %v935_v48 = vpop.f32.mrf.mxu2  ;;  %2220 = vmatpush.msrb.mxu1 %v3502_v22 }
 0x128   : > { %v965_v6 = vadd.f32 %v935_v48, %v847_v8  ;;  %v820_v50 = vpop.f32.mrf.mxu1  ;;  %v1053_v52 = vpop.f32.mrf.mxu3  ;;  %3431 = vmatmul.msk.f32.gmra.mxu0 %vm205_vm0, %v4024_v38 }
 0x129   : > { %v848_v29 = vadd.f32 %v820_v50, %v4223_v26  ;;  %v1455_v26 = vld [vmem:[%s3709_s25 + $0x61] sm:$0xff]  ;;  %v3534_v50 = vld [vmem:[%s5047_s1 + $0x270] sm:$0xff] }
 0x12a   : > { %v1083_v30 = vadd.f32 %v1053_v52, %v965_v6  ;;  %v1575_v6 = vld [vmem:[%s3709_s25 + $0x72] sm:$0xff]  ;;  %2456 = vmatpush.msrb.mxu3 %v3534_v50 }
 0x12b   : > { %3384 = vmatmul.msk.f32.gmra.mxu1 %vm205_vm0, %v4021_v37 }
 0x12c   : > { %v4391_v0 = vadd.f32 %v1171_v25, %v1083_v30  ;;  %3400 = vmatmul.msk.f32.gmra.mxu2 %vm205_vm0, %v4038_v41 }
 0x12d   : > { %3416 = vmatmul.msk.f32.gmra.mxu3 %vm205_vm0, %v3812_v34  ;;  %v1174_v38 = vpop.f32.mrf.mxu0 }
 0x12f   : > { %v938_v37 = vpop.f32.mrf.mxu2 }
 0x130   : > { %v966_v7 = vadd.f32 %v938_v37, %v848_v29  ;;  %v823_v45 = vpop.f32.mrf.mxu1  ;;  %v1056_v27 = vpop.f32.mrf.mxu3  ;;  %3432 = vmatmul.msk.f32.gmra.mxu0 %vm205_vm0, %v4041_v42  ;;  %v3551_v42 = vld [vmem:[%s5047_s1 + $0x298] sm:$0xff] }
 0x131   : > { %v849_v11 = vadd.f32 %v823_v45, %v4240_v59  ;;  %2573 = vmatpush.msrb.mxu0 %v3551_v42  ;;  %v3550_v45 = vld [vmem:[%s5047_s1 + $0x290] sm:$0xff] }
 0x132   : > { %v1084_v34 = vadd.f32 %v1056_v27, %v966_v7 }
 0x133   : > { %3385 = vmatmul.msk.f32.gmra.mxu1 %vm205_vm0, %v4038_v41  ;;  %v4428_v41 = vld [vmem:[%s3709_s25 + $0x68] sm:$0xff]  ;;  %2574 = vmatpush.msrb.mxu0 %v3550_v45 }
 0x134   : > { %v4415_v18 = vadd.f32 %v1174_v38, %v1084_v34  ;;  %3401 = vmatmul.msk.f32.gmra.mxu2 %vm205_vm0, %v4410_v56 }
 0x135   : > { %3417 = vmatmul.msk.f32.gmra.mxu3 %vm205_vm0, %v1455_v26  ;;  %v1177_v19 = vpop.f32.mrf.mxu0 }
 0x137   : > { %v941_v16 = vpop.f32.mrf.mxu2 }
 0x138   : > { %v967_v49 = vadd.f32 %v941_v16, %v849_v11  ;;  %v826_v61 = vpop.f32.mrf.mxu1  ;;  %v1059_v15 = vpop.f32.mrf.mxu3  ;;  %3433 = vmatmul.msk.f32.gmra.mxu0 %vm205_vm0, %v1573_v10  ;;  %v1801_v10 = vld [vmem:[%s3709_s25 + $0x24] sm:$0xff] }
 0x139   : > { %v850_v60 = vadd.f32 %v826_v61, %v4257_v40  ;;  %v3518_v40 = vld [vmem:[%s5047_s1 + $0x250] sm:$0xff] }
 0x13a   : > { %v1085_v59 = vadd.f32 %v1059_v15, %v967_v49  ;;  %2338 = vmatpush.msrb.mxu2 %v3518_v40  ;;  %v4517_v40 = vld [vmem:[%s3709_s25 + $0x3c] sm:$0xff] }
 0x13b   : > { %3386 = vmatmul.msk.f32.gmra.mxu1 %vm205_vm0, %v4410_v56 }
 0x13c   : > { %v4432_v3 = vadd.f32 %v1177_v19, %v1085_v59  ;;  %3402 = vmatmul.msk.f32.gmra.mxu2 %vm205_vm0, %v4428_v41  ;;  %v1683_v19 = vld [vmem:[%s3709_s25 + $0x23] sm:$0xff]  ;;  %v1684_v59 = vld [vmem:[%s3709_s25 + $0x2b] sm:$0xff] }
 0x13d   : > { %3418 = vmatmul.msk.f32.gmra.mxu3 %vm205_vm0, %v1456_v9  ;;  %v1180_v46 = vpop.f32.mrf.mxu0 }
 0x13f   : > { %v944_v5 = vpop.f32.mrf.mxu2 }
 0x140   : > { %v968_v23 = vadd.f32 %v944_v5, %v850_v60  ;;  %v829_v2 = vpop.f32.mrf.mxu1  ;;  %v1062_v36 = vpop.f32.mrf.mxu3  ;;  %3434 = vmatmul.msk.f32.gmra.mxu0 %vm205_vm0, %v1574_v47  ;;  %v4493_v60 = vld [vmem:[%s3709_s25 + $0x34] sm:$0xff]  ;;  %v3533_v47 = vld [vmem:[%s5047_s1 + $0x268] sm:$0xff] }
 0x141   : > { %v851_v25 = vadd.f32 %v829_v2, %v4276_v24  ;;  %2457 = vmatpush.msrb.mxu3 %v3533_v47  ;;  %v3501_v2 = vld [vmem:[%s5047_s1 + $0x228] sm:$0xff] }
 0x142   : > { %v1086_v57 = vadd.f32 %v1062_v36, %v968_v23  ;;  %2221 = vmatpush.msrb.mxu1 %v3501_v2  ;;  %v4600_v2 = vld [vmem:[%s3709_s25 + $0x5c] sm:$0xff] }
 0x143   : > { %3387 = vmatmul.msk.f32.gmra.mxu1 %vm205_vm0, %v4428_v41 }
 0x144   : > { %v4446_v8 = vadd.f32 %v1180_v46, %v1086_v57  ;;  %3403 = vmatmul.msk.f32.gmra.mxu2 %vm205_vm0, %v4442_v12 }
 0x145   : > { %3419 = vmatmul.msk.f32.gmra.mxu3 %vm205_vm0, %v1457_v21  ;;  %v1183_v48 = vpop.f32.mrf.mxu0  ;;  %v4512_v21 = vld [vmem:[%s3709_s25 + $0x33] sm:$0xff] }
 0x147   : > { %v947_v52 = vpop.f32.mrf.mxu2 }
 0x148   : > { %v969_v30 = vadd.f32 %v947_v52, %v851_v25  ;;  %v832_v29 = vpop.f32.mrf.mxu1  ;;  %v1065_v38 = vpop.f32.mrf.mxu3  ;;  %3435 = vmatmul.msk.f32.gmra.mxu0 %vm205_vm0, %v1575_v6  ;;  %v3549_v6 = vld [vmem:[%s5047_s1 + $0x288] sm:$0xff] }
 0x149   : > { %v852_v7 = vadd.f32 %v832_v29, %v4290_v17  ;;  %2575 = vmatpush.msrb.mxu0 %v3549_v6  ;;  %v4532_v29 = vld [vmem:[%s3709_s25 + $0x3b] sm:$0xff] }
 0x14a   : > { %v1087_v24 = vadd.f32 %v1065_v38, %v969_v30  ;;  %v4537_v38 = vld [vmem:[%s3709_s25 + $0x44] sm:$0xff] }
 0x14b   : > { %3440 = vmatmul.msk.f32.vlgmr.msra.gmra.mxu1 %vm205_vm0, %v1682_v44 }
 0x14c   : > { %v4466_v37 = vadd.f32 %v1183_v48, %v1087_v24  ;;  %3456 = vmatmul.msk.f32.vlgmr.msra.gmra.mxu2 %vm205_vm0, %v3889_v58 }
 0x14d   : > { %3472 = vmatmul.msk.f32.vlgmr.msra.gmra.mxu3 %vm205_vm0, %v3909_v63  ;;  %v1186_v51 = vpop.f32.mrf.mxu0 }
 0x14f   : > { %v950_v27 = vpop.f32.mrf.mxu2 }
 0x150   : > { %v970_v34 = vadd.f32 %v950_v27, %v852_v7  ;;  %v835_v26 = vpop.f32.mrf.mxu1  ;;  %v1068_v11 = vpop.f32.mrf.mxu3  ;;  %3488 = vmatmul.msk.f32.vlgmr.msra.gmra.mxu0 %vm205_vm0, %v4115_v39  ;;  %v1802_v39 = vld [vmem:[%s3709_s25 + $0x2c] sm:$0xff] }
 0x151   : > { %v853_v17 = vadd.f32 %v835_v26, %v4301_v31 }
 0x152   : > { %v1088_v58 = vadd.f32 %v1068_v11, %v970_v34  ;;  %v4549_v34 = vld [vmem:[%s3709_s25 + $0x43] sm:$0xff]  ;;  %v4554_v11 = vld [vmem:[%s3709_s25 + $0x4c] sm:$0xff] }
 0x153   : > { %3441 = vmatmul.msk.f32.gmra.mxu1 %vm205_vm0, %v1683_v19 }
 0x154   : > { %v4481_v63 = vadd.f32 %v1186_v51, %v1088_v58  ;;  %3457 = vmatmul.msk.f32.gmra.mxu2 %vm205_vm0, %v1801_v10  ;;  %v3532_v58 = vld [vmem:[%s5047_s1 + $0x260] sm:$0xff] }
 0x155   : > { %3473 = vmatmul.msk.f32.gmra.mxu3 %vm205_vm0, %v3929_v4  ;;  %v1189_v42 = vpop.f32.mrf.mxu0  ;;  %v3517_v4 = vld [vmem:[%s5047_s1 + $0x248] sm:$0xff] }
 0x156   : > { %2339 = vmatpush.msrb.mxu2 %v3517_v4  ;;  %2458 = vmatpush.msrb.mxu3 %v3532_v58  ;;  %v3548_v4 = vld [vmem:[%s5047_s1 + $0x280] sm:$0xff] }
 0x157   : > { %v953_v16 = vpop.f32.mrf.mxu2  ;;  %2576 = vmatpush.msrb.mxu0 %v3548_v4 }
 0x158   : > { %v971_v49 = vadd.f32 %v953_v16, %v853_v17  ;;  %v838_v61 = vpop.f32.mrf.mxu1  ;;  %v1071_v15 = vpop.f32.mrf.mxu3  ;;  %3489 = vmatmul.msk.f32.gmra.mxu0 %vm205_vm0, %v4133_v54  ;;  %v3500_v16 = vld [vmem:[%s5047_s1 + $0x220] sm:$0xff] }
 0x159   : > { %v854_v31 = vadd.f32 %v838_v61, %v4321_v32  ;;  %2222 = vmatpush.msrb.mxu1 %v3500_v16 }
 0x15a   : > { %v1089_v9 = vadd.f32 %v1071_v15, %v971_v49  ;;  %v4575_v15 = vld [vmem:[%s3709_s25 + $0x4b] sm:$0xff] }
 0x15b   : > { %3442 = vmatmul.msk.f32.gmra.mxu1 %vm205_vm0, %v1684_v59  ;;  %v4580_v59 = vld [vmem:[%s3709_s25 + $0x54] sm:$0xff] }
 0x15c   : > { %v4495_v46 = vadd.f32 %v1189_v42, %v1089_v9  ;;  %3458 = vmatmul.msk.f32.gmra.mxu2 %vm205_vm0, %v1802_v39 }
 0x15d   : > { %3474 = vmatmul.msk.f32.gmra.mxu3 %vm205_vm0, %v4493_v60  ;;  %v1192_v54 = vpop.f32.mrf.mxu0 }
 0x15f   : > { %v956_v5 = vpop.f32.mrf.mxu2 }
 0x160   : > { %v972_v23 = vadd.f32 %v956_v5, %v854_v31  ;;  %v841_v36 = vpop.f32.mrf.mxu1  ;;  %v1074_v57 = vpop.f32.mrf.mxu3  ;;  %3490 = vmatmul.msk.f32.gmra.mxu0 %vm205_vm0, %v4144_v28 }
 0x161   : > { %v855_v48 = vadd.f32 %v841_v36, %v4335_v35 }
 0x162   : > { %v1090_v32 = vadd.f32 %v1074_v57, %v972_v23  ;;  %v4595_v23 = vld [vmem:[%s3709_s25 + $0x53] sm:$0xff] }
 0x163   : > { %3443 = vmatmul.msk.f32.gmra.mxu1 %vm205_vm0, %v4512_v21 }
 0x164   : > { %v4519_v25 = vadd.f32 %v1192_v54, %v1090_v32  ;;  %3459 = vmatmul.msk.f32.gmra.mxu2 %vm205_vm0, %v4493_v60 }
 0x165   : > { %3475 = vmatmul.msk.f32.gmra.mxu3 %vm205_vm0, %v4517_v40  ;;  %v1195_v28 = vpop.f32.mrf.mxu0 }
 0x167   : > { %v959_v50 = vpop.f32.mrf.mxu2 }
 0x168   : > { %v973_v52 = vadd.f32 %v959_v50, %v855_v48  ;;  %v1077_v30 = vpop.f32.mrf.mxu3  ;;  %v1280_v22 = vpop.f32.mrf.mxu1  ;;  %3491 = vmatmul.msk.f32.gmra.mxu0 %vm205_vm0, %v4166_v43  ;;  %v4612_v50 = vld [vmem:[%s3709_s25 + $0x5b] sm:$0xff] }
 0x169   : > { %v1316_v24 = vadd.f32 %v1280_v22, %v4346_v55  ;;  %v3516_v55 = vld [vmem:[%s5047_s1 + $0x240] sm:$0xff] }
 0x16a   : > { %v1091_v35 = vadd.f32 %v1077_v30, %v973_v52  ;;  %2340 = vmatpush.msrb.mxu2 %v3516_v55  ;;  %v5052_v52 = vld [vmem:[#allocation3_spill] sm:$0xff] }
 0x16b   : > { %3444 = vmatmul.msk.f32.gmra.mxu1 %vm205_vm0, %v4532_v29  ;;  %v4635_v55 = vld [vmem:[%s3709_s25 + $0x63] sm:$0xff] }
 0x16c   : > { %v4539_v44 = vadd.f32 %v1195_v28, %v1091_v35  ;;  %3460 = vmatmul.msk.f32.gmra.mxu2 %vm205_vm0, %v4517_v40 }
 0x16d   : > { %3476 = vmatmul.msk.f32.gmra.mxu3 %vm205_vm0, %v4537_v38  ;;  %v1634_v7 = vpop.f32.mrf.mxu0 }
 0x16f   : > { %v1398_v51 = vpop.f32.mrf.mxu2 }
 0x170   : > { %v1434_v43 = vadd.f32 %v1398_v51, %v1316_v24  ;;  %v1283_v45 = vpop.f32.mrf.mxu1  ;;  %v1516_v27 = vpop.f32.mrf.mxu3  ;;  %3492 = vmatmul.msk.f32.gmra.mxu0 %vm205_vm0, %v4182_v20 }
 0x171   : > { %v1317_v20 = vadd.f32 %v1283_v45, %v4366_v33  ;;  %v3567_v45 = vld [vmem:[%s5047_s1 + $0x2b8] sm:$0xff] }
 0x172   : > { %v1552_v26 = vadd.f32 %v1516_v27, %v1434_v43  ;;  %2691 = vmatpush.msra.mxu1 %v3567_v45  ;;  %v2272_v45 = vld [vmem:[%s3709_s25 + $0x27] sm:$0xff] }
 0x173   : > { %3445 = vmatmul.msk.f32.gmra.mxu1 %vm205_vm0, %v4549_v34 }
 0x174   : > { %v4556_v19 = vadd.f32 %v1634_v7, %v1552_v26  ;;  %3461 = vmatmul.msk.f32.gmra.mxu2 %vm205_vm0, %v4537_v38  ;;  %v3599_v7 = vld [vmem:[%s5047_s1 + $0x2f8] sm:$0xff] }
 0x175   : > { %3477 = vmatmul.msk.f32.gmra.mxu3 %vm205_vm0, %v4554_v11  ;;  %v1637_v10 = vpop.f32.mrf.mxu0 }
 0x176   : > { %2927 = vmatpush.msra.mxu3 %v3599_v7  ;;  %v3566_v7 = vld [vmem:[%s5047_s1 + $0x2b0] sm:$0xff] }
 0x177   : > { %v1401_v17 = vpop.f32.mrf.mxu2  ;;  %2692 = vmatpush.msra.mxu1 %v3566_v7  ;;  %v2393_v7 = vld [vmem:[%s3709_s25 + $0x40] sm:$0xff] }
 0x178   : > { %v1435_v42 = vadd.f32 %v1401_v17, %v1317_v20  ;;  %v1286_v49 = vpop.f32.mrf.mxu1  ;;  %v1519_v61 = vpop.f32.mrf.mxu3  ;;  %3493 = vmatmul.msk.f32.gmra.mxu0 %vm205_vm0, %v4196_v14  ;;  %v4640_v20 = vld [vmem:[%s3709_s25 + $0x6c] sm:$0xff] }
 0x179   : > { %v1318_v9 = vadd.f32 %v1286_v49, %v4380_v1  ;;  %v2045_v17 = vld [vmem:[%s3709_s25 + $0x6d] sm:$0xff] }
 0x17a   : > { %v1553_v33 = vadd.f32 %v1519_v61, %v1435_v42  ;;  %v3615_v42 = vld [vmem:[%s5047_s1 + $0x318] sm:$0xff] }
 0x17b   : > { %3446 = vmatmul.msk.f32.gmra.mxu1 %vm205_vm0, %v4575_v15  ;;  %3045 = vmatpush.msra.mxu0 %v3615_v42  ;;  %v3614_v42 = vld [vmem:[%s5047_s1 + $0x310] sm:$0xff] }
 0x17c   : > { %v4582_v39 = vadd.f32 %v1637_v10, %v1553_v33  ;;  %3462 = vmatmul.msk.f32.gmra.mxu2 %vm205_vm0, %v4554_v11 }
 0x17d   : > { %3478 = vmatmul.msk.f32.gmra.mxu3 %vm205_vm0, %v4580_v59  ;;  %v1640_v14 = vpop.f32.mrf.mxu0  ;;  %3046 = vmatpush.msra.mxu0 %v3614_v42 }
 0x17f   : > { %v1404_v31 = vpop.f32.mrf.mxu2 }
 0x180   : > { %v1436_v54 = vadd.f32 %v1404_v31, %v1318_v9  ;;  %v1289_v47 = vpop.f32.mrf.mxu1  ;;  %v1522_v5 = vpop.f32.mrf.mxu3  ;;  %3494 = vmatmul.msk.f32.gmra.mxu0 %vm205_vm0, %v4219_v53  ;;  %v4656_v9 = vld [vmem:[%s3709_s25 + $0x6b] sm:$0xff] }
 0x181   : > { %v1319_v57 = vadd.f32 %v1289_v47, %v4391_v0  ;;  %v3583_v0 = vld [vmem:[%s5047_s1 + $0x2d8] sm:$0xff] }
 0x182   : > { %v1554_v1 = vadd.f32 %v1522_v5, %v1436_v54  ;;  %2809 = vmatpush.msra.mxu2 %v3583_v0  ;;  %v2046_v54 = vld [vmem:[%s3709_s25 + $0x75] sm:$0xff] }
 0x183   : > { %3447 = vmatmul.msk.f32.gmra.mxu1 %vm205_vm0, %v4595_v23  ;;  %v3598_v0 = vld [vmem:[%s5047_s1 + $0x2f0] sm:$0xff] }
 0x184   : > { %v4602_v36 = vadd.f32 %v1640_v14, %v1554_v1  ;;  %3463 = vmatmul.msk.f32.gmra.mxu2 %vm205_vm0, %v4580_v59  ;;  %2928 = vmatpush.msra.mxu3 %v3598_v0 }
 0x185   : > { %3479 = vmatmul.msk.f32.gmra.mxu3 %vm205_vm0, %v4600_v2  ;;  %v1643_v32 = vpop.f32.mrf.mxu0 }
 0x187   : > { %v1407_v48 = vpop.f32.mrf.mxu2 }
 0x188   : > { %v1437_v28 = vadd.f32 %v1407_v48, %v1319_v57  ;;  %v1292_v53 = vpop.f32.mrf.mxu1  ;;  %v1525_v6 = vpop.f32.mrf.mxu3  ;;  %3495 = vmatmul.msk.f32.gmra.mxu0 %vm205_vm0, %v5052_v52 }
 0x189   : > { %v1320_v35 = vadd.f32 %v1292_v53, %v4415_v18 }
 0x18a   : > { %v1555_v30 = vadd.f32 %v1525_v6, %v1437_v28  ;;  %v4677_v28 = vld [vmem:[%s3709_s25 + $0x7c] sm:$0xff] }
 0x18b   : > { %3448 = vmatmul.msk.f32.gmra.mxu1 %vm205_vm0, %v4612_v50 }
 0x18c   : > { %v4616_v22 = vadd.f32 %v1643_v32, %v1555_v30  ;;  %3464 = vmatmul.msk.f32.gmra.mxu2 %vm205_vm0, %v4600_v2  ;;  %v4673_v32 = vld [vmem:[%s3709_s25 + $0x73] sm:$0xff]  ;;  %v2047_v30 = vld [vmem:[%s3709_s25 + $0x7d] sm:$0xff] }
 0x18d   : > { %3480 = vmatmul.msk.f32.gmra.mxu3 %vm205_vm0, %v4250_v62  ;;  %v1646_v24 = vpop.f32.mrf.mxu0 }
 0x18f   : > { %v1410_v51 = vpop.f32.mrf.mxu2 }
 0x190   : > { %v1438_v43 = vadd.f32 %v1410_v51, %v1320_v35  ;;  %v1295_v27 = vpop.f32.mrf.mxu1  ;;  %v1528_v26 = vpop.f32.mrf.mxu3  ;;  %3496 = vmatmul.msk.f32.gmra.mxu0 %vm205_vm0, %v4253_v13 }
 0x191   : > { %v1321_v58 = vadd.f32 %v1295_v27, %v4432_v3  ;;  %v4660_v3 = vld [vmem:[%s3709_s25 + $0x74] sm:$0xff] }
 0x192   : > { %v1556_v18 = vadd.f32 %v1528_v26, %v1438_v43  ;;  %v2154_v43 = vld [vmem:[%s3709_s25 + $0x26] sm:$0xff] }
 0x193   : > { %3449 = vmatmul.msk.f32.gmra.mxu1 %vm205_vm0, %v4635_v55  ;;  %v2390_v26 = vld [vmem:[%s3709_s25 + $0x28] sm:$0xff] }
 0x194   : > { %v4642_v10 = vadd.f32 %v1646_v24, %v1556_v18  ;;  %3465 = vmatmul.msk.f32.gmra.mxu2 %vm205_vm0, %v4250_v62 }
 0x195   : > { %3481 = vmatmul.msk.f32.gmra.mxu3 %vm205_vm0, %v4640_v20  ;;  %v1649_v13 = vpop.f32.mrf.mxu0 }
 0x197   : > { %v1413_v16 = vpop.f32.mrf.mxu2 }
 0x198   : > { %v1439_v49 = vadd.f32 %v1413_v16, %v1321_v58  ;;  %v1298_v61 = vpop.f32.mrf.mxu1  ;;  %v1531_v33 = vpop.f32.mrf.mxu3  ;;  %3497 = vmatmul.msk.f32.gmra.mxu0 %vm205_vm0, %v2045_v17  ;;  %v2391_v17 = vld [vmem:[%s3709_s25 + $0x30] sm:$0xff] }
 0x199   : > { %v1322_v4 = vadd.f32 %v1298_v61, %v4446_v8  ;;  %v3582_v8 = vld [vmem:[%s5047_s1 + $0x2d0] sm:$0xff] }
 0x19a   : > { %v1557_v62 = vadd.f32 %v1531_v33, %v1439_v49  ;;  %2810 = vmatpush.msra.mxu2 %v3582_v8 }
 0x19b   : > { %3450 = vmatmul.msk.f32.gmra.mxu1 %vm205_vm0, %v4656_v9 }
 0x19c   : > { %v4662_v14 = vadd.f32 %v1649_v13, %v1557_v62  ;;  %3466 = vmatmul.msk.f32.gmra.mxu2 %vm205_vm0, %v4640_v20  ;;  %v2155_v62 = vld [vmem:[%s3709_s25 + $0x2e] sm:$0xff] }
 0x19d   : > { %3482 = vmatmul.msk.f32.gmra.mxu3 %vm205_vm0, %v4660_v3  ;;  %v1652_v31 = vpop.f32.mrf.mxu0 }
 0x19f   : > { %v1416_v47 = vpop.f32.mrf.mxu2 }
 0x1a0   : > { %v1440_v5 = vadd.f32 %v1416_v47, %v1322_v4  ;;  %v1301_v1 = vpop.f32.mrf.mxu1  ;;  %v1534_v57 = vpop.f32.mrf.mxu3  ;;  %3498 = vmatmul.msk.f32.gmra.mxu0 %vm205_vm0, %v2046_v54  ;;  %v2273_v4 = vld [vmem:[%s3709_s25 + $0x2f] sm:$0xff] }
 0x1a1   : > { %v1323_v6 = vadd.f32 %v1301_v1, %v4466_v37 }
 0x1a2   : > { %v1558_v48 = vadd.f32 %v1534_v57, %v1440_v5  ;;  %v2392_v5 = vld [vmem:[%s3709_s25 + $0x38] sm:$0xff] }
 0x1a3   : > { %3451 = vmatmul.msk.f32.gmra.mxu1 %vm205_vm0, %v4673_v32 }
 0x1a4   : > { %v4679_v53 = vadd.f32 %v1652_v31, %v1558_v48  ;;  %3467 = vmatmul.msk.f32.gmra.mxu2 %vm205_vm0, %v4660_v3 }
 0x1a5   : > { %3483 = vmatmul.msk.f32.gmra.mxu3 %vm205_vm0, %v4677_v28  ;;  %v1655_v52 = vpop.f32.mrf.mxu0 }
 0x1a7   : > { %v1419_v35 = vpop.f32.mrf.mxu2 }
 0x1a8   : > { %v1441_v24 = vadd.f32 %v1419_v35, %v1323_v6  ;;  %v1304_v51 = vpop.f32.mrf.mxu1  ;;  %v1537_v37 = vpop.f32.mrf.mxu3  ;;  %3499 = vmatmul.msk.f32.gmra.mxu0 %vm205_vm0, %v2047_v30  ;;  %v2156_v6 = vld [vmem:[%s3709_s25 + $0x36] sm:$0xff] }
 0x1a9   : > { %v1324_v58 = vadd.f32 %v1304_v51, %v4481_v63  ;;  %v3597_v51 = vld [vmem:[%s5047_s1 + $0x2e8] sm:$0xff] }
 0x1aa   : > { %v1559_v27 = vadd.f32 %v1537_v37, %v1441_v24  ;;  %2929 = vmatpush.msra.mxu3 %v3597_v51 }
 0x1ab   : > { %3504 = vmatmul.msk.f32.vlgmr.msrb.gmra.mxu1 %vm205_vm0, %v2154_v43 }
 0x1ac   : > { %v4702_v18 = vadd.f32 %v1655_v52, %v1559_v27  ;;  %3520 = vmatmul.msk.f32.vlgmr.msrb.gmra.mxu2 %vm205_vm0, %v2272_v45  ;;  %v2274_v52 = vld [vmem:[%s3709_s25 + $0x37] sm:$0xff]  ;;  %v3565_v45 = vld [vmem:[%s5047_s1 + $0x2a8] sm:$0xff] }
 0x1ad   : > { %3536 = vmatmul.msk.f32.vlgmr.msrb.gmra.mxu3 %vm205_vm0, %v2390_v26  ;;  %v1658_v13 = vpop.f32.mrf.mxu0  ;;  %2693 = vmatpush.msra.mxu1 %v3565_v45  ;;  %v3596_v45 = vld [vmem:[%s5047_s1 + $0x2e0] sm:$0xff] }
 0x1ae   : > { %2930 = vmatpush.msra.mxu3 %v3596_v45 }
 0x1af   : > { %v1422_v16 = vpop.f32.mrf.mxu2 }
 0x1b0   : > { %v1442_v49 = vadd.f32 %v1422_v16, %v1324_v58  ;;  %v1307_v61 = vpop.f32.mrf.mxu1  ;;  %v1540_v33 = vpop.f32.mrf.mxu3  ;;  %3552 = vmatmul.msk.f32.vlgmr.msrb.gmra.mxu0 %vm205_vm0, %v2391_v17  ;;  %v2157_v58 = vld [vmem:[%s3709_s25 + $0x3e] sm:$0xff] }
 0x1b1   : > { %v1325_v54 = vadd.f32 %v1307_v61, %v4495_v46  ;;  %v3581_v46 = vld [vmem:[%s5047_s1 + $0x2c8] sm:$0xff] }
 0x1b2   : > { %v1560_v63 = vadd.f32 %v1540_v33, %v1442_v49  ;;  %2811 = vmatpush.msra.mxu2 %v3581_v46  ;;  %v2394_v49 = vld [vmem:[%s3709_s25 + $0x48] sm:$0xff] }
 0x1b3   : > { %3505 = vmatmul.msk.f32.gmra.mxu1 %vm205_vm0, %v2155_v62  ;;  %v3613_v61 = vld [vmem:[%s5047_s1 + $0x308] sm:$0xff] }
 0x1b4   : > { %v4715_v31 = vadd.f32 %v1658_v13, %v1560_v63  ;;  %3521 = vmatmul.msk.f32.gmra.mxu2 %vm205_vm0, %v2273_v4  ;;  %3047 = vmatpush.msra.mxu0 %v3613_v61  ;;  %v2159_v46 = vld [vmem:[%s3709_s25 + $0x4e] sm:$0xff] }
 0x1b5   : > { %3537 = vmatmul.msk.f32.gmra.mxu3 %vm205_vm0, %v2391_v17  ;;  %v1661_v47 = vpop.f32.mrf.mxu0 }
 0x1b7   : > { %v1425_v1 = vpop.f32.mrf.mxu2 }
 0x1b8   : > { %v1443_v57 = vadd.f32 %v1425_v1, %v1325_v54  ;;  %v1310_v48 = vpop.f32.mrf.mxu1  ;;  %v1543_v8 = vpop.f32.mrf.mxu3  ;;  %3553 = vmatmul.msk.f32.gmra.mxu0 %vm205_vm0, %v2392_v5  ;;  %v2158_v54 = vld [vmem:[%s3709_s25 + $0x46] sm:$0xff] }
 0x1b9   : > { %v1326_v35 = vadd.f32 %v1310_v48, %v4519_v25  ;;  %v2275_v25 = vld [vmem:[%s3709_s25 + $0x3f] sm:$0xff]  ;;  %v2395_v48 = vld [vmem:[%s3709_s25 + $0x50] sm:$0xff] }
 0x1ba   : > { %v1561_v30 = vadd.f32 %v1543_v8, %v1443_v57 }
 0x1bb   : > { %3506 = vmatmul.msk.f32.gmra.mxu1 %vm205_vm0, %v2156_v6 }
 0x1bc   : > { %v4725_v0 = vadd.f32 %v1661_v47, %v1561_v30  ;;  %3522 = vmatmul.msk.f32.gmra.mxu2 %vm205_vm0, %v2274_v52  ;;  %v2276_v47 = vld [vmem:[%s3709_s25 + $0x47] sm:$0xff] }
 0x1bd   : > { %3538 = vmatmul.msk.f32.gmra.mxu3 %vm205_vm0, %v2392_v5  ;;  %v1664_v24 = vpop.f32.mrf.mxu0 }
 0x1bf   : > { %v1428_v37 = vpop.f32.mrf.mxu2 }
 0x1c0   : > { %v1444_v43 = vadd.f32 %v1428_v37, %v1326_v35  ;;  %v1313_v27 = vpop.f32.mrf.mxu1  ;;  %v1546_v26 = vpop.f32.mrf.mxu3  ;;  %3554 = vmatmul.msk.f32.gmra.mxu0 %vm205_vm0, %v2393_v7  ;;  %v2277_v35 = vld [vmem:[%s3709_s25 + $0x4f] sm:$0xff] }
 0x1c1   : > { %v1327_v42 = vadd.f32 %v1313_v27, %v4539_v44 }
 0x1c2   : > { %v1562_v13 = vadd.f32 %v1546_v26, %v1444_v43  ;;  %v2396_v43 = vld [vmem:[%s3709_s25 + $0x58] sm:$0xff] }
 0x1c3   : > { %3507 = vmatmul.msk.f32.gmra.mxu1 %vm205_vm0, %v2157_v58  ;;  %v3564_v58 = vld [vmem:[%s5047_s1 + $0x2a0] sm:$0xff] }
 0x1c4   : > { %v4744_v17 = vadd.f32 %v1664_v24, %v1562_v13  ;;  %3523 = vmatmul.msk.f32.gmra.mxu2 %vm205_vm0, %v2275_v25  ;;  %2694 = vmatpush.msra.mxu1 %v3564_v58  ;;  %v2281_v58 = vld [vmem:[%s3709_s25 + $0x6f] sm:$0xff] }
 0x1c5   : > { %3539 = vmatmul.msk.f32.gmra.mxu3 %vm205_vm0, %v2393_v7  ;;  %v1667_v16 = vpop.f32.mrf.mxu0 }
 0x1c7   : > { %v1431_v33 = vpop.f32.mrf.mxu2 }
 0x1c8   : > { %v1445_v62 = vadd.f32 %v1431_v33, %v1327_v42  ;;  %v1549_v4 = vpop.f32.mrf.mxu3  ;;  %v1752_v63 = vpop.f32.mrf.mxu1  ;;  %3555 = vmatmul.msk.f32.gmra.mxu0 %vm205_vm0, %v2394_v49  ;;  %v2160_v42 = vld [vmem:[%s3709_s25 + $0x56] sm:$0xff] }
 0x1c9   : > { %v1788_v1 = vadd.f32 %v1752_v63, %v4556_v19  ;;  %v3580_v19 = vld [vmem:[%s5047_s1 + $0x2c0] sm:$0xff] }
 0x1ca   : > { %v1563_v44 = vadd.f32 %v1549_v4, %v1445_v62  ;;  %2812 = vmatpush.msra.mxu2 %v3580_v19  ;;  %v3612_v62 = vld [vmem:[%s5047_s1 + $0x300] sm:$0xff] }
 0x1cb   : > { %3508 = vmatmul.msk.f32.gmra.mxu1 %vm205_vm0, %v2158_v54  ;;  %3048 = vmatpush.msra.mxu0 %v3612_v62  ;;  %v2164_v62 = vld [vmem:[%s3709_s25 + $0x76] sm:$0xff] }
 0x1cc   : > { %v4757_v5 = vadd.f32 %v1667_v16, %v1563_v44  ;;  %3524 = vmatmul.msk.f32.gmra.mxu2 %vm205_vm0, %v2276_v47  ;;  %v2278_v16 = vld [vmem:[%s3709_s25 + $0x57] sm:$0xff] }
 0x1cd   : > { %3540 = vmatmul.msk.f32.gmra.mxu3 %vm205_vm0, %v2394_v49  ;;  %v2106_v57 = vpop.f32.mrf.mxu0  ;;  %v2161_v44 = vld [vmem:[%s3709_s25 + $0x5e] sm:$0xff] }
 0x1cf   : > { %v1870_v8 = vpop.f32.mrf.mxu2 }
 0x1d0   : > { %v1906_v6 = vadd.f32 %v1870_v8, %v1788_v1  ;;  %v1755_v52 = vpop.f32.mrf.mxu1  ;;  %v1988_v30 = vpop.f32.mrf.mxu3  ;;  %3556 = vmatmul.msk.f32.gmra.mxu0 %vm205_vm0, %v2395_v48  ;;  %v2279_v1 = vld [vmem:[%s3709_s25 + $0x5f] sm:$0xff] }
 0x1d1   : > { %v1789_v51 = vadd.f32 %v1755_v52, %v4582_v39 }
 0x1d2   : > { %v2024_v24 = vadd.f32 %v1988_v30, %v1906_v6 }
 0x1d3   : > { %3509 = vmatmul.msk.f32.gmra.mxu1 %vm205_vm0, %v2159_v46 }
 0x1d4   : > { %v4767_v7 = vadd.f32 %v2106_v57, %v2024_v24  ;;  %3525 = vmatmul.msk.f32.gmra.mxu2 %vm205_vm0, %v2277_v35  ;;  %v2162_v35 = vld [vmem:[%s3709_s25 + $0x66] sm:$0xff] }
 0x1d5   : > { %3541 = vmatmul.msk.f32.gmra.mxu3 %vm205_vm0, %v2395_v48  ;;  %v2109_v37 = vpop.f32.mrf.mxu0  ;;  %v2280_v24 = vld [vmem:[%s3709_s25 + $0x67] sm:$0xff] }
 0x1d7   : > { %v1873_v27 = vpop.f32.mrf.mxu2 }
 0x1d8   : > { %v1907_v26 = vadd.f32 %v1873_v27, %v1789_v51  ;;  %v1758_v25 = vpop.f32.mrf.mxu1  ;;  %v1991_v13 = vpop.f32.mrf.mxu3  ;;  %3557 = vmatmul.msk.f32.gmra.mxu0 %vm205_vm0, %v2396_v43 }
 0x1d9   : > { %v1790_v61 = vadd.f32 %v1758_v25, %v4602_v36 }
 0x1da   : > { %v2025_v39 = vadd.f32 %v1991_v13, %v1907_v26  ;;  %v2163_v26 = vld [vmem:[%s3709_s25 + $0x6e] sm:$0xff] }
 0x1db   : > { %3510 = vmatmul.msk.f32.gmra.mxu1 %vm205_vm0, %v2160_v42  ;;  %v2400_v42 = vld [vmem:[%s3709_s25 + $0x78] sm:$0xff] }
 0x1dc   : > { %v4786_v49 = vadd.f32 %v2109_v37, %v2025_v39  ;;  %3526 = vmatmul.msk.f32.gmra.mxu2 %vm205_vm0, %v2278_v16 }
 0x1dd   : > { %3542 = vmatmul.msk.f32.gmra.mxu3 %vm205_vm0, %v2396_v43  ;;  %v2112_v33 = vpop.f32.mrf.mxu0 }
 0x1df   : > { %v1876_v4 = vpop.f32.mrf.mxu2 }
 0x1e0   : > { %v1908_v63 = vadd.f32 %v1876_v4, %v1790_v61  ;;  %v1761_v54 = vpop.f32.mrf.mxu1  ;;  %v1994_v47 = vpop.f32.mrf.mxu3  ;;  %3558 = vmatmul.msk.f32.gmra.mxu0 %vm205_vm0, %v4410_v56  ;;  %v2282_v4 = vld [vmem:[%s3709_s25 + $0x77] sm:$0xff] }
 0x1e1   : > { %v1791_v48 = vadd.f32 %v1761_v54, %v4616_v22 }
 0x1e2   : > { %v2026_v36 = vadd.f32 %v1994_v47, %v1908_v63  ;;  %v2401_v47 = vld [vmem:[%s3709_s25 + $0x80] sm:$0xff] }
 0x1e3   : > { %3511 = vmatmul.msk.f32.gmra.mxu1 %vm205_vm0, %v2161_v44 }
 0x1e4   : > { %v4799_v57 = vadd.f32 %v2112_v33, %v2026_v36  ;;  %3527 = vmatmul.msk.f32.gmra.mxu2 %vm205_vm0, %v2279_v1 }
 0x1e5   : > { %3543 = vmatmul.msk.f32.gmra.mxu3 %vm205_vm0, %v4410_v56  ;;  %v2115_v8 = vpop.f32.mrf.mxu0 }
 0x1e7   : > { %v1879_v6 = vpop.f32.mrf.mxu2 }
 0x1e8   : > { %v1909_v52 = vadd.f32 %v1879_v6, %v1791_v48  ;;  %v1764_v30 = vpop.f32.mrf.mxu1  ;;  %v1997_v46 = vpop.f32.mrf.mxu3  ;;  %3559 = vmatmul.msk.f32.gmra.mxu0 %vm205_vm0, %v4428_v41  ;;  %v2283_v6 = vld [vmem:[%s3709_s25 + $0x7f] sm:$0xff] }
 0x1e9   : > { %v1792_v56 = vadd.f32 %v1764_v30, %v4642_v10 }
 0x1ea   : > { %v2027_v19 = vadd.f32 %v1997_v46, %v1909_v52 }
 0x1eb   : > { %3512 = vmatmul.msk.f32.gmra.mxu1 %vm205_vm0, %v2162_v35  ;;  %v2519_v35 = vld [vmem:[%s3709_s25 + $0x88] sm:$0xff] }
 0x1ec   : > { %v4810_v51 = vadd.f32 %v2115_v8, %v2027_v19  ;;  %3528 = vmatmul.msk.f32.gmra.mxu2 %vm205_vm0, %v2280_v24  ;;  %v2165_v8 = vld [vmem:[%s3709_s25 + $0x7e] sm:$0xff] }
 0x1ed   : > { %3544 = vmatmul.msk.f32.gmra.mxu3 %vm205_vm0, %v4428_v41  ;;  %v2118_v22 = vpop.f32.mrf.mxu0 }
 0x1ef   : > { %v1882_v37 = vpop.f32.mrf.mxu2 }
 0x1f0   : > { %v1910_v43 = vadd.f32 %v1882_v37, %v1792_v56  ;;  %v1767_v45 = vpop.f32.mrf.mxu1  ;;  %v2000_v27 = vpop.f32.mrf.mxu3  ;;  %3560 = vmatmul.msk.f32.gmra.mxu0 %vm205_vm0, %v4442_v12  ;;  %v2626_v37 = vld [vmem:[%s3709_s25 + $0x31] sm:$0xff] }
 0x1f1   : > { %v1793_v41 = vadd.f32 %v1767_v45, %v4662_v14 }
 0x1f2   : > { %v2028_v25 = vadd.f32 %v2000_v27, %v1910_v43  ;;  %v2744_v43 = vld [vmem:[%s3709_s25 + $0x32] sm:$0xff] }
 0x1f3   : > { %3513 = vmatmul.msk.f32.gmra.mxu1 %vm205_vm0, %v2163_v26 }
 0x1f4   : > { %v4821_v13 = vadd.f32 %v2118_v22, %v2028_v25  ;;  %3529 = vmatmul.msk.f32.gmra.mxu2 %vm205_vm0, %v2281_v58 }
 0x1f5   : > { %3545 = vmatmul.msk.f32.gmra.mxu3 %vm205_vm0, %v4442_v12  ;;  %v2121_v10 = vpop.f32.mrf.mxu0 }
 0x1f7   : > { %v1885_v16 = vpop.f32.mrf.mxu2 }
 0x1f8   : > { %v1911_v39 = vadd.f32 %v1885_v16, %v1793_v41  ;;  %v1770_v61 = vpop.f32.mrf.mxu1  ;;  %v2003_v33 = vpop.f32.mrf.mxu3  ;;  %3561 = vmatmul.msk.f32.gmra.mxu0 %vm205_vm0, %v2400_v42  ;;  %v2745_v16 = vld [vmem:[%s3709_s25 + $0x3a] sm:$0xff] }
 0x1f9   : > { %v1794_v12 = vadd.f32 %v1770_v61, %v4679_v53 }
 0x1fa   : > { %v2029_v63 = vadd.f32 %v2003_v33, %v1911_v39 }
 0x1fb   : > { %3514 = vmatmul.msk.f32.gmra.mxu1 %vm205_vm0, %v2164_v62 }
 0x1fc   : > { %v4832_v54 = vadd.f32 %v2121_v10, %v2029_v63  ;;  %3530 = vmatmul.msk.f32.gmra.mxu2 %vm205_vm0, %v2282_v4 }
 0x1fd   : > { %3546 = vmatmul.msk.f32.gmra.mxu3 %vm205_vm0, %v2400_v42  ;;  %v2124_v14 = vpop.f32.mrf.mxu0  ;;  %v2627_v42 = vld [vmem:[%s3709_s25 + $0x39] sm:$0xff] }
 0x1ff   : > { %v1888_v44 = vpop.f32.mrf.mxu2 }
 0x200   : > { %v1912_v1 = vadd.f32 %v1888_v44, %v1794_v12  ;;  %v1773_v36 = vpop.f32.mrf.mxu1  ;;  %v2006_v48 = vpop.f32.mrf.mxu3  ;;  %3562 = vmatmul.msk.f32.gmra.mxu0 %vm205_vm0, %v2401_v47  ;;  %v2746_v12 = vld [vmem:[%s3709_s25 + $0x42] sm:$0xff] }
 0x201   : > { %v1795_v53 = vadd.f32 %v1773_v36, %v4702_v18 }
 0x202   : > { %v2030_v52 = vadd.f32 %v2006_v48, %v1912_v1 }
 0x203   : > { %3515 = vmatmul.msk.f32.gmra.mxu1 %vm205_vm0, %v2165_v8  ;;  %v2747_v8 = vld [vmem:[%s3709_s25 + $0x4a] sm:$0xff] }
 0x204   : > { %v4842_v30 = vadd.f32 %v2124_v14, %v2030_v52  ;;  %3531 = vmatmul.msk.f32.gmra.mxu2 %vm205_vm0, %v2283_v6 }
 0x205   : > { %3547 = vmatmul.msk.f32.gmra.mxu3 %vm205_vm0, %v2401_v47  ;;  %v2127_v46 = vpop.f32.mrf.mxu0 }
 0x207   : > { %v1891_v24 = vpop.f32.mrf.mxu2 }
 0x208   : > { %v1913_v19 = vadd.f32 %v1891_v24, %v1795_v53  ;;  %v1776_v56 = vpop.f32.mrf.mxu1  ;;  %v2009_v22 = vpop.f32.mrf.mxu3  ;;  %3563 = vmatmul.msk.f32.gmra.mxu0 %vm205_vm0, %v2519_v35 }
 0x209   : > { %v1796_v18 = vadd.f32 %v1776_v56, %v4715_v31 }
 0x20a   : > { %v2031_v45 = vadd.f32 %v2009_v22, %v1913_v19  ;;  %v2748_v19 = vld [vmem:[%s3709_s25 + $0x52] sm:$0xff] }
 0x20b   : > { %3568 = vmatmul.msk.f32.vlgmr.msra.gmra.mxu1 %vm205_vm0, %v2626_v37 }
 0x20c   : > { %v4852_v27 = vadd.f32 %v2127_v46, %v2031_v45  ;;  %3584 = vmatmul.msk.f32.vlgmr.msra.gmra.mxu2 %vm205_vm0, %v2744_v43 }
 0x20d   : > { %3600 = vmatmul.msk.f32.vlgmr.msra.gmra.mxu3 %vm205_vm0, %v4512_v21  ;;  %v2130_v26 = vpop.f32.mrf.mxu0 }
 0x20f   : > { %v1894_v58 = vpop.f32.mrf.mxu2 }
 0x210   : > { %v1914_v25 = vadd.f32 %v1894_v58, %v1796_v18  ;;  %v1779_v41 = vpop.f32.mrf.mxu1  ;;  %v2012_v10 = vpop.f32.mrf.mxu3  ;;  %3616 = vmatmul.msk.f32.vlgmr.msra.gmra.mxu0 %vm205_vm0, %v4493_v60  ;;  %v2628_v60 = vld [vmem:[%s3709_s25 + $0x41] sm:$0xff] }
 0x211   : > { %v1797_v21 = vadd.f32 %v1779_v41, %v4725_v0 }
 0x212   : > { %v2032_v39 = vadd.f32 %v2012_v10, %v1914_v25 }
 0x213   : > { %3569 = vmatmul.msk.f32.gmra.mxu1 %vm205_vm0, %v2627_v42 }
 0x214   : > { %v4863_v61 = vadd.f32 %v2130_v26, %v2032_v39  ;;  %3585 = vmatmul.msk.f32.gmra.mxu2 %vm205_vm0, %v2745_v16  ;;  %v2749_v26 = vld [vmem:[%s3709_s25 + $0x5a] sm:$0xff] }
 0x215   : > { %3601 = vmatmul.msk.f32.gmra.mxu3 %vm205_vm0, %v4532_v29  ;;  %v2133_v31 = vpop.f32.mrf.mxu0 }
 0x217   : > { %v1897_v33 = vpop.f32.mrf.mxu2 }
 0x218   : > { %v1915_v62 = vadd.f32 %v1897_v33, %v1797_v21  ;;  %v1782_v4 = vpop.f32.mrf.mxu1  ;;  %v2015_v63 = vpop.f32.mrf.mxu3  ;;  %3617 = vmatmul.msk.f32.gmra.mxu0 %vm205_vm0, %v4517_v40  ;;  %v2629_v40 = vld [vmem:[%s3709_s25 + $0x49] sm:$0xff] }
 0x219   : > { %v1798_v29 = vadd.f32 %v1782_v4, %v4744_v17  ;;  %v2986_v33 = vld [vmem:[%s3709_s25 + $0x64] sm:$0xff] }
 0x21a   : > { %v2033_v14 = vadd.f32 %v2015_v63, %v1915_v62 }
 0x21b   : > { %3570 = vmatmul.msk.f32.gmra.mxu1 %vm205_vm0, %v2628_v60 }
 0x21c   : > { %v4874_v47 = vadd.f32 %v2133_v31, %v2033_v14  ;;  %3586 = vmatmul.msk.f32.gmra.mxu2 %vm205_vm0, %v2746_v12 }
 0x21d   : > { %3602 = vmatmul.msk.f32.gmra.mxu3 %vm205_vm0, %v4549_v34  ;;  %v2136_v0 = vpop.f32.mrf.mxu0 }
 0x21f   : > { %v1900_v44 = vpop.f32.mrf.mxu2 }
 0x220   : > { %v1916_v1 = vadd.f32 %v1900_v44, %v1798_v29  ;;  %v1785_v36 = vpop.f32.mrf.mxu1  ;;  %v2018_v48 = vpop.f32.mrf.mxu3  ;;  %3618 = vmatmul.msk.f32.gmra.mxu0 %vm205_vm0, %v4537_v38  ;;  %v2630_v38 = vld [vmem:[%s3709_s25 + $0x51] sm:$0xff] }
 0x221   : > { %v1799_v34 = vadd.f32 %v1785_v36, %v4757_v5 }
 0x222   : > { %v2034_v6 = vadd.f32 %v2018_v48, %v1916_v1  ;;  %v2634_v48 = vld [vmem:[%s3709_s25 + $0x71] sm:$0xff] }
 0x223   : > { %3571 = vmatmul.msk.f32.gmra.mxu1 %vm205_vm0, %v2629_v40  ;;  %v2752_v40 = vld [vmem:[%s3709_s25 + $0x72] sm:$0xff] }
 0x224   : > { %v4885_v52 = vadd.f32 %v2136_v0, %v2034_v6  ;;  %3587 = vmatmul.msk.f32.gmra.mxu2 %vm205_vm0, %v2747_v8 }
 0x225   : > { %3603 = vmatmul.msk.f32.gmra.mxu3 %vm205_vm0, %v4575_v15  ;;  %v2139_v17 = vpop.f32.mrf.mxu0 }
 0x227   : > { %v1903_v53 = vpop.f32.mrf.mxu2 }
 0x228   : > { %v1917_v46 = vadd.f32 %v1903_v53, %v1799_v34  ;;  %v2021_v35 = vpop.f32.mrf.mxu3  ;;  %v2224_v24 = vpop.f32.mrf.mxu1  ;;  %3619 = vmatmul.msk.f32.gmra.mxu0 %vm205_vm0, %v4554_v11  ;;  %v2631_v11 = vld [vmem:[%s3709_s25 + $0x59] sm:$0xff] }
 0x229   : > { %v2260_v22 = vadd.f32 %v2224_v24, %v4767_v7 }
 0x22a   : > { %v2035_v56 = vadd.f32 %v2021_v35, %v1917_v46 }
 0x22b   : > { %3572 = vmatmul.msk.f32.gmra.mxu1 %vm205_vm0, %v2630_v38  ;;  %v2871_v38 = vld [vmem:[%s3709_s25 + $0x7b] sm:$0xff] }
 0x22c   : > { %v4897_v37 = vadd.f32 %v2139_v17, %v2035_v56  ;;  %3588 = vmatmul.msk.f32.gmra.mxu2 %vm205_vm0, %v2748_v19 }
 0x22d   : > { %3604 = vmatmul.msk.f32.gmra.mxu3 %vm205_vm0, %v4595_v23  ;;  %v2578_v15 = vpop.f32.mrf.mxu0 }
 0x22f   : > { %v2342_v5 = vpop.f32.mrf.mxu2 }
 0x230   : > { %v2378_v43 = vadd.f32 %v2342_v5, %v2260_v22  ;;  %v2227_v45 = vpop.f32.mrf.mxu1  ;;  %v2460_v18 = vpop.f32.mrf.mxu3  ;;  %3620 = vmatmul.msk.f32.gmra.mxu0 %vm205_vm0, %v4580_v59  ;;  %v2632_v59 = vld [vmem:[%s3709_s25 + $0x61] sm:$0xff] }
 0x231   : > { %v2261_v7 = vadd.f32 %v2227_v45, %v4786_v49  ;;  %v2750_v49 = vld [vmem:[%s3709_s25 + $0x62] sm:$0xff] }
 0x232   : > { %v2496_v58 = vadd.f32 %v2460_v18, %v2378_v43  ;;  %v2872_v18 = vld [vmem:[%s3709_s25 + $0x83] sm:$0xff] }
 0x233   : > { %3573 = vmatmul.msk.f32.gmra.mxu1 %vm205_vm0, %v2631_v11 }
 0x234   : > { %v4908_v25 = vadd.f32 %v2578_v15, %v2496_v58  ;;  %3589 = vmatmul.msk.f32.gmra.mxu2 %vm205_vm0, %v2749_v26 }
 0x235   : > { %3605 = vmatmul.msk.f32.gmra.mxu3 %vm205_vm0, %v4612_v50  ;;  %v2581_v23 = vpop.f32.mrf.mxu0 }
 0x237   : > { %v2345_v41 = vpop.f32.mrf.mxu2 }
 0x238   : > { %v2379_v10 = vadd.f32 %v2345_v41, %v2261_v7  ;;  %v2230_v42 = vpop.f32.mrf.mxu1  ;;  %v2463_v16 = vpop.f32.mrf.mxu3  ;;  %3621 = vmatmul.msk.f32.gmra.mxu0 %vm205_vm0, %v4600_v2  ;;  %v2633_v2 = vld [vmem:[%s3709_s25 + $0x69] sm:$0xff] }
 0x239   : > { %v2262_v39 = vadd.f32 %v2230_v42, %v4799_v57  ;;  %v2751_v57 = vld [vmem:[%s3709_s25 + $0x6a] sm:$0xff] }
 0x23a   : > { %v2497_v21 = vadd.f32 %v2463_v16, %v2379_v10  ;;  %v2990_v7 = vld [vmem:[%s3709_s25 + $0x84] sm:$0xff] }
 0x23b   : > { %3574 = vmatmul.msk.f32.gmra.mxu1 %vm205_vm0, %v2632_v59  ;;  %v2637_v10 = vld [vmem:[%s3709_s25 + $0x89] sm:$0xff] }
 0x23c   : > { %v4919_v31 = vadd.f32 %v2581_v23, %v2497_v21  ;;  %3590 = vmatmul.msk.f32.gmra.mxu2 %vm205_vm0, %v2750_v49  ;;  %v2873_v59 = vld [vmem:[%s3709_s25 + $0x8b] sm:$0xff] }
 0x23d   : > { %3606 = vmatmul.msk.f32.gmra.mxu3 %vm205_vm0, %v4635_v55  ;;  %v2584_v50 = vpop.f32.mrf.mxu0  ;;  %v2991_v21 = vld [vmem:[%s3709_s25 + $0x8c] sm:$0xff] }
 0x23f   : > { %v2348_v62 = vpop.f32.mrf.mxu2 }
 0x240   : > { %v2380_v4 = vadd.f32 %v2348_v62, %v2262_v39  ;;  %v2233_v63 = vpop.f32.mrf.mxu1  ;;  %v2466_v60 = vpop.f32.mrf.mxu3  ;;  %3622 = vmatmul.msk.f32.gmra.mxu0 %vm205_vm0, %v2986_v33 }
 0x241   : > { %v2263_v12 = vadd.f32 %v2233_v63, %v4810_v51 }
 0x242   : > { %v2498_v14 = vadd.f32 %v2466_v60, %v2380_v4 }
 0x243   : > { %3575 = vmatmul.msk.f32.gmra.mxu1 %vm205_vm0, %v2633_v2 }
 0x244   : > { %v4930_v29 = vadd.f32 %v2584_v50, %v2498_v14  ;;  %3591 = vmatmul.msk.f32.gmra.mxu2 %vm205_vm0, %v2751_v57 }
 0x245   : > { %3607 = vmatmul.msk.f32.gmra.mxu3 %vm205_vm0, %v4656_v9  ;;  %v2587_v55 = vpop.f32.mrf.mxu0 }
 0x247   : > { %v2351_v0 = vpop.f32.mrf.mxu2 }
 0x248   : > { %v2381_v44 = vadd.f32 %v2351_v0, %v2263_v12  ;;  %v2236_v1 = vpop.f32.mrf.mxu1  ;;  %v2469_v36 = vpop.f32.mrf.mxu3  ;;  %3623 = vmatmul.msk.f32.gmra.mxu0 %vm205_vm0, %v4640_v20  ;;  %v2635_v20 = vld [vmem:[%s3709_s25 + $0x79] sm:$0xff] }
 0x249   : > { %v2264_v51 = vadd.f32 %v2236_v1, %v4821_v13  ;;  %v2753_v13 = vld [vmem:[%s3709_s25 + $0x7a] sm:$0xff] }
 0x24a   : > { %v2499_v8 = vadd.f32 %v2469_v36, %v2381_v44 }
 0x24b   : > { %3576 = vmatmul.msk.f32.gmra.mxu1 %vm205_vm0, %v2634_v48 }
 0x24c   : > { %v4941_v6 = vadd.f32 %v2587_v55, %v2499_v8  ;;  %3592 = vmatmul.msk.f32.gmra.mxu2 %vm205_vm0, %v2752_v40 }
 0x24d   : > { %3608 = vmatmul.msk.f32.gmra.mxu3 %vm205_vm0, %v4673_v32  ;;  %v2590_v9 = vpop.f32.mrf.mxu0 }
 0x24f   : > { %v2354_v34 = vpop.f32.mrf.mxu2 }
 0x250   : > { %v2382_v17 = vadd.f32 %v2354_v34, %v2264_v51  ;;  %v2239_v53 = vpop.f32.mrf.mxu1  ;;  %v2472_v46 = vpop.f32.mrf.mxu3  ;;  %3624 = vmatmul.msk.f32.gmra.mxu0 %vm205_vm0, %v4660_v3  ;;  %v2636_v3 = vld [vmem:[%s3709_s25 + $0x81] sm:$0xff] }
 0x251   : > { %v2265_v35 = vadd.f32 %v2239_v53, %v4832_v54  ;;  %v2754_v54 = vld [vmem:[%s3709_s25 + $0x82] sm:$0xff] }
 0x252   : > { %v2500_v24 = vadd.f32 %v2472_v46, %v2382_v17 }
 0x253   : > { %3577 = vmatmul.msk.f32.gmra.mxu1 %vm205_vm0, %v2635_v20 }
 0x254   : > { %v4953_v19 = vadd.f32 %v2590_v9, %v2500_v24  ;;  %3593 = vmatmul.msk.f32.gmra.mxu2 %vm205_vm0, %v2753_v13 }
 0x255   : > { %3609 = vmatmul.msk.f32.gmra.mxu3 %vm205_vm0, %v2871_v38  ;;  %v2593_v32 = vpop.f32.mrf.mxu0 }
 0x257   : > { %v2357_v56 = vpop.f32.mrf.mxu2 }
 0x258   : > { %v2383_v22 = vadd.f32 %v2357_v56, %v2265_v35  ;;  %v2242_v15 = vpop.f32.mrf.mxu1  ;;  %v2475_v5 = vpop.f32.mrf.mxu3  ;;  %3625 = vmatmul.msk.f32.gmra.mxu0 %vm205_vm0, %v4677_v28 }
 0x259   : > { %v2266_v43 = vadd.f32 %v2242_v15, %v4842_v30  ;;  %v2755_v30 = vld [vmem:[%s3709_s25 + $0x8a] sm:$0xff] }
 0x25a   : > { %v2501_v45 = vadd.f32 %v2475_v5, %v2383_v22 }
 0x25b   : > { %3578 = vmatmul.msk.f32.gmra.mxu1 %vm205_vm0, %v2636_v3 }
 0x25c   : > { %v4964_v11 = vadd.f32 %v2593_v32, %v2501_v45  ;;  %3594 = vmatmul.msk.f32.gmra.mxu2 %vm205_vm0, %v2754_v54 }
 0x25d   : > { %3610 = vmatmul.msk.f32.gmra.mxu3 %vm205_vm0, %v2872_v18  ;;  %v2596_v26 = vpop.f32.mrf.mxu0 }
 0x25f   : > { %v2360_v58 = vpop.f32.mrf.mxu2 }
 0x260   : > { %v2384_v23 = vadd.f32 %v2360_v58, %v2266_v43  ;;  %v2245_v41 = vpop.f32.mrf.mxu1  ;;  %v2478_v28 = vpop.f32.mrf.mxu3  ;;  %3626 = vmatmul.msk.f32.gmra.mxu0 %vm205_vm0, %v2990_v7 }
 0x261   : > { %v2267_v42 = vadd.f32 %v2245_v41, %v4852_v27 }
 0x262   : > { %v2502_v16 = vadd.f32 %v2478_v28, %v2384_v23 }
 0x263   : > { %3579 = vmatmul.msk.f32.gmra.mxu1 %vm205_vm0, %v2637_v10 }
 0x264   : > { %v4975_v49 = vadd.f32 %v2596_v26, %v2502_v16  ;;  %3595 = vmatmul.msk.f32.gmra.mxu2 %vm205_vm0, %v2755_v30 }
 0x265   : > { %3611 = vmatmul.msk.f32.gmra.mxu3 %vm205_vm0, %v2873_v59  ;;  %v2599_v39 = vpop.f32.mrf.mxu0 }
 0x267   : > { %v2363_v50 = vpop.f32.mrf.mxu2 }
 0x268   : > { %v2385_v33 = vadd.f32 %v2363_v50, %v2267_v42  ;;  %v2248_v62 = vpop.f32.mrf.mxu1  ;;  %v2481_v4 = vpop.f32.mrf.mxu3  ;;  %3627 = vmatmul.msk.f32.gmra.mxu0 %vm205_vm0, %v2991_v21 }
 0x269   : > { %v2268_v27 = vadd.f32 %v2248_v62, %v4863_v61 }
 0x26a   : > { %v2503_v63 = vadd.f32 %v2481_v4, %v2385_v33 }
 0x26c   : > { %v4983_v60 = vadd.f32 %v2599_v39, %v2503_v63 }
 0x26d   : > { %v2602_v2 = vpop.f32.mrf.mxu0 }
 0x26f   : > { %v2366_v57 = vpop.f32.mrf.mxu2 }
 0x270   : > { %v2386_v12 = vadd.f32 %v2366_v57, %v2268_v27  ;;  %v2251_v14 = vpop.f32.mrf.mxu1  ;;  %v2484_v55 = vpop.f32.mrf.mxu3 }
 0x271   : > { %v2269_v0 = vadd.f32 %v2251_v14, %v4874_v47 }
 0x272   : > { %v2504_v44 = vadd.f32 %v2484_v55, %v2386_v12 }
 0x274   : > { %v4986_v1 = vadd.f32 %v2602_v2, %v2504_v44 }
 0x275   : > { %v2605_v36 = vpop.f32.mrf.mxu0 }
 0x277   : > { %v2369_v48 = vpop.f32.mrf.mxu2 }
 0x278   : > { %v2387_v40 = vadd.f32 %v2369_v48, %v2269_v0  ;;  %v2254_v51 = vpop.f32.mrf.mxu1  ;;  %v2487_v8 = vpop.f32.mrf.mxu3 }
 0x279   : > { %v2270_v61 = vadd.f32 %v2254_v51, %v4885_v52 }
 0x27a   : > { %v2505_v9 = vadd.f32 %v2487_v8, %v2387_v40 }
 0x27c   : > { %v4989_v34 = vadd.f32 %v2605_v36, %v2505_v9 }
 0x27d   : > { %v2608_v17 = vpop.f32.mrf.mxu0 }
 0x27f   : > { %v2372_v53 = vpop.f32.mrf.mxu2 }
 0x280   : > { %v2388_v46 = vadd.f32 %v2372_v53, %v2270_v61  ;;  %v2257_v20 = vpop.f32.mrf.mxu1  ;;  %v2490_v13 = vpop.f32.mrf.mxu3 }
 0x281   : > { %v2271_v47 = vadd.f32 %v2257_v20, %v4897_v37 }
 0x282   : > { %v2506_v35 = vadd.f32 %v2490_v13, %v2388_v46 }
 0x284   : > { %v4992_v24 = vadd.f32 %v2608_v17, %v2506_v35 }
 0x285   : > { %v2611_v38 = vpop.f32.mrf.mxu0 }
 0x287   : > { %v2375_v32 = vpop.f32.mrf.mxu2 }
 0x288   : > { %v2389_v56 = vadd.f32 %v2375_v32, %v2271_v47  ;;  %v2493_v22 = vpop.f32.mrf.mxu3  ;;  %v2696_v15 = vpop.f32.mrf.mxu1 }
 0x289   : > { %v2732_v3 = vadd.f32 %v2696_v15, %v4908_v25 }
 0x28a   : > { %v2507_v5 = vadd.f32 %v2493_v22, %v2389_v56 }
 0x28c   : > { %v4994_v52 = vadd.f32 %v2611_v38, %v2507_v5 }
 0x28d   : > { %v3050_v54 = vpop.f32.mrf.mxu0 }
 0x28f   : > { %v2814_v43 = vpop.f32.mrf.mxu2 }
 0x290   : > { %v2850_v45 = vadd.f32 %v2814_v43, %v2732_v3  ;;  %v2699_v18 = vpop.f32.mrf.mxu1  ;;  %v2932_v26 = vpop.f32.mrf.mxu3 }
 0x291   : > { %v2733_v58 = vadd.f32 %v2699_v18, %v4919_v31 }
 0x292   : > { %v2968_v7 = vadd.f32 %v2932_v26, %v2850_v45 }
 0x294   : > { %v3086_v37 = vadd.f32 %v3050_v54, %v2968_v7 }
 0x295   : > { %v3053_v23 = vpop.f32.mrf.mxu0 }
 0x296   : > { %3099 = vst.msk [vmem:[#allocation2] sm:$0xff] %vm3098_vm1, %v3086_v37 }
 0x297   : > { %v2817_v41 = vpop.f32.mrf.mxu2 }
 0x298   : > { %v2851_v28 = vadd.f32 %v2817_v41, %v2733_v58  ;;  %v2702_v10 = vpop.f32.mrf.mxu1  ;;  %v2935_v30 = vpop.f32.mrf.mxu3 }
 0x299   : > { %v2734_v25 = vadd.f32 %v2702_v10, %v4930_v29  ;;  %v171_v29 = vld [vmem:[%s5048_s2] sm:$0x1] }
 0x29a   : > { %v2969_v42 = vadd.f32 %v2935_v30, %v2851_v28  ;;  %v5007_v51 = vperm.slane %v171_v29, 0 }
 0x29c   : > { %v3087_v16 = vadd.f32 %v3053_v23, %v2969_v42 }
 0x29d   : > { %v3056_v59 = vpop.f32.mrf.mxu0  ;;  %v3111_v55 = vld [vmem:[#allocation2] ss:$2 sm:$0xf]  ;;  %v3113_v0 = vld [vmem:[#allocation2 + $0x1] ss:$2 sm:$0xf] }
 0x29e   : > { %3100 = vst.msk [vmem:[#allocation2 + $0x8] sm:$0xff] %vm3098_vm1, %v3087_v16  ;;  %v3118_v40 = vmax.f32 %v3111_v55, %v3113_v0 }
 0x29f   : > { %v2820_v39 = vpop.f32.mrf.mxu2 }
 0x2a0   : > { %v2852_v21 = vadd.f32 %v2820_v39, %v2734_v25  ;;  %v2705_v50 = vpop.f32.mrf.mxu1  ;;  %v2938_v33 = vpop.f32.mrf.mxu3 }
 0x2a1   : > { %v2735_v4 = vadd.f32 %v2705_v50, %v4941_v6 }
 0x2a2   : > { %v2970_v62 = vadd.f32 %v2938_v33, %v2852_v21 }
 0x2a4   : > { %v3088_v31 = vadd.f32 %v3056_v59, %v2970_v62 }
 0x2a5   : > { %v3059_v27 = vpop.f32.mrf.mxu0 }
 0x2a6   : > { %3101 = vst.msk [vmem:[#allocation2 + $0x10] sm:$0xff] %vm3098_vm1, %v3088_v31 }
 0x2a7   : > { %v2823_v63 = vpop.f32.mrf.mxu2 }
 0x2a8   : > { %v2853_v2 = vadd.f32 %v2823_v63, %v2735_v4  ;;  %v2708_v57 = vpop.f32.mrf.mxu1  ;;  %v2941_v12 = vpop.f32.mrf.mxu3 }
 0x2a9   : > { %v2736_v8 = vadd.f32 %v2708_v57, %v4953_v19 }
 0x2aa   : > { %v2971_v14 = vadd.f32 %v2941_v12, %v2853_v2 }
 0x2ac   : > { %v3089_v44 = vadd.f32 %v3059_v27, %v2971_v14 }
 0x2ad   : > { %v3115_v36 = vld [vmem:[#allocation2 + $0xc] ss:$2 sm:$0xf]  ;;  %v3117_v48 = vld [vmem:[#allocation2 + $0xd] ss:$2 sm:$0xf]  ;;  %v3062_v61 = vpop.f32.mrf.mxu0 }
 0x2ae   : > { %v3119_v6 = vmax.f32 %v3115_v36, %v3117_v48  ;;  %3102 = vst.msk [vmem:[#allocation2 + $0x18] sm:$0xff] %vm3098_vm1, %v3089_v44 }
 0x2af   : > { %v2826_v9 = vpop.f32.mrf.mxu2 }
 0x2b0   : > { %v3120_v17 = vmax.f32 %v3118_v40, %v3119_v6  ;;  %v2854_v53 = vadd.f32 %v2826_v9, %v2736_v8  ;;  %v2711_v46 = vpop.f32.mrf.mxu1  ;;  %v2944_v20 = vpop.f32.mrf.mxu3 }
 0x2b1   : > { %v2737_v35 = vadd.f32 %v2711_v46, %v4964_v11 }
 0x2b2   : > { %v3124_v13 = vadd.f32 %v5007_v51, %v3120_v17  ;;  %v2972_v47 = vadd.f32 %v2944_v20, %v2854_v53 }
 0x2b4   : > { %3126 = vst.msk [vmem:[%s5014_s30] sm:$0xf] %vm3125_vm2, %v3124_v13  ;;  %v3090_v19 = vadd.f32 %v3062_v61, %v2972_v47 }
 0x2b5   : > { %v3065_v38 = vpop.f32.mrf.mxu0  ;;  %v3128_v11 = vld [vmem:[#allocation2 + $0x18] ss:$2 sm:$0xf]  ;;  %v3130_v58 = vld [vmem:[#allocation2 + $0x19] ss:$2 sm:$0xf] }
 0x2b6   : > { %3103 = vst.msk [vmem:[#allocation2 + $0x20] sm:$0xff] %vm3098_vm1, %v3090_v19  ;;  %v3135_v10 = vmax.f32 %v3128_v11, %v3130_v58 }
 0x2b7   : > { %v2829_v32 = vpop.f32.mrf.mxu2 }
 0x2b8   : > { %v2855_v56 = vadd.f32 %v2829_v32, %v2737_v35  ;;  %v2714_v22 = vpop.f32.mrf.mxu1  ;;  %v2947_v15 = vpop.f32.mrf.mxu3 }
 0x2b9   : > { %v2738_v54 = vadd.f32 %v2714_v22, %v4975_v49 }
 0x2ba   : > { %v2973_v5 = vadd.f32 %v2947_v15, %v2855_v56 }
 0x2bc   : > { %v3091_v3 = vadd.f32 %v3065_v38, %v2973_v5 }
 0x2bd   : > { %v3068_v43 = vpop.f32.mrf.mxu0 }
 0x2be   : > { %3104 = vst.msk [vmem:[#allocation2 + $0x28] sm:$0xff] %vm3098_vm1, %v3091_v3 }
 0x2bf   : > { %v2832_v45 = vpop.f32.mrf.mxu2 }
 0x2c0   : > { %v2856_v18 = vadd.f32 %v2832_v45, %v2738_v54  ;;  %v2717_v26 = vpop.f32.mrf.mxu1  ;;  %v2950_v7 = vpop.f32.mrf.mxu3 }
 0x2c1   : > { %v2739_v42 = vadd.f32 %v2717_v26, %v4983_v60 }
 0x2c2   : > { %v2974_v37 = vadd.f32 %v2950_v7, %v2856_v18 }
 0x2c4   : > { %v3092_v23 = vadd.f32 %v3068_v43, %v2974_v37 }
 0x2c5   : > { %v3132_v41 = vld [vmem:[#allocation2 + $0x24] ss:$2 sm:$0xf]  ;;  %v3134_v28 = vld [vmem:[#allocation2 + $0x25] ss:$2 sm:$0xf]  ;;  %v3071_v49 = vpop.f32.mrf.mxu0 }
 0x2c6   : > { %v3136_v30 = vmax.f32 %v3132_v41, %v3134_v28  ;;  %3105 = vst.msk [vmem:[#allocation2 + $0x30] sm:$0xff] %vm3098_vm1, %v3092_v23 }
 0x2c7   : > { %v2835_v16 = vpop.f32.mrf.mxu2 }
 0x2c8   : > { %v3137_v25 = vmax.f32 %v3135_v10, %v3136_v30  ;;  %v2857_v59 = vadd.f32 %v2835_v16, %v2739_v42  ;;  %v2720_v39 = vpop.f32.mrf.mxu1  ;;  %v2953_v21 = vpop.f32.mrf.mxu3 }
 0x2c9   : > { %v2740_v31 = vadd.f32 %v2720_v39, %v4986_v1 }
 0x2ca   : > { %v3138_v50 = vadd.f32 %v3137_v25, %v5007_v51  ;;  %v2975_v33 = vadd.f32 %v2953_v21, %v2857_v59 }
 0x2cc   : > { %3628 = vst.msk [vmem:[%s5014_s30 + $0x4] sm:$0xf] %vm3125_vm2, %v3138_v50  ;;  %v3093_v62 = vadd.f32 %v3071_v49, %v2975_v33 }
 0x2cd   : > { %v3074_v4 = vpop.f32.mrf.mxu0  ;;  %v3142_v1 = vld [vmem:[#allocation2 + $0x30] ss:$2 sm:$0xf]  ;;  %v3144_v40 = vld [vmem:[#allocation2 + $0x31] ss:$2 sm:$0xf] }
 0x2ce   : > { %3106 = vst.msk [vmem:[#allocation2 + $0x38] sm:$0xff] %vm3098_vm1, %v3093_v62  ;;  %v3149_v9 = vmax.f32 %v3142_v1, %v3144_v40 }
 0x2cf   : > { %v2838_v60 = vpop.f32.mrf.mxu2 }
 0x2d0   : > { %v2858_v27 = vadd.f32 %v2838_v60, %v2740_v31  ;;  %v2723_v63 = vpop.f32.mrf.mxu1  ;;  %v2956_v2 = vpop.f32.mrf.mxu3 }
 0x2d1   : > { %v2741_v29 = vadd.f32 %v2723_v63, %v4989_v34 }
 0x2d2   : > { %v2976_v57 = vadd.f32 %v2956_v2, %v2858_v27 }
 0x2d4   : > { %v3094_v12 = vadd.f32 %v3074_v4, %v2976_v57 }
 0x2d5   : > { %v3077_v14 = vpop.f32.mrf.mxu0 }
 0x2d6   : > { %3107 = vst.msk [vmem:[#allocation2 + $0x40] sm:$0xff] %vm3098_vm1, %v3094_v12 }
 0x2d7   : > { %v2841_v55 = vpop.f32.mrf.mxu2 }
 0x2d8   : > { %v2859_v0 = vadd.f32 %v2841_v55, %v2741_v29  ;;  %v2726_v44 = vpop.f32.mrf.mxu1  ;;  %v2959_v36 = vpop.f32.mrf.mxu3 }
 0x2d9   : > { %v2742_v53 = vadd.f32 %v2726_v44, %v4992_v24 }
 0x2da   : > { %v2977_v48 = vadd.f32 %v2959_v36, %v2859_v0 }
 0x2dc   : > { %v3095_v6 = vadd.f32 %v3077_v14, %v2977_v48 }
 0x2dd   : > { %v3146_v8 = vld [vmem:[#allocation2 + $0x3c] ss:$2 sm:$0xf]  ;;  %v3148_v61 = vld [vmem:[#allocation2 + $0x3d] ss:$2 sm:$0xf]  ;;  %v3080_v46 = vpop.f32.mrf.mxu0 }
 0x2de   : > { %v3150_v17 = vmax.f32 %v3146_v8, %v3148_v61  ;;  %3108 = vst.msk [vmem:[#allocation2 + $0x48] sm:$0xff] %vm3098_vm1, %v3095_v6 }
 0x2df   : > { %v2844_v34 = vpop.f32.mrf.mxu2 }
 0x2e0   : > { %v3151_v20 = vmax.f32 %v3149_v9, %v3150_v17  ;;  %v2860_v13 = vadd.f32 %v2844_v34, %v2742_v53  ;;  %v2962_v47 = vpop.f32.mrf.mxu3  ;;  %v2729_v38 = vpop.f32.mrf.mxu1 }
 0x2e1   : > { %v2743_v56 = vadd.f32 %v2729_v38, %v4994_v52 }
 0x2e2   : > { %v3152_v19 = vadd.f32 %v3151_v20, %v5007_v51  ;;  %v2978_v35 = vadd.f32 %v2962_v47, %v2860_v13 }
 0x2e4   : > { %3629 = vst.msk [vmem:[%s5014_s30 + $0x8] sm:$0xf] %vm3125_vm2, %v3152_v19  ;;  %v3096_v32 = vadd.f32 %v3080_v46, %v2978_v35 }
 0x2e5   : > { %v3083_v5 = vpop.f32.mrf.mxu0  ;;  %v3156_v43 = vld [vmem:[#allocation2 + $0x48] ss:$2 sm:$0xf]  ;;  %v3158_v45 = vld [vmem:[#allocation2 + $0x49] ss:$2 sm:$0xf] }
 0x2e6   : > { %3109 = vst.msk [vmem:[#allocation2 + $0x50] sm:$0xff] %vm3098_vm1, %v3096_v32  ;;  %v3163_v7 = vmax.f32 %v3156_v43, %v3158_v45 }
 0x2e7   : > { %v2847_v24 = vpop.f32.mrf.mxu2 }
 0x2e8   : > { %v2861_v22 = vadd.f32 %v2847_v24, %v2743_v56  ;;  %v2965_v15 = vpop.f32.mrf.mxu3 }
 0x2ea   : > { %v2979_v3 = vadd.f32 %v2965_v15, %v2861_v22 }
 0x2ec   : > { %v3097_v54 = vadd.f32 %v3083_v5, %v2979_v3 }
 0x2ee   : > { %3110 = vst.msk [vmem:[#allocation2 + $0x58] sm:$0xff] %vm3098_vm1, %v3097_v54 }
 0x2f5   : > { %v3160_v18 = vld [vmem:[#allocation2 + $0x54] ss:$2 sm:$0xf]  ;;  %v3162_v26 = vld [vmem:[#allocation2 + $0x55] ss:$2 sm:$0xf] }
 0x2f6   : > { %v3164_v37 = vmax.f32 %v3160_v18, %v3162_v26 }
 0x2f8   : > { %v3165_v11 = vmax.f32 %v3163_v7, %v3164_v37 }
 0x2fa   : > { %v3166_v52 = vadd.f32 %v3165_v11, %v5007_v51 }
 0x2fc   : > { %3630 = vst.msk [vmem:[%s5014_s30 + $0xc] sm:$0xf] %vm3125_vm2, %v3166_v52 }
 0x2fd PF: > { %s13_s12 = sadd.s32 1, %s3661_s12  }
 0x2fe   : > { %p10_p4 = scmp.ge.s32.totalorder %s13_s12, 4  }
 0x300   :  { %12 = sbr.rel (!%p10_p4) target bundleno = 1 (0x1), region = 104 }

</bundles_post_ra>
